<compile_context>
chip_gen: v5e
topology: v5e:2x2
jax: 0.10.0
libtpu: 0.0.40
codegen_flags: <defaults>
</compile_context>

<pallas_src>
import jax
import jax.numpy as jnp
from jax.experimental import pallas as pl
from jax.experimental.pallas import tpu as pltpu

LANE = 128
SUBLANE = 8
TILE_M_MAX = 512        # <=512 keeps v7x (64 MiB VMEM, 2 TCs) happy; v5e/v6e
                        # could raise to 1024-2048 for very large M.
BAND_ROWS_CAP = 4096    # max flat output rows per conv band
NEG_SLOPE = 0.01        # nn.LeakyReLU default
BN_EPS = 1e-5           # nn.BatchNorm2d default


def _round_up(x, m):
    return (x + m - 1) // m * m


def _pick_tile_m(m):
    """Row tile for the flattened 1x1-head matmuls: multiple of 8, <=TILE_M_MAX,
    and >=2 grid steps whenever m is big enough (keeps both v7x TCs busy)."""
    m8 = _round_up(m, SUBLANE)
    if m8 <= 2 * SUBLANE:
        return m8
    half = _round_up((m8 + 1) // 2, SUBLANE)
    return max(SUBLANE, min(TILE_M_MAX, half))


def _pick_band_height(n, h, w):
    """Output-row band height for the 3x3 conv pass: power-of-two divisor of h,
    moderate flat-band size, and >=2 total grid steps when possible."""
    th = h
    while th % 2 == 0 and th * (w + 2) > BAND_ROWS_CAP:
        th //= 2
    if n * (h // th) < 2 and th % 2 == 0:
        th //= 2
    return th


def _compiler_params(grid_semantics, vmem_estimate_bytes):
    # Cap at 32 MiB: ~50% of v7x's 64 MiB physical VMEM (well inside
    # v5e/v6e's 128 MiB), leaving headroom for Mosaic-internal scratch.
    limit = int(min(max(2 * vmem_estimate_bytes, 16 << 20), 32 << 20))
    return pltpu.CompilerParams(dimension_semantics=grid_semantics,
                                vmem_limit_bytes=limit)


# ---------------------------------------------------------------------------
# Pallas kernels + wrappers: 3x3 conv (tap accumulation) and normalize passes
# ---------------------------------------------------------------------------

def conv3x3_stats(band, w, mask, out_rows, wp):
    """band: (NB, band_rows, C_p) bf16 -- flattened (th+2, W+2) row bands of the
    spatially zero-padded activation (plus a few slack rows for wrap-around).
    w: (9, C_p, Cout_p) bf16 tap-major weights.  mask: (out_rows, 1) f32 zeros
    out the two wrap-around columns per padded row for the streamed BN stats.
    Returns y (NB, out_rows, Cout_p) bf16 and channel sum / sumsq (Cout_p,)."""
    nb, band_rows, c_p = band.shape
    cout_p = w.shape[2]

    def kernel(x_ref, w_ref, m_ref, y_ref, s_ref, ss_ref):
        acc = jnp.zeros((out_rows, cout_p), jnp.float32)
        for dy in range(3):
            for dx in range(3):
                tap = x_ref[0, pl.ds(dy * wp + dx, out_rows), :]
                acc += jnp.dot(tap, w_ref[dy * 3 + dx],
                               preferred_element_type=jnp.float32)
        y_ref[0] = acc.astype(jnp.bfloat16)
        masked = acc * m_ref[...]                    # zero wrap-around columns
        s_ref[0] = jnp.sum(masked, axis=0, keepdims=True)
        ss_ref[0] = jnp.sum(masked * acc, axis=0, keepdims=True)

    vmem = (2 * band_rows * c_p * 2 + 2 * 9 * c_p * cout_p * 2
            + 2 * out_rows * cout_p * 2 + out_rows * cout_p * 4
            + out_rows * 4 + 32 * cout_p * 4)
    # NOTE: the constant-index weight/mask blocks could use
    # pipeline_mode=pl.Buffered(1) to skip pointless double buffering.
    y, ps, pss = pl.pallas_call(
        kernel,
        out_shape=(jax.ShapeDtypeStruct((nb, out_rows, cout_p), jnp.bfloat16),
                   jax.ShapeDtypeStruct((nb, 1, cout_p), jnp.float32),
                   jax.ShapeDtypeStruct((nb, 1, cout_p), jnp.float32)),
        grid=(nb,),
        in_specs=[pl.BlockSpec((1, band_rows, c_p), lambda i: (i, 0, 0)),
                  pl.BlockSpec((9, c_p, cout_p), lambda i: (0, 0, 0)),
                  pl.BlockSpec((out_rows, 1), lambda i: (0, 0))],
        out_specs=(pl.BlockSpec((1, out_rows, cout_p), lambda i: (i, 0, 0)),
                   pl.BlockSpec((1, 1, cout_p), lambda i: (i, 0, 0)),
                   pl.BlockSpec((1, 1, cout_p), lambda i: (i, 0, 0))),
        compiler_params=_compiler_params(("parallel",), vmem),
        cost_estimate=pl.CostEstimate(
            flops=2 * 9 * nb * out_rows * c_p * cout_p, transcendentals=0,
            bytes_accessed=(nb * band_rows * c_p * 2 + 9 * c_p * cout_p * 2
                            + nb * out_rows * cout_p * 2)),
    )(band, w, mask)
    return y, jnp.sum(ps, axis=(0, 1)), jnp.sum(pss, axis=(0, 1))


def norm_lrelu_banded(y, scale, shift):
    """o = LeakyReLU(y * scale + shift); bf16 in, bf16 out (banded layout)."""
    nb, out_rows, c_p = y.shape

    def kernel(y_ref, sc_ref, sh_ref, o_ref):
        a = y_ref[...].astype(jnp.float32) * sc_ref[...] + sh_ref[...]
        o_ref[...] = jnp.where(a >= 0, a, NEG_SLOPE * a).astype(jnp.bfloat16)

    vmem = 4 * out_rows * c_p * 2 + out_rows * c_p * 4 + 8 * c_p * 4
    return pl.pallas_call(
        kernel,
        out_shape=jax.ShapeDtypeStruct((nb, out_rows, c_p), jnp.bfloat16),
        grid=(nb,),
        in_specs=[pl.BlockSpec((1, out_rows, c_p), lambda i: (i, 0, 0)),
                  pl.BlockSpec((1, 1, c_p), lambda i: (0, 0, 0)),
                  pl.BlockSpec((1, 1, c_p), lambda i: (0, 0, 0))],
        out_specs=pl.BlockSpec((1, out_rows, c_p), lambda i: (i, 0, 0)),
        compiler_params=_compiler_params(("parallel",), vmem),
        cost_estimate=pl.CostEstimate(
            flops=3 * nb * out_rows * c_p, transcendentals=0,
            bytes_accessed=2 * nb * out_rows * c_p * 2),
    )(y, scale.reshape(1, 1, c_p), shift.reshape(1, 1, c_p))


# ---------------------------------------------------------------------------
# Pallas kernels + wrappers: fused 1x1 head
# ---------------------------------------------------------------------------

def _matmul_stats_kernel(a_ref, w_ref, y_ref, s_ref, ss_ref):
    y = jnp.dot(a_ref[...], w_ref[...], preferred_element_type=jnp.float32)
    y_ref[...] = y.astype(jnp.bfloat16)
    s_ref[...] = jnp.sum(y, axis=0, keepdims=True)[None]
    ss_ref[...] = jnp.sum(y * y, axis=0, keepdims=True)[None]


def matmul_stats(a, w, tile_m):
    """a:(M_pad,K_p) bf16, w:(K_p,C_p) bf16 -> y bf16, channel sum/sumsq f32."""
    m_pad, k_p = a.shape
    c_p = w.shape[1]
    g = m_pad // tile_m
    vmem = (2 * tile_m * k_p * 2 + 2 * k_p * c_p * 2
            + 2 * tile_m * c_p * 2 + tile_m * c_p * 4 + 16 * c_p * 4)
    y, ps, pss = pl.pallas_call(
        _matmul_stats_kernel,
        out_shape=(jax.ShapeDtypeStruct((m_pad, c_p), jnp.bfloat16),
                   jax.ShapeDtypeStruct((g, 1, c_p), jnp.float32),
                   jax.ShapeDtypeStruct((g, 1, c_p), jnp.float32)),
        grid=(g,),
        in_specs=[pl.BlockSpec((tile_m, k_p), lambda i: (i, 0)),
                  pl.BlockSpec((k_p, c_p), lambda i: (0, 0))],
        out_specs=(pl.BlockSpec((tile_m, c_p), lambda i: (i, 0)),
                   pl.BlockSpec((1, 1, c_p), lambda i: (i, 0, 0)),
                   pl.BlockSpec((1, 1, c_p), lambda i: (i, 0, 0))),
        compiler_params=_compiler_params(("parallel",), vmem),
        cost_estimate=pl.CostEstimate(
            flops=2 * m_pad * k_p * c_p, transcendentals=0,
            bytes_accessed=m_pad * k_p * 2 + k_p * c_p * 2 + m_pad * c_p * 2),
    )(a, w)
    return y, jnp.sum(ps, axis=(0, 1)), jnp.sum(pss, axis=(0, 1))


def _make_norm_lrelu_matmul_stats_kernel(tile_m, m_real, mask_rows):
    def kernel(y_ref, sc_ref, sh_ref, w_ref, y2_ref, s_ref, ss_ref):
        a = y_ref[...].astype(jnp.float32) * sc_ref[...] + sh_ref[...]
        a = jnp.where(a >= 0, a, NEG_SLOPE * a)
        if mask_rows:
            # Only emitted when padded rows can exist at all (trace-time
            # check), so the iota/compare/select is not paid in the usual case.
            row = (jax.lax.broadcasted_iota(jnp.int32, a.shape, 0)
                   + pl.program_id(0) * tile_m)
            a = jnp.where(row < m_real, a, 0.0)
        y2 = jnp.dot(a.astype(jnp.bfloat16), w_ref[...],
                     preferred_element_type=jnp.float32)
        y2_ref[...] = y2.astype(jnp.bfloat16)
        s_ref[...] = jnp.sum(y2, axis=0, keepdims=True)[None]
        ss_ref[...] = jnp.sum(y2 * y2, axis=0, keepdims=True)[None]
    return kernel


def norm_lrelu_matmul_stats(y1, scale, shift, w, tile_m, m_real):
    m_pad, c1_p = y1.shape
    c2_p = w.shape[1]
    g = m_pad // tile_m
    kernel = _make_norm_lrelu_matmul_stats_kernel(tile_m, m_real, m_pad != m_real)
    vmem = (2 * tile_m * c1_p * 2 + 2 * c1_p * c2_p * 2
            + 2 * tile_m * c2_p * 2 + tile_m * (c1_p + c2_p) * 4 + 16 * c2_p * 4)
    y2, ps, pss = pl.pallas_call(
        kernel,
        out_shape=(jax.ShapeDtypeStruct((m_pad, c2_p), jnp.bfloat16),
                   jax.ShapeDtypeStruct((g, 1, c2_p), jnp.float32),
                   jax.ShapeDtypeStruct((g, 1, c2_p), jnp.float32)),
        grid=(g,),
        in_specs=[pl.BlockSpec((tile_m, c1_p), lambda i: (i, 0)),
                  pl.BlockSpec((1, c1_p), lambda i: (0, 0)),
                  pl.BlockSpec((1, c1_p), lambda i: (0, 0)),
                  pl.BlockSpec((c1_p, c2_p), lambda i: (0, 0))],
        out_specs=(pl.BlockSpec((tile_m, c2_p), lambda i: (i, 0)),
                   pl.BlockSpec((1, 1, c2_p), lambda i: (i, 0, 0)),
                   pl.BlockSpec((1, 1, c2_p), lambda i: (i, 0, 0))),
        compiler_params=_compiler_params(("parallel",), vmem),
        cost_estimate=pl.CostEstimate(
            flops=2 * m_pad * c1_p * c2_p + 4 * m_pad * c1_p, transcendentals=0,
            bytes_accessed=m_pad * (c1_p + c2_p) * 2 + c1_p * c2_p * 2),
    )(y1, scale.reshape(1, c1_p), shift.reshape(1, c1_p), w)
    return y2, jnp.sum(ps, axis=(0, 1)), jnp.sum(pss, axis=(0, 1))


def _norm_lrelu_matmul_bias_res_kernel(y_ref, sc_ref, sh_ref, w_ref, b_ref,
                                       skip_ref, o_ref):
    a = y_ref[...].astype(jnp.float32) * sc_ref[...] + sh_ref[...]
    a = jnp.where(a >= 0, a, NEG_SLOPE * a)
    o_ref[...] = (skip_ref[...] + b_ref[...]
                  + jnp.dot(a.astype(jnp.bfloat16), w_ref[...],
                            preferred_element_type=jnp.float32))


def norm_lrelu_matmul_bias_res(y2, scale, shift, w, b, skip, tile_m):
    m_pad, c2_p = y2.shape
    c3_p = w.shape[1]
    g = m_pad // tile_m
    vmem = (2 * tile_m * c2_p * 2 + 2 * c2_p * c3_p * 2
            + 4 * tile_m * c3_p * 4 + 8 * c3_p * 4)
    return pl.pallas_call(
        _norm_lrelu_matmul_bias_res_kernel,
        out_shape=jax.ShapeDtypeStruct((m_pad, c3_p), jnp.float32),
        grid=(g,),
        in_specs=[pl.BlockSpec((tile_m, c2_p), lambda i: (i, 0)),
                  pl.BlockSpec((1, c2_p), lambda i: (0, 0)),
                  pl.BlockSpec((1, c2_p), lambda i: (0, 0)),
                  pl.BlockSpec((c2_p, c3_p), lambda i: (0, 0)),
                  pl.BlockSpec((1, c3_p), lambda i: (0, 0)),
                  pl.BlockSpec((tile_m, c3_p), lambda i: (i, 0))],
        out_specs=pl.BlockSpec((tile_m, c3_p), lambda i: (i, 0)),
        compiler_params=_compiler_params(("parallel",), vmem),
        cost_estimate=pl.CostEstimate(
            flops=2 * m_pad * c2_p * c3_p + 4 * m_pad * c2_p, transcendentals=0,
            bytes_accessed=(m_pad * c2_p * 2 + m_pad * 2 * c3_p * 4
                            + c2_p * c3_p * 2)),
    )(y2, scale.reshape(1, c2_p), shift.reshape(1, c2_p), w,
      b.reshape(1, c3_p), skip)


# ---------------------------------------------------------------------------
# BN stat folding (tiny per-channel math, plain JAX)
# ---------------------------------------------------------------------------

def _bn_scale_shift(s, ss, gamma, beta, m_real, c_p):
    # E[y^2]-E[y]^2 in f32 (biased variance, training-mode BatchNorm).
    # TODO(synk): merge per-tile (count, mean, M2) Welford partials if
    # cancellation ever becomes an issue at very large M / deep layers.
    mean = s / m_real
    var = jnp.maximum(ss / m_real - mean * mean, 0.0)
    gamma_p = jnp.pad(gamma, (0, c_p - gamma.shape[0]))   # padded channels -> 0
    beta_p = jnp.pad(beta, (0, c_p - beta.shape[0]))
    scale = gamma_p * jax.lax.rsqrt(var + BN_EPS)
    shift = beta_p - mean * scale
    return scale, shift


# ---------------------------------------------------------------------------
# Conv layers
# ---------------------------------------------------------------------------

def conv3x3_bn_lrelu(x, p):
    """x: (N,H,W,Cin) bf16 (real channel width).  Conv3x3(pad=1; bias cancels
    against BN mean) + BatchNorm(batch stats) + LeakyReLU -> (N,H,W,Cout) bf16."""
    n, h, w_sp, c = x.shape
    cout = p['gamma'].shape[0]
    c_p, cout_p = p['w'].shape[1], p['w'].shape[2]
    th = _pick_band_height(n, h, w_sp)
    nbands = h // th
    nb = n * nbands
    wp = w_sp + 2
    out_rows = th * wp
    band_rows = (th + 2) * wp + SUBLANE     # slack rows for wrap-around taps

    # Row-band gather (plain-JAX glue): ~1.2x of the activation instead of the
    # 9x patch matrix of an im2col.
    # TODO(synk): keep HBM intermediates at real channel width and pad to 128
    # lanes only inside VMEM; at chans=8 most streamed bytes are still zeros.
    xp = jnp.pad(x.astype(jnp.bfloat16),
                 ((0, 0), (1, 1), (1, 1), (0, c_p - c)))
    row_idx = (jnp.arange(nbands) * th)[:, None] + jnp.arange(th + 2)[None, :]
    band = xp[:, row_idx].reshape(nb, (th + 2) * wp, c_p)
    band = jnp.pad(band, ((0, 0), (0, band_rows - (th + 2) * wp), (0, 0)))

    # Validity mask for the two wrap-around columns of each padded row.
    col = jnp.arange(out_rows, dtype=jnp.int32) % wp
    mask = (col < w_sp).astype(jnp.float32).reshape(out_rows, 1)

    y, s, ss = conv3x3_stats(band, p['w'], mask, out_rows, wp)
    scale, shift = _bn_scale_shift(s, ss, p['gamma'], p['beta'],
                                   n * h * w_sp, cout_p)
    act = norm_lrelu_banded(y, scale, shift)
    act = act.reshape(n, nbands, th, wp, cout_p)[:, :, :, :w_sp, :cout]
    return act.reshape(n, h, w_sp, cout)


def conv_block(x, pb):
    x = conv3x3_bn_lrelu(x, pb['c1'])
    # Dropout2d(drop_prob=0.0) == identity.
    x = conv3x3_bn_lrelu(x, pb['c2'])
    return x


def head_forward(x_act, x_in, hp):
    """Fused 1x1 head: conv->BN->LReLU -> conv->BN->LReLU -> conv, + residual."""
    n, h, w_sp, c = x_act.shape
    out_chans = hp['b3'].shape[0]
    assert x_in.shape[-1] == out_chans, "residual skip needs in_chans == out_chans"
    m = n * h * w_sp
    tile_m = _pick_tile_m(m)
    m_pad = _round_up(m, tile_m)

    k1_p, c1_p = hp['w1'].shape
    a = x_act.reshape(m, c).astype(jnp.bfloat16)
    a = jnp.pad(a, ((0, m_pad - m), (0, k1_p - c)))
    y1, s1, ss1 = matmul_stats(a, hp['w1'], tile_m)
    sc1, sh1 = _bn_scale_shift(s1, ss1, hp['g1'], hp['bt1'], m, c1_p)

    c2_p = hp['w2'].shape[1]
    y2, s2, ss2 = norm_lrelu_matmul_stats(y1, sc1, sh1, hp['w2'], tile_m, m)
    sc2, sh2 = _bn_scale_shift(s2, ss2, hp['g2'], hp['bt2'], m, c2_p)

    c3_p = hp['w3'].shape[1]
    skip = jnp.pad(x_in.reshape(m, out_chans).astype(jnp.float32),
                   ((0, m_pad - m), (0, c3_p - out_chans)))
    b3 = jnp.pad(hp['b3'], (0, c3_p - out_chans))
    out = norm_lrelu_matmul_bias_res(y2, sc2, sh2, hp['w3'], b3, skip, tile_m)
    return out[:m, :out_chans].reshape(n, h, w_sp, out_chans)


# ---------------------------------------------------------------------------
# Spatial glue (plain JAX)
# ---------------------------------------------------------------------------

def avg_pool2x2(x):
    # TODO(synk): fuse the 2x2 average pool into norm_lrelu_banded as a second
    # output to save one activation round-trip per down stage.
    n, h, w, c = x.shape
    return x.reshape(n, h // 2, 2, w // 2, 2, c).mean(axis=(2, 4)).astype(x.dtype)


def _up_coords(n_out, n_in):
    # F.interpolate(scale_factor=2, mode='bilinear', align_corners=False)
    c = (jnp.arange(n_out, dtype=jnp.float32) + 0.5) * (n_in / n_out) - 0.5
    c = jnp.clip(c, 0.0, n_in - 1.0)
    i0 = jnp.floor(c).astype(jnp.int32)
    i1 = jnp.minimum(i0 + 1, n_in - 1)
    return i0, i1, c - i0.astype(jnp.float32)


def upsample_bilinear_2x(x):
    n, h, w, c = x.shape
    xf = x.astype(jnp.float32)
    i0, i1, fh = _up_coords(2 * h, h)
    xh = (xf[:, i0] * (1.0 - fh)[None, :, None, None]
          + xf[:, i1] * fh[None, :, None, None])
    j0, j1, fw = _up_coords(2 * w, w)
    out = (xh[:, :, j0] * (1.0 - fw)[None, None, :, None]
           + xh[:, :, j1] * fw[None, None, :, None])
    return out.astype(x.dtype)


# ---------------------------------------------------------------------------
# Parameters (deterministic, PyTorch-default-style init; lane-padded weights)
# ---------------------------------------------------------------------------

def _pad2(a, rows, cols):
    return jnp.pad(a, ((0, rows - a.shape[0]), (0, cols - a.shape[1])))


def _init_conv3x3(key, cin, cout):
    # Conv bias before BatchNorm cancels exactly against the mean subtraction,
    # so it is not generated.
    bound = 1.0 / (9 * cin) ** 0.5
    w = jax.random.uniform(key, (3, 3, cin, cout), jnp.float32, -bound, bound)
    w = w.reshape(9, cin, cout)                    # tap-major (dy*3+dx, cin, cout)
    c_p, cout_p = _round_up(cin, LANE), _round_up(cout, LANE)
    w = jnp.pad(w, ((0, 0), (0, c_p - cin), (0, cout_p - cout))).astype(jnp.bfloat16)
    return dict(w=w, gamma=jnp.ones(cout, jnp.float32),
                beta=jnp.zeros(cout, jnp.float32))


def _init_conv1x1(key, cin, cout, with_bias):
    wk, bk = jax.random.split(key)
    bound = 1.0 / cin ** 0.5
    w = jax.random.uniform(wk, (cin, cout), jnp.float32, -bound, bound)
    w = _pad2(w, _round_up(cin, LANE), _round_up(cout, LANE)).astype(jnp.bfloat16)
    if with_bias:
        b = jax.random.uniform(bk, (cout,), jnp.float32, -bound, bound)
        return w, b
    return w


def init_gan_generator_params(key, in_chans, out_chans, chans, num_pool_layers):
    keys = iter(jax.random.split(key, 4 * num_pool_layers + 8))

    def block(cin, cout):
        return dict(c1=_init_conv3x3(next(keys), cin, cout),
                    c2=_init_conv3x3(next(keys), cout, cout))

    down = [block(in_chans, chans)]
    ch = chans
    for _ in range(num_pool_layers - 1):
        down.append(block(ch, ch * 2))
        ch *= 2
    mid = block(ch, ch)
    up = []
    for _ in range(num_pool_layers - 1):
        up.append(block(ch * 2, ch // 2))
        ch //= 2
    up.append(block(ch * 2, ch))

    w1 = _init_conv1x1(next(keys), ch, ch // 2, with_bias=False)
    w2 = _init_conv1x1(next(keys), ch // 2, out_chans, with_bias=False)
    w3, b3 = _init_conv1x1(next(keys), out_chans, out_chans, with_bias=True)
    head = dict(w1=w1, g1=jnp.ones(ch // 2, jnp.float32),
                bt1=jnp.zeros(ch // 2, jnp.float32),
                w2=w2, g2=jnp.ones(out_chans, jnp.float32),
                bt2=jnp.zeros(out_chans, jnp.float32),
                w3=w3, b3=b3)
    return dict(down=down, mid=mid, up=up, head=head)


# ---------------------------------------------------------------------------
# Forward pass
# ---------------------------------------------------------------------------

def gan_generator_forward(params, x_nchw):
    x_nhwc = jnp.transpose(x_nchw, (0, 2, 3, 1)).astype(jnp.float32)  # NCHW->NHWC
    out = x_nhwc.astype(jnp.bfloat16)
    stack = []
    for pb in params['down']:
        out = conv_block(out, pb)
        stack.append(out)
        out = avg_pool2x2(out)
    out = conv_block(out, params['mid'])
    for pb in params['up']:
        out = upsample_bilinear_2x(out)
        # TODO(synk): feed the upsampled tensor and the skip as two separate
        # conv-pass inputs instead of materializing the concat.
        out = jnp.concatenate([out, stack.pop()], axis=-1)  # NCHW dim=1 == NHWC -1
        out = conv_block(out, pb)
    out = head_forward(out, x_nhwc, params['head'])          # fused 1x1 head
    return jnp.transpose(out, (0, 3, 1, 2))                  # back to NCHW


if __name__ == "__main__":
    in_chans, out_chans, chans, num_pool_layers, drop_prob = 4, 4, 8, 2, 0.0
    N, H, W = 2, 16, 16

    key = jax.random.PRNGKey(0)
    pkey, xkey = jax.random.split(key)
    params = init_gan_generator_params(pkey, in_chans, out_chans, chans,
                                       num_pool_layers)
    x = jax.random.normal(xkey, (N, in_chans, H, W), jnp.float32)  # NCHW input

    fwd = jax.jit(gan_generator_forward)
    y = fwd(params, x)
    jax.block_until_ready(y)

    assert y.shape == (N, out_chans, H, W), y.shape
    assert bool(jnp.all(jnp.isfinite(y)))
    print("KERNEL_OK")
</pallas_src>

<mosaic_0001>
module attributes {stable_mosaic.version = 11 : i64} {
  func.func @kernel(%arg0: i32, %arg1: memref<1x332x128xbf16, #tpu.memory_space<vmem>>, %arg2: memref<9x128x128xbf16, #tpu.memory_space<vmem>>, %arg3: memref<288x1xf32, #tpu.memory_space<vmem>>, %arg4: memref<1x288x128xbf16, #tpu.memory_space<vmem>>, %arg5: memref<1x1x128xf32, #tpu.memory_space<vmem>>, %arg6: memref<1x1x128xf32, #tpu.memory_space<vmem>>) attributes {dimension_semantics = [#tpu.dimension_semantics<parallel>], iteration_bounds = array<i64: 2>, scalar_prefetch = 0 : i64, scratch_operands = 0 : i64, tpu.core_type = #tpu.core_type<tc>, window_params = [{transform_indices = @transform_0, window_bounds = array<i64: 1, 332, 128>}, {pipeline_mode = #tpu.pipeline_mode<synchronous>, transform_indices = @transform_1, window_bounds = array<i64: 9, 128, 128>}, {pipeline_mode = #tpu.pipeline_mode<synchronous>, transform_indices = @transform_2, window_bounds = array<i64: 288, 1>}, {transform_indices = @transform_3, window_bounds = array<i64: 1, 288, 128>}, {transform_indices = @transform_4, window_bounds = array<i64: 1, 1, 128>}, {transform_indices = @transform_5, window_bounds = array<i64: 1, 1, 128>}]} {
    %cst = arith.constant 0.000000e+00 : f32
    %0 = vector.broadcast %cst : f32 to vector<288x128xf32>
    %c0 = arith.constant 0 : index
    %c0_0 = arith.constant 0 : index
    %c0_1 = arith.constant 0 : index
    %1 = vector.load %arg1[%c0, %c0_0, %c0_1] : memref<1x332x128xbf16, #tpu.memory_space<vmem>>, vector<1x288x128xbf16>
    %2 = vector.shape_cast %1 : vector<1x288x128xbf16> to vector<288x128xbf16>
    %c0_2 = arith.constant 0 : index
    %c0_3 = arith.constant 0 : index
    %c0_4 = arith.constant 0 : index
    %3 = vector.load %arg2[%c0_2, %c0_3, %c0_4] : memref<9x128x128xbf16, #tpu.memory_space<vmem>>, vector<1x128x128xbf16>
    %4 = vector.shape_cast %3 : vector<1x128x128xbf16> to vector<128x128xbf16>
    %cst_5 = arith.constant dense<0.000000e+00> : vector<288x128xf32>
    %5 = tpu.matmul %2, %4, %cst_5 {dimension_numbers = #tpu.dot_dimension_numbers<[1], [0], [0], [1], [0, 0, 1, 1], [], []>} : vector<288x128xbf16>, vector<128x128xbf16>, vector<288x128xf32> -> vector<288x128xf32>
    %6 = arith.addf %0, %5 : vector<288x128xf32>
    %c0_6 = arith.constant 0 : index
    %c1 = arith.constant 1 : index
    %c0_7 = arith.constant 0 : index
    %7 = vector.load %arg1[%c0_6, %c1, %c0_7] : memref<1x332x128xbf16, #tpu.memory_space<vmem>>, vector<1x288x128xbf16>
    %8 = vector.shape_cast %7 : vector<1x288x128xbf16> to vector<288x128xbf16>
    %c1_8 = arith.constant 1 : index
    %c0_9 = arith.constant 0 : index
    %c0_10 = arith.constant 0 : index
    %9 = vector.load %arg2[%c1_8, %c0_9, %c0_10] : memref<9x128x128xbf16, #tpu.memory_space<vmem>>, vector<1x128x128xbf16>
    %10 = vector.shape_cast %9 : vector<1x128x128xbf16> to vector<128x128xbf16>
    %cst_11 = arith.constant dense<0.000000e+00> : vector<288x128xf32>
    %11 = tpu.matmul %8, %10, %cst_11 {dimension_numbers = #tpu.dot_dimension_numbers<[1], [0], [0], [1], [0, 0, 1, 1], [], []>} : vector<288x128xbf16>, vector<128x128xbf16>, vector<288x128xf32> -> vector<288x128xf32>
    %12 = arith.addf %6, %11 : vector<288x128xf32>
    %c0_12 = arith.constant 0 : index
    %c2 = arith.constant 2 : index
    %c0_13 = arith.constant 0 : index
    %13 = vector.load %arg1[%c0_12, %c2, %c0_13] : memref<1x332x128xbf16, #tpu.memory_space<vmem>>, vector<1x288x128xbf16>
    %14 = vector.shape_cast %13 : vector<1x288x128xbf16> to vector<288x128xbf16>
    %c2_14 = arith.constant 2 : index
    %c0_15 = arith.constant 0 : index
    %c0_16 = arith.constant 0 : index
    %15 = vector.load %arg2[%c2_14, %c0_15, %c0_16] : memref<9x128x128xbf16, #tpu.memory_space<vmem>>, vector<1x128x128xbf16>
    %16 = vector.shape_cast %15 : vector<1x128x128xbf16> to vector<128x128xbf16>
    %cst_17 = arith.constant dense<0.000000e+00> : vector<288x128xf32>
    %17 = tpu.matmul %14, %16, %cst_17 {dimension_numbers = #tpu.dot_dimension_numbers<[1], [0], [0], [1], [0, 0, 1, 1], [], []>} : vector<288x128xbf16>, vector<128x128xbf16>, vector<288x128xf32> -> vector<288x128xf32>
    %18 = arith.addf %12, %17 : vector<288x128xf32>
    %c0_18 = arith.constant 0 : index
    %c18 = arith.constant 18 : index
    %c0_19 = arith.constant 0 : index
    %19 = vector.load %arg1[%c0_18, %c18, %c0_19] : memref<1x332x128xbf16, #tpu.memory_space<vmem>>, vector<1x288x128xbf16>
    %20 = vector.shape_cast %19 : vector<1x288x128xbf16> to vector<288x128xbf16>
    %c3 = arith.constant 3 : index
    %c0_20 = arith.constant 0 : index
    %c0_21 = arith.constant 0 : index
    %21 = vector.load %arg2[%c3, %c0_20, %c0_21] : memref<9x128x128xbf16, #tpu.memory_space<vmem>>, vector<1x128x128xbf16>
    %22 = vector.shape_cast %21 : vector<1x128x128xbf16> to vector<128x128xbf16>
    %cst_22 = arith.constant dense<0.000000e+00> : vector<288x128xf32>
    %23 = tpu.matmul %20, %22, %cst_22 {dimension_numbers = #tpu.dot_dimension_numbers<[1], [0], [0], [1], [0, 0, 1, 1], [], []>} : vector<288x128xbf16>, vector<128x128xbf16>, vector<288x128xf32> -> vector<288x128xf32>
    %24 = arith.addf %18, %23 : vector<288x128xf32>
    %c0_23 = arith.constant 0 : index
    %c19 = arith.constant 19 : index
    %c0_24 = arith.constant 0 : index
    %25 = vector.load %arg1[%c0_23, %c19, %c0_24] : memref<1x332x128xbf16, #tpu.memory_space<vmem>>, vector<1x288x128xbf16>
    %26 = vector.shape_cast %25 : vector<1x288x128xbf16> to vector<288x128xbf16>
    %c4 = arith.constant 4 : index
    %c0_25 = arith.constant 0 : index
    %c0_26 = arith.constant 0 : index
    %27 = vector.load %arg2[%c4, %c0_25, %c0_26] : memref<9x128x128xbf16, #tpu.memory_space<vmem>>, vector<1x128x128xbf16>
    %28 = vector.shape_cast %27 : vector<1x128x128xbf16> to vector<128x128xbf16>
    %cst_27 = arith.constant dense<0.000000e+00> : vector<288x128xf32>
    %29 = tpu.matmul %26, %28, %cst_27 {dimension_numbers = #tpu.dot_dimension_numbers<[1], [0], [0], [1], [0, 0, 1, 1], [], []>} : vector<288x128xbf16>, vector<128x128xbf16>, vector<288x128xf32> -> vector<288x128xf32>
    %30 = arith.addf %24, %29 : vector<288x128xf32>
    %c0_28 = arith.constant 0 : index
    %c20 = arith.constant 20 : index
    %c0_29 = arith.constant 0 : index
    %31 = vector.load %arg1[%c0_28, %c20, %c0_29] : memref<1x332x128xbf16, #tpu.memory_space<vmem>>, vector<1x288x128xbf16>
    %32 = vector.shape_cast %31 : vector<1x288x128xbf16> to vector<288x128xbf16>
    %c5 = arith.constant 5 : index
    %c0_30 = arith.constant 0 : index
    %c0_31 = arith.constant 0 : index
    %33 = vector.load %arg2[%c5, %c0_30, %c0_31] : memref<9x128x128xbf16, #tpu.memory_space<vmem>>, vector<1x128x128xbf16>
    %34 = vector.shape_cast %33 : vector<1x128x128xbf16> to vector<128x128xbf16>
    %cst_32 = arith.constant dense<0.000000e+00> : vector<288x128xf32>
    %35 = tpu.matmul %32, %34, %cst_32 {dimension_numbers = #tpu.dot_dimension_numbers<[1], [0], [0], [1], [0, 0, 1, 1], [], []>} : vector<288x128xbf16>, vector<128x128xbf16>, vector<288x128xf32> -> vector<288x128xf32>
    %36 = arith.addf %30, %35 : vector<288x128xf32>
    %c0_33 = arith.constant 0 : index
    %c36 = arith.constant 36 : index
    %c0_34 = arith.constant 0 : index
    %37 = vector.load %arg1[%c0_33, %c36, %c0_34] : memref<1x332x128xbf16, #tpu.memory_space<vmem>>, vector<1x288x128xbf16>
    %38 = vector.shape_cast %37 : vector<1x288x128xbf16> to vector<288x128xbf16>
    %c6 = arith.constant 6 : index
    %c0_35 = arith.constant 0 : index
    %c0_36 = arith.constant 0 : index
    %39 = vector.load %arg2[%c6, %c0_35, %c0_36] : memref<9x128x128xbf16, #tpu.memory_space<vmem>>, vector<1x128x128xbf16>
    %40 = vector.shape_cast %39 : vector<1x128x128xbf16> to vector<128x128xbf16>
    %cst_37 = arith.constant dense<0.000000e+00> : vector<288x128xf32>
    %41 = tpu.matmul %38, %40, %cst_37 {dimension_numbers = #tpu.dot_dimension_numbers<[1], [0], [0], [1], [0, 0, 1, 1], [], []>} : vector<288x128xbf16>, vector<128x128xbf16>, vector<288x128xf32> -> vector<288x128xf32>
    %42 = arith.addf %36, %41 : vector<288x128xf32>
    %c0_38 = arith.constant 0 : index
    %c37 = arith.constant 37 : index
    %c0_39 = arith.constant 0 : index
    %43 = vector.load %arg1[%c0_38, %c37, %c0_39] : memref<1x332x128xbf16, #tpu.memory_space<vmem>>, vector<1x288x128xbf16>
    %44 = vector.shape_cast %43 : vector<1x288x128xbf16> to vector<288x128xbf16>
    %c7 = arith.constant 7 : index
    %c0_40 = arith.constant 0 : index
    %c0_41 = arith.constant 0 : index
    %45 = vector.load %arg2[%c7, %c0_40, %c0_41] : memref<9x128x128xbf16, #tpu.memory_space<vmem>>, vector<1x128x128xbf16>
    %46 = vector.shape_cast %45 : vector<1x128x128xbf16> to vector<128x128xbf16>
    %cst_42 = arith.constant dense<0.000000e+00> : vector<288x128xf32>
    %47 = tpu.matmul %44, %46, %cst_42 {dimension_numbers = #tpu.dot_dimension_numbers<[1], [0], [0], [1], [0, 0, 1, 1], [], []>} : vector<288x128xbf16>, vector<128x128xbf16>, vector<288x128xf32> -> vector<288x128xf32>
    %48 = arith.addf %42, %47 : vector<288x128xf32>
    %c0_43 = arith.constant 0 : index
    %c38 = arith.constant 38 : index
    %c0_44 = arith.constant 0 : index
    %49 = vector.load %arg1[%c0_43, %c38, %c0_44] : memref<1x332x128xbf16, #tpu.memory_space<vmem>>, vector<1x288x128xbf16>
    %50 = vector.shape_cast %49 : vector<1x288x128xbf16> to vector<288x128xbf16>
    %c8 = arith.constant 8 : index
    %c0_45 = arith.constant 0 : index
    %c0_46 = arith.constant 0 : index
    %51 = vector.load %arg2[%c8, %c0_45, %c0_46] : memref<9x128x128xbf16, #tpu.memory_space<vmem>>, vector<1x128x128xbf16>
    %52 = vector.shape_cast %51 : vector<1x128x128xbf16> to vector<128x128xbf16>
    %cst_47 = arith.constant dense<0.000000e+00> : vector<288x128xf32>
    %53 = tpu.matmul %50, %52, %cst_47 {dimension_numbers = #tpu.dot_dimension_numbers<[1], [0], [0], [1], [0, 0, 1, 1], [], []>} : vector<288x128xbf16>, vector<128x128xbf16>, vector<288x128xf32> -> vector<288x128xf32>
    %54 = arith.addf %48, %53 : vector<288x128xf32>
    %55 = arith.truncf %54 : vector<288x128xf32> to vector<288x128xbf16>
    %c0_48 = arith.constant 0 : index
    %c0_49 = arith.constant 0 : index
    %c0_50 = arith.constant 0 : index
    %56 = vector.load %arg4[%c0_48, %c0_49, %c0_50] : memref<1x288x128xbf16, #tpu.memory_space<vmem>>, vector<1x288x128xbf16>
    %57 = vector.shape_cast %56 : vector<1x288x128xbf16> to vector<288x128xbf16>
    %58 = vector.shape_cast %55 : vector<288x128xbf16> to vector<1x288x128xbf16>
    tpu.vector_store %arg4[%c0_48, %c0_49, %c0_50], %58 {strides = array<i32>} : memref<1x288x128xbf16, #tpu.memory_space<vmem>>, vector<1x288x128xbf16>,
    %c0_51 = arith.constant 0 : index
    %c0_52 = arith.constant 0 : index
    %59 = vector.load %arg3[%c0_51, %c0_52] : memref<288x1xf32, #tpu.memory_space<vmem>>, vector<288x1xf32>
    %60 = vector.broadcast %59 : vector<288x1xf32> to vector<288x128xf32>
    %61 = arith.mulf %54, %60 : vector<288x128xf32>
    %cst_53 = arith.constant dense<0.000000e+00> : vector<128xf32>
    %62 = vector.multi_reduction <add>, %61, %cst_53 [0] : vector<288x128xf32> to vector<128xf32>
    %63 = vector.shape_cast %62 : vector<128xf32> to vector<1x128xf32>
    %c0_54 = arith.constant 0 : index
    %c0_55 = arith.constant 0 : index
    %c0_56 = arith.constant 0 : index
    %64 = vector.load %arg5[%c0_54, %c0_55, %c0_56] : memref<1x1x128xf32, #tpu.memory_space<vmem>>, vector<1x1x128xf32>
    %65 = vector.shape_cast %64 : vector<1x1x128xf32> to vector<1x128xf32>
    %66 = vector.shape_cast %63 : vector<1x128xf32> to vector<1x1x128xf32>
    tpu.vector_store %arg5[%c0_54, %c0_55, %c0_56], %66 {strides = array<i32>} : memref<1x1x128xf32, #tpu.memory_space<vmem>>, vector<1x1x128xf32>,
    %67 = arith.mulf %61, %54 : vector<288x128xf32>
    %cst_57 = arith.constant dense<0.000000e+00> : vector<128xf32>
    %68 = vector.multi_reduction <add>, %67, %cst_57 [0] : vector<288x128xf32> to vector<128xf32>
    %69 = vector.shape_cast %68 : vector<128xf32> to vector<1x128xf32>
    %c0_58 = arith.constant 0 : index
    %c0_59 = arith.constant 0 : index
    %c0_60 = arith.constant 0 : index
    %70 = vector.load %arg6[%c0_58, %c0_59, %c0_60] : memref<1x1x128xf32, #tpu.memory_space<vmem>>, vector<1x1x128xf32>
    %71 = vector.shape_cast %70 : vector<1x1x128xf32> to vector<1x128xf32>
    %72 = vector.shape_cast %69 : vector<1x128xf32> to vector<1x1x128xf32>
    tpu.vector_store %arg6[%c0_58, %c0_59, %c0_60], %72 {strides = array<i32>} : memref<1x1x128xf32, #tpu.memory_space<vmem>>, vector<1x1x128xf32>,
    return
  }
  func.func @transform_0(%arg0: i32) -> (i32, i32, i32) {
    %c0_i32 = arith.constant 0 : i32
    %c0_i32_0 = arith.constant 0 : i32
    %c0_i32_1 = arith.constant 0 : i32
    return %arg0, %c0_i32, %c0_i32_0 : i32, i32, i32
  }
  func.func @transform_1(%arg0: i32) -> (i32, i32, i32) {
    %c0_i32 = arith.constant 0 : i32
    %c0_i32_0 = arith.constant 0 : i32
    %c0_i32_1 = arith.constant 0 : i32
    %c0_i32_2 = arith.constant 0 : i32
    return %c0_i32, %c0_i32_0, %c0_i32_1 : i32, i32, i32
  }
  func.func @transform_2(%arg0: i32) -> (i32, i32) {
    %c0_i32 = arith.constant 0 : i32
    %c0_i32_0 = arith.constant 0 : i32
    %c0_i32_1 = arith.constant 0 : i32
    return %c0_i32, %c0_i32_0 : i32, i32
  }
  func.func @transform_3(%arg0: i32) -> (i32, i32, i32) {
    %c0_i32 = arith.constant 0 : i32
    %c0_i32_0 = arith.constant 0 : i32
    %c0_i32_1 = arith.constant 0 : i32
    return %arg0, %c0_i32, %c0_i32_0 : i32, i32, i32
  }
  func.func @transform_4(%arg0: i32) -> (i32, i32, i32) {
    %c0_i32 = arith.constant 0 : i32
    %c0_i32_0 = arith.constant 0 : i32
    %c0_i32_1 = arith.constant 0 : i32
    return %arg0, %c0_i32, %c0_i32_0 : i32, i32, i32
  }
  func.func @transform_5(%arg0: i32) -> (i32, i32, i32) {
    %c0_i32 = arith.constant 0 : i32
    %c0_i32_0 = arith.constant 0 : i32
    %c0_i32_1 = arith.constant 0 : i32
    return %arg0, %c0_i32, %c0_i32_0 : i32, i32, i32
  }
}

module attributes {stable_mosaic.version = 11 : i64} {
  func.func @kernel(%arg0: i32, %arg1: memref<1x288x128xbf16, #tpu.memory_space<vmem>>, %arg2: memref<1x1x128xf32, #tpu.memory_space<vmem>>, %arg3: memref<1x1x128xf32, #tpu.memory_space<vmem>>, %arg4: memref<1x288x128xbf16, #tpu.memory_space<vmem>>) attributes {dimension_semantics = [#tpu.dimension_semantics<parallel>], iteration_bounds = array<i64: 2>, scalar_prefetch = 0 : i64, scratch_operands = 0 : i64, tpu.core_type = #tpu.core_type<tc>, window_params = [{transform_indices = @transform_0, window_bounds = array<i64: 1, 288, 128>}, {pipeline_mode = #tpu.pipeline_mode<synchronous>, transform_indices = @transform_1, window_bounds = array<i64: 1, 1, 128>}, {pipeline_mode = #tpu.pipeline_mode<synchronous>, transform_indices = @transform_2, window_bounds = array<i64: 1, 1, 128>}, {transform_indices = @transform_3, window_bounds = array<i64: 1, 288, 128>}]} {
    %c0 = arith.constant 0 : index
    %c0_0 = arith.constant 0 : index
    %c0_1 = arith.constant 0 : index
    %0 = vector.load %arg1[%c0, %c0_0, %c0_1] : memref<1x288x128xbf16, #tpu.memory_space<vmem>>, vector<1x288x128xbf16>
    %1 = arith.extf %0 : vector<1x288x128xbf16> to vector<1x288x128xf32>
    %c0_2 = arith.constant 0 : index
    %c0_3 = arith.constant 0 : index
    %c0_4 = arith.constant 0 : index
    %2 = vector.load %arg2[%c0_2, %c0_3, %c0_4] : memref<1x1x128xf32, #tpu.memory_space<vmem>>, vector<1x1x128xf32>
    %3 = vector.broadcast %2 : vector<1x1x128xf32> to vector<1x288x128xf32>
    %4 = arith.mulf %1, %3 : vector<1x288x128xf32>
    %c0_5 = arith.constant 0 : index
    %c0_6 = arith.constant 0 : index
    %c0_7 = arith.constant 0 : index
    %5 = vector.load %arg3[%c0_5, %c0_6, %c0_7] : memref<1x1x128xf32, #tpu.memory_space<vmem>>, vector<1x1x128xf32>
    %6 = vector.broadcast %5 : vector<1x1x128xf32> to vector<1x288x128xf32>
    %7 = arith.addf %4, %6 : vector<1x288x128xf32>
    %cst = arith.constant 0.000000e+00 : f32
    %8 = vector.broadcast %cst : f32 to vector<1x288x128xf32>
    %9 = arith.cmpf oge, %7, %8 : vector<1x288x128xf32>
    %cst_8 = arith.constant 0.00999999977 : f32
    %10 = vector.broadcast %cst_8 : f32 to vector<1x288x128xf32>
    %11 = arith.mulf %10, %7 : vector<1x288x128xf32>
    %12 = arith.select %9, %7, %11 : vector<1x288x128xi1>, vector<1x288x128xf32>
    %13 = arith.truncf %12 : vector<1x288x128xf32> to vector<1x288x128xbf16>
    %c0_9 = arith.constant 0 : index
    %c0_10 = arith.constant 0 : index
    %c0_11 = arith.constant 0 : index
    %14 = vector.load %arg4[%c0_9, %c0_10, %c0_11] : memref<1x288x128xbf16, #tpu.memory_space<vmem>>, vector<1x288x128xbf16>
    tpu.vector_store %arg4[%c0_9, %c0_10, %c0_11], %13 {strides = array<i32>} : memref<1x288x128xbf16, #tpu.memory_space<vmem>>, vector<1x288x128xbf16>,
    return
  }
  func.func @transform_0(%arg0: i32) -> (i32, i32, i32) {
    %c0_i32 = arith.constant 0 : i32
    %c0_i32_0 = arith.constant 0 : i32
    %c0_i32_1 = arith.constant 0 : i32
    return %arg0, %c0_i32, %c0_i32_0 : i32, i32, i32
  }
  func.func @transform_1(%arg0: i32) -> (i32, i32, i32) {
    %c0_i32 = arith.constant 0 : i32
    %c0_i32_0 = arith.constant 0 : i32
    %c0_i32_1 = arith.constant 0 : i32
    %c0_i32_2 = arith.constant 0 : i32
    return %c0_i32, %c0_i32_0, %c0_i32_1 : i32, i32, i32
  }
  func.func @transform_2(%arg0: i32) -> (i32, i32, i32) {
    %c0_i32 = arith.constant 0 : i32
    %c0_i32_0 = arith.constant 0 : i32
    %c0_i32_1 = arith.constant 0 : i32
    %c0_i32_2 = arith.constant 0 : i32
    return %c0_i32, %c0_i32_0, %c0_i32_1 : i32, i32, i32
  }
  func.func @transform_3(%arg0: i32) -> (i32, i32, i32) {
    %c0_i32 = arith.constant 0 : i32
    %c0_i32_0 = arith.constant 0 : i32
    %c0_i32_1 = arith.constant 0 : i32
    return %arg0, %c0_i32, %c0_i32_0 : i32, i32, i32
  }
}

module attributes {stable_mosaic.version = 11 : i64} {
  func.func @kernel(%arg0: i32, %arg1: memref<1x108x128xbf16, #tpu.memory_space<vmem>>, %arg2: memref<9x128x128xbf16, #tpu.memory_space<vmem>>, %arg3: memref<80x1xf32, #tpu.memory_space<vmem>>, %arg4: memref<1x80x128xbf16, #tpu.memory_space<vmem>>, %arg5: memref<1x1x128xf32, #tpu.memory_space<vmem>>, %arg6: memref<1x1x128xf32, #tpu.memory_space<vmem>>) attributes {dimension_semantics = [#tpu.dimension_semantics<parallel>], iteration_bounds = array<i64: 2>, scalar_prefetch = 0 : i64, scratch_operands = 0 : i64, tpu.core_type = #tpu.core_type<tc>, window_params = [{transform_indices = @transform_0, window_bounds = array<i64: 1, 108, 128>}, {pipeline_mode = #tpu.pipeline_mode<synchronous>, transform_indices = @transform_1, window_bounds = array<i64: 9, 128, 128>}, {pipeline_mode = #tpu.pipeline_mode<synchronous>, transform_indices = @transform_2, window_bounds = array<i64: 80, 1>}, {transform_indices = @transform_3, window_bounds = array<i64: 1, 80, 128>}, {transform_indices = @transform_4, window_bounds = array<i64: 1, 1, 128>}, {transform_indices = @transform_5, window_bounds = array<i64: 1, 1, 128>}]} {
    %cst = arith.constant 0.000000e+00 : f32
    %0 = vector.broadcast %cst : f32 to vector<80x128xf32>
    %c0 = arith.constant 0 : index
    %c0_0 = arith.constant 0 : index
    %c0_1 = arith.constant 0 : index
    %1 = vector.load %arg1[%c0, %c0_0, %c0_1] : memref<1x108x128xbf16, #tpu.memory_space<vmem>>, vector<1x80x128xbf16>
    %2 = vector.shape_cast %1 : vector<1x80x128xbf16> to vector<80x128xbf16>
    %c0_2 = arith.constant 0 : index
    %c0_3 = arith.constant 0 : index
    %c0_4 = arith.constant 0 : index
    %3 = vector.load %arg2[%c0_2, %c0_3, %c0_4] : memref<9x128x128xbf16, #tpu.memory_space<vmem>>, vector<1x128x128xbf16>
    %4 = vector.shape_cast %3 : vector<1x128x128xbf16> to vector<128x128xbf16>
    %cst_5 = arith.constant dense<0.000000e+00> : vector<80x128xf32>
    %5 = tpu.matmul %2, %4, %cst_5 {dimension_numbers = #tpu.dot_dimension_numbers<[1], [0], [0], [1], [0, 0, 1, 1], [], []>} : vector<80x128xbf16>, vector<128x128xbf16>, vector<80x128xf32> -> vector<80x128xf32>
    %6 = arith.addf %0, %5 : vector<80x128xf32>
    %c0_6 = arith.constant 0 : index
    %c1 = arith.constant 1 : index
    %c0_7 = arith.constant 0 : index
    %7 = vector.load %arg1[%c0_6, %c1, %c0_7] : memref<1x108x128xbf16, #tpu.memory_space<vmem>>, vector<1x80x128xbf16>
    %8 = vector.shape_cast %7 : vector<1x80x128xbf16> to vector<80x128xbf16>
    %c1_8 = arith.constant 1 : index
    %c0_9 = arith.constant 0 : index
    %c0_10 = arith.constant 0 : index
    %9 = vector.load %arg2[%c1_8, %c0_9, %c0_10] : memref<9x128x128xbf16, #tpu.memory_space<vmem>>, vector<1x128x128xbf16>
    %10 = vector.shape_cast %9 : vector<1x128x128xbf16> to vector<128x128xbf16>
    %cst_11 = arith.constant dense<0.000000e+00> : vector<80x128xf32>
    %11 = tpu.matmul %8, %10, %cst_11 {dimension_numbers = #tpu.dot_dimension_numbers<[1], [0], [0], [1], [0, 0, 1, 1], [], []>} : vector<80x128xbf16>, vector<128x128xbf16>, vector<80x128xf32> -> vector<80x128xf32>
    %12 = arith.addf %6, %11 : vector<80x128xf32>
    %c0_12 = arith.constant 0 : index
    %c2 = arith.constant 2 : index
    %c0_13 = arith.constant 0 : index
    %13 = vector.load %arg1[%c0_12, %c2, %c0_13] : memref<1x108x128xbf16, #tpu.memory_space<vmem>>, vector<1x80x128xbf16>
    %14 = vector.shape_cast %13 : vector<1x80x128xbf16> to vector<80x128xbf16>
    %c2_14 = arith.constant 2 : index
    %c0_15 = arith.constant 0 : index
    %c0_16 = arith.constant 0 : index
    %15 = vector.load %arg2[%c2_14, %c0_15, %c0_16] : memref<9x128x128xbf16, #tpu.memory_space<vmem>>, vector<1x128x128xbf16>
    %16 = vector.shape_cast %15 : vector<1x128x128xbf16> to vector<128x128xbf16>
    %cst_17 = arith.constant dense<0.000000e+00> : vector<80x128xf32>
    %17 = tpu.matmul %14, %16, %cst_17 {dimension_numbers = #tpu.dot_dimension_numbers<[1], [0], [0], [1], [0, 0, 1, 1], [], []>} : vector<80x128xbf16>, vector<128x128xbf16>, vector<80x128xf32> -> vector<80x128xf32>
    %18 = arith.addf %12, %17 : vector<80x128xf32>
    %c0_18 = arith.constant 0 : index
    %c10 = arith.constant 10 : index
    %c0_19 = arith.constant 0 : index
    %19 = vector.load %arg1[%c0_18, %c10, %c0_19] : memref<1x108x128xbf16, #tpu.memory_space<vmem>>, vector<1x80x128xbf16>
    %20 = vector.shape_cast %19 : vector<1x80x128xbf16> to vector<80x128xbf16>
    %c3 = arith.constant 3 : index
    %c0_20 = arith.constant 0 : index
    %c0_21 = arith.constant 0 : index
    %21 = vector.load %arg2[%c3, %c0_20, %c0_21] : memref<9x128x128xbf16, #tpu.memory_space<vmem>>, vector<1x128x128xbf16>
    %22 = vector.shape_cast %21 : vector<1x128x128xbf16> to vector<128x128xbf16>
    %cst_22 = arith.constant dense<0.000000e+00> : vector<80x128xf32>
    %23 = tpu.matmul %20, %22, %cst_22 {dimension_numbers = #tpu.dot_dimension_numbers<[1], [0], [0], [1], [0, 0, 1, 1], [], []>} : vector<80x128xbf16>, vector<128x128xbf16>, vector<80x128xf32> -> vector<80x128xf32>
    %24 = arith.addf %18, %23 : vector<80x128xf32>
    %c0_23 = arith.constant 0 : index
    %c11 = arith.constant 11 : index
    %c0_24 = arith.constant 0 : index
    %25 = vector.load %arg1[%c0_23, %c11, %c0_24] : memref<1x108x128xbf16, #tpu.memory_space<vmem>>, vector<1x80x128xbf16>
    %26 = vector.shape_cast %25 : vector<1x80x128xbf16> to vector<80x128xbf16>
    %c4 = arith.constant 4 : index
    %c0_25 = arith.constant 0 : index
    %c0_26 = arith.constant 0 : index
    %27 = vector.load %arg2[%c4, %c0_25, %c0_26] : memref<9x128x128xbf16, #tpu.memory_space<vmem>>, vector<1x128x128xbf16>
    %28 = vector.shape_cast %27 : vector<1x128x128xbf16> to vector<128x128xbf16>
    %cst_27 = arith.constant dense<0.000000e+00> : vector<80x128xf32>
    %29 = tpu.matmul %26, %28, %cst_27 {dimension_numbers = #tpu.dot_dimension_numbers<[1], [0], [0], [1], [0, 0, 1, 1], [], []>} : vector<80x128xbf16>, vector<128x128xbf16>, vector<80x128xf32> -> vector<80x128xf32>
    %30 = arith.addf %24, %29 : vector<80x128xf32>
    %c0_28 = arith.constant 0 : index
    %c12 = arith.constant 12 : index
    %c0_29 = arith.constant 0 : index
    %31 = vector.load %arg1[%c0_28, %c12, %c0_29] : memref<1x108x128xbf16, #tpu.memory_space<vmem>>, vector<1x80x128xbf16>
    %32 = vector.shape_cast %31 : vector<1x80x128xbf16> to vector<80x128xbf16>
    %c5 = arith.constant 5 : index
    %c0_30 = arith.constant 0 : index
    %c0_31 = arith.constant 0 : index
    %33 = vector.load %arg2[%c5, %c0_30, %c0_31] : memref<9x128x128xbf16, #tpu.memory_space<vmem>>, vector<1x128x128xbf16>
    %34 = vector.shape_cast %33 : vector<1x128x128xbf16> to vector<128x128xbf16>
    %cst_32 = arith.constant dense<0.000000e+00> : vector<80x128xf32>
    %35 = tpu.matmul %32, %34, %cst_32 {dimension_numbers = #tpu.dot_dimension_numbers<[1], [0], [0], [1], [0, 0, 1, 1], [], []>} : vector<80x128xbf16>, vector<128x128xbf16>, vector<80x128xf32> -> vector<80x128xf32>
    %36 = arith.addf %30, %35 : vector<80x128xf32>
    %c0_33 = arith.constant 0 : index
    %c20 = arith.constant 20 : index
    %c0_34 = arith.constant 0 : index
    %37 = vector.load %arg1[%c0_33, %c20, %c0_34] : memref<1x108x128xbf16, #tpu.memory_space<vmem>>, vector<1x80x128xbf16>
    %38 = vector.shape_cast %37 : vector<1x80x128xbf16> to vector<80x128xbf16>
    %c6 = arith.constant 6 : index
    %c0_35 = arith.constant 0 : index
    %c0_36 = arith.constant 0 : index
    %39 = vector.load %arg2[%c6, %c0_35, %c0_36] : memref<9x128x128xbf16, #tpu.memory_space<vmem>>, vector<1x128x128xbf16>
    %40 = vector.shape_cast %39 : vector<1x128x128xbf16> to vector<128x128xbf16>
    %cst_37 = arith.constant dense<0.000000e+00> : vector<80x128xf32>
    %41 = tpu.matmul %38, %40, %cst_37 {dimension_numbers = #tpu.dot_dimension_numbers<[1], [0], [0], [1], [0, 0, 1, 1], [], []>} : vector<80x128xbf16>, vector<128x128xbf16>, vector<80x128xf32> -> vector<80x128xf32>
    %42 = arith.addf %36, %41 : vector<80x128xf32>
    %c0_38 = arith.constant 0 : index
    %c21 = arith.constant 21 : index
    %c0_39 = arith.constant 0 : index
    %43 = vector.load %arg1[%c0_38, %c21, %c0_39] : memref<1x108x128xbf16, #tpu.memory_space<vmem>>, vector<1x80x128xbf16>
    %44 = vector.shape_cast %43 : vector<1x80x128xbf16> to vector<80x128xbf16>
    %c7 = arith.constant 7 : index
    %c0_40 = arith.constant 0 : index
    %c0_41 = arith.constant 0 : index
    %45 = vector.load %arg2[%c7, %c0_40, %c0_41] : memref<9x128x128xbf16, #tpu.memory_space<vmem>>, vector<1x128x128xbf16>
    %46 = vector.shape_cast %45 : vector<1x128x128xbf16> to vector<128x128xbf16>
    %cst_42 = arith.constant dense<0.000000e+00> : vector<80x128xf32>
    %47 = tpu.matmul %44, %46, %cst_42 {dimension_numbers = #tpu.dot_dimension_numbers<[1], [0], [0], [1], [0, 0, 1, 1], [], []>} : vector<80x128xbf16>, vector<128x128xbf16>, vector<80x128xf32> -> vector<80x128xf32>
    %48 = arith.addf %42, %47 : vector<80x128xf32>
    %c0_43 = arith.constant 0 : index
    %c22 = arith.constant 22 : index
    %c0_44 = arith.constant 0 : index
    %49 = vector.load %arg1[%c0_43, %c22, %c0_44] : memref<1x108x128xbf16, #tpu.memory_space<vmem>>, vector<1x80x128xbf16>
    %50 = vector.shape_cast %49 : vector<1x80x128xbf16> to vector<80x128xbf16>
    %c8 = arith.constant 8 : index
    %c0_45 = arith.constant 0 : index
    %c0_46 = arith.constant 0 : index
    %51 = vector.load %arg2[%c8, %c0_45, %c0_46] : memref<9x128x128xbf16, #tpu.memory_space<vmem>>, vector<1x128x128xbf16>
    %52 = vector.shape_cast %51 : vector<1x128x128xbf16> to vector<128x128xbf16>
    %cst_47 = arith.constant dense<0.000000e+00> : vector<80x128xf32>
    %53 = tpu.matmul %50, %52, %cst_47 {dimension_numbers = #tpu.dot_dimension_numbers<[1], [0], [0], [1], [0, 0, 1, 1], [], []>} : vector<80x128xbf16>, vector<128x128xbf16>, vector<80x128xf32> -> vector<80x128xf32>
    %54 = arith.addf %48, %53 : vector<80x128xf32>
    %55 = arith.truncf %54 : vector<80x128xf32> to vector<80x128xbf16>
    %c0_48 = arith.constant 0 : index
    %c0_49 = arith.constant 0 : index
    %c0_50 = arith.constant 0 : index
    %56 = vector.load %arg4[%c0_48, %c0_49, %c0_50] : memref<1x80x128xbf16, #tpu.memory_space<vmem>>, vector<1x80x128xbf16>
    %57 = vector.shape_cast %56 : vector<1x80x128xbf16> to vector<80x128xbf16>
    %58 = vector.shape_cast %55 : vector<80x128xbf16> to vector<1x80x128xbf16>
    tpu.vector_store %arg4[%c0_48, %c0_49, %c0_50], %58 {strides = array<i32>} : memref<1x80x128xbf16, #tpu.memory_space<vmem>>, vector<1x80x128xbf16>,
    %c0_51 = arith.constant 0 : index
    %c0_52 = arith.constant 0 : index
    %59 = vector.load %arg3[%c0_51, %c0_52] : memref<80x1xf32, #tpu.memory_space<vmem>>, vector<80x1xf32>
    %60 = vector.broadcast %59 : vector<80x1xf32> to vector<80x128xf32>
    %61 = arith.mulf %54, %60 : vector<80x128xf32>
    %cst_53 = arith.constant dense<0.000000e+00> : vector<128xf32>
    %62 = vector.multi_reduction <add>, %61, %cst_53 [0] : vector<80x128xf32> to vector<128xf32>
    %63 = vector.shape_cast %62 : vector<128xf32> to vector<1x128xf32>
    %c0_54 = arith.constant 0 : index
    %c0_55 = arith.constant 0 : index
    %c0_56 = arith.constant 0 : index
    %64 = vector.load %arg5[%c0_54, %c0_55, %c0_56] : memref<1x1x128xf32, #tpu.memory_space<vmem>>, vector<1x1x128xf32>
    %65 = vector.shape_cast %64 : vector<1x1x128xf32> to vector<1x128xf32>
    %66 = vector.shape_cast %63 : vector<1x128xf32> to vector<1x1x128xf32>
    tpu.vector_store %arg5[%c0_54, %c0_55, %c0_56], %66 {strides = array<i32>} : memref<1x1x128xf32, #tpu.memory_space<vmem>>, vector<1x1x128xf32>,
    %67 = arith.mulf %61, %54 : vector<80x128xf32>
    %cst_57 = arith.constant dense<0.000000e+00> : vector<128xf32>
    %68 = vector.multi_reduction <add>, %67, %cst_57 [0] : vector<80x128xf32> to vector<128xf32>
    %69 = vector.shape_cast %68 : vector<128xf32> to vector<1x128xf32>
    %c0_58 = arith.constant 0 : index
    %c0_59 = arith.constant 0 : index
    %c0_60 = arith.constant 0 : index
    %70 = vector.load %arg6[%c0_58, %c0_59, %c0_60] : memref<1x1x128xf32, #tpu.memory_space<vmem>>, vector<1x1x128xf32>
    %71 = vector.shape_cast %70 : vector<1x1x128xf32> to vector<1x128xf32>
    %72 = vector.shape_cast %69 : vector<1x128xf32> to vector<1x1x128xf32>
    tpu.vector_store %arg6[%c0_58, %c0_59, %c0_60], %72 {strides = array<i32>} : memref<1x1x128xf32, #tpu.memory_space<vmem>>, vector<1x1x128xf32>,
    return
  }
  func.func @transform_0(%arg0: i32) -> (i32, i32, i32) {
    %c0_i32 = arith.constant 0 : i32
    %c0_i32_0 = arith.constant 0 : i32
    %c0_i32_1 = arith.constant 0 : i32
    return %arg0, %c0_i32, %c0_i32_0 : i32, i32, i32
  }
  func.func @transform_1(%arg0: i32) -> (i32, i32, i32) {
    %c0_i32 = arith.constant 0 : i32
    %c0_i32_0 = arith.constant 0 : i32
    %c0_i32_1 = arith.constant 0 : i32
    %c0_i32_2 = arith.constant 0 : i32
    return %c0_i32, %c0_i32_0, %c0_i32_1 : i32, i32, i32
  }
  func.func @transform_2(%arg0: i32) -> (i32, i32) {
    %c0_i32 = arith.constant 0 : i32
    %c0_i32_0 = arith.constant 0 : i32
    %c0_i32_1 = arith.constant 0 : i32
    return %c0_i32, %c0_i32_0 : i32, i32
  }
  func.func @transform_3(%arg0: i32) -> (i32, i32, i32) {
    %c0_i32 = arith.constant 0 : i32
    %c0_i32_0 = arith.constant 0 : i32
    %c0_i32_1 = arith.constant 0 : i32
    return %arg0, %c0_i32, %c0_i32_0 : i32, i32, i32
  }
  func.func @transform_4(%arg0: i32) -> (i32, i32, i32) {
    %c0_i32 = arith.constant 0 : i32
    %c0_i32_0 = arith.constant 0 : i32
    %c0_i32_1 = arith.constant 0 : i32
    return %arg0, %c0_i32, %c0_i32_0 : i32, i32, i32
  }
  func.func @transform_5(%arg0: i32) -> (i32, i32, i32) {
    %c0_i32 = arith.constant 0 : i32
    %c0_i32_0 = arith.constant 0 : i32
    %c0_i32_1 = arith.constant 0 : i32
    return %arg0, %c0_i32, %c0_i32_0 : i32, i32, i32
  }
}

module attributes {stable_mosaic.version = 11 : i64} {
  func.func @kernel(%arg0: i32, %arg1: memref<1x80x128xbf16, #tpu.memory_space<vmem>>, %arg2: memref<1x1x128xf32, #tpu.memory_space<vmem>>, %arg3: memref<1x1x128xf32, #tpu.memory_space<vmem>>, %arg4: memref<1x80x128xbf16, #tpu.memory_space<vmem>>) attributes {dimension_semantics = [#tpu.dimension_semantics<parallel>], iteration_bounds = array<i64: 2>, scalar_prefetch = 0 : i64, scratch_operands = 0 : i64, tpu.core_type = #tpu.core_type<tc>, window_params = [{transform_indices = @transform_0, window_bounds = array<i64: 1, 80, 128>}, {pipeline_mode = #tpu.pipeline_mode<synchronous>, transform_indices = @transform_1, window_bounds = array<i64: 1, 1, 128>}, {pipeline_mode = #tpu.pipeline_mode<synchronous>, transform_indices = @transform_2, window_bounds = array<i64: 1, 1, 128>}, {transform_indices = @transform_3, window_bounds = array<i64: 1, 80, 128>}]} {
    %c0 = arith.constant 0 : index
    %c0_0 = arith.constant 0 : index
    %c0_1 = arith.constant 0 : index
    %0 = vector.load %arg1[%c0, %c0_0, %c0_1] : memref<1x80x128xbf16, #tpu.memory_space<vmem>>, vector<1x80x128xbf16>
    %1 = arith.extf %0 : vector<1x80x128xbf16> to vector<1x80x128xf32>
    %c0_2 = arith.constant 0 : index
    %c0_3 = arith.constant 0 : index
    %c0_4 = arith.constant 0 : index
    %2 = vector.load %arg2[%c0_2, %c0_3, %c0_4] : memref<1x1x128xf32, #tpu.memory_space<vmem>>, vector<1x1x128xf32>
    %3 = vector.broadcast %2 : vector<1x1x128xf32> to vector<1x80x128xf32>
    %4 = arith.mulf %1, %3 : vector<1x80x128xf32>
    %c0_5 = arith.constant 0 : index
    %c0_6 = arith.constant 0 : index
    %c0_7 = arith.constant 0 : index
    %5 = vector.load %arg3[%c0_5, %c0_6, %c0_7] : memref<1x1x128xf32, #tpu.memory_space<vmem>>, vector<1x1x128xf32>
    %6 = vector.broadcast %5 : vector<1x1x128xf32> to vector<1x80x128xf32>
    %7 = arith.addf %4, %6 : vector<1x80x128xf32>
    %cst = arith.constant 0.000000e+00 : f32
    %8 = vector.broadcast %cst : f32 to vector<1x80x128xf32>
    %9 = arith.cmpf oge, %7, %8 : vector<1x80x128xf32>
    %cst_8 = arith.constant 0.00999999977 : f32
    %10 = vector.broadcast %cst_8 : f32 to vector<1x80x128xf32>
    %11 = arith.mulf %10, %7 : vector<1x80x128xf32>
    %12 = arith.select %9, %7, %11 : vector<1x80x128xi1>, vector<1x80x128xf32>
    %13 = arith.truncf %12 : vector<1x80x128xf32> to vector<1x80x128xbf16>
    %c0_9 = arith.constant 0 : index
    %c0_10 = arith.constant 0 : index
    %c0_11 = arith.constant 0 : index
    %14 = vector.load %arg4[%c0_9, %c0_10, %c0_11] : memref<1x80x128xbf16, #tpu.memory_space<vmem>>, vector<1x80x128xbf16>
    tpu.vector_store %arg4[%c0_9, %c0_10, %c0_11], %13 {strides = array<i32>} : memref<1x80x128xbf16, #tpu.memory_space<vmem>>, vector<1x80x128xbf16>,
    return
  }
  func.func @transform_0(%arg0: i32) -> (i32, i32, i32) {
    %c0_i32 = arith.constant 0 : i32
    %c0_i32_0 = arith.constant 0 : i32
    %c0_i32_1 = arith.constant 0 : i32
    return %arg0, %c0_i32, %c0_i32_0 : i32, i32, i32
  }
  func.func @transform_1(%arg0: i32) -> (i32, i32, i32) {
    %c0_i32 = arith.constant 0 : i32
    %c0_i32_0 = arith.constant 0 : i32
    %c0_i32_1 = arith.constant 0 : i32
    %c0_i32_2 = arith.constant 0 : i32
    return %c0_i32, %c0_i32_0, %c0_i32_1 : i32, i32, i32
  }
  func.func @transform_2(%arg0: i32) -> (i32, i32, i32) {
    %c0_i32 = arith.constant 0 : i32
    %c0_i32_0 = arith.constant 0 : i32
    %c0_i32_1 = arith.constant 0 : i32
    %c0_i32_2 = arith.constant 0 : i32
    return %c0_i32, %c0_i32_0, %c0_i32_1 : i32, i32, i32
  }
  func.func @transform_3(%arg0: i32) -> (i32, i32, i32) {
    %c0_i32 = arith.constant 0 : i32
    %c0_i32_0 = arith.constant 0 : i32
    %c0_i32_1 = arith.constant 0 : i32
    return %arg0, %c0_i32, %c0_i32_0 : i32, i32, i32
  }
}

module attributes {stable_mosaic.version = 11 : i64} {
  func.func @kernel(%arg0: i32, %arg1: memref<1x24x128xbf16, #tpu.memory_space<vmem>>, %arg2: memref<1x1x128xf32, #tpu.memory_space<vmem>>, %arg3: memref<1x1x128xf32, #tpu.memory_space<vmem>>, %arg4: memref<1x24x128xbf16, #tpu.memory_space<vmem>>) attributes {dimension_semantics = [#tpu.dimension_semantics<parallel>], iteration_bounds = array<i64: 2>, scalar_prefetch = 0 : i64, scratch_operands = 0 : i64, tpu.core_type = #tpu.core_type<tc>, window_params = [{transform_indices = @transform_0, window_bounds = array<i64: 1, 24, 128>}, {pipeline_mode = #tpu.pipeline_mode<synchronous>, transform_indices = @transform_1, window_bounds = array<i64: 1, 1, 128>}, {pipeline_mode = #tpu.pipeline_mode<synchronous>, transform_indices = @transform_2, window_bounds = array<i64: 1, 1, 128>}, {transform_indices = @transform_3, window_bounds = array<i64: 1, 24, 128>}]} {
    %c0 = arith.constant 0 : index
    %c0_0 = arith.constant 0 : index
    %c0_1 = arith.constant 0 : index
    %0 = vector.load %arg1[%c0, %c0_0, %c0_1] : memref<1x24x128xbf16, #tpu.memory_space<vmem>>, vector<1x24x128xbf16>
    %1 = arith.extf %0 : vector<1x24x128xbf16> to vector<1x24x128xf32>
    %c0_2 = arith.constant 0 : index
    %c0_3 = arith.constant 0 : index
    %c0_4 = arith.constant 0 : index
    %2 = vector.load %arg2[%c0_2, %c0_3, %c0_4] : memref<1x1x128xf32, #tpu.memory_space<vmem>>, vector<1x1x128xf32>
    %3 = vector.broadcast %2 : vector<1x1x128xf32> to vector<1x24x128xf32>
    %4 = arith.mulf %1, %3 : vector<1x24x128xf32>
    %c0_5 = arith.constant 0 : index
    %c0_6 = arith.constant 0 : index
    %c0_7 = arith.constant 0 : index
    %5 = vector.load %arg3[%c0_5, %c0_6, %c0_7] : memref<1x1x128xf32, #tpu.memory_space<vmem>>, vector<1x1x128xf32>
    %6 = vector.broadcast %5 : vector<1x1x128xf32> to vector<1x24x128xf32>
    %7 = arith.addf %4, %6 : vector<1x24x128xf32>
    %cst = arith.constant 0.000000e+00 : f32
    %8 = vector.broadcast %cst : f32 to vector<1x24x128xf32>
    %9 = arith.cmpf oge, %7, %8 : vector<1x24x128xf32>
    %cst_8 = arith.constant 0.00999999977 : f32
    %10 = vector.broadcast %cst_8 : f32 to vector<1x24x128xf32>
    %11 = arith.mulf %10, %7 : vector<1x24x128xf32>
    %12 = arith.select %9, %7, %11 : vector<1x24x128xi1>, vector<1x24x128xf32>
    %13 = arith.truncf %12 : vector<1x24x128xf32> to vector<1x24x128xbf16>
    %c0_9 = arith.constant 0 : index
    %c0_10 = arith.constant 0 : index
    %c0_11 = arith.constant 0 : index
    %14 = vector.load %arg4[%c0_9, %c0_10, %c0_11] : memref<1x24x128xbf16, #tpu.memory_space<vmem>>, vector<1x24x128xbf16>
    tpu.vector_store %arg4[%c0_9, %c0_10, %c0_11], %13 {strides = array<i32>} : memref<1x24x128xbf16, #tpu.memory_space<vmem>>, vector<1x24x128xbf16>,
    return
  }
  func.func @transform_0(%arg0: i32) -> (i32, i32, i32) {
    %c0_i32 = arith.constant 0 : i32
    %c0_i32_0 = arith.constant 0 : i32
    %c0_i32_1 = arith.constant 0 : i32
    return %arg0, %c0_i32, %c0_i32_0 : i32, i32, i32
  }
  func.func @transform_1(%arg0: i32) -> (i32, i32, i32) {
    %c0_i32 = arith.constant 0 : i32
    %c0_i32_0 = arith.constant 0 : i32
    %c0_i32_1 = arith.constant 0 : i32
    %c0_i32_2 = arith.constant 0 : i32
    return %c0_i32, %c0_i32_0, %c0_i32_1 : i32, i32, i32
  }
  func.func @transform_2(%arg0: i32) -> (i32, i32, i32) {
    %c0_i32 = arith.constant 0 : i32
    %c0_i32_0 = arith.constant 0 : i32
    %c0_i32_1 = arith.constant 0 : i32
    %c0_i32_2 = arith.constant 0 : i32
    return %c0_i32, %c0_i32_0, %c0_i32_1 : i32, i32, i32
  }
  func.func @transform_3(%arg0: i32) -> (i32, i32, i32) {
    %c0_i32 = arith.constant 0 : i32
    %c0_i32_0 = arith.constant 0 : i32
    %c0_i32_1 = arith.constant 0 : i32
    return %arg0, %c0_i32, %c0_i32_0 : i32, i32, i32
  }
}

module attributes {stable_mosaic.version = 11 : i64} {
  func.func @kernel(%arg0: i32, %arg1: memref<1x44x128xbf16, #tpu.memory_space<vmem>>, %arg2: memref<9x128x128xbf16, #tpu.memory_space<vmem>>, %arg3: memref<24x1xf32, #tpu.memory_space<vmem>>, %arg4: memref<1x24x128xbf16, #tpu.memory_space<vmem>>, %arg5: memref<1x1x128xf32, #tpu.memory_space<vmem>>, %arg6: memref<1x1x128xf32, #tpu.memory_space<vmem>>) attributes {dimension_semantics = [#tpu.dimension_semantics<parallel>], iteration_bounds = array<i64: 2>, scalar_prefetch = 0 : i64, scratch_operands = 0 : i64, tpu.core_type = #tpu.core_type<tc>, window_params = [{transform_indices = @transform_0, window_bounds = array<i64: 1, 44, 128>}, {pipeline_mode = #tpu.pipeline_mode<synchronous>, transform_indices = @transform_1, window_bounds = array<i64: 9, 128, 128>}, {pipeline_mode = #tpu.pipeline_mode<synchronous>, transform_indices = @transform_2, window_bounds = array<i64: 24, 1>}, {transform_indices = @transform_3, window_bounds = array<i64: 1, 24, 128>}, {transform_indices = @transform_4, window_bounds = array<i64: 1, 1, 128>}, {transform_indices = @transform_5, window_bounds = array<i64: 1, 1, 128>}]} {
    %cst = arith.constant 0.000000e+00 : f32
    %0 = vector.broadcast %cst : f32 to vector<24x128xf32>
    %c0 = arith.constant 0 : index
    %c0_0 = arith.constant 0 : index
    %c0_1 = arith.constant 0 : index
    %1 = vector.load %arg1[%c0, %c0_0, %c0_1] : memref<1x44x128xbf16, #tpu.memory_space<vmem>>, vector<1x24x128xbf16>
    %2 = vector.shape_cast %1 : vector<1x24x128xbf16> to vector<24x128xbf16>
    %c0_2 = arith.constant 0 : index
    %c0_3 = arith.constant 0 : index
    %c0_4 = arith.constant 0 : index
    %3 = vector.load %arg2[%c0_2, %c0_3, %c0_4] : memref<9x128x128xbf16, #tpu.memory_space<vmem>>, vector<1x128x128xbf16>
    %4 = vector.shape_cast %3 : vector<1x128x128xbf16> to vector<128x128xbf16>
    %cst_5 = arith.constant dense<0.000000e+00> : vector<24x128xf32>
    %5 = tpu.matmul %2, %4, %cst_5 {dimension_numbers = #tpu.dot_dimension_numbers<[1], [0], [0], [1], [0, 0, 1, 1], [], []>} : vector<24x128xbf16>, vector<128x128xbf16>, vector<24x128xf32> -> vector<24x128xf32>
    %6 = arith.addf %0, %5 : vector<24x128xf32>
    %c0_6 = arith.constant 0 : index
    %c1 = arith.constant 1 : index
    %c0_7 = arith.constant 0 : index
    %7 = vector.load %arg1[%c0_6, %c1, %c0_7] : memref<1x44x128xbf16, #tpu.memory_space<vmem>>, vector<1x24x128xbf16>
    %8 = vector.shape_cast %7 : vector<1x24x128xbf16> to vector<24x128xbf16>
    %c1_8 = arith.constant 1 : index
    %c0_9 = arith.constant 0 : index
    %c0_10 = arith.constant 0 : index
    %9 = vector.load %arg2[%c1_8, %c0_9, %c0_10] : memref<9x128x128xbf16, #tpu.memory_space<vmem>>, vector<1x128x128xbf16>
    %10 = vector.shape_cast %9 : vector<1x128x128xbf16> to vector<128x128xbf16>
    %cst_11 = arith.constant dense<0.000000e+00> : vector<24x128xf32>
    %11 = tpu.matmul %8, %10, %cst_11 {dimension_numbers = #tpu.dot_dimension_numbers<[1], [0], [0], [1], [0, 0, 1, 1], [], []>} : vector<24x128xbf16>, vector<128x128xbf16>, vector<24x128xf32> -> vector<24x128xf32>
    %12 = arith.addf %6, %11 : vector<24x128xf32>
    %c0_12 = arith.constant 0 : index
    %c2 = arith.constant 2 : index
    %c0_13 = arith.constant 0 : index
    %13 = vector.load %arg1[%c0_12, %c2, %c0_13] : memref<1x44x128xbf16, #tpu.memory_space<vmem>>, vector<1x24x128xbf16>
    %14 = vector.shape_cast %13 : vector<1x24x128xbf16> to vector<24x128xbf16>
    %c2_14 = arith.constant 2 : index
    %c0_15 = arith.constant 0 : index
    %c0_16 = arith.constant 0 : index
    %15 = vector.load %arg2[%c2_14, %c0_15, %c0_16] : memref<9x128x128xbf16, #tpu.memory_space<vmem>>, vector<1x128x128xbf16>
    %16 = vector.shape_cast %15 : vector<1x128x128xbf16> to vector<128x128xbf16>
    %cst_17 = arith.constant dense<0.000000e+00> : vector<24x128xf32>
    %17 = tpu.matmul %14, %16, %cst_17 {dimension_numbers = #tpu.dot_dimension_numbers<[1], [0], [0], [1], [0, 0, 1, 1], [], []>} : vector<24x128xbf16>, vector<128x128xbf16>, vector<24x128xf32> -> vector<24x128xf32>
    %18 = arith.addf %12, %17 : vector<24x128xf32>
    %c0_18 = arith.constant 0 : index
    %c6 = arith.constant 6 : index
    %c0_19 = arith.constant 0 : index
    %19 = vector.load %arg1[%c0_18, %c6, %c0_19] : memref<1x44x128xbf16, #tpu.memory_space<vmem>>, vector<1x24x128xbf16>
    %20 = vector.shape_cast %19 : vector<1x24x128xbf16> to vector<24x128xbf16>
    %c3 = arith.constant 3 : index
    %c0_20 = arith.constant 0 : index
    %c0_21 = arith.constant 0 : index
    %21 = vector.load %arg2[%c3, %c0_20, %c0_21] : memref<9x128x128xbf16, #tpu.memory_space<vmem>>, vector<1x128x128xbf16>
    %22 = vector.shape_cast %21 : vector<1x128x128xbf16> to vector<128x128xbf16>
    %cst_22 = arith.constant dense<0.000000e+00> : vector<24x128xf32>
    %23 = tpu.matmul %20, %22, %cst_22 {dimension_numbers = #tpu.dot_dimension_numbers<[1], [0], [0], [1], [0, 0, 1, 1], [], []>} : vector<24x128xbf16>, vector<128x128xbf16>, vector<24x128xf32> -> vector<24x128xf32>
    %24 = arith.addf %18, %23 : vector<24x128xf32>
    %c0_23 = arith.constant 0 : index
    %c7 = arith.constant 7 : index
    %c0_24 = arith.constant 0 : index
    %25 = vector.load %arg1[%c0_23, %c7, %c0_24] : memref<1x44x128xbf16, #tpu.memory_space<vmem>>, vector<1x24x128xbf16>
    %26 = vector.shape_cast %25 : vector<1x24x128xbf16> to vector<24x128xbf16>
    %c4 = arith.constant 4 : index
    %c0_25 = arith.constant 0 : index
    %c0_26 = arith.constant 0 : index
    %27 = vector.load %arg2[%c4, %c0_25, %c0_26] : memref<9x128x128xbf16, #tpu.memory_space<vmem>>, vector<1x128x128xbf16>
    %28 = vector.shape_cast %27 : vector<1x128x128xbf16> to vector<128x128xbf16>
    %cst_27 = arith.constant dense<0.000000e+00> : vector<24x128xf32>
    %29 = tpu.matmul %26, %28, %cst_27 {dimension_numbers = #tpu.dot_dimension_numbers<[1], [0], [0], [1], [0, 0, 1, 1], [], []>} : vector<24x128xbf16>, vector<128x128xbf16>, vector<24x128xf32> -> vector<24x128xf32>
    %30 = arith.addf %24, %29 : vector<24x128xf32>
    %c0_28 = arith.constant 0 : index
    %c8 = arith.constant 8 : index
    %c0_29 = arith.constant 0 : index
    %31 = vector.load %arg1[%c0_28, %c8, %c0_29] : memref<1x44x128xbf16, #tpu.memory_space<vmem>>, vector<1x24x128xbf16>
    %32 = vector.shape_cast %31 : vector<1x24x128xbf16> to vector<24x128xbf16>
    %c5 = arith.constant 5 : index
    %c0_30 = arith.constant 0 : index
    %c0_31 = arith.constant 0 : index
    %33 = vector.load %arg2[%c5, %c0_30, %c0_31] : memref<9x128x128xbf16, #tpu.memory_space<vmem>>, vector<1x128x128xbf16>
    %34 = vector.shape_cast %33 : vector<1x128x128xbf16> to vector<128x128xbf16>
    %cst_32 = arith.constant dense<0.000000e+00> : vector<24x128xf32>
    %35 = tpu.matmul %32, %34, %cst_32 {dimension_numbers = #tpu.dot_dimension_numbers<[1], [0], [0], [1], [0, 0, 1, 1], [], []>} : vector<24x128xbf16>, vector<128x128xbf16>, vector<24x128xf32> -> vector<24x128xf32>
    %36 = arith.addf %30, %35 : vector<24x128xf32>
    %c0_33 = arith.constant 0 : index
    %c12 = arith.constant 12 : index
    %c0_34 = arith.constant 0 : index
    %37 = vector.load %arg1[%c0_33, %c12, %c0_34] : memref<1x44x128xbf16, #tpu.memory_space<vmem>>, vector<1x24x128xbf16>
    %38 = vector.shape_cast %37 : vector<1x24x128xbf16> to vector<24x128xbf16>
    %c6_35 = arith.constant 6 : index
    %c0_36 = arith.constant 0 : index
    %c0_37 = arith.constant 0 : index
    %39 = vector.load %arg2[%c6_35, %c0_36, %c0_37] : memref<9x128x128xbf16, #tpu.memory_space<vmem>>, vector<1x128x128xbf16>
    %40 = vector.shape_cast %39 : vector<1x128x128xbf16> to vector<128x128xbf16>
    %cst_38 = arith.constant dense<0.000000e+00> : vector<24x128xf32>
    %41 = tpu.matmul %38, %40, %cst_38 {dimension_numbers = #tpu.dot_dimension_numbers<[1], [0], [0], [1], [0, 0, 1, 1], [], []>} : vector<24x128xbf16>, vector<128x128xbf16>, vector<24x128xf32> -> vector<24x128xf32>
    %42 = arith.addf %36, %41 : vector<24x128xf32>
    %c0_39 = arith.constant 0 : index
    %c13 = arith.constant 13 : index
    %c0_40 = arith.constant 0 : index
    %43 = vector.load %arg1[%c0_39, %c13, %c0_40] : memref<1x44x128xbf16, #tpu.memory_space<vmem>>, vector<1x24x128xbf16>
    %44 = vector.shape_cast %43 : vector<1x24x128xbf16> to vector<24x128xbf16>
    %c7_41 = arith.constant 7 : index
    %c0_42 = arith.constant 0 : index
    %c0_43 = arith.constant 0 : index
    %45 = vector.load %arg2[%c7_41, %c0_42, %c0_43] : memref<9x128x128xbf16, #tpu.memory_space<vmem>>, vector<1x128x128xbf16>
    %46 = vector.shape_cast %45 : vector<1x128x128xbf16> to vector<128x128xbf16>
    %cst_44 = arith.constant dense<0.000000e+00> : vector<24x128xf32>
    %47 = tpu.matmul %44, %46, %cst_44 {dimension_numbers = #tpu.dot_dimension_numbers<[1], [0], [0], [1], [0, 0, 1, 1], [], []>} : vector<24x128xbf16>, vector<128x128xbf16>, vector<24x128xf32> -> vector<24x128xf32>
    %48 = arith.addf %42, %47 : vector<24x128xf32>
    %c0_45 = arith.constant 0 : index
    %c14 = arith.constant 14 : index
    %c0_46 = arith.constant 0 : index
    %49 = vector.load %arg1[%c0_45, %c14, %c0_46] : memref<1x44x128xbf16, #tpu.memory_space<vmem>>, vector<1x24x128xbf16>
    %50 = vector.shape_cast %49 : vector<1x24x128xbf16> to vector<24x128xbf16>
    %c8_47 = arith.constant 8 : index
    %c0_48 = arith.constant 0 : index
    %c0_49 = arith.constant 0 : index
    %51 = vector.load %arg2[%c8_47, %c0_48, %c0_49] : memref<9x128x128xbf16, #tpu.memory_space<vmem>>, vector<1x128x128xbf16>
    %52 = vector.shape_cast %51 : vector<1x128x128xbf16> to vector<128x128xbf16>
    %cst_50 = arith.constant dense<0.000000e+00> : vector<24x128xf32>
    %53 = tpu.matmul %50, %52, %cst_50 {dimension_numbers = #tpu.dot_dimension_numbers<[1], [0], [0], [1], [0, 0, 1, 1], [], []>} : vector<24x128xbf16>, vector<128x128xbf16>, vector<24x128xf32> -> vector<24x128xf32>
    %54 = arith.addf %48, %53 : vector<24x128xf32>
    %55 = arith.truncf %54 : vector<24x128xf32> to vector<24x128xbf16>
    %c0_51 = arith.constant 0 : index
    %c0_52 = arith.constant 0 : index
    %c0_53 = arith.constant 0 : index
    %56 = vector.load %arg4[%c0_51, %c0_52, %c0_53] : memref<1x24x128xbf16, #tpu.memory_space<vmem>>, vector<1x24x128xbf16>
    %57 = vector.shape_cast %56 : vector<1x24x128xbf16> to vector<24x128xbf16>
    %58 = vector.shape_cast %55 : vector<24x128xbf16> to vector<1x24x128xbf16>
    tpu.vector_store %arg4[%c0_51, %c0_52, %c0_53], %58 {strides = array<i32>} : memref<1x24x128xbf16, #tpu.memory_space<vmem>>, vector<1x24x128xbf16>,
    %c0_54 = arith.constant 0 : index
    %c0_55 = arith.constant 0 : index
    %59 = vector.load %arg3[%c0_54, %c0_55] : memref<24x1xf32, #tpu.memory_space<vmem>>, vector<24x1xf32>
    %60 = vector.broadcast %59 : vector<24x1xf32> to vector<24x128xf32>
    %61 = arith.mulf %54, %60 : vector<24x128xf32>
    %cst_56 = arith.constant dense<0.000000e+00> : vector<128xf32>
    %62 = vector.multi_reduction <add>, %61, %cst_56 [0] : vector<24x128xf32> to vector<128xf32>
    %63 = vector.shape_cast %62 : vector<128xf32> to vector<1x128xf32>
    %c0_57 = arith.constant 0 : index
    %c0_58 = arith.constant 0 : index
    %c0_59 = arith.constant 0 : index
    %64 = vector.load %arg5[%c0_57, %c0_58, %c0_59] : memref<1x1x128xf32, #tpu.memory_space<vmem>>, vector<1x1x128xf32>
    %65 = vector.shape_cast %64 : vector<1x1x128xf32> to vector<1x128xf32>
    %66 = vector.shape_cast %63 : vector<1x128xf32> to vector<1x1x128xf32>
    tpu.vector_store %arg5[%c0_57, %c0_58, %c0_59], %66 {strides = array<i32>} : memref<1x1x128xf32, #tpu.memory_space<vmem>>, vector<1x1x128xf32>,
    %67 = arith.mulf %61, %54 : vector<24x128xf32>
    %cst_60 = arith.constant dense<0.000000e+00> : vector<128xf32>
    %68 = vector.multi_reduction <add>, %67, %cst_60 [0] : vector<24x128xf32> to vector<128xf32>
    %69 = vector.shape_cast %68 : vector<128xf32> to vector<1x128xf32>
    %c0_61 = arith.constant 0 : index
    %c0_62 = arith.constant 0 : index
    %c0_63 = arith.constant 0 : index
    %70 = vector.load %arg6[%c0_61, %c0_62, %c0_63] : memref<1x1x128xf32, #tpu.memory_space<vmem>>, vector<1x1x128xf32>
    %71 = vector.shape_cast %70 : vector<1x1x128xf32> to vector<1x128xf32>
    %72 = vector.shape_cast %69 : vector<1x128xf32> to vector<1x1x128xf32>
    tpu.vector_store %arg6[%c0_61, %c0_62, %c0_63], %72 {strides = array<i32>} : memref<1x1x128xf32, #tpu.memory_space<vmem>>, vector<1x1x128xf32>,
    return
  }
  func.func @transform_0(%arg0: i32) -> (i32, i32, i32) {
    %c0_i32 = arith.constant 0 : i32
    %c0_i32_0 = arith.constant 0 : i32
    %c0_i32_1 = arith.constant 0 : i32
    return %arg0, %c0_i32, %c0_i32_0 : i32, i32, i32
  }
  func.func @transform_1(%arg0: i32) -> (i32, i32, i32) {
    %c0_i32 = arith.constant 0 : i32
    %c0_i32_0 = arith.constant 0 : i32
    %c0_i32_1 = arith.constant 0 : i32
    %c0_i32_2 = arith.constant 0 : i32
    return %c0_i32, %c0_i32_0, %c0_i32_1 : i32, i32, i32
  }
  func.func @transform_2(%arg0: i32) -> (i32, i32) {
    %c0_i32 = arith.constant 0 : i32
    %c0_i32_0 = arith.constant 0 : i32
    %c0_i32_1 = arith.constant 0 : i32
    return %c0_i32, %c0_i32_0 : i32, i32
  }
  func.func @transform_3(%arg0: i32) -> (i32, i32, i32) {
    %c0_i32 = arith.constant 0 : i32
    %c0_i32_0 = arith.constant 0 : i32
    %c0_i32_1 = arith.constant 0 : i32
    return %arg0, %c0_i32, %c0_i32_0 : i32, i32, i32
  }
  func.func @transform_4(%arg0: i32) -> (i32, i32, i32) {
    %c0_i32 = arith.constant 0 : i32
    %c0_i32_0 = arith.constant 0 : i32
    %c0_i32_1 = arith.constant 0 : i32
    return %arg0, %c0_i32, %c0_i32_0 : i32, i32, i32
  }
  func.func @transform_5(%arg0: i32) -> (i32, i32, i32) {
    %c0_i32 = arith.constant 0 : i32
    %c0_i32_0 = arith.constant 0 : i32
    %c0_i32_1 = arith.constant 0 : i32
    return %arg0, %c0_i32, %c0_i32_0 : i32, i32, i32
  }
}

module attributes {stable_mosaic.version = 11 : i64} {
  func.func @_matmul_stats_kernel(%arg0: i32, %arg1: memref<256x128xbf16, #tpu.memory_space<vmem>>, %arg2: memref<128x128xbf16, #tpu.memory_space<vmem>>, %arg3: memref<256x128xbf16, #tpu.memory_space<vmem>>, %arg4: memref<1x1x128xf32, #tpu.memory_space<vmem>>, %arg5: memref<1x1x128xf32, #tpu.memory_space<vmem>>) attributes {dimension_semantics = [#tpu.dimension_semantics<parallel>], iteration_bounds = array<i64: 2>, scalar_prefetch = 0 : i64, scratch_operands = 0 : i64, tpu.core_type = #tpu.core_type<tc>, window_params = [{transform_indices = @transform_0, window_bounds = array<i64: 256, 128>}, {pipeline_mode = #tpu.pipeline_mode<synchronous>, transform_indices = @transform_1, window_bounds = array<i64: 128, 128>}, {transform_indices = @transform_2, window_bounds = array<i64: 256, 128>}, {transform_indices = @transform_3, window_bounds = array<i64: 1, 1, 128>}, {transform_indices = @transform_4, window_bounds = array<i64: 1, 1, 128>}]} {
    %c0 = arith.constant 0 : index
    %c0_0 = arith.constant 0 : index
    %0 = vector.load %arg1[%c0, %c0_0] : memref<256x128xbf16, #tpu.memory_space<vmem>>, vector<256x128xbf16>
    %c0_1 = arith.constant 0 : index
    %c0_2 = arith.constant 0 : index
    %1 = vector.load %arg2[%c0_1, %c0_2] : memref<128x128xbf16, #tpu.memory_space<vmem>>, vector<128x128xbf16>
    %cst = arith.constant dense<0.000000e+00> : vector<256x128xf32>
    %2 = tpu.matmul %0, %1, %cst {dimension_numbers = #tpu.dot_dimension_numbers<[1], [0], [0], [1], [0, 0, 1, 1], [], []>} : vector<256x128xbf16>, vector<128x128xbf16>, vector<256x128xf32> -> vector<256x128xf32>
    %3 = arith.truncf %2 : vector<256x128xf32> to vector<256x128xbf16>
    %c0_3 = arith.constant 0 : index
    %c0_4 = arith.constant 0 : index
    %4 = vector.load %arg3[%c0_3, %c0_4] : memref<256x128xbf16, #tpu.memory_space<vmem>>, vector<256x128xbf16>
    tpu.vector_store %arg3[%c0_3, %c0_4], %3 {strides = array<i32>} : memref<256x128xbf16, #tpu.memory_space<vmem>>, vector<256x128xbf16>,
    %cst_5 = arith.constant dense<0.000000e+00> : vector<128xf32>
    %5 = vector.multi_reduction <add>, %2, %cst_5 [0] : vector<256x128xf32> to vector<128xf32>
    %6 = vector.shape_cast %5 : vector<128xf32> to vector<1x128xf32>
    %7 = vector.shape_cast %6 : vector<1x128xf32> to vector<1x1x128xf32>
    %c0_6 = arith.constant 0 : index
    %c0_7 = arith.constant 0 : index
    %c0_8 = arith.constant 0 : index
    %8 = vector.load %arg4[%c0_6, %c0_7, %c0_8] : memref<1x1x128xf32, #tpu.memory_space<vmem>>, vector<1x1x128xf32>
    tpu.vector_store %arg4[%c0_6, %c0_7, %c0_8], %7 {strides = array<i32>} : memref<1x1x128xf32, #tpu.memory_space<vmem>>, vector<1x1x128xf32>,
    %9 = arith.mulf %2, %2 : vector<256x128xf32>
    %cst_9 = arith.constant dense<0.000000e+00> : vector<128xf32>
    %10 = vector.multi_reduction <add>, %9, %cst_9 [0] : vector<256x128xf32> to vector<128xf32>
    %11 = vector.shape_cast %10 : vector<128xf32> to vector<1x128xf32>
    %12 = vector.shape_cast %11 : vector<1x128xf32> to vector<1x1x128xf32>
    %c0_10 = arith.constant 0 : index
    %c0_11 = arith.constant 0 : index
    %c0_12 = arith.constant 0 : index
    %13 = vector.load %arg5[%c0_10, %c0_11, %c0_12] : memref<1x1x128xf32, #tpu.memory_space<vmem>>, vector<1x1x128xf32>
    tpu.vector_store %arg5[%c0_10, %c0_11, %c0_12], %12 {strides = array<i32>} : memref<1x1x128xf32, #tpu.memory_space<vmem>>, vector<1x1x128xf32>,
    return
  }
  func.func @transform_0(%arg0: i32) -> (i32, i32) {
    %c0_i32 = arith.constant 0 : i32
    %c0_i32_0 = arith.constant 0 : i32
    return %arg0, %c0_i32 : i32, i32
  }
  func.func @transform_1(%arg0: i32) -> (i32, i32) {
    %c0_i32 = arith.constant 0 : i32
    %c0_i32_0 = arith.constant 0 : i32
    %c0_i32_1 = arith.constant 0 : i32
    return %c0_i32, %c0_i32_0 : i32, i32
  }
  func.func @transform_2(%arg0: i32) -> (i32, i32) {
    %c0_i32 = arith.constant 0 : i32
    %c0_i32_0 = arith.constant 0 : i32
    return %arg0, %c0_i32 : i32, i32
  }
  func.func @transform_3(%arg0: i32) -> (i32, i32, i32) {
    %c0_i32 = arith.constant 0 : i32
    %c0_i32_0 = arith.constant 0 : i32
    %c0_i32_1 = arith.constant 0 : i32
    return %arg0, %c0_i32, %c0_i32_0 : i32, i32, i32
  }
  func.func @transform_4(%arg0: i32) -> (i32, i32, i32) {
    %c0_i32 = arith.constant 0 : i32
    %c0_i32_0 = arith.constant 0 : i32
    %c0_i32_1 = arith.constant 0 : i32
    return %arg0, %c0_i32, %c0_i32_0 : i32, i32, i32
  }
}

module attributes {stable_mosaic.version = 11 : i64} {
  func.func @kernel(%arg0: i32, %arg1: memref<256x128xbf16, #tpu.memory_space<vmem>>, %arg2: memref<1x128xf32, #tpu.memory_space<vmem>>, %arg3: memref<1x128xf32, #tpu.memory_space<vmem>>, %arg4: memref<128x128xbf16, #tpu.memory_space<vmem>>, %arg5: memref<256x128xbf16, #tpu.memory_space<vmem>>, %arg6: memref<1x1x128xf32, #tpu.memory_space<vmem>>, %arg7: memref<1x1x128xf32, #tpu.memory_space<vmem>>) attributes {dimension_semantics = [#tpu.dimension_semantics<parallel>], iteration_bounds = array<i64: 2>, scalar_prefetch = 0 : i64, scratch_operands = 0 : i64, tpu.core_type = #tpu.core_type<tc>, window_params = [{transform_indices = @transform_0, window_bounds = array<i64: 256, 128>}, {pipeline_mode = #tpu.pipeline_mode<synchronous>, transform_indices = @transform_1, window_bounds = array<i64: 1, 128>}, {pipeline_mode = #tpu.pipeline_mode<synchronous>, transform_indices = @transform_2, window_bounds = array<i64: 1, 128>}, {pipeline_mode = #tpu.pipeline_mode<synchronous>, transform_indices = @transform_3, window_bounds = array<i64: 128, 128>}, {transform_indices = @transform_4, window_bounds = array<i64: 256, 128>}, {transform_indices = @transform_5, window_bounds = array<i64: 1, 1, 128>}, {transform_indices = @transform_6, window_bounds = array<i64: 1, 1, 128>}]} {
    %c0 = arith.constant 0 : index
    %c0_0 = arith.constant 0 : index
    %0 = vector.load %arg1[%c0, %c0_0] : memref<256x128xbf16, #tpu.memory_space<vmem>>, vector<256x128xbf16>
    %1 = arith.extf %0 : vector<256x128xbf16> to vector<256x128xf32>
    %c0_1 = arith.constant 0 : index
    %c0_2 = arith.constant 0 : index
    %2 = vector.load %arg2[%c0_1, %c0_2] : memref<1x128xf32, #tpu.memory_space<vmem>>, vector<1x128xf32>
    %3 = vector.broadcast %2 : vector<1x128xf32> to vector<256x128xf32>
    %4 = arith.mulf %1, %3 : vector<256x128xf32>
    %c0_3 = arith.constant 0 : index
    %c0_4 = arith.constant 0 : index
    %5 = vector.load %arg3[%c0_3, %c0_4] : memref<1x128xf32, #tpu.memory_space<vmem>>, vector<1x128xf32>
    %6 = vector.broadcast %5 : vector<1x128xf32> to vector<256x128xf32>
    %7 = arith.addf %4, %6 : vector<256x128xf32>
    %cst = arith.constant 0.000000e+00 : f32
    %8 = vector.broadcast %cst : f32 to vector<256x128xf32>
    %9 = arith.cmpf oge, %7, %8 : vector<256x128xf32>
    %cst_5 = arith.constant 0.00999999977 : f32
    %10 = vector.broadcast %cst_5 : f32 to vector<256x128xf32>
    %11 = arith.mulf %10, %7 : vector<256x128xf32>
    %12 = arith.select %9, %7, %11 : vector<256x128xi1>, vector<256x128xf32>
    %13 = arith.truncf %12 : vector<256x128xf32> to vector<256x128xbf16>
    %c0_6 = arith.constant 0 : index
    %c0_7 = arith.constant 0 : index
    %14 = vector.load %arg4[%c0_6, %c0_7] : memref<128x128xbf16, #tpu.memory_space<vmem>>, vector<128x128xbf16>
    %cst_8 = arith.constant dense<0.000000e+00> : vector<256x128xf32>
    %15 = tpu.matmul %13, %14, %cst_8 {dimension_numbers = #tpu.dot_dimension_numbers<[1], [0], [0], [1], [0, 0, 1, 1], [], []>} : vector<256x128xbf16>, vector<128x128xbf16>, vector<256x128xf32> -> vector<256x128xf32>
    %16 = arith.truncf %15 : vector<256x128xf32> to vector<256x128xbf16>
    %c0_9 = arith.constant 0 : index
    %c0_10 = arith.constant 0 : index
    %17 = vector.load %arg5[%c0_9, %c0_10] : memref<256x128xbf16, #tpu.memory_space<vmem>>, vector<256x128xbf16>
    tpu.vector_store %arg5[%c0_9, %c0_10], %16 {strides = array<i32>} : memref<256x128xbf16, #tpu.memory_space<vmem>>, vector<256x128xbf16>,
    %cst_11 = arith.constant dense<0.000000e+00> : vector<128xf32>
    %18 = vector.multi_reduction <add>, %15, %cst_11 [0] : vector<256x128xf32> to vector<128xf32>
    %19 = vector.shape_cast %18 : vector<128xf32> to vector<1x128xf32>
    %20 = vector.shape_cast %19 : vector<1x128xf32> to vector<1x1x128xf32>
    %c0_12 = arith.constant 0 : index
    %c0_13 = arith.constant 0 : index
    %c0_14 = arith.constant 0 : index
    %21 = vector.load %arg6[%c0_12, %c0_13, %c0_14] : memref<1x1x128xf32, #tpu.memory_space<vmem>>, vector<1x1x128xf32>
    tpu.vector_store %arg6[%c0_12, %c0_13, %c0_14], %20 {strides = array<i32>} : memref<1x1x128xf32, #tpu.memory_space<vmem>>, vector<1x1x128xf32>,
    %22 = arith.mulf %15, %15 : vector<256x128xf32>
    %cst_15 = arith.constant dense<0.000000e+00> : vector<128xf32>
    %23 = vector.multi_reduction <add>, %22, %cst_15 [0] : vector<256x128xf32> to vector<128xf32>
    %24 = vector.shape_cast %23 : vector<128xf32> to vector<1x128xf32>
    %25 = vector.shape_cast %24 : vector<1x128xf32> to vector<1x1x128xf32>
    %c0_16 = arith.constant 0 : index
    %c0_17 = arith.constant 0 : index
    %c0_18 = arith.constant 0 : index
    %26 = vector.load %arg7[%c0_16, %c0_17, %c0_18] : memref<1x1x128xf32, #tpu.memory_space<vmem>>, vector<1x1x128xf32>
    tpu.vector_store %arg7[%c0_16, %c0_17, %c0_18], %25 {strides = array<i32>} : memref<1x1x128xf32, #tpu.memory_space<vmem>>, vector<1x1x128xf32>,
    return
  }
  func.func @transform_0(%arg0: i32) -> (i32, i32) {
    %c0_i32 = arith.constant 0 : i32
    %c0_i32_0 = arith.constant 0 : i32
    return %arg0, %c0_i32 : i32, i32
  }
  func.func @transform_1(%arg0: i32) -> (i32, i32) {
    %c0_i32 = arith.constant 0 : i32
    %c0_i32_0 = arith.constant 0 : i32
    %c0_i32_1 = arith.constant 0 : i32
    return %c0_i32, %c0_i32_0 : i32, i32
  }
  func.func @transform_2(%arg0: i32) -> (i32, i32) {
    %c0_i32 = arith.constant 0 : i32
    %c0_i32_0 = arith.constant 0 : i32
    %c0_i32_1 = arith.constant 0 : i32
    return %c0_i32, %c0_i32_0 : i32, i32
  }
  func.func @transform_3(%arg0: i32) -> (i32, i32) {
    %c0_i32 = arith.constant 0 : i32
    %c0_i32_0 = arith.constant 0 : i32
    %c0_i32_1 = arith.constant 0 : i32
    return %c0_i32, %c0_i32_0 : i32, i32
  }
  func.func @transform_4(%arg0: i32) -> (i32, i32) {
    %c0_i32 = arith.constant 0 : i32
    %c0_i32_0 = arith.constant 0 : i32
    return %arg0, %c0_i32 : i32, i32
  }
  func.func @transform_5(%arg0: i32) -> (i32, i32, i32) {
    %c0_i32 = arith.constant 0 : i32
    %c0_i32_0 = arith.constant 0 : i32
    %c0_i32_1 = arith.constant 0 : i32
    return %arg0, %c0_i32, %c0_i32_0 : i32, i32, i32
  }
  func.func @transform_6(%arg0: i32) -> (i32, i32, i32) {
    %c0_i32 = arith.constant 0 : i32
    %c0_i32_0 = arith.constant 0 : i32
    %c0_i32_1 = arith.constant 0 : i32
    return %arg0, %c0_i32, %c0_i32_0 : i32, i32, i32
  }
}

module attributes {stable_mosaic.version = 11 : i64} {
  func.func @_norm_lrelu_matmul_bias_res_kernel(%arg0: i32, %arg1: memref<256x128xbf16, #tpu.memory_space<vmem>>, %arg2: memref<1x128xf32, #tpu.memory_space<vmem>>, %arg3: memref<1x128xf32, #tpu.memory_space<vmem>>, %arg4: memref<128x128xbf16, #tpu.memory_space<vmem>>, %arg5: memref<1x128xf32, #tpu.memory_space<vmem>>, %arg6: memref<256x128xf32, #tpu.memory_space<vmem>>, %arg7: memref<256x128xf32, #tpu.memory_space<vmem>>) attributes {dimension_semantics = [#tpu.dimension_semantics<parallel>], iteration_bounds = array<i64: 2>, scalar_prefetch = 0 : i64, scratch_operands = 0 : i64, tpu.core_type = #tpu.core_type<tc>, window_params = [{transform_indices = @transform_0, window_bounds = array<i64: 256, 128>}, {pipeline_mode = #tpu.pipeline_mode<synchronous>, transform_indices = @transform_1, window_bounds = array<i64: 1, 128>}, {pipeline_mode = #tpu.pipeline_mode<synchronous>, transform_indices = @transform_2, window_bounds = array<i64: 1, 128>}, {pipeline_mode = #tpu.pipeline_mode<synchronous>, transform_indices = @transform_3, window_bounds = array<i64: 128, 128>}, {pipeline_mode = #tpu.pipeline_mode<synchronous>, transform_indices = @transform_4, window_bounds = array<i64: 1, 128>}, {transform_indices = @transform_5, window_bounds = array<i64: 256, 128>}, {transform_indices = @transform_6, window_bounds = array<i64: 256, 128>}]} {
    %c0 = arith.constant 0 : index
    %c0_0 = arith.constant 0 : index
    %0 = vector.load %arg1[%c0, %c0_0] : memref<256x128xbf16, #tpu.memory_space<vmem>>, vector<256x128xbf16>
    %1 = arith.extf %0 : vector<256x128xbf16> to vector<256x128xf32>
    %c0_1 = arith.constant 0 : index
    %c0_2 = arith.constant 0 : index
    %2 = vector.load %arg2[%c0_1, %c0_2] : memref<1x128xf32, #tpu.memory_space<vmem>>, vector<1x128xf32>
    %3 = vector.broadcast %2 : vector<1x128xf32> to vector<256x128xf32>
    %4 = arith.mulf %1, %3 : vector<256x128xf32>
    %c0_3 = arith.constant 0 : index
    %c0_4 = arith.constant 0 : index
    %5 = vector.load %arg3[%c0_3, %c0_4] : memref<1x128xf32, #tpu.memory_space<vmem>>, vector<1x128xf32>
    %6 = vector.broadcast %5 : vector<1x128xf32> to vector<256x128xf32>
    %7 = arith.addf %4, %6 : vector<256x128xf32>
    %cst = arith.constant 0.000000e+00 : f32
    %8 = vector.broadcast %cst : f32 to vector<256x128xf32>
    %9 = arith.cmpf oge, %7, %8 : vector<256x128xf32>
    %cst_5 = arith.constant 0.00999999977 : f32
    %10 = vector.broadcast %cst_5 : f32 to vector<256x128xf32>
    %11 = arith.mulf %10, %7 : vector<256x128xf32>
    %12 = arith.select %9, %7, %11 : vector<256x128xi1>, vector<256x128xf32>
    %c0_6 = arith.constant 0 : index
    %c0_7 = arith.constant 0 : index
    %13 = vector.load %arg6[%c0_6, %c0_7] : memref<256x128xf32, #tpu.memory_space<vmem>>, vector<256x128xf32>
    %c0_8 = arith.constant 0 : index
    %c0_9 = arith.constant 0 : index
    %14 = vector.load %arg5[%c0_8, %c0_9] : memref<1x128xf32, #tpu.memory_space<vmem>>, vector<1x128xf32>
    %15 = vector.broadcast %14 : vector<1x128xf32> to vector<256x128xf32>
    %16 = arith.addf %13, %15 : vector<256x128xf32>
    %17 = arith.truncf %12 : vector<256x128xf32> to vector<256x128xbf16>
    %c0_10 = arith.constant 0 : index
    %c0_11 = arith.constant 0 : index
    %18 = vector.load %arg4[%c0_10, %c0_11] : memref<128x128xbf16, #tpu.memory_space<vmem>>, vector<128x128xbf16>
    %cst_12 = arith.constant dense<0.000000e+00> : vector<256x128xf32>
    %19 = tpu.matmul %17, %18, %cst_12 {dimension_numbers = #tpu.dot_dimension_numbers<[1], [0], [0], [1], [0, 0, 1, 1], [], []>} : vector<256x128xbf16>, vector<128x128xbf16>, vector<256x128xf32> -> vector<256x128xf32>
    %20 = arith.addf %16, %19 : vector<256x128xf32>
    %c0_13 = arith.constant 0 : index
    %c0_14 = arith.constant 0 : index
    %21 = vector.load %arg7[%c0_13, %c0_14] : memref<256x128xf32, #tpu.memory_space<vmem>>, vector<256x128xf32>
    tpu.vector_store %arg7[%c0_13, %c0_14], %20 {strides = array<i32>} : memref<256x128xf32, #tpu.memory_space<vmem>>, vector<256x128xf32>,
    return
  }
  func.func @transform_0(%arg0: i32) -> (i32, i32) {
    %c0_i32 = arith.constant 0 : i32
    %c0_i32_0 = arith.constant 0 : i32
    return %arg0, %c0_i32 : i32, i32
  }
  func.func @transform_1(%arg0: i32) -> (i32, i32) {
    %c0_i32 = arith.constant 0 : i32
    %c0_i32_0 = arith.constant 0 : i32
    %c0_i32_1 = arith.constant 0 : i32
    return %c0_i32, %c0_i32_0 : i32, i32
  }
  func.func @transform_2(%arg0: i32) -> (i32, i32) {
    %c0_i32 = arith.constant 0 : i32
    %c0_i32_0 = arith.constant 0 : i32
    %c0_i32_1 = arith.constant 0 : i32
    return %c0_i32, %c0_i32_0 : i32, i32
  }
  func.func @transform_3(%arg0: i32) -> (i32, i32) {
    %c0_i32 = arith.constant 0 : i32
    %c0_i32_0 = arith.constant 0 : i32
    %c0_i32_1 = arith.constant 0 : i32
    return %c0_i32, %c0_i32_0 : i32, i32
  }
  func.func @transform_4(%arg0: i32) -> (i32, i32) {
    %c0_i32 = arith.constant 0 : i32
    %c0_i32_0 = arith.constant 0 : i32
    %c0_i32_1 = arith.constant 0 : i32
    return %c0_i32, %c0_i32_0 : i32, i32
  }
  func.func @transform_5(%arg0: i32) -> (i32, i32) {
    %c0_i32 = arith.constant 0 : i32
    %c0_i32_0 = arith.constant 0 : i32
    return %arg0, %c0_i32 : i32, i32
  }
  func.func @transform_6(%arg0: i32) -> (i32, i32) {
    %c0_i32 = arith.constant 0 : i32
    %c0_i32_0 = arith.constant 0 : i32
    return %arg0, %c0_i32 : i32, i32
  }
}

</mosaic_0001>

<bundles_post_ra>
// kernel: gan_generator_forward.24
= control target key start
LH: loop header
LB: loop body
LE: loop exit
PB: predicated region body
PF: predicated region fallthrough
CT: control target
= control target key end

     0   :  { %s802_s12 = smov 0   ;;  %s949_s0 = inlined_call_operand.vmem [shape: bf16[2,288,128], index: 0, kind: input, shape index: {}]   ;;  %s950_s1 = inlined_call_operand.vmem [shape: f32[1,1,128], index: 1, kind: input, shape index: {}]   ;;  %s951_s2 = inlined_call_operand.vmem [shape: f32[1,1,128], index: 2, kind: input, shape index: {}]   ;;  %s952_s3 = inlined_call_operand.vmem [shape: bf16[2,288,128], index: 3, kind: output, shape index: {}]  }
   0x1 LB: > { %s558_s13 = sadd.s32 4294967295, %s780_s12   ;;  %p562_p0 = scmp.ge.s32.totalorder %s780_s12, 1  ;;  %s780_s12 = sphi %s802_s12, %s13_s12  }
   0x2   : > { %p137_p1 = scmp.lt.s32.totalorder %s780_s12, 3 }
   0x4   : > { %p138_p2 = pnand %p562_p0, %p137_p1 }
   0x5   : > { %p161_p3 = scmp.lt.s32.totalorder (!%p138_p2), %s558_s13, 1 }
   0x6   : > { %141 = sbr.rel (%p138_p2) target bundleno = 80 (0x50), region = 32 }
   0xb   : > { %s954_s13 = smov (!%p161_p3, %s558_s13), 1  ;;  %v823_v0 = vld [vmem:[%s950_s1] ss:$0 sm:$0xff] }
   0xc   : > { %s763_s14 = smul.u32 144, %s954_s13  ;;  %v831_v6 = vld [vmem:[%s951_s2] ss:$0 sm:$0xff] }
   0xe   : > { %s818_s17 = scalar_lea.vmem %s949_s0, %s763_s14  ;;  %s855_s24 = scalar_lea.vmem %s952_s3, %s763_s14 }
   0xf   : > { %v568_v1 = vld [vmem:[%s818_s17] sm:$0xff]   ;;  %v729_v2 = vld [vmem:[%s818_s17 + $0x8] sm:$0xff]   ;;  %v730_v3 = vld [vmem:[%s818_s17 + $0x10] sm:$0xff]  }
  0x10   : > { %v569_v4 = vunpack.c.l.bf16 %v568_v1  ;;  %v570_v5 = vunpack.c.h.bf16 %v568_v1  ;;  %v573_v7 = vunpack.c.l.bf16 %v729_v2  ;;  %v574_v8 = vunpack.c.h.bf16 %v729_v2  ;;  %v731_v9 = vld [vmem:[%s818_s17 + $0x18] sm:$0xff]   ;;  %v732_v36 = vld [vmem:[%s818_s17 + $0x20] sm:$0xff]   ;;  %v733_v41 = vld [vmem:[%s818_s17 + $0x28] sm:$0xff]  }
  0x11   : > { %v577_v10 = vunpack.c.l.bf16 %v730_v3  ;;  %v578_v11 = vunpack.c.h.bf16 %v730_v3  ;;  %v581_v12 = vunpack.c.l.bf16 %v731_v9  ;;  %v582_v13 = vunpack.c.h.bf16 %v731_v9  ;;  %v734_v52 = vld [vmem:[%s818_s17 + $0x30] sm:$0xff]   ;;  %v735_v53 = vld [vmem:[%s818_s17 + $0x38] sm:$0xff]  }
  0x12   : > { %v247_v14 = vmul.f32 %v823_v0, %v569_v4  ;;  %v248_v15 = vmul.f32 %v823_v0, %v570_v5  ;;  %v249_v16 = vmul.f32 %v823_v0, %v573_v7  ;;  %v250_v17 = vmul.f32 %v823_v0, %v574_v8 }
  0x13   : > { %v251_v18 = vmul.f32 %v823_v0, %v577_v10  ;;  %v252_v19 = vmul.f32 %v823_v0, %v578_v11  ;;  %v253_v20 = vmul.f32 %v823_v0, %v581_v12  ;;  %v254_v21 = vmul.f32 %v823_v0, %v582_v13 }
  0x14   : > { %v287_v22 = vadd.f32 %v831_v6, %v247_v14  ;;  %v288_v23 = vadd.f32 %v831_v6, %v248_v15  ;;  %v289_v24 = vadd.f32 %v831_v6, %v249_v16  ;;  %v290_v25 = vadd.f32 %v831_v6, %v250_v17 }
  0x15   : > { %v291_v26 = vadd.f32 %v831_v6, %v251_v18  ;;  %v292_v27 = vadd.f32 %v831_v6, %v252_v19  ;;  %v293_v28 = vadd.f32 %v831_v6, %v253_v20  ;;  %v294_v29 = vadd.f32 %v831_v6, %v254_v21  ;;  %v736_v20 = vld [vmem:[%s818_s17 + $0x40] sm:$0xff]  }
  0x16   : > { %vm323_vm0 = vcmp.ge.f32.partialorder %v287_v22, 0.0  ;;  %vm324_vm1 = vcmp.ge.f32.partialorder %v288_v23, 0.0  ;;  %v359_v30 = vmul.f32 0.01, %v287_v22  ;;  %v360_v31 = vmul.f32 0.01, %v288_v23 }
  0x17   : > { %vm325_vm2 = vcmp.ge.f32.partialorder %v289_v24, 0.0  ;;  %vm326_vm3 = vcmp.ge.f32.partialorder %v290_v25, 0.0  ;;  %v361_v32 = vmul.f32 0.01, %v289_v24  ;;  %v362_v33 = vmul.f32 0.01, %v290_v25 }
  0x18   : > { %v395_v34 = vsel %vm323_vm0, %v287_v22, %v359_v30  ;;  %v396_v35 = vsel %vm324_vm1, %v288_v23, %v360_v31  ;;  %vm327_vm4 = vcmp.ge.f32.partialorder %v291_v26, 0.0  ;;  %vm328_vm5 = vcmp.ge.f32.partialorder %v292_v27, 0.0 }
  0x19   : > { %v642_v37 = vpack.c.bf16 %v396_v35, %v395_v34  ;;  %v397_v38 = vsel %vm325_vm2, %v289_v24, %v361_v32  ;;  %v398_v39 = vsel %vm326_vm3, %v290_v25, %v362_v33  ;;  %v363_v40 = vmul.f32 0.01, %v291_v26  ;;  %v737_v24 = vld [vmem:[%s818_s17 + $0x48] sm:$0xff]  }
  0x1a   : > { %v647_v42 = vpack.c.bf16 %v398_v39, %v397_v38  ;;  %v364_v43 = vmul.f32 0.01, %v292_v27  ;;  %vm329_vm6 = vcmp.ge.f32.partialorder %v293_v28, 0.0  ;;  %vm330_vm7 = vcmp.ge.f32.partialorder %v294_v29, 0.0 }
  0x1b   : > { %643 = vst [vmem:[%s855_s24] sm:$0xff] %v642_v37   ;;  %v399_v44 = vsel %vm327_vm4, %v291_v26, %v363_v40  ;;  %v365_v45 = vmul.f32 0.01, %v293_v28  ;;  %v366_v46 = vmul.f32 0.01, %v294_v29  ;;  %v585_v47 = vunpack.c.l.bf16 %v732_v36 }
  0x1c   : > { %746 = vst [vmem:[%s855_s24 + $0x8] sm:$0xff] %v647_v42   ;;  %v400_v48 = vsel %vm328_vm5, %v292_v27, %v364_v43  ;;  %v586_v49 = vunpack.c.h.bf16 %v732_v36  ;;  %v589_v50 = vunpack.c.l.bf16 %v733_v41  ;;  %v590_v51 = vunpack.c.h.bf16 %v733_v41  ;;  %v738_v36 = vld [vmem:[%s818_s17 + $0x50] sm:$0xff]  }
  0x1d   : > { %v652_v54 = vpack.c.bf16 %v400_v48, %v399_v44  ;;  %v401_v55 = vsel %vm329_vm6, %v293_v28, %v365_v45  ;;  %v402_v56 = vsel %vm330_vm7, %v294_v29, %v366_v46  ;;  %v255_v57 = vmul.f32 %v823_v0, %v585_v47 }
  0x1e   : > { %v657_v58 = vpack.c.bf16 %v402_v56, %v401_v55  ;;  %v256_v59 = vmul.f32 %v823_v0, %v586_v49  ;;  %v257_v60 = vmul.f32 %v823_v0, %v589_v50  ;;  %v258_v61 = vmul.f32 %v823_v0, %v590_v51 }
  0x1f   : > { %747 = vst [vmem:[%s855_s24 + $0x10] sm:$0xff] %v652_v54   ;;  %v295_v62 = vadd.f32 %v831_v6, %v255_v57  ;;  %v593_v63 = vunpack.c.l.bf16 %v734_v52  ;;  %v594_v1 = vunpack.c.h.bf16 %v734_v52  ;;  %v597_v2 = vunpack.c.l.bf16 %v735_v53 }
  0x20   : > { %748 = vst [vmem:[%s855_s24 + $0x18] sm:$0xff] %v657_v58   ;;  %v296_v3 = vadd.f32 %v831_v6, %v256_v59  ;;  %v297_v4 = vadd.f32 %v831_v6, %v257_v60  ;;  %v298_v5 = vadd.f32 %v831_v6, %v258_v61  ;;  %v598_v7 = vunpack.c.h.bf16 %v735_v53  ;;  %v739_v59 = vld [vmem:[%s818_s17 + $0x58] sm:$0xff]  }
  0x21   : > { %vm331_vm8 = vcmp.ge.f32.partialorder %v295_v62, 0.0  ;;  %v367_v8 = vmul.f32 0.01, %v295_v62  ;;  %v259_v9 = vmul.f32 %v823_v0, %v593_v63  ;;  %v260_v10 = vmul.f32 %v823_v0, %v594_v1  ;;  %v740_v1 = vld [vmem:[%s818_s17 + $0x60] sm:$0xff]  }
  0x22   : > { %vm332_vm9 = vcmp.ge.f32.partialorder %v296_v3, 0.0  ;;  %v368_v11 = vmul.f32 0.01, %v296_v3  ;;  %vm333_vm10 = vcmp.ge.f32.partialorder %v297_v4, 0.0  ;;  %vm334_vm11 = vcmp.ge.f32.partialorder %v298_v5, 0.0 }
  0x23   : > { %v403_v12 = vsel %vm331_vm8, %v295_v62, %v367_v8  ;;  %v369_v13 = vmul.f32 0.01, %v297_v4  ;;  %v370_v14 = vmul.f32 0.01, %v298_v5  ;;  %v299_v15 = vadd.f32 %v831_v6, %v259_v9 }
  0x24   : > { %v404_v16 = vsel %vm332_vm9, %v296_v3, %v368_v11  ;;  %v300_v17 = vadd.f32 %v831_v6, %v260_v10  ;;  %v261_v18 = vmul.f32 %v823_v0, %v597_v2  ;;  %v262_v19 = vmul.f32 %v823_v0, %v598_v7 }
  0x25   : > { %v662_v21 = vpack.c.bf16 %v404_v16, %v403_v12  ;;  %v405_v22 = vsel %vm333_vm10, %v297_v4, %v369_v13  ;;  %v406_v23 = vsel %vm334_vm11, %v298_v5, %v370_v14  ;;  %vm335_vm12 = vcmp.ge.f32.partialorder %v299_v15, 0.0  ;;  %v741_v5 = vld [vmem:[%s818_s17 + $0x68] sm:$0xff]   ;;  %v742_v14 = vld [vmem:[%s818_s17 + $0x70] sm:$0xff]  }
  0x26   : > { %v667_v25 = vpack.c.bf16 %v406_v23, %v405_v22  ;;  %vm336_vm13 = vcmp.ge.f32.partialorder %v300_v17, 0.0  ;;  %v371_v26 = vmul.f32 0.01, %v299_v15  ;;  %v372_v27 = vmul.f32 0.01, %v300_v17 }
  0x27   : > { %749 = vst [vmem:[%s855_s24 + $0x20] sm:$0xff] %v662_v21   ;;  %v301_v28 = vadd.f32 %v831_v6, %v261_v18  ;;  %v302_v29 = vadd.f32 %v831_v6, %v262_v19  ;;  %v601_v30 = vunpack.c.l.bf16 %v736_v20  ;;  %v602_v31 = vunpack.c.h.bf16 %v736_v20 }
  0x28   : > { %750 = vst [vmem:[%s855_s24 + $0x28] sm:$0xff] %v667_v25   ;;  %v407_v32 = vsel %vm335_vm12, %v299_v15, %v371_v26  ;;  %v408_v33 = vsel %vm336_vm13, %v300_v17, %v372_v27  ;;  %v605_v34 = vunpack.c.l.bf16 %v737_v24  ;;  %v606_v35 = vunpack.c.h.bf16 %v737_v24 }
  0x29   : > { %v672_v37 = vpack.c.bf16 %v408_v33, %v407_v32  ;;  %vm337_vm14 = vcmp.ge.f32.partialorder %v301_v28, 0.0  ;;  %vm338_vm15 = vcmp.ge.f32.partialorder %v302_v29, 0.0  ;;  %v373_v38 = vmul.f32 0.01, %v301_v28 }
  0x2a   : > { %v374_v39 = vmul.f32 0.01, %v302_v29  ;;  %v263_v40 = vmul.f32 %v823_v0, %v601_v30  ;;  %v264_v41 = vmul.f32 %v823_v0, %v602_v31  ;;  %v265_v42 = vmul.f32 %v823_v0, %v605_v34 }
  0x2b   : > { %751 = vst [vmem:[%s855_s24 + $0x30] sm:$0xff] %v672_v37   ;;  %v409_v43 = vsel %vm337_vm14, %v301_v28, %v373_v38  ;;  %v266_v44 = vmul.f32 %v823_v0, %v606_v35  ;;  %v609_v45 = vunpack.c.l.bf16 %v738_v36  ;;  %v610_v46 = vunpack.c.h.bf16 %v738_v36 }
  0x2c   : > { %v410_v47 = vsel %vm338_vm15, %v302_v29, %v374_v39  ;;  %v303_v48 = vadd.f32 %v831_v6, %v263_v40  ;;  %v304_v49 = vadd.f32 %v831_v6, %v264_v41  ;;  %v305_v50 = vadd.f32 %v831_v6, %v265_v42  ;;  %v743_v42 = vld [vmem:[%s818_s17 + $0x78] sm:$0xff]  }
  0x2d   : > { %v677_v51 = vpack.c.bf16 %v410_v47, %v409_v43  ;;  %v306_v52 = vadd.f32 %v831_v6, %v266_v44  ;;  %v267_v53 = vmul.f32 %v823_v0, %v609_v45  ;;  %v268_v54 = vmul.f32 %v823_v0, %v610_v46  ;;  %v744_v43 = vld [vmem:[%s818_s17 + $0x80] sm:$0xff]  }
  0x2e   : > { %vm339_vm0 = vcmp.ge.f32.partialorder %v303_v48, 0.0  ;;  %vm340_vm1 = vcmp.ge.f32.partialorder %v304_v49, 0.0  ;;  %v375_v55 = vmul.f32 0.01, %v303_v48  ;;  %v376_v56 = vmul.f32 0.01, %v304_v49 }
  0x2f   : > { %752 = vst [vmem:[%s855_s24 + $0x38] sm:$0xff] %v677_v51   ;;  %vm341_vm2 = vcmp.ge.f32.partialorder %v305_v50, 0.0  ;;  %vm342_vm3 = vcmp.ge.f32.partialorder %v306_v52, 0.0  ;;  %v377_v57 = vmul.f32 0.01, %v305_v50  ;;  %v307_v58 = vadd.f32 %v831_v6, %v267_v53  ;;  %v745_v51 = vld [vmem:[%s818_s17 + $0x88] sm:$0xff]  }
  0x30   : > { %v411_v60 = vsel %vm339_vm0, %v303_v48, %v375_v55  ;;  %v412_v61 = vsel %vm340_vm1, %v304_v49, %v376_v56  ;;  %v378_v62 = vmul.f32 0.01, %v306_v52  ;;  %v308_v63 = vadd.f32 %v831_v6, %v268_v54 }
  0x31   : > { %v682_v2 = vpack.c.bf16 %v412_v61, %v411_v60  ;;  %v413_v3 = vsel %vm341_vm2, %v305_v50, %v377_v57  ;;  %vm343_vm4 = vcmp.ge.f32.partialorder %v307_v58, 0.0  ;;  %v379_v4 = vmul.f32 0.01, %v307_v58 }
  0x32   : > { %v414_v7 = vsel %vm342_vm3, %v306_v52, %v378_v62  ;;  %vm344_vm5 = vcmp.ge.f32.partialorder %v308_v63, 0.0  ;;  %v380_v8 = vmul.f32 0.01, %v308_v63  ;;  %v613_v9 = vunpack.c.l.bf16 %v739_v59 }
  0x33   : > { %753 = vst [vmem:[%s855_s24 + $0x40] sm:$0xff] %v682_v2   ;;  %v687_v10 = vpack.c.bf16 %v414_v7, %v413_v3  ;;  %v415_v11 = vsel %vm343_vm4, %v307_v58, %v379_v4  ;;  %v614_v12 = vunpack.c.h.bf16 %v739_v59  ;;  %v617_v13 = vunpack.c.l.bf16 %v740_v1 }
  0x34   : > { %v416_v15 = vsel %vm344_vm5, %v308_v63, %v380_v8  ;;  %v269_v16 = vmul.f32 %v823_v0, %v613_v9  ;;  %v618_v17 = vunpack.c.h.bf16 %v740_v1  ;;  %v621_v18 = vunpack.c.l.bf16 %v741_v5 }
  0x35   : > { %754 = vst [vmem:[%s855_s24 + $0x48] sm:$0xff] %v687_v10   ;;  %v692_v19 = vpack.c.bf16 %v416_v15, %v415_v11  ;;  %v270_v20 = vmul.f32 %v823_v0, %v614_v12  ;;  %v271_v21 = vmul.f32 %v823_v0, %v617_v13  ;;  %v622_v22 = vunpack.c.h.bf16 %v741_v5 }
  0x36   : > { %v309_v23 = vadd.f32 %v831_v6, %v269_v16  ;;  %v272_v24 = vmul.f32 %v823_v0, %v618_v17  ;;  %v273_v25 = vmul.f32 %v823_v0, %v621_v18  ;;  %v625_v26 = vunpack.c.l.bf16 %v742_v14 }
  0x37   : > { %755 = vst [vmem:[%s855_s24 + $0x50] sm:$0xff] %v692_v19   ;;  %v310_v27 = vadd.f32 %v831_v6, %v270_v20  ;;  %v311_v28 = vadd.f32 %v831_v6, %v271_v21  ;;  %v274_v29 = vmul.f32 %v823_v0, %v622_v22  ;;  %v626_v30 = vunpack.c.h.bf16 %v742_v14 }
  0x38   : > { %vm345_vm6 = vcmp.ge.f32.partialorder %v309_v23, 0.0  ;;  %v381_v31 = vmul.f32 0.01, %v309_v23  ;;  %v312_v32 = vadd.f32 %v831_v6, %v272_v24  ;;  %v313_v33 = vadd.f32 %v831_v6, %v273_v25 }
  0x39   : > { %vm346_vm7 = vcmp.ge.f32.partialorder %v310_v27, 0.0  ;;  %v382_v34 = vmul.f32 0.01, %v310_v27  ;;  %vm347_vm8 = vcmp.ge.f32.partialorder %v311_v28, 0.0  ;;  %v383_v35 = vmul.f32 0.01, %v311_v28 }
  0x3a   : > { %v417_v36 = vsel %vm345_vm6, %v309_v23, %v381_v31  ;;  %vm348_vm9 = vcmp.ge.f32.partialorder %v312_v32, 0.0  ;;  %v384_v37 = vmul.f32 0.01, %v312_v32  ;;  %v314_v38 = vadd.f32 %v831_v6, %v274_v29 }
  0x3b   : > { %v418_v39 = vsel %vm346_vm7, %v310_v27, %v382_v34  ;;  %v419_v40 = vsel %vm347_vm8, %v311_v28, %v383_v35  ;;  %vm349_vm10 = vcmp.ge.f32.partialorder %v313_v33, 0.0  ;;  %v385_v41 = vmul.f32 0.01, %v313_v33 }
  0x3c   : > { %v697_v44 = vpack.c.bf16 %v418_v39, %v417_v36  ;;  %v420_v45 = vsel %vm348_vm9, %v312_v32, %v384_v37  ;;  %vm350_vm11 = vcmp.ge.f32.partialorder %v314_v38, 0.0  ;;  %v386_v46 = vmul.f32 0.01, %v314_v38 }
  0x3d   : > { %v702_v47 = vpack.c.bf16 %v420_v45, %v419_v40  ;;  %v421_v48 = vsel %vm349_vm10, %v313_v33, %v385_v41  ;;  %v275_v49 = vmul.f32 %v823_v0, %v625_v26  ;;  %v276_v50 = vmul.f32 %v823_v0, %v626_v30 }
  0x3e   : > { %756 = vst [vmem:[%s855_s24 + $0x58] sm:$0xff] %v697_v44   ;;  %v422_v52 = vsel %vm350_vm11, %v314_v38, %v386_v46  ;;  %v629_v53 = vunpack.c.l.bf16 %v743_v42  ;;  %v630_v54 = vunpack.c.h.bf16 %v743_v42  ;;  %v633_v55 = vunpack.c.l.bf16 %v744_v43 }
  0x3f   : > { %757 = vst [vmem:[%s855_s24 + $0x60] sm:$0xff] %v702_v47   ;;  %v707_v56 = vpack.c.bf16 %v422_v52, %v421_v48  ;;  %v315_v57 = vadd.f32 %v831_v6, %v275_v49  ;;  %v316_v58 = vadd.f32 %v831_v6, %v276_v50  ;;  %v634_v59 = vunpack.c.h.bf16 %v744_v43 }
  0x40   : > { %v277_v60 = vmul.f32 %v823_v0, %v629_v53  ;;  %v278_v61 = vmul.f32 %v823_v0, %v630_v54  ;;  %v279_v62 = vmul.f32 %v823_v0, %v633_v55  ;;  %v637_v63 = vunpack.c.l.bf16 %v745_v51 }
  0x41   : > { %758 = vst [vmem:[%s855_s24 + $0x68] sm:$0xff] %v707_v56   ;;  %vm351_vm12 = vcmp.ge.f32.partialorder %v315_v57, 0.0  ;;  %vm352_vm13 = vcmp.ge.f32.partialorder %v316_v58, 0.0  ;;  %v387_v1 = vmul.f32 0.01, %v315_v57  ;;  %v280_v2 = vmul.f32 %v823_v0, %v634_v59 }
  0x42   : > { %v388_v3 = vmul.f32 0.01, %v316_v58  ;;  %v317_v4 = vadd.f32 %v831_v6, %v277_v60  ;;  %v318_v5 = vadd.f32 %v831_v6, %v278_v61  ;;  %v319_v7 = vadd.f32 %v831_v6, %v279_v62 }
  0x43   : > { %v423_v8 = vsel %vm351_vm12, %v315_v57, %v387_v1  ;;  %v320_v9 = vadd.f32 %v831_v6, %v280_v2  ;;  %v638_v10 = vunpack.c.h.bf16 %v745_v51  ;;  %v281_v11 = vmul.f32 %v823_v0, %v637_v63 }
  0x44   : > { %v424_v12 = vsel %vm352_vm13, %v316_v58, %v388_v3  ;;  %vm353_vm14 = vcmp.ge.f32.partialorder %v317_v4, 0.0  ;;  %vm354_vm15 = vcmp.ge.f32.partialorder %v318_v5, 0.0  ;;  %v389_v13 = vmul.f32 0.01, %v317_v4 }
  0x45   : > { %v712_v14 = vpack.c.bf16 %v424_v12, %v423_v8  ;;  %v390_v15 = vmul.f32 0.01, %v318_v5  ;;  %vm355_vm0 = vcmp.ge.f32.partialorder %v319_v7, 0.0  ;;  %vm356_vm1 = vcmp.ge.f32.partialorder %v320_v9, 0.0 }
  0x46   : > { %v425_v16 = vsel %vm353_vm14, %v317_v4, %v389_v13  ;;  %v391_v17 = vmul.f32 0.01, %v319_v7  ;;  %v392_v18 = vmul.f32 0.01, %v320_v9  ;;  %v282_v19 = vmul.f32 %v823_v0, %v638_v10 }
  0x47   : > { %759 = vst [vmem:[%s855_s24 + $0x70] sm:$0xff] %v712_v14   ;;  %v426_v20 = vsel %vm354_vm15, %v318_v5, %v390_v15  ;;  %v321_v21 = vadd.f32 %v831_v6, %v281_v11 }
  0x48   : > { %v717_v22 = vpack.c.bf16 %v426_v20, %v425_v16  ;;  %v427_v23 = vsel %vm355_vm0, %v319_v7, %v391_v17  ;;  %v428_v24 = vsel %vm356_vm1, %v320_v9, %v392_v18  ;;  %v322_v25 = vadd.f32 %v831_v6, %v282_v19 }
  0x49   : > { %v722_v26 = vpack.c.bf16 %v428_v24, %v427_v23  ;;  %vm357_vm2 = vcmp.ge.f32.partialorder %v321_v21, 0.0  ;;  %v393_v27 = vmul.f32 0.01, %v321_v21 }
  0x4a   : > { %760 = vst [vmem:[%s855_s24 + $0x78] sm:$0xff] %v717_v22   ;;  %vm358_vm3 = vcmp.ge.f32.partialorder %v322_v25, 0.0  ;;  %v394_v28 = vmul.f32 0.01, %v322_v25 }
  0x4b   : > { %761 = vst [vmem:[%s855_s24 + $0x80] sm:$0xff] %v722_v26   ;;  %v429_v29 = vsel %vm357_vm2, %v321_v21, %v393_v27 }
  0x4c   : > { %v430_v30 = vsel %vm358_vm3, %v322_v25, %v394_v28 }
  0x4d   : > { %v727_v0 = vpack.c.bf16 %v430_v30, %v429_v29 }
  0x4f   : > { %762 = vst [vmem:[%s855_s24 + $0x88] sm:$0xff] %v727_v0  }
  0x50 PF: > { %s13_s12 = sadd.s32 1, %s780_s12  }
  0x51   : > { %p10_p4 = scmp.ge.s32.totalorder %s13_s12, 4  }
  0x53   :  { %12 = sbr.rel (!%p10_p4) target bundleno = 1 (0x1), region = 62 }

// kernel: gan_generator_forward.23
= control target key start
LH: loop header
LB: loop body
LE: loop exit
PB: predicated region body
PF: predicated region fallthrough
CT: control target
= control target key end

     0   :  { %s4735_s18 = smov 0   ;;  %s6080_s0 = inlined_call_operand.vmem [shape: bf16[2,332,128], index: 0, kind: input, shape index: {}]   ;;  %s6081_s1 = inlined_call_operand.vmem [shape: bf16[9,128,128], index: 1, kind: input, shape index: {}]   ;;  %s6082_s2 = inlined_call_operand.vmem [shape: f32[288,1], index: 2, kind: input, shape index: {}]   ;;  %s6083_s3 = inlined_call_operand.vmem [shape: bf16[2,288,128], index: 3, kind: output, shape index: {0}]   ;;  %s6084_s4 = inlined_call_operand.vmem [shape: f32[2,1,128], index: 4, kind: output, shape index: {1}]   ;;  %s6085_s5 = inlined_call_operand.vmem [shape: f32[2,1,128], index: 5, kind: output, shape index: {2}]  }
   0x1 LB: > { %s3769_s19 = sadd.s32 4294967295, %s4702_s18   ;;  %p3773_p0 = scmp.ge.s32.totalorder %s4702_s18, 1  ;;  %s4702_s18 = sphi %s4735_s18, %s16_s18  }
   0x2   : > { %p192_p1 = scmp.lt.s32.totalorder %s4702_s18, 3 }
   0x4   : > { %p193_p2 = pnand %p3773_p0, %p192_p1 }
   0x6   : > { %196 = sbr.rel (%p193_p2) target bundleno = 848 (0x350), region = 32 }
   0xb   : > { %v4430_v0 = vld [vmem:[%s6081_s1 + $0x78] sm:$0xff]  ;;  %p226_p3 = scmp.lt.s32.totalorder %s3769_s19, 1  ;;  %v4429_v1 = vld [vmem:[%s6081_s1 + $0x70] sm:$0xff]  ;;  %v4428_v2 = vld [vmem:[%s6081_s1 + $0x68] sm:$0xff]  ;;  %vm405_vm0 = vsmask.f32 7424 }
   0xc   : > { %4635 = vmatpush.bf16.msra.mxu1 %v4430_v0  ;;  %4636 = vmatpush.bf16.msra.mxu2 %v4430_v0  ;;  %v4427_v3 = vld [vmem:[%s6081_s1 + $0x60] sm:$0xff]  ;;  %v4426_v5 = vld [vmem:[%s6081_s1 + $0x58] sm:$0xff]  ;;  %v4425_v11 = vld [vmem:[%s6081_s1 + $0x50] sm:$0xff]  ;;  %vm905_vm1 = vcmask 1046528   ;;  %vm1550_vm2 = vsmask.f32 6400 }
   0xd   : > { %s6115_s19 = smov (!%p226_p3, %s3769_s19), 1  ;;  %620 = vmatpush.bf16.msra.mxu0 %v4430_v0  ;;  %4637 = vmatpush.bf16.msra.mxu3 %v4430_v0  ;;  %v4424_v20 = vld [vmem:[%s6081_s1 + $0x48] sm:$0xff]  ;;  %v4423_v31 = vld [vmem:[%s6081_s1 + $0x40] sm:$0xff]  ;;  %v4438_v36 = vld [vmem:[%s6081_s1 + $0xb8] sm:$0xff]  ;;  %vm2588_vm3 = vsmask.f32 5376 }
   0xe   : > { %s4659_s26 = smul.u32 168, %s6115_s19  ;;  %v4422_v39 = vld [vmem:[%s6081_s1 + $0x38] sm:$0xff]  ;;  %v4437_v46 = vld [vmem:[%s6081_s1 + $0xb0] sm:$0xff]  ;;  %v4436_v54 = vld [vmem:[%s6081_s1 + $0xa8] sm:$0xff]  ;;  %vm1943_vm4 = vcmask 1045504   ;;  %vm2981_vm5 = vcmask 1044480   ;;  %s238_s25 = scalar_lea.vmem %s6084_s4, %s6115_s19 }
   0xf   : > { %v4471_v40 = vld [vmem:[%s6081_s1 + $0x138] sm:$0xff]  ;;  %v4421_v47 = vld [vmem:[%s6081_s1 + $0x30] sm:$0xff]  ;;  %v4420_v55 = vld [vmem:[%s6081_s1 + $0x28] sm:$0xff]  ;;  %s4660_s29 = smul.u32 144, %s6115_s19  ;;  %s241_s27 = scalar_lea.vmem %s6085_s5, %s6115_s19 }
  0x10   : > { %4638 = vmatpush.bf16.msra.mxu1 %v4429_v1  ;;  %4639 = vmatpush.bf16.msra.mxu2 %v4429_v1  ;;  %s4761_s6 = scalar_lea.vmem %s6080_s0, %s4659_s26  ;;  %v4470_v48 = vld [vmem:[%s6081_s1 + $0x130] sm:$0xff]  ;;  %v4463_v52 = vld [vmem:[%s6081_s1 + $0xf8] sm:$0xff]  ;;  %v4469_v56 = vld [vmem:[%s6081_s1 + $0x128] sm:$0xff] }
  0x11   : > { %621 = vmatpush.bf16.msra.mxu0 %v4429_v1  ;;  %4640 = vmatpush.bf16.msra.mxu3 %v4429_v1  ;;  %v4764_v4 = vld [vmem:[%s4761_s6 + $0x28] sm:$0xff]  ;;  %v4770_v6 = vld [vmem:[%s4761_s6 + $0x50] sm:$0xff]  ;;  %v4773_v7 = vld [vmem:[%s4761_s6] sm:$0xff]   ;;  %s5762_s8 = scalar_lea.vmem %s6083_s3, %s4660_s29 }
  0x12   : > { %v4776_v8 = vld [vmem:[%s4761_s6 + $0x30] sm:$0xff]  ;;  %v446_v9 = vshll.u32 %v4764_v4, 16  ;;  %v4780_v10 = vld [vmem:[%s4761_s6 + $0x58] sm:$0xff]  ;;  %v486_v12 = vshll.u32 %v4770_v6, 16  ;;  %v4787_v13 = vld [vmem:[%s4761_s6 + $0x8] sm:$0xff]  ;;  %v409_v14 = vshll.u32 %v4773_v7, 16 }
  0x13   : > { %v4412_v15 = vld [vmem:[%s4761_s6 + $0x78] sm:$0xff]  ;;  %v450_v17 = vshrl.u32 %v4764_v4, 16  ;;  %v454_v18 = vshll.u32 %v4776_v8, 16  ;;  %v494_v19 = vshll.u32 %v4780_v10, 16  ;;  %v490_v22 = vshrl.u32 %v4770_v6, 16  ;;  %v4803_v23 = vld [vmem:[%s4761_s6 + $0x80] sm:$0xff] }
  0x14   : > { %4641 = vmatpush.bf16.msra.mxu1 %v4428_v2  ;;  %4642 = vmatpush.bf16.msra.mxu2 %v4428_v2  ;;  %v4791_v16 = vrot.slane %v446_v9, 1  ;;  %v4799_v21 = vrot.slane %v486_v12, 1  ;;  %v526_v24 = vshll.u32 %v4412_v15, 16  ;;  %v407_v25 = vshrl.u32 %v4773_v7, 16  ;;  %v4841_v49 = vld [vmem:[%s4761_s6 + $0x38] sm:$0xff]  ;;  %v4844_v50 = vld [vmem:[%s4761_s6 + $0x60] sm:$0xff] }
  0x15   : > { %622 = vmatpush.bf16.msra.mxu0 %v4428_v2  ;;  %4643 = vmatpush.bf16.msra.mxu3 %v4428_v2  ;;  %v411_v26 = vrot.slane %v409_v14, 1  ;;  %v414_v27 = vshll.u32 %v4787_v13, 16  ;;  %v456_v29 = vrot.slane %v454_v18, 1  ;;  %v4808_v30 = vrot.slane %v494_v19, 1  ;;  %v4851_v53 = vld [vmem:[%s4761_s6 + $0x10] sm:$0xff]  ;;  %v4870_v62 = vld [vmem:[%s4761_s6 + $0x88] sm:$0xff] }
  0x16   : > { %v452_v28 = vor.u32 %v450_v17, %v4791_v16  ;;  %v492_v32 = vor.u32 %v490_v22, %v4799_v21  ;;  %v4814_v33 = vrot.slane %v526_v24, 1  ;;  %v530_v34 = vshrl.u32 %v4412_v15, 16  ;;  %v4462_v61 = vld [vmem:[%s6081_s1 + $0xf0] sm:$0xff]  ;;  %v4435_v1 = vld [vmem:[%s6081_s1 + $0xa0] sm:$0xff]  ;;  %v4461_v17 = vld [vmem:[%s6081_s1 + $0xe8] sm:$0xff] }
  0x17   : > { %v534_v35 = vshll.u32 %v4803_v23, 16  ;;  %v412_v37 = vor.u32 %v411_v26, %v407_v25  ;;  %v416_v38 = vrot.slane %v414_v27, 1  ;;  %v458_v57 = vshrl.u32 %v4776_v8, 16  ;;  %v4419_v2 = vld [vmem:[%s6081_s1 + $0x20] sm:$0xff]  ;;  %v4890_v18 = vld [vmem:[%s4761_s6 + $0x48] sm:$0xff]  ;;  %v4434_v22 = vld [vmem:[%s6081_s1 + $0x98] sm:$0xff] }
  0x18   : > { %4644 = vmatpush.bf16.msra.mxu1 %v4427_v3  ;;  %4645 = vmatpush.bf16.msra.mxu2 %v4427_v3  ;;  %v457_v41 = vsel %vm405_vm0, %v452_v28, %v456_v29  ;;  %v497_v42 = vsel %vm405_vm0, %v492_v32, %v4808_v30  ;;  %v532_v43 = vor.u32 %v530_v34, %v4814_v33  ;;  %v462_v58 = vshll.u32 %v4841_v49, 16  ;;  %v294_v32 = vld [vmem:[%s4761_s6 + $0x90] sm:$0x1] }
  0x19   : > { %623 = vmatpush.bf16.msra.mxu0 %v4427_v3  ;;  %4646 = vmatpush.bf16.msra.mxu3 %v4427_v3  ;;  %v536_v44 = vrot.slane %v534_v35, 1  ;;  %v417_v45 = vsel %vm405_vm0, %v412_v37, %v416_v38  ;;  %v498_v59 = vshrl.u32 %v4780_v10, 16  ;;  %v502_v60 = vshll.u32 %v4844_v50, 16  ;;  %v4468_v3 = vld [vmem:[%s6081_s1 + $0x120] sm:$0xff]  ;;  %v4467_v37 = vld [vmem:[%s6081_s1 + $0x118] sm:$0xff] }
  0x1a   : > { %v418_v63 = vshrl.u32 %v4787_v13, 16  ;;  %v422_v0 = vshll.u32 %v4851_v53, 16  ;;  %v464_v9 = vrot.slane %v462_v58, 1  ;;  %v538_v14 = vshrl.u32 %v4803_v23, 16  ;;  %v4418_v23 = vld [vmem:[%s6081_s1 + $0x18] sm:$0xff] }
  0x1b   : > { %v537_v51 = vsel %vm405_vm0, %v532_v43, %v536_v44  ;;  %v504_v12 = vrot.slane %v502_v60, 1  ;;  %v542_v15 = vshll.u32 %v4870_v62, 16  ;;  %v478_v28 = vshll.u32 %v4890_v18, 16  ;;  %v4432_v43 = vld [vmem:[%s6081_s1 + $0x88] sm:$0xff] }
  0x1c   : > { %4647 = vmatpush.bf16.msra.mxu1 %v4426_v5  ;;  %4648 = vmatpush.bf16.msra.mxu2 %v4426_v5  ;;  %v420_v19 = vor.u32 %v418_v63, %v416_v38  ;;  %v540_v26 = vor.u32 %v538_v14, %v536_v44  ;;  %v4460_v38 = vld [vmem:[%s6081_s1 + $0xe0] sm:$0xff]  ;;  %v4466_v44 = vld [vmem:[%s6081_s1 + $0x110] sm:$0xff] }
  0x1d   : > { %624 = vmatpush.bf16.msra.mxu0 %v4426_v5  ;;  %4649 = vmatpush.bf16.msra.mxu3 %v4426_v5  ;;  %v460_v5 = vor.u32 %v458_v57, %v456_v29  ;;  %v544_v27 = vrot.slane %v542_v15, 1  ;;  %v4910_v35 = vrot.slane %v478_v28, 1  ;;  %v426_v57 = vshrl.u32 %v4851_v53, 16  ;;  %v4415_v28 = vld [vmem:[%s6081_s1] sm:$0xff] }
  0x1f   : > { %v465_v24 = vsel %vm405_vm0, %v460_v5, %v464_v9  ;;  %v545_v34 = vsel %vm405_vm0, %v540_v26, %v544_v27  ;;  %v4431_v26 = vld [vmem:[%s6081_s1 + $0x80] sm:$0xff] }
  0x20   : > { %4650 = vmatpush.bf16.msra.mxu1 %v4425_v11  ;;  %4651 = vmatpush.bf16.msra.mxu2 %v4425_v11 }
  0x21   : > { %625 = vmatpush.bf16.msra.mxu0 %v4425_v11  ;;  %4652 = vmatpush.bf16.msra.mxu3 %v4425_v11  ;;  %v500_v11 = vor.u32 %v498_v59, %v4808_v30  ;;  %v4903_v30 = vld [vmem:[%s4761_s6 + $0x40] sm:$0xff] }
  0x23   : > { %v505_v25 = vsel %vm405_vm0, %v500_v11, %v504_v12 }
  0x24   : > { %4653 = vmatpush.bf16.msra.mxu1 %v4424_v20  ;;  %4654 = vmatpush.bf16.msra.mxu2 %v4424_v20 }
  0x25   : > { %626 = vmatpush.bf16.msra.mxu0 %v4424_v20  ;;  %4655 = vmatpush.bf16.msra.mxu3 %v4424_v20  ;;  %v424_v20 = vrot.slane %v422_v0, 1 }
  0x27   : > { %v425_v29 = vsel %vm405_vm0, %v420_v19, %v424_v20 }
  0x28   : > { %4656 = vmatpush.bf16.msra.mxu1 %v4423_v31  ;;  %4657 = vmatpush.bf16.msra.mxu2 %v4423_v31 }
  0x29   : > { %627 = vmatpush.bf16.msra.mxu0 %v4423_v31  ;;  %4658 = vmatpush.bf16.msra.mxu3 %v4423_v31  ;;  %v4906_v31 = vld [vmem:[%s4761_s6 + $0x68] sm:$0xff] }
  0x2b   : > { %653 = vmatmul.bf16.vlgmr.msra.gmra.mxu1 %v457_v41  ;;  %678 = vmatmul.bf16.vlgmr.msra.gmra.mxu2 %v497_v42  ;;  %v4923_v41 = vld [vmem:[%s4761_s6 + $0x18] sm:$0xff]  ;;  %v4417_v42 = vld [vmem:[%s6081_s1 + $0x10] sm:$0xff] }
  0x2c   : > { %1009 = vmatpush.bf16.msrb.mxu2 %v4438_v36  ;;  %785 = vmatpush.bf16.msrb.mxu1 %v4422_v39  ;;  %v4433_v36 = vld [vmem:[%s6081_s1 + $0x90] sm:$0xff]  ;;  %v385_v39 = vunpack.c.l.b16 %v294_v32  ;;  %v430_v58 = vshll.u32 %v4923_v41, 16  ;;  %v4989_v32 = vld [vmem:[%s4761_s6 + $0xc] sm:$0xf] }
  0x2d   : > { %1787 = vmatpush.bf16.msrb.mxu0 %v4471_v40  ;;  %703 = vmatmul.bf16.vlgmr.msra.gmra.mxu3 %v537_v51  ;;  %v482_v40 = vshrl.u32 %v4890_v18, 16  ;;  %v510_v51 = vshll.u32 %v4906_v31, 16 }
  0x2e   : > { %628 = vmatmul.bf16.vlgmr.msra.gmra.mxu0 %v417_v45  ;;  %1394 = vmatpush.bf16.msrb.mxu3 %v4463_v52  ;;  %v4940_v52 = vld [vmem:[%s4761_s6 + $0x20] sm:$0xff]  ;;  %v432_v5 = vrot.slane %v430_v58, 1 }
  0x2f   : > { %v484_v45 = vor.u32 %v482_v40, %v4910_v35  ;;  %v512_v63 = vrot.slane %v510_v51, 1  ;;  %v438_v0 = vshll.u32 %v4940_v52, 16  ;;  %v6086_v40 = vunpack.c.l.b16 %v4989_v32 }
  0x30   : > { %1010 = vmatpush.bf16.msrb.mxu2 %v4437_v46  ;;  %786 = vmatpush.bf16.msrb.mxu1 %v4421_v47  ;;  %v466_v46 = vshrl.u32 %v4841_v49, 16  ;;  %v470_v47 = vshll.u32 %v4903_v30, 16 }
  0x31   : > { %1788 = vmatpush.bf16.msrb.mxu0 %v4470_v48  ;;  %v506_v48 = vshrl.u32 %v4844_v50, 16 }
  0x32   : > { %1395 = vmatpush.bf16.msrb.mxu3 %v4462_v61  ;;  %v468_v59 = vor.u32 %v466_v46, %v464_v9  ;;  %v472_v60 = vrot.slane %v470_v47, 1  ;;  %v4439_v46 = vld [vmem:[%s4761_s6 + $0x10] sm:$0xff] }
  0x33   : > { %v508_v61 = vor.u32 %v506_v48, %v504_v12  ;;  %v440_v12 = vrot.slane %v438_v0, 1  ;;  %v1292_v58 = vrot.slane %v4439_v46, 1  ;;  %v4520_v0 = vld [vmem:[%s6081_s1 + $0x238] sm:$0xff] }
  0x34   : > { %1011 = vmatpush.bf16.msrb.mxu2 %v4436_v54  ;;  %787 = vmatpush.bf16.msrb.mxu1 %v4420_v55  ;;  %v4942_v54 = vpack.c.b16 %v385_v39, %v385_v39  ;;  %v4459_v55 = vld [vmem:[%s6081_s1 + $0xd8] sm:$0xff]  ;;  %v473_v11 = vsel %vm405_vm0, %v468_v59, %v472_v60 }
  0x35   : > { %1789 = vmatpush.bf16.msrb.mxu0 %v4469_v56  ;;  %v4949_v56 = vsel %vm405_vm0, %v484_v45, %v4799_v21  ;;  %v4458_v21 = vld [vmem:[%s6081_s1 + $0xd0] sm:$0xff]  ;;  %v513_v9 = vsel %vm405_vm0, %v508_v61, %v512_v63 }
  0x36   : > { %1396 = vmatpush.bf16.msrb.mxu3 %v4461_v17 }
  0x38   : > { %1012 = vmatpush.bf16.msrb.mxu2 %v4435_v1  ;;  %788 = vmatpush.bf16.msrb.mxu1 %v4419_v2  ;;  %v546_v1 = vshrl.u32 %v4870_v62, 16  ;;  %v550_v2 = vshll.u32 %v4942_v54, 16  ;;  %v442_v62 = vshrl.u32 %v4940_v52, 16 }
  0x39   : > { %1790 = vmatpush.bf16.msrb.mxu0 %v4468_v3  ;;  %v428_v3 = vor.u32 %v426_v57, %v424_v20  ;;  %v4416_v20 = vld [vmem:[%s6081_s1 + $0x8] sm:$0xff] }
  0x3a   : > { %1397 = vmatpush.bf16.msrb.mxu3 %v4460_v38  ;;  %v548_v14 = vor.u32 %v546_v1, %v544_v27  ;;  %v552_v15 = vrot.slane %v550_v2, 1  ;;  %v444_v19 = vor.u32 %v442_v62, %v440_v12  ;;  %v4465_v27 = vld [vmem:[%s6081_s1 + $0x108] sm:$0xff]  ;;  %v1560_v62 = vshrl.u32 %v4439_v46, 16 }
  0x3b   : > { %658 = vmatmul.bf16.gmra.mxu1 %v465_v24  ;;  %683 = vmatmul.bf16.gmra.mxu2 %v505_v25  ;;  %v433_v17 = vsel %vm405_vm0, %v428_v3, %v432_v5  ;;  %v4457_v25 = vld [vmem:[%s6081_s1 + $0xc8] sm:$0xff] }
  0x3c   : > { %1013 = vmatpush.bf16.msrb.mxu2 %v4434_v22  ;;  %789 = vmatpush.bf16.msrb.mxu1 %v4418_v23  ;;  %v4964_v22 = vld [vmem:[%s4761_s6 + $0x70] sm:$0xff]  ;;  %v553_v23 = vsel %vm405_vm0, %v548_v14, %v552_v15  ;;  %v449_v24 = vsel %vm405_vm0, %v444_v19, %v4791_v16  ;;  %v4456_v16 = vld [vmem:[%s6081_s1 + $0xc0] sm:$0xff] }
  0x3d   : > { %1791 = vmatpush.bf16.msrb.mxu0 %v4467_v37  ;;  %708 = vmatmul.bf16.gmra.mxu3 %v545_v34  ;;  %v474_v34 = vshrl.u32 %v4903_v30, 16  ;;  %v514_v37 = vshrl.u32 %v4906_v31, 16  ;;  %v518_v38 = vshll.u32 %v4964_v22, 16  ;;  %v522_v1 = vshrl.u32 %v4964_v22, 16 }
  0x3e   : > { %633 = vmatmul.bf16.gmra.mxu0 %v425_v29  ;;  %1398 = vmatpush.bf16.msrb.mxu3 %v4459_v55  ;;  %v1144_v29 = vld [vmem:[%s4761_s6 + $0x8] sm:$0xe] }
  0x3f   : > { %v1235_v39 = vunpack.c.l.b16 %v1144_v29  ;;  %v520_v45 = vrot.slane %v518_v38, 1  ;;  %v4511_v38 = vld [vmem:[%s6081_s1 + $0x1f0] sm:$0xff] }
  0x40   : > { %1014 = vmatpush.bf16.msrb.mxu2 %v4433_v36  ;;  %790 = vmatpush.bf16.msrb.mxu1 %v4417_v42  ;;  %v4464_v36 = vld [vmem:[%s6081_s1 + $0x100] sm:$0xff]  ;;  %v434_v42 = vshrl.u32 %v4923_v41, 16 }
  0x41   : > { %1792 = vmatpush.bf16.msrb.mxu0 %v4466_v44  ;;  %v516_v44 = vor.u32 %v514_v37, %v512_v63  ;;  %v1272_v47 = vpack.c.b16 %v6086_v40, %v1235_v39  ;;  %v4479_v63 = vld [vmem:[%s6081_s1 + $0x178] sm:$0xff]  ;;  %v524_v2 = vor.u32 %v522_v1, %v520_v45  ;;  %v4503_v37 = vld [vmem:[%s6081_s1 + $0x1b0] sm:$0xff] }
  0x42   : > { %1399 = vmatpush.bf16.msrb.mxu3 %v4458_v21  ;;  %v436_v48 = vor.u32 %v434_v42, %v432_v5  ;;  %v4440_v21 = vld [vmem:[%s4761_s6 + $0x18] sm:$0xff]  ;;  %v4478_v39 = vld [vmem:[%s6081_s1 + $0x170] sm:$0xff] }
  0x43   : > { %v521_v55 = vsel %vm405_vm0, %v516_v44, %v520_v45  ;;  %v1291_v57 = vrot.slane %v1272_v47, 1  ;;  %v529_v3 = vsel %vm405_vm0, %v524_v2, %v4814_v33  ;;  %v1294_v5 = vrot.slane %v4440_v21, 1 }
  0x44   : > { %1015 = vmatpush.bf16.msrb.mxu2 %v4432_v43  ;;  %791 = vmatpush.bf16.msrb.mxu1 %v4416_v20  ;;  %v476_v43 = vor.u32 %v474_v34, %v472_v60  ;;  %v441_v59 = vsel %vm405_vm0, %v436_v48, %v440_v12  ;;  %v4504_v60 = vld [vmem:[%s6081_s1 + $0x1b8] sm:$0xff]  ;;  %v4616_v12 = vld [vmem:[%s4761_s6] sm:$0xe]  ;;  %v1552_v14 = vshrl.u32 %v1272_v47, 16  ;;  %v1555_v15 = vshll.u32 %v1272_v47, 16 }
  0x45   : > { %1793 = vmatpush.bf16.msrb.mxu0 %v4465_v27  ;;  %v1293_v61 = vsel %vm905_vm1, %v1291_v57, %v1292_v58  ;;  %v4441_v27 = vld [vmem:[%s4761_s6 + $0x20] sm:$0xff]  ;;  %v1569_v42 = vshrl.u32 %v4440_v21, 16  ;;  %v909_v45 = vrot.slane %v4851_v53, 1 }
  0x46   : > { %1400 = vmatpush.bf16.msrb.mxu3 %v4457_v25  ;;  %v481_v51 = vsel %vm405_vm0, %v476_v43, %v4910_v35  ;;  %v4512_v35 = vld [vmem:[%s6081_s1 + $0x1f8] sm:$0xff]  ;;  %v1554_v20 = vrot.slane %v1552_v14, 1  ;;  %v1562_v25 = vrot.slane %v1560_v62, 1  ;;  %v1572_v43 = vshll.u32 %v4440_v21, 16  ;;  %v4502_v14 = vld [vmem:[%s6081_s1 + $0x1a8] sm:$0xff] }
  0x47   : > { %v4444_v62 = vld [vmem:[%s4761_s6 + $0x38] sm:$0xff] }
  0x48   : > { %1016 = vmatpush.bf16.msrb.mxu2 %v4431_v26  ;;  %792 = vmatpush.bf16.msrb.mxu1 %v4415_v28  ;;  %v1574_v44 = vrot.slane %v1572_v43, 2 }
  0x49   : > { %1794 = vmatpush.bf16.msrb.mxu0 %v4464_v36 }
  0x4a   : > { %1401 = vmatpush.bf16.msrb.mxu3 %v4456_v16  ;;  %v1296_v16 = vrot.slane %v4441_v27, 1 }
  0x4b   : > { %663 = vmatmul.bf16.gmra.mxu1 %v473_v11  ;;  %688 = vmatmul.bf16.gmra.mxu2 %v513_v9  ;;  %v4615_v11 = vld [vmem:[%s4761_s6] sm:$0xf0]  ;;  %v1295_v9 = vsel %vm905_vm1, %v1292_v58, %v1294_v5 }
  0x4c   : > { %2432 = vmatpush.bf16.msra.mxu2 %v4504_v60  ;;  %2047 = vmatpush.bf16.msra.mxu1 %v4479_v63  ;;  %v4617_v19 = vor.u32 %v4616_v12, %v4615_v11  ;;  %v1297_v36 = vsel %vm905_vm1, %v1294_v5, %v1296_v16  ;;  %v1581_v60 = vshll.u32 %v4441_v27, 16  ;;  %v911_v63 = vrot.slane %v4923_v41, 1 }
  0x4d   : > { %713 = vmatmul.bf16.gmra.mxu3 %v553_v23  ;;  %3085 = vmatpush.bf16.msra.mxu0 %v4520_v0  ;;  %v1557_v23 = vrot.slane %v1555_v15, 2  ;;  %v4443_v0 = vld [vmem:[%s4761_s6 + $0x30] sm:$0xff]  ;;  %v4510_v15 = vld [vmem:[%s6081_s1 + $0x1e8] sm:$0xff] }
  0x4e   : > { %638 = vmatmul.bf16.gmra.mxu0 %v433_v17  ;;  %2825 = vmatpush.bf16.msra.mxu3 %v4512_v35  ;;  %v1563_v17 = vshll.u32 %v4439_v46, 16  ;;  %v906_v26 = vrot.slane %v4617_v19, 1  ;;  %v4442_v46 = vld [vmem:[%s4761_s6 + $0x28] sm:$0xff]  ;;  %v1583_v35 = vrot.slane %v1581_v60, 2  ;;  %v912_v2 = vsel %vm905_vm1, %v909_v45, %v911_v63 }
  0x4f   : > { %v1300_v21 = vrot.slane %v4443_v0, 1  ;;  %v1587_v5 = vshrl.u32 %v4442_v46, 16  ;;  %v1590_v11 = vshll.u32 %v4442_v46, 16  ;;  %v4477_v19 = vld [vmem:[%s6081_s1 + $0x168] sm:$0xff] }
  0x50   : > { %v1565_v33 = vrot.slane %v1563_v17, 2  ;;  %2433 = vmatpush.bf16.msra.mxu2 %v4503_v37  ;;  %2048 = vmatpush.bf16.msra.mxu1 %v4478_v39  ;;  %v4445_v39 = vld [vmem:[%s4761_s6 + $0x40] sm:$0xff] }
  0x51   : > { %v1592_v12 = vrot.slane %v1590_v11, 2  ;;  %v4509_v11 = vld [vmem:[%s6081_s1 + $0x1e0] sm:$0xff] }
  0x52   : > { %v1566_v28 = vor.u32 %v1565_v33, %v1562_v25  ;;  %2826 = vmatpush.bf16.msra.mxu3 %v4511_v38  ;;  %v1302_v25 = vrot.slane %v4444_v62, 1  ;;  %v915_v38 = vrot.slane %v4764_v4, 1 }
  0x54   : > { %2434 = vmatpush.bf16.msra.mxu2 %v4502_v14  ;;  %2049 = vmatpush.bf16.msra.mxu1 %v4477_v19 }
  0x56   : > { %2827 = vmatpush.bf16.msra.mxu3 %v4510_v15  ;;  %v4476_v15 = vld [vmem:[%s6081_s1 + $0x160] sm:$0xff] }
  0x58   : > { %2050 = vmatpush.bf16.msra.mxu1 %v4476_v15 }
  0x5a   : > { %2828 = vmatpush.bf16.msra.mxu3 %v4509_v11  ;;  %v921_v11 = vrot.slane %v4903_v30, 1 }
  0x5b   : > { %668 = vmatmul.bf16.gmra.mxu1 %v481_v51  ;;  %693 = vmatmul.bf16.gmra.mxu2 %v521_v55  ;;  %v1298_v51 = vrot.slane %v4442_v46, 1  ;;  %v4519_v55 = vld [vmem:[%s6081_s1 + $0x230] sm:$0xff] }
  0x5c   : > { %3086 = vmatpush.bf16.msra.mxu0 %v4519_v55  ;;  %v1605_v55 = vshrl.u32 %v4444_v62, 16 }
  0x5d   : > { %1402 = vmatmul.bf16.vlgmr.msrb.gmra.mxu3 %v1293_v61  ;;  %v1299_v58 = vsel %vm905_vm1, %v1296_v16, %v1298_v51 }
  0x5e   : > { %643 = vmatmul.bf16.gmra.mxu0 %v441_v59  ;;  %v1578_v59 = vshrl.u32 %v4441_v27, 16  ;;  %v4518_v27 = vld [vmem:[%s6081_s1 + $0x228] sm:$0xff] }
  0x60   : > { %v1580_v61 = vrot.slane %v1578_v59, 1  ;;  %3087 = vmatpush.bf16.msra.mxu0 %v4518_v27 }
  0x62   : > { %v1584_v1 = vor.u32 %v1583_v35, %v1580_v61  ;;  %v1607_v61 = vrot.slane %v1605_v55, 1 }
  0x6b   : > { %673 = vmatmul.bf16.gmra.mxu1 %v4949_v56  ;;  %698 = vmatmul.bf16.gmra.mxu2 %v529_v3  ;;  %v907_v56 = vrot.slane %v4787_v13, 1 }
  0x6d   : > { %1407 = vmatmul.bf16.gmra.mxu3 %v1295_v9  ;;  %v908_v29 = vsel %vm905_vm1, %v906_v26, %v907_v56  ;;  %v910_v48 = vsel %vm905_vm1, %v907_v56, %v909_v45  ;;  %v1589_v9 = vrot.slane %v1587_v5, 1  ;;  %v1303_v56 = vsel %vm905_vm1, %v1300_v21, %v1302_v25 }
  0x6e   : > { %648 = vmatmul.bf16.gmra.mxu0 %v449_v24  ;;  %v1558_v24 = vor.u32 %v1557_v23, %v1554_v20  ;;  %v1304_v45 = vrot.slane %v4445_v39, 1 }
  0x6f   : > { %v1593_v17 = vor.u32 %v1592_v12, %v1589_v9 }
  0x70   : > { %v1567_v34 = vsel %vm1550_vm2, %v1558_v24, %v1566_v28  ;;  %v1596_v24 = vshrl.u32 %v4443_v0, 16 }
  0x71   : > { %v1594_v26 = vsel %vm1550_vm2, %v1584_v1, %v1593_v17 }
  0x7b   : > { %793 = vmatmul.bf16.vlgmr.msrb.gmra.mxu1 %v4773_v7  ;;  %1017 = vmatmul.bf16.vlgmr.msrb.gmra.mxu2 %v908_v29  ;;  %v1571_v7 = vrot.slane %v1569_v42, 1 }
  0x7d   : > { %1412 = vmatmul.bf16.gmra.mxu3 %v1297_v36  ;;  %v1575_v47 = vor.u32 %v1574_v44, %v1571_v7 }
  0x7e   : > { %1795 = vmatmul.bf16.vlgmr.msrb.gmra.mxu0 %v1567_v34 }
  0x7f   : > { %v1576_v57 = vsel %vm1550_vm2, %v1566_v28, %v1575_v47  ;;  %v1585_v3 = vsel %vm1550_vm2, %v1575_v47, %v1584_v1  ;;  %v1599_v28 = vshll.u32 %v4443_v0, 16  ;;  %v917_v0 = vrot.slane %v4776_v8, 1 }
  0x81   : > { %v1601_v36 = vrot.slane %v1599_v28, 2  ;;  %v4447_v28 = vld [vmem:[%s4761_s6 + $0x50] sm:$0xff] }
  0x8b   : > { %798 = vmatmul.bf16.gmra.mxu1 %v4787_v13  ;;  %1022 = vmatmul.bf16.gmra.mxu2 %v910_v48  ;;  %v1301_v13 = vsel %vm905_vm1, %v1298_v51, %v1300_v21  ;;  %v1305_v51 = vsel %vm905_vm1, %v1302_v25, %v1304_v45  ;;  %v4501_v21 = vld [vmem:[%s6081_s1 + $0x1a0] sm:$0xff] }
  0x8c   : > { %2435 = vmatpush.bf16.msra.mxu2 %v4501_v21 }
  0x8d   : > { %1417 = vmatmul.bf16.gmra.mxu3 %v1299_v58 }
  0x8e   : > { %1800 = vmatmul.bf16.gmra.mxu0 %v1576_v57  ;;  %v1608_v57 = vshll.u32 %v4444_v62, 16  ;;  %v1614_v62 = vshrl.u32 %v4445_v39, 16 }
  0x90   : > { %v1610_v35 = vrot.slane %v1608_v57, 2 }
  0x92   : > { %v1611_v1 = vor.u32 %v1610_v35, %v1607_v61 }
  0x9b   : > { %803 = vmatmul.bf16.gmra.mxu1 %v4851_v53  ;;  %1027 = vmatmul.bf16.gmra.mxu2 %v912_v2  ;;  %v913_v53 = vrot.slane %v4940_v52, 1 }
  0x9d   : > { %1422 = vmatmul.bf16.gmra.mxu3 %v1301_v13  ;;  %v914_v23 = vsel %vm905_vm1, %v911_v63, %v913_v53  ;;  %v916_v44 = vsel %vm905_vm1, %v913_v53, %v915_v38  ;;  %v918_v13 = vsel %vm905_vm1, %v915_v38, %v917_v0 }
  0x9e   : > { %1805 = vmatmul.bf16.gmra.mxu0 %v1585_v3 }
  0xa8   : > { %v5068_v20 = vpop.f32.mrf.mxu1 }
  0xab   : > { %v5071_v33 = vpop.f32.mrf.mxu0  ;;  %808 = vmatmul.bf16.gmra.mxu1 %v4923_v41  ;;  %1032 = vmatmul.bf16.gmra.mxu2 %v914_v23  ;;  %v1598_v41 = vrot.slane %v1596_v24, 1  ;;  %v919_v24 = vrot.slane %v4841_v49, 1 }
  0xad   : > { %1427 = vmatmul.bf16.gmra.mxu3 %v1303_v56  ;;  %v1602_v42 = vor.u32 %v1601_v36, %v1598_v41 }
  0xae   : > { %1810 = vmatmul.bf16.gmra.mxu0 %v1594_v26  ;;  %v5079_v29 = vpop.f32.mrf.mxu2  ;;  %v1616_v26 = vrot.slane %v1614_v62, 1 }
  0xaf   : > { %v1603_v47 = vsel %vm1550_vm2, %v1593_v17, %v1602_v42  ;;  %v1612_v12 = vsel %vm1550_vm2, %v1602_v42, %v1611_v1  ;;  %v1617_v17 = vshll.u32 %v4445_v39, 16  ;;  %v920_v39 = vsel %vm905_vm1, %v917_v0, %v919_v24 }
  0xb0   : > { %v5081_v16 = vpop.f32.mrf.mxu1  ;;  %v5085_v37 = vpop.f32.mrf.mxu3  ;;  %v1308_v42 = vrot.slane %v4447_v28, 1 }
  0xb1   : > { %6089 = vst [vmem:[#allocation2_spill] sm:$0xff] %v5085_v37  ;;  %v1619_v56 = vrot.slane %v1617_v17, 2 }
  0xb3   : > { %v5083_v34 = vpop.f32.mrf.mxu0  ;;  %v1620_v41 = vor.u32 %v1619_v56, %v1616_v26  ;;  %v4500_v26 = vld [vmem:[%s6081_s1 + $0x198] sm:$0xff] }
  0xb4   : > { %2436 = vmatpush.bf16.msra.mxu2 %v4500_v26 }
  0xb6   : > { %v5089_v43 = vpop.f32.mrf.mxu2 }
  0xb8   : > { %v5091_v7 = vpop.f32.mrf.mxu1  ;;  %v5097_v48 = vpop.f32.mrf.mxu3 }
  0xb9   : > { %6090 = vst [vmem:[#allocation3_spill] sm:$0xff] %v5097_v48 }
  0xbb   : > { %v5094_v46 = vpop.f32.mrf.mxu0  ;;  %813 = vmatmul.bf16.gmra.mxu1 %v4940_v52  ;;  %1037 = vmatmul.bf16.gmra.mxu2 %v916_v44  ;;  %v4446_v52 = vld [vmem:[%s4761_s6 + $0x48] sm:$0xff] }
  0xbc   : > { %v1306_v5 = vrot.slane %v4446_v52, 1  ;;  %v1623_v55 = vshrl.u32 %v4446_v52, 16  ;;  %v1626_v57 = vshll.u32 %v4446_v52, 16  ;;  %v922_v52 = vsel %vm905_vm1, %v919_v24, %v921_v11  ;;  %v4508_v24 = vld [vmem:[%s6081_s1 + $0x1d8] sm:$0xff] }
  0xbd   : > { %1432 = vmatmul.bf16.gmra.mxu3 %v1305_v51 }
  0xbe   : > { %1815 = vmatmul.bf16.gmra.mxu0 %v1603_v47  ;;  %v5101_v58 = vpop.f32.mrf.mxu2  ;;  %v1307_v53 = vsel %vm905_vm1, %v1304_v45, %v1306_v5  ;;  %v1621_v45 = vsel %vm1550_vm2, %v1611_v1, %v1620_v41  ;;  %v1309_v51 = vsel %vm905_vm1, %v1306_v5, %v1308_v42  ;;  %v1625_v21 = vrot.slane %v1623_v55, 1  ;;  %2829 = vmatpush.bf16.msra.mxu3 %v4508_v24 }
  0xbf   : > { %v1628_v1 = vrot.slane %v1626_v57, 2 }
  0xc0   : > { %v5103_v59 = vpop.f32.mrf.mxu1  ;;  %v5107_v63 = vpop.f32.mrf.mxu3 }
  0xc1   : > { %6091 = vst [vmem:[#allocation4_spill] sm:$0xff] %v5107_v63 }
  0xc3   : > { %v5105_v60 = vpop.f32.mrf.mxu0 }
  0xc6   : > { %v5111_v2 = vpop.f32.mrf.mxu2 }
  0xc8   : > { %v5116_v3 = vpop.f32.mrf.mxu1  ;;  %v5125_v14 = vpop.f32.mrf.mxu3 }
  0xc9   : > { %6092 = vst [vmem:[#allocation5_spill] sm:$0xff] %v5125_v14 }
  0xcb   : > { %v5122_v9 = vpop.f32.mrf.mxu0  ;;  %818 = vmatmul.bf16.gmra.mxu1 %v4764_v4  ;;  %1042 = vmatmul.bf16.gmra.mxu2 %v918_v13  ;;  %v4517_v4 = vld [vmem:[%s6081_s1 + $0x220] sm:$0xff] }
  0xcc   : > { %3088 = vmatpush.bf16.msra.mxu0 %v4517_v4 }
  0xcd   : > { %1437 = vmatmul.bf16.gmra.mxu3 %v1307_v53 }
  0xce   : > { %1820 = vmatmul.bf16.gmra.mxu0 %v1612_v12  ;;  %v5132_v19 = vpop.f32.mrf.mxu2  ;;  %v4448_v12 = vld [vmem:[%s4761_s6 + $0x58] sm:$0xff] }
  0xcf   : > { %v1310_v5 = vrot.slane %v4448_v12, 1 }
  0xd0   : > { %v5134_v23 = vpop.f32.mrf.mxu1  ;;  %v5141_v27 = vpop.f32.mrf.mxu3 }
  0xd1   : > { %6093 = vst [vmem:[#allocation6_spill] sm:$0xff] %v5141_v27  ;;  %v1311_v56 = vsel %vm905_vm1, %v1308_v42, %v1310_v5  ;;  %v4475_v42 = vld [vmem:[%s6081_s1 + $0x158] sm:$0xff] }
  0xd2   : > { %2051 = vmatpush.bf16.msra.mxu1 %v4475_v42 }
  0xd3   : > { %v5139_v25 = vpop.f32.mrf.mxu0 }
  0xd6   : > { %v5145_v36 = vpop.f32.mrf.mxu2 }
  0xd8   : > { %v5147_v38 = vpop.f32.mrf.mxu1  ;;  %v5153_v47 = vpop.f32.mrf.mxu3 }
  0xd9   : > { %6094 = vst [vmem:[#allocation7_spill] sm:$0xff] %v5153_v47 }
  0xdb   : > { %v5150_v44 = vpop.f32.mrf.mxu0  ;;  %823 = vmatmul.bf16.gmra.mxu1 %v4776_v8  ;;  %1047 = vmatmul.bf16.gmra.mxu2 %v920_v39  ;;  %v1629_v8 = vor.u32 %v1628_v1, %v1625_v21  ;;  %v1632_v39 = vshrl.u32 %v4447_v28, 16  ;;  %v4516_v21 = vld [vmem:[%s6081_s1 + $0x218] sm:$0xff]  ;;  %v923_v1 = vrot.slane %v4890_v18, 1 }
  0xdc   : > { %3089 = vmatpush.bf16.msra.mxu0 %v4516_v21  ;;  %v1644_v21 = vshll.u32 %v4448_v12, 16 }
  0xdd   : > { %1442 = vmatmul.bf16.gmra.mxu3 %v1309_v51  ;;  %v1630_v17 = vsel %vm1550_vm2, %v1620_v41, %v1629_v8  ;;  %v1634_v55 = vrot.slane %v1632_v39, 1  ;;  %v924_v24 = vsel %vm905_vm1, %v921_v11, %v923_v1 }
  0xde   : > { %1825 = vmatmul.bf16.gmra.mxu0 %v1621_v45  ;;  %v5157_v61 = vpop.f32.mrf.mxu2  ;;  %v1635_v45 = vshll.u32 %v4447_v28, 16  ;;  %v1646_v37 = vrot.slane %v1644_v21, 2 }
  0xe0   : > { %v5159_v35 = vpop.f32.mrf.mxu1  ;;  %v1403_v13 = vpop.f32.mrf.mxu3  ;;  %v1637_v57 = vrot.slane %v1635_v45, 2 }
  0xe3   : > { %v5161_v0 = vpop.f32.mrf.mxu0 }
  0xe6   : > { %v5165_v15 = vpop.f32.mrf.mxu2 }
  0xe8   : > { %v5167_v53 = vpop.f32.mrf.mxu1  ;;  %v1405_v4 = vpop.f32.mrf.mxu3 }
  0xeb   : > { %v5170_v62 = vpop.f32.mrf.mxu0  ;;  %828 = vmatmul.bf16.gmra.mxu1 %v4841_v49  ;;  %1052 = vmatmul.bf16.gmra.mxu2 %v922_v52  ;;  %v4449_v52 = vld [vmem:[%s4761_s6 + $0x60] sm:$0xff] }
  0xec   : > { %v1312_v39 = vrot.slane %v4449_v52, 1 }
  0xed   : > { %1447 = vmatmul.bf16.gmra.mxu3 %v1311_v56 }
  0xee   : > { %1830 = vmatmul.bf16.gmra.mxu0 %v1630_v17  ;;  %v5181_v41 = vpop.f32.mrf.mxu2  ;;  %v1638_v17 = vor.u32 %v1637_v57, %v1634_v55  ;;  %v1313_v42 = vsel %vm905_vm1, %v1310_v5, %v1312_v39  ;;  %v1641_v57 = vshrl.u32 %v4448_v12, 16 }
  0xf0   : > { %v5183_v49 = vpop.f32.mrf.mxu1  ;;  %v1408_v28 = vpop.f32.mrf.mxu3  ;;  %v1639_v40 = vsel %vm1550_vm2, %v1629_v8, %v1638_v17  ;;  %v1643_v8 = vrot.slane %v1641_v57, 1 }
  0xf2   : > { %v1647_v5 = vor.u32 %v1646_v37, %v1643_v8 }
  0xf3   : > { %v5185_v51 = vpop.f32.mrf.mxu0 }
  0xf4   : > { %v1648_v57 = vsel %vm1550_vm2, %v1638_v17, %v1647_v5 }
  0xf6   : > { %v5195_v26 = vpop.f32.mrf.mxu2 }
  0xf7   : > { %6095 = vst [vmem:[#allocation8_spill] sm:$0xff] %v5195_v26 }
  0xf8   : > { %v794_v56 = vpop.f32.mrf.mxu1  ;;  %v5199_v47 = vpop.f32.mrf.mxu3 }
  0xf9   : > { %v795_v55 = vadd.f32 %v794_v56, %v5071_v33 }
  0xfb   : > { %v1796_v45 = vpop.f32.mrf.mxu0  ;;  %833 = vmatmul.bf16.gmra.mxu1 %v4903_v30  ;;  %1057 = vmatmul.bf16.gmra.mxu2 %v924_v24  ;;  %v5210_v24 = vld [vmem:[%s4761_s6 + $0x68] sm:$0xff] }
  0xfd   : > { %1452 = vmatmul.bf16.gmra.mxu3 %v1313_v42 }
  0xfe   : > { %1835 = vmatmul.bf16.gmra.mxu0 %v1639_v40  ;;  %v1018_v27 = vpop.f32.mrf.mxu2  ;;  %v925_v40 = vrot.slane %v4770_v6, 1 }
  0xff   : > { %v1108_v14 = vadd.f32 %v1018_v27, %v795_v55 }
 0x100   : > { %v796_v11 = vpop.f32.mrf.mxu1  ;;  %v5204_v26 = vpop.f32.mrf.mxu3  ;;  %v926_v42 = vsel %vm905_vm1, %v923_v1, %v925_v40  ;;  %v1653_v1 = vshll.u32 %v4449_v52, 16 }
 0x101   : > { %v1493_v63 = vadd.f32 %v1403_v13, %v1108_v14  ;;  %v797_v33 = vadd.f32 %v796_v11, %v5083_v34  ;;  %v1314_v14 = vrot.slane %v5210_v24, 1 }
 0x103   : > { %v1798_v48 = vpop.f32.mrf.mxu0  ;;  %v5206_v30 = vadd.f32 %v1796_v45, %v1493_v63  ;;  %v1315_v34 = vsel %vm905_vm1, %v1312_v39, %v1314_v14  ;;  %v1650_v45 = vshrl.u32 %v4449_v52, 16  ;;  %v927_v39 = vrot.slane %v4780_v10, 1  ;;  %v4515_v10 = vld [vmem:[%s6081_s1 + $0x210] sm:$0xff] }
 0x104   : > { %3090 = vmatpush.bf16.msra.mxu0 %v4515_v10 }
 0x106   : > { %v1020_v12 = vpop.f32.mrf.mxu2 }
 0x107   : > { %v1109_v56 = vadd.f32 %v1020_v12, %v797_v33  ;;  %v1652_v33 = vrot.slane %v1650_v45, 1  ;;  %v1655_v12 = vrot.slane %v1653_v1, 2 }
 0x108   : > { %v799_v27 = vpop.f32.mrf.mxu1  ;;  %v5216_v63 = vpop.f32.mrf.mxu3 }
 0x109   : > { %v1494_v13 = vadd.f32 %v1405_v4, %v1109_v56  ;;  %v800_v37 = vadd.f32 %v799_v27, %v5094_v46  ;;  %v4474_v46 = vld [vmem:[%s6081_s1 + $0x150] sm:$0xff] }
 0x10a   : > { %2052 = vmatpush.bf16.msra.mxu1 %v4474_v46  ;;  %v4451_v56 = vld [vmem:[%s4761_s6 + $0x70] sm:$0xff] }
 0x10b   : > { %v1801_v55 = vpop.f32.mrf.mxu0  ;;  %838 = vmatmul.bf16.gmra.mxu1 %v4890_v18  ;;  %1062 = vmatmul.bf16.gmra.mxu2 %v926_v42  ;;  %v5219_v6 = vadd.f32 %v1798_v48, %v1494_v13  ;;  %v4499_v18 = vld [vmem:[%s6081_s1 + $0x190] sm:$0xff]  ;;  %v1656_v42 = vor.u32 %v1655_v12, %v1652_v33  ;;  %v1316_v45 = vrot.slane %v4451_v56, 1 }
 0x10c   : > { %v4507_v48 = vld [vmem:[%s6081_s1 + $0x1d0] sm:$0xff]  ;;  %2437 = vmatpush.bf16.msra.mxu2 %v4499_v18 }
 0x10d   : > { %1457 = vmatmul.bf16.gmra.mxu3 %v1315_v34 }
 0x10e   : > { %1840 = vmatmul.bf16.gmra.mxu0 %v1648_v57  ;;  %v1023_v21 = vpop.f32.mrf.mxu2  ;;  %2830 = vmatpush.bf16.msra.mxu3 %v4507_v48 }
 0x10f   : > { %v1110_v11 = vadd.f32 %v1023_v21, %v800_v37  ;;  %v928_v37 = vsel %vm905_vm1, %v925_v40, %v927_v39  ;;  %v1317_v40 = vsel %vm905_vm1, %v1314_v14, %v1316_v45 }
 0x110   : > { %v801_v4 = vpop.f32.mrf.mxu1  ;;  %v5232_v52 = vpop.f32.mrf.mxu3 }
 0x111   : > { %v1495_v17 = vadd.f32 %v1408_v28, %v1110_v11  ;;  %v802_v27 = vadd.f32 %v801_v4, %v5105_v60  ;;  %v1659_v4 = vshrl.u32 %v5210_v24, 16 }
 0x113   : > { %v1803_v8 = vpop.f32.mrf.mxu0  ;;  %v5234_v28 = vadd.f32 %v1801_v55, %v1495_v17  ;;  %v1657_v55 = vsel %vm1550_vm2, %v1647_v5, %v1656_v42  ;;  %v4673_v17 = vld [vmem:[%s4761_s6 + $0x50] sm:$0xff]  ;;  %v1662_v5 = vshll.u32 %v5210_v24, 16 }
 0x116   : > { %v1025_v13 = vpop.f32.mrf.mxu2 }
 0x117   : > { %v1111_v57 = vadd.f32 %v1025_v13, %v802_v27  ;;  %v1664_v27 = vrot.slane %v1662_v5, 2 }
 0x118   : > { %v804_v34 = vpop.f32.mrf.mxu1  ;;  %v5245_v11 = vpop.f32.mrf.mxu3 }
 0x119   : > { %v1496_v1 = vadd.f32 %v5199_v47, %v1111_v57  ;;  %v805_v47 = vadd.f32 %v804_v34, %v5122_v9  ;;  %v929_v9 = vrot.slane %v4844_v50, 1  ;;  %v5261_v57 = vld [vmem:[%s4761_s6 + $0x78] sm:$0xff] }
 0x11a   : > { %v1318_v10 = vrot.slane %v5261_v57, 1  ;;  %v4674_v50 = vld [vmem:[%s4761_s6 + $0x58] sm:$0xff] }
 0x11b   : > { %v1806_v21 = vpop.f32.mrf.mxu0  ;;  %843 = vmatmul.bf16.gmra.mxu1 %v4673_v17  ;;  %1067 = vmatmul.bf16.gmra.mxu2 %v928_v37  ;;  %v5248_v60 = vadd.f32 %v1803_v8, %v1496_v1  ;;  %v1661_v8 = vrot.slane %v1659_v4, 1 }
 0x11d   : > { %1462 = vmatmul.bf16.gmra.mxu3 %v1317_v40  ;;  %v1665_v34 = vor.u32 %v1664_v27, %v1661_v8 }
 0x11e   : > { %1845 = vmatmul.bf16.gmra.mxu0 %v1657_v55  ;;  %v1028_v33 = vpop.f32.mrf.mxu2 }
 0x11f   : > { %v1112_v12 = vadd.f32 %v1028_v33, %v805_v47  ;;  %v1671_v33 = vshll.u32 %v4451_v56, 16 }
 0x120   : > { %v806_v18 = vpop.f32.mrf.mxu1  ;;  %v5255_v13 = vpop.f32.mrf.mxu3 }
 0x121   : > { %v1497_v48 = vadd.f32 %v5204_v26, %v1112_v12  ;;  %v807_v24 = vadd.f32 %v806_v18, %v5139_v25  ;;  %v930_v26 = vsel %vm905_vm1, %v927_v39, %v929_v9  ;;  %v1319_v25 = vsel %vm905_vm1, %v1316_v45, %v1318_v10 }
 0x122   : > { %v1668_v39 = vshrl.u32 %v4451_v56, 16  ;;  %v1673_v27 = vrot.slane %v1671_v33, 2 }
 0x123   : > { %v1808_v46 = vpop.f32.mrf.mxu0  ;;  %v5257_v14 = vadd.f32 %v1806_v21, %v1497_v48  ;;  %v1666_v21 = vsel %vm1550_vm2, %v1656_v42, %v1665_v34 }
 0x124   : > { %v1670_v8 = vrot.slane %v1668_v39, 1  ;;  %v4473_v39 = vld [vmem:[%s6081_s1 + $0x148] sm:$0xff] }
 0x125   : > { %2053 = vmatpush.bf16.msra.mxu1 %v4473_v39 }
 0x126   : > { %v1030_v37 = vpop.f32.mrf.mxu2 }
 0x127   : > { %v1113_v1 = vadd.f32 %v1030_v37, %v807_v24  ;;  %v5288_v24 = vld [vmem:[%s4761_s6 + $0x80] sm:$0xff] }
 0x128   : > { %v809_v55 = vpop.f32.mrf.mxu1  ;;  %v5268_v47 = vpop.f32.mrf.mxu3 }
 0x129   : > { %v1498_v17 = vadd.f32 %v5216_v63, %v1113_v1  ;;  %v810_v5 = vadd.f32 %v809_v55, %v5150_v44  ;;  %v4506_v44 = vld [vmem:[%s6081_s1 + $0x1c8] sm:$0xff]  ;;  %v1674_v1 = vor.u32 %v1673_v27, %v1670_v8 }
 0x12a   : > { %2831 = vmatpush.bf16.msra.mxu3 %v4506_v44 }
 0x12b   : > { %v1811_v40 = vpop.f32.mrf.mxu0  ;;  %848 = vmatmul.bf16.gmra.mxu1 %v4674_v50  ;;  %1072 = vmatmul.bf16.gmra.mxu2 %v930_v26  ;;  %v5271_v4 = vadd.f32 %v1808_v46, %v1498_v17  ;;  %v4498_v46 = vld [vmem:[%s6081_s1 + $0x188] sm:$0xff]  ;;  %v1320_v50 = vrot.slane %v5288_v24, 1 }
 0x12c   : > { %2438 = vmatpush.bf16.msra.mxu2 %v4498_v46 }
 0x12d   : > { %1467 = vmatmul.bf16.gmra.mxu3 %v1319_v25 }
 0x12e   : > { %1850 = vmatmul.bf16.gmra.mxu0 %v1666_v21  ;;  %v1033_v12 = vpop.f32.mrf.mxu2 }
 0x12f   : > { %v1114_v63 = vadd.f32 %v1033_v12, %v810_v5 }
 0x130   : > { %v811_v18 = vpop.f32.mrf.mxu1  ;;  %v5282_v45 = vpop.f32.mrf.mxu3 }
 0x131   : > { %v1499_v42 = vadd.f32 %v5232_v52, %v1114_v63  ;;  %v931_v52 = vrot.slane %v4906_v31, 1  ;;  %v812_v37 = vadd.f32 %v811_v18, %v5161_v0  ;;  %v4675_v0 = vld [vmem:[%s4761_s6 + $0x60] sm:$0xff]  ;;  %v1677_v63 = vshrl.u32 %v5261_v57, 16 }
 0x132   : > { %v1680_v18 = vshll.u32 %v5261_v57, 16 }
 0x133   : > { %v1813_v48 = vpop.f32.mrf.mxu0  ;;  %v5284_v56 = vadd.f32 %v1811_v40, %v1499_v42  ;;  %v932_v21 = vsel %vm905_vm1, %v929_v9, %v931_v52  ;;  %v1675_v40 = vsel %vm1550_vm2, %v1665_v34, %v1674_v1  ;;  %v1321_v9 = vsel %vm905_vm1, %v1318_v10, %v1320_v50 }
 0x134   : > { %v1679_v46 = vrot.slane %v1677_v63, 1  ;;  %v1682_v44 = vrot.slane %v1680_v18, 2  ;;  %v1686_v63 = vshrl.u32 %v5288_v24, 16 }
 0x136   : > { %v1035_v55 = vpop.f32.mrf.mxu2 }
 0x137   : > { %v1115_v26 = vadd.f32 %v1035_v55, %v812_v37 }
 0x138   : > { %v814_v17 = vpop.f32.mrf.mxu1  ;;  %v5298_v33 = vpop.f32.mrf.mxu3 }
 0x139   : > { %v1500_v25 = vadd.f32 %v5245_v11, %v1115_v26  ;;  %v4514_v11 = vld [vmem:[%s6081_s1 + $0x208] sm:$0xff]  ;;  %v815_v34 = vadd.f32 %v814_v17, %v5170_v62  ;;  %v933_v62 = vrot.slane %v4964_v22, 1  ;;  %v1683_v17 = vor.u32 %v1682_v44, %v1679_v46 }
 0x13a   : > { %3091 = vmatpush.bf16.msra.mxu0 %v4514_v11  ;;  %v5317_v26 = vld [vmem:[%s4761_s6 + $0x88] sm:$0xff] }
 0x13b   : > { %v1816_v5 = vpop.f32.mrf.mxu0  ;;  %853 = vmatmul.bf16.gmra.mxu1 %v4675_v0  ;;  %1077 = vmatmul.bf16.gmra.mxu2 %v932_v21  ;;  %v5301_v12 = vadd.f32 %v1813_v48, %v1500_v25  ;;  %v934_v39 = vsel %vm905_vm1, %v931_v52, %v933_v62 }
 0x13d   : > { %1472 = vmatmul.bf16.gmra.mxu3 %v1321_v9 }
 0x13e   : > { %1855 = vmatmul.bf16.gmra.mxu0 %v1675_v40  ;;  %v1038_v42 = vpop.f32.mrf.mxu2 }
 0x13f   : > { %v1116_v8 = vadd.f32 %v1038_v42, %v815_v34 }
 0x140   : > { %v816_v48 = vpop.f32.mrf.mxu1  ;;  %v5311_v37 = vpop.f32.mrf.mxu3 }
 0x141   : > { %v1501_v27 = vadd.f32 %v5255_v13, %v1116_v8  ;;  %v817_v57 = vadd.f32 %v816_v48, %v5185_v51  ;;  %v1322_v13 = vrot.slane %v5317_v26, 1  ;;  %v1688_v48 = vrot.slane %v1686_v63, 1 }
 0x143   : > { %v1818_v10 = vpop.f32.mrf.mxu0  ;;  %v5313_v55 = vadd.f32 %v1816_v5, %v1501_v27  ;;  %v1684_v5 = vsel %vm1550_vm2, %v1674_v1, %v1683_v17  ;;  %v1323_v51 = vsel %vm905_vm1, %v1320_v50, %v1322_v13  ;;  %v4676_v50 = vld [vmem:[%s4761_s6 + $0x78] sm:$0xff] }
 0x144   : > { %v935_v44 = vrot.slane %v4676_v50, 1 }
 0x146   : > { %v1040_v21 = vpop.f32.mrf.mxu2 }
 0x147   : > { %v1117_v25 = vadd.f32 %v1040_v21, %v817_v57 }
 0x148   : > { %v819_v40 = vpop.f32.mrf.mxu1  ;;  %v5324_v11 = vpop.f32.mrf.mxu3 }
 0x149   : > { %v1502_v0 = vadd.f32 %v5268_v47, %v1117_v25  ;;  %v820_v52 = vadd.f32 %v819_v40, %v5068_v20  ;;  %v1689_v47 = vshll.u32 %v5288_v24, 16  ;;  %v5340_v20 = vld [vmem:[%s4761_s6 + $0x90] sm:$0xff] }
 0x14b   : > { %v1821_v9 = vpop.f32.mrf.mxu0  ;;  %858 = vmatmul.bf16.gmra.mxu1 %v4906_v31  ;;  %1082 = vmatmul.bf16.gmra.mxu2 %v934_v39  ;;  %v5327_v34 = vadd.f32 %v1818_v10, %v1502_v0  ;;  %v1691_v27 = vrot.slane %v1689_v47, 2  ;;  %v936_v39 = vsel %vm905_vm1, %v933_v62, %v935_v44  ;;  %v1695_v47 = vshrl.u32 %v5317_v26, 16 }
 0x14d   : > { %1477 = vmatmul.bf16.gmra.mxu3 %v1323_v51  ;;  %v1692_v24 = vor.u32 %v1691_v27, %v1688_v48  ;;  %v4497_v51 = vld [vmem:[%s6081_s1 + $0x180] sm:$0xff] }
 0x14e   : > { %1860 = vmatmul.bf16.gmra.mxu0 %v1684_v5  ;;  %v1043_v18 = vpop.f32.mrf.mxu2  ;;  %2439 = vmatpush.bf16.msra.mxu2 %v4497_v51 }
 0x14f   : > { %v1118_v1 = vadd.f32 %v1043_v18, %v820_v52  ;;  %v1698_v18 = vshll.u32 %v5317_v26, 16 }
 0x150   : > { %v821_v42 = vpop.f32.mrf.mxu1  ;;  %v5334_v10 = vpop.f32.mrf.mxu3 }
 0x151   : > { %v1503_v31 = vadd.f32 %v5282_v45, %v1118_v1  ;;  %v822_v57 = vadd.f32 %v821_v42, %v5081_v16  ;;  %v1324_v45 = vrot.slane %v5340_v20, 1  ;;  %v4505_v16 = vld [vmem:[%s6081_s1 + $0x1c0] sm:$0xff] }
 0x152   : > { %2832 = vmatpush.bf16.msra.mxu3 %v4505_v16 }
 0x153   : > { %v1823_v8 = vpop.f32.mrf.mxu0  ;;  %v5336_v46 = vadd.f32 %v1821_v9, %v1503_v31  ;;  %v1693_v9 = vsel %vm1550_vm2, %v1683_v17, %v1692_v24  ;;  %v1325_v17 = vsel %vm905_vm1, %v1322_v13, %v1324_v45  ;;  %v1697_v13 = vrot.slane %v1695_v47, 1 }
 0x155   : > { %6096 = vst [vmem:[#allocation9_spill] sm:$0xff] %v5336_v46 }
 0x156   : > { %v1045_v21 = vpop.f32.mrf.mxu2 }
 0x157   : > { %v1119_v25 = vadd.f32 %v1045_v21, %v822_v57  ;;  %v1700_v57 = vrot.slane %v1698_v18, 2  ;;  %v2182_v18 = vld [vmem:[%s4761_s6 + $0x10] sm:$0xc] }
 0x158   : > { %v824_v40 = vpop.f32.mrf.mxu1  ;;  %v5353_v52 = vpop.f32.mrf.mxu3 }
 0x159   : > { %v1504_v0 = vadd.f32 %v5298_v33, %v1119_v25  ;;  %v4472_v33 = vld [vmem:[%s6081_s1 + $0x140] sm:$0xff]  ;;  %v825_v63 = vadd.f32 %v824_v40, %v5091_v7 }
 0x15a   : > { %2054 = vmatpush.bf16.msra.mxu1 %v4472_v33  ;;  %v4513_v7 = vld [vmem:[%s6081_s1 + $0x200] sm:$0xff] }
 0x15b   : > { %v1826_v5 = vpop.f32.mrf.mxu0  ;;  %863 = vmatmul.bf16.gmra.mxu1 %v4964_v22  ;;  %1087 = vmatmul.bf16.gmra.mxu2 %v936_v39  ;;  %v5359_v62 = vadd.f32 %v1823_v8, %v1504_v0  ;;  %v1180_v22 = vld [vmem:[%s4761_s6 + $0x98] sm:$0x1]  ;;  %v5375_v25 = vld [vmem:[%s4761_s6 + $0x80] sm:$0xff]  ;;  %v1701_v0 = vor.u32 %v1700_v57, %v1697_v13 }
 0x15c   : > { %v1271_v8 = vunpack.c.l.b16 %v1180_v22  ;;  %3092 = vmatpush.bf16.msra.mxu0 %v4513_v7  ;;  %v937_v40 = vrot.slane %v5375_v25, 1  ;;  %v5384_v22 = vld [vmem:[%s4761_s6 + $0x14] sm:$0xf] }
 0x15d   : > { %6097 = vst [vmem:[#allocation10_spill] sm:$0xff] %v5359_v62  ;;  %1482 = vmatmul.bf16.gmra.mxu3 %v1325_v17 }
 0x15e   : > { %1865 = vmatmul.bf16.gmra.mxu0 %v1693_v9  ;;  %v1048_v1 = vpop.f32.mrf.mxu2  ;;  %v1290_v39 = vpack.c.b16 %v1271_v8, %v1271_v8  ;;  %v938_v33 = vsel %vm905_vm1, %v935_v44, %v937_v40  ;;  %v5393_v8 = vld [vmem:[%s4761_s6 + $0x18] sm:$0xff] }
 0x15f   : > { %v1120_v42 = vadd.f32 %v1048_v1, %v825_v63 }
 0x160   : > { %v826_v31 = vpop.f32.mrf.mxu1  ;;  %v5370_v21 = vpop.f32.mrf.mxu3  ;;  %v1326_v17 = vrot.slane %v1290_v39, 1  ;;  %v2598_v39 = vshrl.u32 %v5393_v8, 16 }
 0x161   : > { %v1505_v48 = vadd.f32 %v5311_v37, %v1120_v42  ;;  %v827_v37 = vadd.f32 %v826_v31, %v5103_v59  ;;  %v2273_v42 = vunpack.c.l.b16 %v2182_v18  ;;  %v6087_v59 = vunpack.c.l.b16 %v5384_v22 }
 0x162   : > { %v1327_v44 = vsel %vm905_vm1, %v1324_v45, %v1326_v17  ;;  %v4678_v17 = vld [vmem:[%s4761_s6 + $0x88] sm:$0xff] }
 0x163   : > { %v1828_v27 = vpop.f32.mrf.mxu0  ;;  %v5372_v26 = vadd.f32 %v1826_v5, %v1505_v48  ;;  %v1702_v5 = vsel %vm1550_vm2, %v1692_v24, %v1701_v0  ;;  %v1704_v48 = vshrl.u32 %v5340_v20, 16 }
 0x165   : > { %6098 = vst [vmem:[#allocation11_spill] sm:$0xff] %v5372_v26 }
 0x166   : > { %v1050_v9 = vpop.f32.mrf.mxu2 }
 0x167   : > { %v1121_v51 = vadd.f32 %v1050_v9, %v827_v37  ;;  %v2601_v37 = vshll.u32 %v5393_v8, 16 }
 0x168   : > { %v829_v16 = vpop.f32.mrf.mxu1  ;;  %v5386_v1 = vpop.f32.mrf.mxu3 }
 0x169   : > { %v1506_v63 = vadd.f32 %v5324_v11, %v1121_v51  ;;  %v5397_v11 = vpack.c.b16 %v6087_v59, %v2273_v42  ;;  %v830_v24 = vadd.f32 %v829_v16, %v5116_v3  ;;  %v1706_v51 = vrot.slane %v1704_v48, 1 }
 0x16b   : > { %v1831_v47 = vpop.f32.mrf.mxu0  ;;  %868 = vmatmul.bf16.gmra.mxu1 %v4676_v50  ;;  %1092 = vmatmul.bf16.gmra.mxu2 %v938_v33  ;;  %v5389_v31 = vadd.f32 %v1828_v27, %v1506_v63  ;;  %v1707_v50 = vshll.u32 %v5340_v20, 16  ;;  %v2590_v45 = vshrl.u32 %v5397_v11, 16  ;;  %v2593_v7 = vshll.u32 %v5397_v11, 16  ;;  %v1529_v20 = vld [vmem:[%s4761_s6 + $0x98] sm:$0x3] }
 0x16c   : > { %v939_v63 = vrot.slane %v4678_v17, 1 }
 0x16d   : > { %6099 = vst [vmem:[#allocation12_spill] sm:$0xff] %v5389_v31  ;;  %1487 = vmatmul.bf16.gmra.mxu3 %v1327_v44  ;;  %v1709_v16 = vrot.slane %v1707_v50, 2  ;;  %v2592_v18 = vrot.slane %v2590_v45, 2  ;;  %v2595_v42 = vrot.slane %v2593_v7, 3  ;;  %v2600_v44 = vrot.slane %v2598_v39, 2 }
 0x16e   : > { %1870 = vmatmul.bf16.gmra.mxu0 %v1702_v5  ;;  %v1053_v13 = vpop.f32.mrf.mxu2  ;;  %v1548_v31 = vunpack.c.l.b16 %v1529_v20  ;;  %v940_v50 = vsel %vm905_vm1, %v937_v40, %v939_v63  ;;  %v5426_v40 = vld [vmem:[%s4761_s6 + $0x20] sm:$0xff] }
 0x16f   : > { %v1122_v27 = vadd.f32 %v1053_v13, %v830_v24  ;;  %v2603_v24 = vrot.slane %v2601_v37, 3  ;;  %v1710_v59 = vor.u32 %v1709_v16, %v1706_v51 }
 0x170   : > { %v831_v57 = vpop.f32.mrf.mxu1  ;;  %v5407_v33 = vpop.f32.mrf.mxu3  ;;  %v5417_v7 = vpack.c.b16 %v1548_v31, %v1548_v31 }
 0x171   : > { %v1507_v3 = vadd.f32 %v5334_v10, %v1122_v27  ;;  %v832_v13 = vadd.f32 %v831_v57, %v5134_v23  ;;  %v2596_v27 = vor.u32 %v2595_v42, %v2592_v18  ;;  %v2604_v62 = vor.u32 %v2603_v24, %v2600_v44 }
 0x172   : > { %v1711_v45 = vsel %vm1550_vm2, %v1701_v0, %v1710_v59  ;;  %v1713_v57 = vshrl.u32 %v5417_v7, 16  ;;  %v1716_v0 = vshll.u32 %v5417_v7, 16  ;;  %v941_v42 = vrot.slane %v4942_v54, 1 }
 0x173   : > { %v1833_v9 = vpop.f32.mrf.mxu0  ;;  %v5411_v5 = vadd.f32 %v1831_v47, %v1507_v3 }
 0x174   : > { %v1715_v16 = vrot.slane %v1713_v57, 1  ;;  %v1718_v20 = vrot.slane %v1716_v0, 2  ;;  %v2960_v0 = vld [vmem:[%s4761_s6 + $0x10] sm:$0x8] }
 0x176   : > { %v1055_v26 = vpop.f32.mrf.mxu2 }
 0x177   : > { %v1123_v10 = vadd.f32 %v1055_v26, %v832_v13  ;;  %v2605_v26 = vsel %vm2588_vm3, %v2596_v27, %v2604_v62 }
 0x178   : > { %v834_v48 = vpop.f32.mrf.mxu1  ;;  %v5419_v39 = vpop.f32.mrf.mxu3 }
 0x179   : > { %v1508_v46 = vadd.f32 %v5353_v52, %v1123_v10  ;;  %v835_v52 = vadd.f32 %v834_v48, %v5147_v38  ;;  %v1719_v10 = vor.u32 %v1718_v20, %v1715_v16 }
 0x17b   : > { %v1836_v47 = vpop.f32.mrf.mxu0  ;;  %873 = vmatmul.bf16.gmra.mxu1 %v5375_v25  ;;  %1097 = vmatmul.bf16.gmra.mxu2 %v940_v50  ;;  %v5422_v23 = vadd.f32 %v1833_v9, %v1508_v46  ;;  %v2607_v25 = vshrl.u32 %v5426_v40, 16  ;;  %v2610_v46 = vshll.u32 %v5426_v40, 16 }
 0x17d   : > { %2833 = vmatmul.bf16.vlgmr.msra.gmra.mxu3 %v2605_v26  ;;  %v2609_v44 = vrot.slane %v2607_v25, 2  ;;  %v2612_v24 = vrot.slane %v2610_v46, 3  ;;  %v2979_v25 = vunpack.c.l.b16 %v2960_v0 }
 0x17e   : > { %1875 = vmatmul.bf16.gmra.mxu0 %v1711_v45  ;;  %v1058_v31 = vpop.f32.mrf.mxu2  ;;  %v1922_v45 = vld [vmem:[%s4761_s6 + $0x8] sm:$0xc] }
 0x17f   : > { %v1124_v37 = vadd.f32 %v1058_v31, %v835_v52  ;;  %v2613_v26 = vor.u32 %v2612_v24, %v2609_v44 }
 0x180   : > { %v836_v3 = vpop.f32.mrf.mxu1  ;;  %v5434_v18 = vpop.f32.mrf.mxu3 }
 0x181   : > { %v1509_v9 = vadd.f32 %v5370_v21, %v1124_v37  ;;  %v837_v13 = vadd.f32 %v836_v3, %v5159_v35  ;;  %v942_v21 = vsel %vm905_vm1, %v939_v63, %v941_v42  ;;  %v1941_v35 = vunpack.c.l.b16 %v1922_v45  ;;  %v5451_v3 = vld [vmem:[%s4761_s6 + $0x28] sm:$0xff] }
 0x182   : > { %v2614_v37 = vsel %vm2588_vm3, %v2604_v62, %v2613_v26  ;;  %v2616_v16 = vshrl.u32 %v5451_v3, 16  ;;  %v6101_v42 = vunpack.c.l.b16 %v5384_v22  ;;  %v2330_v22 = vrot.slane %v5393_v8, 2 }
 0x183   : > { %v1838_v51 = vpop.f32.mrf.mxu0  ;;  %v5436_v38 = vadd.f32 %v1836_v47, %v1509_v9  ;;  %v1720_v47 = vsel %vm1550_vm2, %v1710_v59, %v1719_v10  ;;  %v6100_v59 = vunpack.c.l.b16 %v4989_v32  ;;  %v3292_v32 = vld [vmem:[%s6082_s2] sm:$0xff]  ;;  %v4679_v10 = vld [vmem:[%s4761_s6 + $0x10] sm:$0xff] }
 0x184   : > { %v2980_v44 = vpack.c.b16 %v6101_v42, %v2979_v25 }
 0x185   : > { %v1942_v9 = vpack.c.b16 %v6100_v59, %v1941_v35 }
 0x186   : > { %v1060_v48 = vpop.f32.mrf.mxu2 }
 0x187   : > { %v1125_v50 = vadd.f32 %v1060_v48, %v837_v13  ;;  %v1944_v13 = vrot.slane %v1942_v9, 2  ;;  %v1945_v48 = vrot.slane %v4679_v10, 2 }
 0x188   : > { %v839_v27 = vpop.f32.mrf.mxu1  ;;  %v5445_v54 = vpop.f32.mrf.mxu3 }
 0x189   : > { %v1510_v52 = vadd.f32 %v5386_v1, %v1125_v50  ;;  %v840_v63 = vadd.f32 %v839_v27, %v5167_v53  ;;  %v4704_v53 = vmov 0   ;;  %v2618_v27 = vrot.slane %v2616_v16, 2 }
 0x18a   : > { %4670 = vset.pattern.permute.xlu0 %v4704_v53  ;;  %4671 = vset.pattern.permute.xlu1 %v4704_v53 }
 0x18b   : > { %v1841_v57 = vpop.f32.mrf.mxu0  ;;  %878 = vmatmul.bf16.gmra.mxu1 %v4678_v17  ;;  %1102 = vmatmul.bf16.gmra.mxu2 %v942_v21  ;;  %v5447_v31 = vadd.f32 %v1838_v51, %v1510_v52  ;;  %v2619_v51 = vshll.u32 %v5451_v3, 16  ;;  %v2982_v52 = vrot.slane %v2980_v44, 3 }
 0x18c   : > { %3330 = vperm.xlu0 %4670, %v3292_v32   ;;  %4672 = vset.pattern.permute.xlu2 %v4704_v53  ;;  %v3294_v32 = vld [vmem:[%s6082_s2 + $0x10] sm:$0xff] }
 0x18d   : > { %2838 = vmatmul.bf16.gmra.mxu3 %v2614_v37  ;;  %v2621_v21 = vrot.slane %v2619_v51, 3  ;;  %3340 = vperm.xlu1 %4671, %v3294_v32   ;;  %v2334_v32 = vrot.slane %v5451_v3, 2 }
 0x18e   : > { %1880 = vmatmul.bf16.gmra.mxu0 %v1720_v47  ;;  %v1063_v1 = vpop.f32.mrf.mxu2  ;;  %v2983_v47 = vrot.slane %v5393_v8, 3 }
 0x18f   : > { %v1126_v46 = vadd.f32 %v1063_v1, %v840_v63 }
 0x190   : > { %v841_v17 = vpop.f32.mrf.mxu1  ;;  %v5464_v24 = vpop.f32.mrf.mxu3 }
 0x191   : > { %v1511_v20 = vadd.f32 %v5407_v33, %v1126_v46  ;;  %v2329_v33 = vrot.slane %v5397_v11, 2  ;;  %v842_v45 = vadd.f32 %v841_v17, %v5183_v49  ;;  %v2622_v11 = vor.u32 %v2621_v21, %v2618_v27  ;;  %v3293_v49 = vld [vmem:[%s6082_s2 + $0x8] sm:$0xff]  ;;  %v5486_v17 = vld [vmem:[%s4761_s6 + $0x30] sm:$0xff] }
 0x192   : > { %v2984_v46 = vsel %vm2981_vm5, %v2982_v52, %v2983_v47  ;;  %v2625_v42 = vshrl.u32 %v5486_v17, 16  ;;  %v2628_v44 = vshll.u32 %v5486_v17, 16 }
 0x193   : > { %v1843_v62 = vpop.f32.mrf.mxu0  ;;  %v5467_v50 = vadd.f32 %v1841_v57, %v1511_v20  ;;  %v1946_v57 = vsel %vm1943_vm4, %v1944_v13, %v1945_v48  ;;  %v2331_v63 = vsel %vm1943_vm4, %v2329_v33, %v2330_v22  ;;  %v2623_v9 = vsel %vm2588_vm3, %v2613_v26, %v2622_v11 }
 0x194   : > { %3335 = vperm.xlu0 %4670, %v3293_v49   ;;  %v2332_v33 = vrot.slane %v5426_v40, 2  ;;  %v2627_v27 = vrot.slane %v2625_v42, 2  ;;  %v2630_v21 = vrot.slane %v2628_v44, 3 }
 0x196   : > { %v1065_v0 = vpop.f32.mrf.mxu2 }
 0x197   : > { %v1127_v35 = vadd.f32 %v1065_v0, %v842_v45 }
 0x198   : > { %v844_v37 = vpop.f32.mrf.mxu1  ;;  %v5480_v8 = vpop.f32.mrf.mxu3 }
 0x199   : > { %v1512_v25 = vadd.f32 %v5419_v39, %v1127_v35  ;;  %v845_v39 = vadd.f32 %v844_v37, %v5079_v29  ;;  %v4680_v29 = vld [vmem:[%s4761_s6 + $0x18] sm:$0xff] }
 0x19a   : > { %v1947_v10 = vrot.slane %v4680_v29, 2 }
 0x19b   : > { %v1846_v1 = vpop.f32.mrf.mxu0  ;;  %2055 = vmatmul.bf16.vlgmr.msra.gmra.mxu1 %v1946_v57  ;;  %2440 = vmatmul.bf16.vlgmr.msra.gmra.mxu2 %v2331_v63  ;;  %v5482_v59 = vadd.f32 %v1843_v62, %v1512_v25  ;;  %v2333_v57 = vsel %vm1943_vm4, %v2330_v22, %v2332_v33  ;;  %v2631_v63 = vor.u32 %v2630_v21, %v2627_v27  ;;  %v5516_v22 = vld [vmem:[%s4761_s6 + $0x38] sm:$0xff]  ;;  %v2987_v21 = vrot.slane %v5451_v3, 3 }
 0x19c   : > { %v1948_v37 = vsel %vm1943_vm4, %v1945_v48, %v1947_v10 }
 0x19d   : > { %2843 = vmatmul.bf16.gmra.mxu3 %v2623_v9  ;;  %v2632_v48 = vsel %vm2588_vm3, %v2622_v11, %v2631_v63  ;;  %v4681_v11 = vld [vmem:[%s4761_s6 + $0x20] sm:$0xff] }
 0x19e   : > { %3093 = vmatmul.bf16.vlgmr.msra.gmra.mxu0 %v2984_v46  ;;  %v1068_v16 = vpop.f32.mrf.mxu2 }
 0x19f   : > { %v1128_v51 = vadd.f32 %v1068_v16, %v845_v39  ;;  %v2634_v16 = vshrl.u32 %v5516_v22, 16 }
 0x1a0   : > { %v846_v20 = vpop.f32.mrf.mxu1  ;;  %v5495_v26 = vpop.f32.mrf.mxu3 }
 0x1a1   : > { %v1513_v53 = vadd.f32 %v5434_v18, %v1128_v51  ;;  %v847_v45 = vadd.f32 %v846_v20, %v5089_v43  ;;  %v2985_v18 = vrot.slane %v5426_v40, 3  ;;  %v3295_v43 = vld [vmem:[%s6082_s2 + $0x18] sm:$0xff]  ;;  %v2637_v51 = vshll.u32 %v5516_v22, 16 }
 0x1a2   : > { %3345 = vperm.xlu1 %4671, %v3295_v43   ;;  %v5540_v43 = vld [vmem:[%s4761_s6 + $0x40] sm:$0xff] }
 0x1a3   : > { %v1848_v62 = vpop.f32.mrf.mxu0  ;;  %v5497_v13 = vadd.f32 %v1846_v1, %v1513_v53  ;;  %v2986_v46 = vsel %vm2981_vm5, %v2983_v47, %v2985_v18  ;;  %v2639_v29 = vrot.slane %v2637_v51, 3 }
 0x1a6   : > { %v1070_v52 = vpop.f32.mrf.mxu2 }
 0x1a7   : > { %v1129_v0 = vadd.f32 %v1070_v52, %v847_v45 }
 0x1a8   : > { %v849_v35 = vpop.f32.mrf.mxu1  ;;  %v5510_v49 = vpop.f32.mrf.mxu3 }
 0x1a9   : > { %v1514_v25 = vadd.f32 %v5445_v54, %v1129_v0  ;;  %v850_v54 = vadd.f32 %v849_v35, %v5101_v58  ;;  %v2636_v58 = vrot.slane %v2634_v16, 2  ;;  %v2335_v35 = vsel %vm1943_vm4, %v2332_v33, %v2334_v32 }
 0x1ab   : > { %v1851_v1 = vpop.f32.mrf.mxu0  ;;  %2060 = vmatmul.bf16.gmra.mxu1 %v1948_v37  ;;  %2445 = vmatmul.bf16.gmra.mxu2 %v2333_v57  ;;  %v5512_v40 = vadd.f32 %v1848_v62, %v1514_v25  ;;  %v1949_v62 = vrot.slane %v4681_v11, 2  ;;  %v2640_v37 = vor.u32 %v2639_v29, %v2636_v58 }
 0x1ad   : > { %2848 = vmatmul.bf16.gmra.mxu3 %v2632_v48  ;;  %v2641_v3 = vsel %vm2588_vm3, %v2631_v63, %v2640_v37 }
 0x1ae   : > { %3098 = vmatmul.bf16.gmra.mxu0 %v2986_v46  ;;  %v1073_v47 = vpop.f32.mrf.mxu2 }
 0x1af   : > { %v1130_v9 = vadd.f32 %v1073_v47, %v850_v54  ;;  %v2646_v54 = vshll.u32 %v5540_v43, 16 }
 0x1b0   : > { %v851_v39 = vpop.f32.mrf.mxu1  ;;  %v5522_v44 = vpop.f32.mrf.mxu3 }
 0x1b1   : > { %v1515_v20 = vadd.f32 %v5464_v24, %v1130_v9  ;;  %v852_v27 = vadd.f32 %v851_v39, %v5111_v2  ;;  %v1950_v24 = vsel %vm1943_vm4, %v1947_v10, %v1949_v62  ;;  %v3298_v39 = vld [vmem:[%s6082_s2 + $0x30] sm:$0xff]  ;;  %v2648_v11 = vrot.slane %v2646_v54, 3 }
 0x1b2   : > { %3360 = vperm.xlu0 %4670, %v3298_v39  }
 0x1b3   : > { %v1853_v42 = vpop.f32.mrf.mxu0  ;;  %v5524_v53 = vadd.f32 %v1851_v1, %v1515_v20  ;;  %v2988_v1 = vsel %vm2981_vm5, %v2985_v18, %v2987_v21  ;;  %v2643_v18 = vshrl.u32 %v5540_v43, 16  ;;  %v2336_v20 = vrot.slane %v5486_v17, 2 }
 0x1b6   : > { %v1075_v45 = vpop.f32.mrf.mxu2 }
 0x1b7   : > { %v1131_v52 = vadd.f32 %v1075_v45, %v852_v27 }
 0x1b8   : > { %v854_v0 = vpop.f32.mrf.mxu1  ;;  %v5534_v46 = vpop.f32.mrf.mxu3 }
 0x1b9   : > { %v1516_v57 = vadd.f32 %v5480_v8, %v1131_v52  ;;  %v855_v10 = vadd.f32 %v854_v0, %v5132_v19  ;;  %v4682_v19 = vld [vmem:[%s4761_s6 + $0x28] sm:$0xff]  ;;  %v2337_v0 = vsel %vm1943_vm4, %v2334_v32, %v2336_v20 }
 0x1ba   : > { %v1951_v51 = vrot.slane %v4682_v19, 2  ;;  %v5573_v32 = vld [vmem:[%s4761_s6 + $0x48] sm:$0xff]  ;;  %v2338_v19 = vrot.slane %v5516_v22, 2 }
 0x1bb   : > { %v1856_v25 = vpop.f32.mrf.mxu0  ;;  %2065 = vmatmul.bf16.gmra.mxu1 %v1950_v24  ;;  %2450 = vmatmul.bf16.gmra.mxu2 %v2335_v35  ;;  %v5536_v2 = vadd.f32 %v1853_v42, %v1516_v57  ;;  %v2645_v42 = vrot.slane %v2643_v18, 2 }
 0x1bc   : > { %v1952_v52 = vsel %vm1943_vm4, %v1949_v62, %v1951_v51 }
 0x1bd   : > { %2853 = vmatmul.bf16.gmra.mxu3 %v2641_v3  ;;  %v2649_v24 = vor.u32 %v2648_v11, %v2645_v42 }
 0x1be   : > { %3103 = vmatmul.bf16.gmra.mxu0 %v2988_v1  ;;  %v1078_v33 = vpop.f32.mrf.mxu2 }
 0x1bf   : > { %v1132_v48 = vadd.f32 %v1078_v33, %v855_v10 }
 0x1c0   : > { %v856_v8 = vpop.f32.mrf.mxu1  ;;  %v5549_v63 = vpop.f32.mrf.mxu3 }
 0x1c1   : > { %v1517_v47 = vadd.f32 %v5495_v26, %v1132_v48  ;;  %v857_v58 = vadd.f32 %v856_v8, %v5145_v36  ;;  %v2989_v26 = vrot.slane %v5486_v17, 3  ;;  %v3296_v36 = vld [vmem:[%s6082_s2 + $0x20] sm:$0xff]  ;;  %v3299_v17 = vld [vmem:[%s6082_s2 + $0x38] sm:$0xff]  ;;  %v2652_v48 = vshrl.u32 %v5573_v32, 16 }
 0x1c2   : > { %3350 = vperm.xlu2 %4672, %v3296_v36   ;;  %3365 = vperm.xlu1 %4671, %v3299_v17   ;;  %v2655_v8 = vshll.u32 %v5573_v32, 16 }
 0x1c3   : > { %v1858_v9 = vpop.f32.mrf.mxu0  ;;  %v5551_v16 = vadd.f32 %v1856_v25, %v1517_v47  ;;  %v2990_v25 = vsel %vm2981_vm5, %v2987_v21, %v2989_v26  ;;  %v3297_v47 = vld [vmem:[%s6082_s2 + $0x28] sm:$0xff]  ;;  %v2654_v42 = vrot.slane %v2652_v48, 2 }
 0x1c4   : > { %v2657_v11 = vrot.slane %v2655_v8, 3  ;;  %v3302_v8 = vld [vmem:[%s6082_s2 + $0x50] sm:$0xff] }
 0x1c6   : > { %v1080_v29 = vpop.f32.mrf.mxu2 }
 0x1c7   : > { %v1133_v27 = vadd.f32 %v1080_v29, %v857_v58 }
 0x1c8   : > { %v859_v45 = vpop.f32.mrf.mxu1  ;;  %v5567_v1 = vpop.f32.mrf.mxu3 }
 0x1c9   : > { %v1518_v35 = vadd.f32 %v5510_v49, %v1133_v27  ;;  %v2650_v49 = vsel %vm2588_vm3, %v2640_v37, %v2649_v24  ;;  %v860_v21 = vadd.f32 %v859_v45, %v5157_v61  ;;  %v4683_v61 = vld [vmem:[%s4761_s6 + $0x30] sm:$0xff] }
 0x1ca   : > { %3355 = vperm.xlu2 %4672, %v3297_v47   ;;  %v1953_v39 = vrot.slane %v4683_v61, 2  ;;  %3380 = vperm.xlu1 %4671, %v3302_v8   ;;  %v2340_v47 = vrot.slane %v5540_v43, 2  ;;  %v3304_v8 = vld [vmem:[%s6082_s2 + $0x60] sm:$0xff] }
 0x1cb   : > { %v1861_v57 = vpop.f32.mrf.mxu0  ;;  %2070 = vmatmul.bf16.gmra.mxu1 %v1952_v52  ;;  %2455 = vmatmul.bf16.gmra.mxu2 %v2337_v0  ;;  %v5569_v62 = vadd.f32 %v1858_v9, %v1518_v35  ;;  %v2339_v0 = vsel %vm1943_vm4, %v2336_v20, %v2338_v19  ;;  %v2658_v35 = vor.u32 %v2657_v11, %v2654_v42  ;;  %v5603_v20 = vld [vmem:[%s4761_s6 + $0x50] sm:$0xff] }
 0x1cc   : > { %v1954_v52 = vsel %vm1943_vm4, %v1951_v51, %v1953_v39  ;;  %v6102_v11 = vld [vmem:[#allocation8_spill] sm:$0xff] }
 0x1cd   : > { %2858 = vmatmul.bf16.gmra.mxu3 %v2650_v49  ;;  %v2659_v51 = vsel %vm2588_vm3, %v2649_v24, %v2658_v35 }
 0x1ce   : > { %3108 = vmatmul.bf16.gmra.mxu0 %v2990_v25  ;;  %v1083_v3 = vpop.f32.mrf.mxu2 }
 0x1cf   : > { %v1134_v10 = vadd.f32 %v1083_v3, %v860_v21  ;;  %v2661_v3 = vshrl.u32 %v5603_v20, 16 }
 0x1d0   : > { %v861_v33 = vpop.f32.mrf.mxu1  ;;  %v5582_v37 = vpop.f32.mrf.mxu3 }
 0x1d1   : > { %v1519_v18 = vadd.f32 %v5522_v44, %v1134_v10  ;;  %v862_v58 = vadd.f32 %v861_v33, %v5165_v15  ;;  %v2991_v44 = vrot.slane %v5516_v22, 3  ;;  %v3301_v15 = vld [vmem:[%s6082_s2 + $0x48] sm:$0xff]  ;;  %v2664_v10 = vshll.u32 %v5603_v20, 16 }
 0x1d2   : > { %3375 = vperm.xlu0 %4670, %v3301_v15   ;;  %v2663_v61 = vrot.slane %v2661_v3, 2 }
 0x1d3   : > { %v1863_v54 = vpop.f32.mrf.mxu0  ;;  %v5584_v9 = vadd.f32 %v1861_v57, %v1519_v18  ;;  %v2992_v36 = vsel %vm2981_vm5, %v2989_v26, %v2991_v44  ;;  %v2666_v42 = vrot.slane %v2664_v10, 3 }
 0x1d6   : > { %v1085_v29 = vpop.f32.mrf.mxu2 }
 0x1d7   : > { %v1135_v27 = vadd.f32 %v1085_v29, %v862_v58 }
 0x1d8   : > { %v864_v45 = vpop.f32.mrf.mxu1  ;;  %v5597_v17 = vpop.f32.mrf.mxu3 }
 0x1d9   : > { %v1520_v57 = vadd.f32 %v5534_v46, %v1135_v27  ;;  %v865_v46 = vadd.f32 %v864_v45, %v5181_v41  ;;  %v4684_v41 = vld [vmem:[%s4761_s6 + $0x38] sm:$0xff] }
 0x1da   : > { %3390 = vperm.xlu0 %4670, %v3304_v8  }
 0x1db   : > { %v1866_v25 = vpop.f32.mrf.mxu0  ;;  %2075 = vmatmul.bf16.gmra.mxu1 %v1954_v52  ;;  %2460 = vmatmul.bf16.gmra.mxu2 %v2339_v0  ;;  %v5599_v22 = vadd.f32 %v1863_v54, %v1520_v57  ;;  %v1955_v54 = vrot.slane %v4684_v41, 2  ;;  %v2341_v0 = vsel %vm1943_vm4, %v2338_v19, %v2340_v47  ;;  %v2667_v57 = vor.u32 %v2666_v42, %v2663_v61  ;;  %v5633_v19 = vld [vmem:[%s4761_s6 + $0x58] sm:$0xff]  ;;  %v4685_v61 = vld [vmem:[%s4761_s6 + $0x40] sm:$0xff] }
 0x1dc   : > { %v2670_v3 = vshrl.u32 %v5633_v19, 16  ;;  %v2673_v10 = vshll.u32 %v5633_v19, 16  ;;  %v1957_v42 = vrot.slane %v4685_v61, 2 }
 0x1dd   : > { %2863 = vmatmul.bf16.gmra.mxu3 %v2659_v51  ;;  %v1956_v52 = vsel %vm1943_vm4, %v1953_v39, %v1955_v54  ;;  %v3300_v51 = vld [vmem:[%s6082_s2 + $0x40] sm:$0xff]  ;;  %v2668_v39 = vsel %vm2588_vm3, %v2658_v35, %v2667_v57 }
 0x1de   : > { %3113 = vmatmul.bf16.gmra.mxu0 %v2992_v36  ;;  %v1088_v26 = vpop.f32.mrf.mxu2  ;;  %3370 = vperm.xlu2 %4672, %v3300_v51  }
 0x1df   : > { %v1136_v49 = vadd.f32 %v1088_v26, %v865_v46 }
 0x1e0   : > { %v866_v21 = vpop.f32.mrf.mxu1  ;;  %v5612_v24 = vpop.f32.mrf.mxu3 }
 0x1e1   : > { %v1521_v33 = vadd.f32 %v5549_v63, %v1136_v49  ;;  %v867_v58 = vadd.f32 %v866_v21, %v6102_v11  ;;  %v2993_v63 = vrot.slane %v5540_v43, 3  ;;  %v2342_v11 = vrot.slane %v5573_v32, 2 }
 0x1e3   : > { %v1868_v48 = vpop.f32.mrf.mxu0  ;;  %v5614_v18 = vadd.f32 %v1866_v25, %v1521_v33  ;;  %v2994_v15 = vsel %vm2981_vm5, %v2991_v44, %v2993_v63  ;;  %v2343_v51 = vsel %vm1943_vm4, %v2340_v47, %v2342_v11  ;;  %v5663_v47 = vld [vmem:[%s4761_s6 + $0x60] sm:$0xff] }
 0x1e4   : > { %v2682_v8 = vshll.u32 %v5663_v47, 16 }
 0x1e6   : > { %v1090_v29 = vpop.f32.mrf.mxu2 }
 0x1e7   : > { %v1137_v27 = vadd.f32 %v1090_v29, %v867_v58  ;;  %v2672_v58 = vrot.slane %v2670_v3, 2  ;;  %v2675_v29 = vrot.slane %v2673_v10, 3 }
 0x1e8   : > { %v869_v45 = vpop.f32.mrf.mxu1  ;;  %v5627_v46 = vpop.f32.mrf.mxu3 }
 0x1e9   : > { %v1522_v25 = vadd.f32 %v5567_v1, %v1137_v27  ;;  %v6103_v1 = vld [vmem:[#allocation2_spill] sm:$0xff]  ;;  %v6104_v27 = vld [vmem:[#allocation3_spill] sm:$0xff] }
 0x1ea   : > { %v870_v26 = vadd.f32 %v869_v45, %v6103_v1 }
 0x1eb   : > { %v1871_v36 = vpop.f32.mrf.mxu0  ;;  %2080 = vmatmul.bf16.gmra.mxu1 %v1956_v52  ;;  %2465 = vmatmul.bf16.gmra.mxu2 %v2341_v0  ;;  %v5629_v43 = vadd.f32 %v1868_v48, %v1522_v25 }
 0x1ed   : > { %2868 = vmatmul.bf16.gmra.mxu3 %v2668_v39 }
 0x1ee   : > { %3118 = vmatmul.bf16.gmra.mxu0 %v2994_v15  ;;  %v1093_v44 = vpop.f32.mrf.mxu2  ;;  %v1958_v15 = vsel %vm1943_vm4, %v1955_v54, %v1957_v42 }
 0x1ef   : > { %v1138_v49 = vadd.f32 %v1093_v44, %v870_v26  ;;  %v3305_v44 = vld [vmem:[%s6082_s2 + $0x68] sm:$0xff] }
 0x1f0   : > { %v871_v21 = vpop.f32.mrf.mxu1  ;;  %v5642_v35 = vpop.f32.mrf.mxu3  ;;  %3395 = vperm.xlu1 %4671, %v3305_v44  }
 0x1f1   : > { %v1523_v33 = vadd.f32 %v5582_v37, %v1138_v49  ;;  %v872_v45 = vadd.f32 %v871_v21, %v6104_v27  ;;  %v2995_v37 = vrot.slane %v5573_v32, 3  ;;  %v4686_v27 = vld [vmem:[%s4761_s6 + $0x48] sm:$0xff] }
 0x1f3   : > { %v1873_v48 = vpop.f32.mrf.mxu0  ;;  %v5644_v41 = vadd.f32 %v1871_v36, %v1523_v33  ;;  %v2676_v36 = vor.u32 %v2675_v29, %v2672_v58  ;;  %v2996_v26 = vsel %vm2981_vm5, %v2993_v63, %v2995_v37  ;;  %v2679_v33 = vshrl.u32 %v5663_v47, 16  ;;  %v3303_v58 = vld [vmem:[%s6082_s2 + $0x58] sm:$0xff] }
 0x1f4   : > { %3385 = vperm.xlu2 %4672, %v3303_v58  }
 0x1f5   : > { %v2677_v54 = vsel %vm2588_vm3, %v2667_v57, %v2676_v36 }
 0x1f6   : > { %v1095_v52 = vpop.f32.mrf.mxu2 }
 0x1f7   : > { %v1139_v0 = vadd.f32 %v1095_v52, %v872_v45  ;;  %v1959_v45 = vrot.slane %v4686_v27, 2  ;;  %v2344_v52 = vrot.slane %v5603_v20, 2 }
 0x1f8   : > { %v874_v25 = vpop.f32.mrf.mxu1  ;;  %v5657_v49 = vpop.f32.mrf.mxu3 }
 0x1f9   : > { %v1524_v39 = vadd.f32 %v5597_v17, %v1139_v0  ;;  %v6105_v17 = vld [vmem:[#allocation4_spill] sm:$0xff]  ;;  %v2681_v0 = vrot.slane %v2679_v33, 2 }
 0x1fa   : > { %v875_v21 = vadd.f32 %v874_v25, %v6105_v17  ;;  %v2684_v25 = vrot.slane %v2682_v8, 3  ;;  %v2345_v17 = vsel %vm1943_vm4, %v2342_v11, %v2344_v52  ;;  %v5693_v11 = vld [vmem:[%s4761_s6 + $0x68] sm:$0xff] }
 0x1fb   : > { %v1876_v1 = vpop.f32.mrf.mxu0  ;;  %2085 = vmatmul.bf16.gmra.mxu1 %v1958_v15  ;;  %2470 = vmatmul.bf16.gmra.mxu2 %v2343_v51  ;;  %v5659_v32 = vadd.f32 %v1873_v48, %v1524_v39  ;;  %v6106_v15 = vld [vmem:[#allocation5_spill] sm:$0xff]  ;;  %v2688_v27 = vshrl.u32 %v5693_v11, 16 }
 0x1fd   : > { %2873 = vmatmul.bf16.gmra.mxu3 %v2677_v54  ;;  %v1960_v54 = vsel %vm1943_vm4, %v1957_v42, %v1959_v45 }
 0x1fe   : > { %3123 = vmatmul.bf16.gmra.mxu0 %v2996_v26  ;;  %v1098_v63 = vpop.f32.mrf.mxu2 }
 0x1ff   : > { %v1140_v3 = vadd.f32 %v1098_v63, %v875_v21 }
 0x200   : > { %v876_v10 = vpop.f32.mrf.mxu1  ;;  %v5672_v57 = vpop.f32.mrf.mxu3 }
 0x201   : > { %v1525_v61 = vadd.f32 %v5612_v24, %v1140_v3  ;;  %v877_v51 = vadd.f32 %v876_v10, %v6106_v15  ;;  %v2997_v24 = vrot.slane %v5603_v20, 3  ;;  %v3307_v10 = vld [vmem:[%s6082_s2 + $0x78] sm:$0xff]  ;;  %v3308_v15 = vld [vmem:[%s6082_s2 + $0x80] sm:$0xff] }
 0x202   : > { %3405 = vperm.xlu0 %4670, %v3307_v10   ;;  %3410 = vperm.xlu1 %4671, %v3308_v15  }
 0x203   : > { %v1878_v48 = vpop.f32.mrf.mxu0  ;;  %v5674_v29 = vadd.f32 %v1876_v1, %v1525_v61  ;;  %v2685_v1 = vor.u32 %v2684_v25, %v2681_v0  ;;  %v2998_v3 = vsel %vm2981_vm5, %v2995_v37, %v2997_v24  ;;  %v2691_v0 = vshll.u32 %v5693_v11, 16 }
 0x205   : > { %v2686_v42 = vsel %vm2588_vm3, %v2676_v36, %v2685_v1 }
 0x206   : > { %v1100_v39 = vpop.f32.mrf.mxu2 }
 0x207   : > { %v1141_v26 = vadd.f32 %v1100_v39, %v877_v51  ;;  %v4687_v39 = vld [vmem:[%s4761_s6 + $0x50] sm:$0xff] }
 0x208   : > { %v879_v44 = vpop.f32.mrf.mxu1  ;;  %v5687_v33 = vpop.f32.mrf.mxu3 }
 0x209   : > { %v1526_v21 = vadd.f32 %v5627_v46, %v1141_v26  ;;  %v6107_v46 = vld [vmem:[#allocation6_spill] sm:$0xff]  ;;  %v1961_v26 = vrot.slane %v4687_v39, 2 }
 0x20a   : > { %v880_v8 = vadd.f32 %v879_v44, %v6107_v46  ;;  %v2346_v44 = vrot.slane %v5633_v19, 2 }
 0x20b   : > { %v1881_v63 = vpop.f32.mrf.mxu0  ;;  %2090 = vmatmul.bf16.gmra.mxu1 %v1960_v54  ;;  %2475 = vmatmul.bf16.gmra.mxu2 %v2345_v17  ;;  %v5689_v20 = vadd.f32 %v1878_v48, %v1526_v21  ;;  %v2690_v54 = vrot.slane %v2688_v27, 2  ;;  %v2693_v17 = vrot.slane %v2691_v0, 3  ;;  %v6108_v21 = vld [vmem:[#allocation7_spill] sm:$0xff] }
 0x20d   : > { %2878 = vmatmul.bf16.gmra.mxu3 %v2686_v42 }
 0x20e   : > { %3128 = vmatmul.bf16.gmra.mxu0 %v2998_v3  ;;  %v1103_v37 = vpop.f32.mrf.mxu2 }
 0x20f   : > { %v1142_v61 = vadd.f32 %v1103_v37, %v880_v8  ;;  %v1962_v8 = vsel %vm1943_vm4, %v1959_v45, %v1961_v26  ;;  %v2347_v37 = vsel %vm1943_vm4, %v2344_v52, %v2346_v44  ;;  %v5723_v52 = vld [vmem:[%s4761_s6 + $0x70] sm:$0xff] }
 0x210   : > { %v881_v58 = vpop.f32.mrf.mxu1  ;;  %v5702_v36 = vpop.f32.mrf.mxu3 }
 0x211   : > { %v1527_v25 = vadd.f32 %v5642_v35, %v1142_v61  ;;  %v882_v3 = vadd.f32 %v881_v58, %v6108_v21  ;;  %v2999_v35 = vrot.slane %v5633_v19, 3  ;;  %v3306_v58 = vld [vmem:[%s6082_s2 + $0x70] sm:$0xff]  ;;  %v2700_v21 = vshll.u32 %v5723_v52, 16 }
 0x212   : > { %3400 = vperm.xlu2 %4672, %v3306_v58  }
 0x213   : > { %v1883_v48 = vpop.f32.mrf.mxu0  ;;  %v5704_v51 = vadd.f32 %v1881_v63, %v1527_v25  ;;  %v2694_v63 = vor.u32 %v2693_v17, %v2690_v54  ;;  %v3000_v15 = vsel %vm2981_vm5, %v2997_v24, %v2999_v35  ;;  %v3331_v54 = vpop.permute.xlu0 %3330  ;;  %v2697_v17 = vshrl.u32 %v5723_v52, 16 }
 0x215   : > { %v2695_v45 = vsel %vm2588_vm3, %v2685_v1, %v2694_v63 }
 0x216   : > { %v1105_v10 = vpop.f32.mrf.mxu2 }
 0x217   : > { %v1143_v42 = vadd.f32 %v1105_v10, %v882_v3 }
 0x218   : > { %v2056_v46 = vpop.f32.mrf.mxu1  ;;  %v5717_v27 = vpop.f32.mrf.mxu3 }
 0x219   : > { %v1528_v61 = vadd.f32 %v5657_v49, %v1143_v42  ;;  %v2146_v49 = vadd.f32 %v2056_v46, %v5206_v30  ;;  %v5735_v30 = vld [vmem:[%s4761_s6 + $0x58] sm:$0xff]  ;;  %v2348_v46 = vrot.slane %v5663_v47, 2 }
 0x21a   : > { %v1963_v42 = vrot.slane %v5735_v30, 2  ;;  %v6109_v30 = vrot.slane %v5663_v47, 3 }
 0x21b   : > { %v3094_v25 = vpop.f32.mrf.mxu0  ;;  %2095 = vmatmul.bf16.gmra.mxu1 %v1962_v8  ;;  %2480 = vmatmul.bf16.gmra.mxu2 %v2347_v37  ;;  %v5719_v19 = vadd.f32 %v1883_v48, %v1528_v61  ;;  %v3310_v48 = vld [vmem:[%s6082_s2 + $0x90] sm:$0xff]  ;;  %v2699_v8 = vrot.slane %v2697_v17, 2  ;;  %v2702_v37 = vrot.slane %v2700_v21, 3  ;;  %v2349_v17 = vsel %vm1943_vm4, %v2346_v44, %v2348_v46  ;;  %v5767_v44 = vld [vmem:[%s4761_s6 + $0x78] sm:$0xff] }
 0x21c   : > { %3420 = vperm.xlu0 %4670, %v3310_v48  }
 0x21d   : > { %2883 = vmatmul.bf16.gmra.mxu3 %v2695_v45 }
 0x21e   : > { %3133 = vmatmul.bf16.gmra.mxu0 %v3000_v15  ;;  %v2441_v24 = vpop.f32.mrf.mxu2  ;;  %v6088_v15 = vrot.slane %v5663_v47, 3 }
 0x21f   : > { %v2531_v0 = vadd.f32 %v2441_v24, %v2146_v49 }
 0x220   : > { %v2058_v39 = vpop.f32.mrf.mxu1  ;;  %v5732_v10 = vpop.f32.mrf.mxu3  ;;  %v3002_v21 = vsel %vm2981_vm5, %v2999_v35, %v6088_v15  ;;  %v3317_v15 = vld [vmem:[%s6082_s2 + $0xc8] sm:$0xff] }
 0x221   : > { %v2924_v1 = vadd.f32 %v5672_v57, %v2531_v0  ;;  %v2147_v61 = vadd.f32 %v2058_v39, %v5219_v6  ;;  %v3311_v57 = vld [vmem:[%s6082_s2 + $0x98] sm:$0xff]  ;;  %v1964_v0 = vsel %vm1943_vm4, %v1961_v26, %v1963_v42  ;;  %v5751_v6 = vor.u32 %v2702_v37, %v2699_v8 }
 0x222   : > { %3425 = vperm.xlu1 %4671, %v3311_v57  }
 0x223   : > { %v3096_v3 = vpop.f32.mrf.mxu0  ;;  %v3184_v58 = vadd.f32 %v3094_v25, %v2924_v1  ;;  %v3336_v1 = vpop.permute.xlu0 %3335 }
 0x225   : > { %v3508_v48 = vmul.f32 %v3331_v54, %v3184_v58 }
 0x226   : > { %v2443_v45 = vpop.f32.mrf.mxu2 }
 0x227   : > { %v2532_v49 = vadd.f32 %v2443_v45, %v2147_v61  ;;  %v3586_v37 = vmul.f32 %v3508_v48, %v3184_v58 }
 0x228   : > { %v2061_v24 = vpop.f32.mrf.mxu1  ;;  %v5757_v61 = vpop.f32.mrf.mxu3 }
 0x229   : > { %v2925_v25 = vadd.f32 %v5687_v33, %v2532_v49  ;;  %v2704_v33 = vsel %vm2588_vm3, %v2694_v63, %v5751_v6  ;;  %v2148_v35 = vadd.f32 %v2061_v24, %v5234_v28  ;;  %v3314_v63 = vld [vmem:[%s6082_s2 + $0xb0] sm:$0xff]  ;;  %v3341_v24 = vpop.permute.xlu1 %3340 }
 0x22a   : > { %3440 = vperm.xlu1 %4671, %v3314_v63  }
 0x22b   : > { %v3099_v39 = vpop.f32.mrf.mxu0  ;;  %2100 = vmatmul.bf16.gmra.mxu1 %v1964_v0  ;;  %2485 = vmatmul.bf16.gmra.mxu2 %v2349_v17  ;;  %v3185_v26 = vadd.f32 %v3096_v3, %v2925_v25  ;;  %v3313_v3 = vld [vmem:[%s6082_s2 + $0xa8] sm:$0xff]  ;;  %v2706_v17 = vshrl.u32 %v5767_v44, 16  ;;  %v2709_v25 = vshll.u32 %v5767_v44, 16 }
 0x22c   : > { %3435 = vperm.xlu0 %4670, %v3313_v3  }
 0x22d   : > { %v4528_v54 = vpack.c.bf16 %v3185_v26, %v3184_v58  ;;  %v3509_v8 = vmul.f32 %v3336_v1, %v3185_v26  ;;  %2888 = vmatmul.bf16.gmra.mxu3 %v2704_v33  ;;  %v2708_v3 = vrot.slane %v2706_v17, 2 }
 0x22e   : > { %3138 = vmatmul.bf16.gmra.mxu0 %v3002_v21  ;;  %v2446_v45 = vpop.f32.mrf.mxu2 }
 0x22f   : > { %4529 = vst [vmem:[%s5762_s8] sm:$0xff] %v4528_v54   ;;  %v3544_v49 = vadd.f32 %v3509_v8, %v3508_v48  ;;  %v3587_v57 = vmul.f32 %v3509_v8, %v3185_v26  ;;  %v2533_v0 = vadd.f32 %v2446_v45, %v2148_v35  ;;  %v3309_v48 = vld [vmem:[%s6082_s2 + $0x88] sm:$0xff]  ;;  %v5786_v35 = vld [vmem:[%s4761_s6 + $0x60] sm:$0xff]  ;;  %v2350_v8 = vrot.slane %v5693_v11, 2 }
 0x230   : > { %v2063_v28 = vpop.f32.mrf.mxu1  ;;  %v5783_v26 = vpop.f32.mrf.mxu3  ;;  %3415 = vperm.xlu2 %4672, %v3309_v48   ;;  %v1965_v54 = vrot.slane %v5786_v35, 2  ;;  %v2711_v45 = vrot.slane %v2709_v25, 3 }
 0x231   : > { %v3622_v58 = vadd.f32 %v3587_v57, %v3586_v37  ;;  %v2926_v21 = vadd.f32 %v5702_v36, %v2533_v0  ;;  %v2149_v37 = vadd.f32 %v2063_v28, %v5248_v60  ;;  %v3003_v57 = vrot.slane %v5693_v11, 3  ;;  %v3316_v0 = vld [vmem:[%s6082_s2 + $0xc0] sm:$0xff]  ;;  %v5880_v11 = vld [vmem:[%s4761_s6 + $0x88] sm:$0xff] }
 0x232   : > { %v1966_v60 = vsel %vm1943_vm4, %v1963_v42, %v1965_v54  ;;  %v5808_v28 = vor.u32 %v2711_v45, %v2708_v3  ;;  %3455 = vperm.xlu1 %4671, %v3317_v15   ;;  %v3319_v45 = vld [vmem:[%s6082_s2 + $0xd8] sm:$0xff] }
 0x233   : > { %v3101_v1 = vpop.f32.mrf.mxu0  ;;  %v3186_v33 = vadd.f32 %v3099_v39, %v2926_v21  ;;  %v3004_v42 = vsel %vm2981_vm5, %v6109_v30, %v3003_v57 }
 0x234   : > { %3450 = vperm.xlu0 %4670, %v3316_v0   ;;  %v2713_v15 = vsel %vm2588_vm3, %v5751_v6, %v5808_v28  ;;  %v3320_v6 = vld [vmem:[%s6082_s2 + $0xe0] sm:$0xff] }
 0x235   : > { %v3510_v36 = vmul.f32 %v3341_v24, %v3186_v33 }
 0x236   : > { %v2448_v63 = vpop.f32.mrf.mxu2 }
 0x237   : > { %v3545_v39 = vadd.f32 %v3544_v49, %v3510_v36  ;;  %v3588_v21 = vmul.f32 %v3510_v36, %v3186_v33  ;;  %v2534_v48 = vadd.f32 %v2448_v63, %v2149_v37  ;;  %v2351_v49 = vsel %vm1943_vm4, %v2348_v46, %v2350_v8  ;;  %v3346_v36 = vpop.permute.xlu1 %3345 }
 0x238   : > { %v2066_v17 = vpop.f32.mrf.mxu1  ;;  %v5816_v0 = vpop.f32.mrf.mxu3 }
 0x239   : > { %v3623_v24 = vadd.f32 %v3622_v58, %v3588_v21  ;;  %v2927_v25 = vadd.f32 %v5717_v27, %v2534_v48  ;;  %v5822_v27 = vld [vmem:[%s4761_s6 + $0x80] sm:$0xff]  ;;  %v2150_v58 = vadd.f32 %v2066_v17, %v5257_v14  ;;  %v3351_v14 = vpop.permute.xlu2 %3350 }
 0x23a   : > { %3470 = vperm.xlu1 %4671, %v3320_v6   ;;  %v2718_v17 = vshll.u32 %v5822_v27, 16 }
 0x23b   : > { %v3104_v37 = vpop.f32.mrf.mxu0  ;;  %2105 = vmatmul.bf16.gmra.mxu1 %v1966_v60  ;;  %2490 = vmatmul.bf16.gmra.mxu2 %v2351_v49  ;;  %v3187_v46 = vadd.f32 %v3101_v1, %v2927_v25 }
 0x23c   : > { %3465 = vperm.xlu0 %4670, %v3319_v45   ;;  %v3005_v45 = vrot.slane %v5723_v52, 3 }
 0x23d   : > { %v4533_v3 = vpack.c.bf16 %v3187_v46, %v3186_v33  ;;  %v3511_v47 = vmul.f32 %v3346_v36, %v3187_v46  ;;  %2893 = vmatmul.bf16.gmra.mxu3 %v2713_v15  ;;  %v2715_v33 = vshrl.u32 %v5822_v27, 16 }
 0x23e   : > { %3143 = vmatmul.bf16.gmra.mxu0 %v3004_v42  ;;  %v2451_v63 = vpop.f32.mrf.mxu2  ;;  %v3006_v35 = vsel %vm2981_vm5, %v3003_v57, %v3005_v45 }
 0x23f   : > { %4618 = vst [vmem:[%s5762_s8 + $0x8] sm:$0xff] %v4533_v3   ;;  %v3546_v21 = vadd.f32 %v3545_v39, %v3511_v47  ;;  %v3589_v1 = vmul.f32 %v3511_v47, %v3187_v46  ;;  %v2535_v48 = vadd.f32 %v2451_v63, %v2150_v58  ;;  %v3312_v39 = vld [vmem:[%s6082_s2 + $0xa0] sm:$0xff]  ;;  %v5841_v46 = vld [vmem:[%s4761_s6 + $0x68] sm:$0xff]  ;;  %v2352_v58 = vrot.slane %v5723_v52, 2  ;;  %v3322_v63 = vld [vmem:[%s6082_s2 + $0xf0] sm:$0xff] }
 0x240   : > { %v2068_v60 = vpop.f32.mrf.mxu1  ;;  %v5838_v42 = vpop.f32.mrf.mxu3  ;;  %3430 = vperm.xlu2 %4672, %v3312_v39   ;;  %v1967_v15 = vrot.slane %v5841_v46, 2  ;;  %v2717_v3 = vrot.slane %v2715_v33, 2  ;;  %v2720_v47 = vrot.slane %v2718_v17, 3  ;;  %v5932_v52 = vld [vmem:[%s4761_s6 + $0x90] sm:$0xff] }
 0x241   : > { %v3624_v49 = vadd.f32 %v3623_v24, %v3589_v1  ;;  %v2928_v25 = vadd.f32 %v5732_v10, %v2535_v48  ;;  %v2151_v24 = vadd.f32 %v2068_v60, %v5271_v4  ;;  %v2353_v60 = vsel %vm1943_vm4, %v2350_v8, %v2352_v58  ;;  %v3356_v8 = vpop.permute.xlu2 %3355 }
 0x242   : > { %v1968_v4 = vsel %vm1943_vm4, %v1965_v54, %v1967_v15  ;;  %v3315_v54 = vld [vmem:[%s6082_s2 + $0xb8] sm:$0xff] }
 0x243   : > { %v3106_v30 = vpop.f32.mrf.mxu0  ;;  %v3188_v36 = vadd.f32 %v3104_v37, %v2928_v25  ;;  %v3323_v25 = vld [vmem:[%s6082_s2 + $0xf8] sm:$0xff] }
 0x244   : > { %3480 = vperm.xlu0 %4670, %v3322_v63   ;;  %3485 = vperm.xlu1 %4671, %v3323_v25  }
 0x245   : > { %v3512_v10 = vmul.f32 %v3351_v14, %v3188_v36 }
 0x246   : > { %v2453_v1 = vpop.f32.mrf.mxu2 }
 0x247   : > { %v3547_v37 = vadd.f32 %v3546_v21, %v3512_v10  ;;  %v3590_v48 = vmul.f32 %v3512_v10, %v3188_v36  ;;  %v2536_v6 = vadd.f32 %v2453_v1, %v2151_v24  ;;  %v5863_v21 = vor.u32 %v2720_v47, %v2717_v3  ;;  %v3325_v10 = vld [vmem:[%s6082_s2 + $0x108] sm:$0xff] }
 0x248   : > { %v2071_v33 = vpop.f32.mrf.mxu1  ;;  %v5874_v24 = vpop.f32.mrf.mxu3  ;;  %3445 = vperm.xlu2 %4672, %v3315_v54   ;;  %v5899_v54 = vld [vmem:[%s4761_s6 + $0x70] sm:$0xff] }
 0x249   : > { %v3625_v14 = vadd.f32 %v3624_v49, %v3590_v48  ;;  %v2929_v17 = vadd.f32 %v5757_v61, %v2536_v6  ;;  %v2722_v61 = vsel %vm2588_vm3, %v5808_v28, %v5863_v21  ;;  %v2152_v57 = vadd.f32 %v2071_v33, %v5284_v56  ;;  %v3326_v28 = vld [vmem:[%s6082_s2 + $0x110] sm:$0xff] }
 0x24a   : > { %v2724_v56 = vshrl.u32 %v5880_v11, 16 }
 0x24b   : > { %v3109_v39 = vpop.f32.mrf.mxu0  ;;  %2110 = vmatmul.bf16.gmra.mxu1 %v1968_v4  ;;  %2495 = vmatmul.bf16.gmra.mxu2 %v2353_v60  ;;  %v3189_v49 = vadd.f32 %v3106_v30, %v2929_v17  ;;  %v3361_v60 = vpop.permute.xlu0 %3360 }
 0x24c   : > { %3495 = vperm.xlu0 %4670, %v3325_v10   ;;  %3500 = vperm.xlu1 %4671, %v3326_v28  }
 0x24d   : > { %v4538_v3 = vpack.c.bf16 %v3189_v49, %v3188_v36  ;;  %v3513_v47 = vmul.f32 %v3356_v8, %v3189_v49  ;;  %2898 = vmatmul.bf16.gmra.mxu3 %v2722_v61  ;;  %v2727_v36 = vshll.u32 %v5880_v11, 16  ;;  %v1969_v8 = vrot.slane %v5899_v54, 2  ;;  %v3327_v54 = vld [vmem:[%s6082_s2 + $0x118] sm:$0xff] }
 0x24e   : > { %3148 = vmatmul.bf16.gmra.mxu0 %v3006_v35  ;;  %v2456_v63 = vpop.f32.mrf.mxu2  ;;  %v2726_v61 = vrot.slane %v2724_v56, 2 }
 0x24f   : > { %4619 = vst [vmem:[%s5762_s8 + $0x10] sm:$0xff] %v4538_v3   ;;  %v3548_v1 = vadd.f32 %v3547_v37, %v3513_v47  ;;  %v3591_v30 = vmul.f32 %v3513_v47, %v3189_v49  ;;  %v2537_v48 = vadd.f32 %v2456_v63, %v2152_v57  ;;  %v3318_v37 = vld [vmem:[%s6082_s2 + $0xd0] sm:$0xff]  ;;  %v2354_v49 = vrot.slane %v5767_v44, 2 }
 0x250   : > { %v2073_v6 = vpop.f32.mrf.mxu1  ;;  %v5896_v17 = vpop.f32.mrf.mxu3  ;;  %3460 = vperm.xlu2 %4672, %v3318_v37   ;;  %v3007_v3 = vrot.slane %v5767_v44, 3  ;;  %v6110_v44 = vld [vmem:[#allocation9_spill] sm:$0xff] }
 0x251   : > { %v3626_v25 = vadd.f32 %v3625_v14, %v3591_v30  ;;  %v2930_v33 = vadd.f32 %v5783_v26, %v2537_v48  ;;  %v2729_v14 = vrot.slane %v2727_v36, 3  ;;  %v2153_v26 = vadd.f32 %v2073_v6, %v5301_v12  ;;  %v3366_v36 = vpop.permute.xlu1 %3365 }
 0x252   : > { %v2355_v12 = vsel %vm1943_vm4, %v2352_v58, %v2354_v49  ;;  %v3008_v46 = vsel %vm2981_vm5, %v3005_v45, %v3007_v3 }
 0x253   : > { %v3111_v4 = vpop.f32.mrf.mxu0  ;;  %v3190_v35 = vadd.f32 %v3109_v39, %v2930_v33  ;;  %v1970_v39 = vsel %vm1943_vm4, %v1967_v15, %v1969_v8  ;;  %v5915_v28 = vor.u32 %v2729_v14, %v2726_v61  ;;  %v3321_v15 = vld [vmem:[%s6082_s2 + $0xe8] sm:$0xff] }
 0x255   : > { %v3514_v57 = vmul.f32 %v3361_v60, %v3190_v35 }
 0x256   : > { %v2458_v47 = vpop.f32.mrf.mxu2 }
 0x257   : > { %v3549_v10 = vadd.f32 %v3548_v1, %v3514_v57  ;;  %v3592_v63 = vmul.f32 %v3514_v57, %v3190_v35  ;;  %v2538_v30 = vadd.f32 %v2458_v47, %v2153_v26  ;;  %v2736_v47 = vshll.u32 %v5932_v52, 16 }
 0x258   : > { %v2076_v48 = vpop.f32.mrf.mxu1  ;;  %v5926_v33 = vpop.f32.mrf.mxu3  ;;  %3475 = vperm.xlu2 %4672, %v3321_v15  }
 0x259   : > { %v3627_v6 = vadd.f32 %v3626_v25, %v3592_v63  ;;  %v2931_v1 = vadd.f32 %v5816_v0, %v2538_v30  ;;  %v2731_v0 = vsel %vm2588_vm3, %v5863_v21, %v5915_v28  ;;  %v2154_v45 = vadd.f32 %v2076_v48, %v5313_v55  ;;  %v3324_v55 = vld [vmem:[%s6082_s2 + $0x100] sm:$0xff] }
 0x25b   : > { %v3114_v56 = vpop.f32.mrf.mxu0  ;;  %2115 = vmatmul.bf16.gmra.mxu1 %v1970_v39  ;;  %2500 = vmatmul.bf16.gmra.mxu2 %v2355_v12  ;;  %v3191_v58 = vadd.f32 %v3111_v4, %v2931_v1  ;;  %v2733_v4 = vshrl.u32 %v5932_v52, 16  ;;  %v5945_v39 = vld [vmem:[%s4761_s6 + $0x78] sm:$0xff]  ;;  %v2356_v1 = vrot.slane %v5822_v27, 2 }
 0x25c   : > { %v1971_v12 = vrot.slane %v5945_v39, 2 }
 0x25d   : > { %v4543_v25 = vpack.c.bf16 %v3191_v58, %v3190_v35  ;;  %v3515_v37 = vmul.f32 %v3366_v36, %v3191_v58  ;;  %2903 = vmatmul.bf16.gmra.mxu3 %v2731_v0  ;;  %v3371_v35 = vpop.permute.xlu2 %3370  ;;  %v3009_v36 = vrot.slane %v5822_v27, 3 }
 0x25e   : > { %3153 = vmatmul.bf16.gmra.mxu0 %v3008_v46  ;;  %v2461_v60 = vpop.f32.mrf.mxu2  ;;  %v2735_v46 = vrot.slane %v2733_v4, 2  ;;  %v5969_v4 = vld [vmem:[%s4761_s6 + $0x98] sm:$0xff] }
 0x25f   : > { %4620 = vst [vmem:[%s5762_s8 + $0x18] sm:$0xff] %v4543_v25   ;;  %v3550_v61 = vadd.f32 %v3549_v10, %v3515_v37  ;;  %v3593_v14 = vmul.f32 %v3515_v37, %v3191_v58  ;;  %v2539_v26 = vadd.f32 %v2461_v60, %v2154_v45  ;;  %v2357_v60 = vsel %vm1943_vm4, %v2354_v49, %v2356_v1 }
 0x260   : > { %v2078_v57 = vpop.f32.mrf.mxu1  ;;  %v5942_v48 = vpop.f32.mrf.mxu3  ;;  %3490 = vperm.xlu2 %4672, %v3324_v55   ;;  %v3010_v27 = vsel %vm2981_vm5, %v3007_v3, %v3009_v36 }
 0x261   : > { %v3628_v63 = vadd.f32 %v3627_v6, %v3593_v14  ;;  %v2932_v21 = vadd.f32 %v5838_v42, %v2539_v26  ;;  %v2738_v6 = vrot.slane %v2736_v47, 3  ;;  %v2155_v42 = vadd.f32 %v2078_v57, %v5327_v34 }
 0x263   : > { %v3116_v30 = vpop.f32.mrf.mxu0  ;;  %v3192_v10 = vadd.f32 %v3114_v56, %v2932_v21  ;;  %v1972_v56 = vsel %vm1943_vm4, %v1969_v8, %v1971_v12  ;;  %v2739_v14 = vor.u32 %v2738_v6, %v2735_v46  ;;  %v3376_v8 = vpop.permute.xlu0 %3375  ;;  %v2745_v6 = vshll.u32 %v5969_v4, 16 }
 0x265   : > { %v3516_v15 = vmul.f32 %v3371_v35, %v3192_v10 }
 0x266   : > { %v2463_v58 = vpop.f32.mrf.mxu2 }
 0x267   : > { %v3551_v0 = vadd.f32 %v3550_v61, %v3516_v15  ;;  %v3594_v45 = vmul.f32 %v3516_v15, %v3192_v10  ;;  %v2540_v25 = vadd.f32 %v2463_v58, %v2155_v42  ;;  %v3381_v58 = vpop.permute.xlu1 %3380 }
 0x268   : > { %v2081_v37 = vpop.f32.mrf.mxu1  ;;  %v5964_v61 = vpop.f32.mrf.mxu3  ;;  %3505 = vperm.xlu2 %4672, %v3327_v54  }
 0x269   : > { %v3629_v26 = vadd.f32 %v3628_v63, %v3594_v45  ;;  %v2933_v34 = vadd.f32 %v5874_v24, %v2540_v25  ;;  %v2740_v24 = vsel %vm2588_vm3, %v5915_v28, %v2739_v14  ;;  %v2156_v47 = vadd.f32 %v2081_v37, %v6110_v44  ;;  %v5979_v25 = vld [vmem:[%s4761_s6 + $0x80] sm:$0xff] }
 0x26a   : > { %v2358_v37 = vrot.slane %v5880_v11, 2 }
 0x26b   : > { %v3119_v57 = vpop.f32.mrf.mxu0  ;;  %2120 = vmatmul.bf16.gmra.mxu1 %v1972_v56  ;;  %2505 = vmatmul.bf16.gmra.mxu2 %v2357_v60  ;;  %v3193_v49 = vadd.f32 %v3116_v30, %v2933_v34  ;;  %v2742_v30 = vshrl.u32 %v5969_v4, 16  ;;  %v2747_v60 = vrot.slane %v2745_v6, 3  ;;  %v6111_v34 = vld [vmem:[#allocation10_spill] sm:$0xff] }
 0x26d   : > { %v4548_v3 = vpack.c.bf16 %v3193_v49, %v3192_v10  ;;  %v3517_v63 = vmul.f32 %v3376_v8, %v3193_v49  ;;  %2908 = vmatmul.bf16.gmra.mxu3 %v2740_v24  ;;  %v2744_v56 = vrot.slane %v2742_v30, 2  ;;  %v3386_v30 = vpop.permute.xlu2 %3385 }
 0x26e   : > { %3158 = vmatmul.bf16.gmra.mxu0 %v3010_v27  ;;  %v2466_v21 = vpop.f32.mrf.mxu2 }
 0x26f   : > { %4621 = vst [vmem:[%s5762_s8 + $0x20] sm:$0xff] %v4548_v3   ;;  %v3552_v55 = vadd.f32 %v3551_v0, %v3517_v63  ;;  %v3595_v35 = vmul.f32 %v3517_v63, %v3193_v49  ;;  %v2541_v39 = vadd.f32 %v2466_v21, %v2156_v47  ;;  %v1973_v0 = vrot.slane %v5979_v25, 2 }
 0x270   : > { %v2083_v46 = vpop.f32.mrf.mxu1  ;;  %v5976_v45 = vpop.f32.mrf.mxu3  ;;  %v2359_v47 = vsel %vm1943_vm4, %v2356_v1, %v2358_v37  ;;  %v2748_v3 = vor.u32 %v2747_v60, %v2744_v56 }
 0x271   : > { %v3630_v42 = vadd.f32 %v3629_v26, %v3595_v35  ;;  %v2934_v28 = vadd.f32 %v5896_v17, %v2541_v39  ;;  %v2157_v27 = vadd.f32 %v2083_v46, %v6111_v34  ;;  %v3011_v26 = vrot.slane %v5880_v11, 3  ;;  %v2567_v46 = vld [vmem:[%s4761_s6 + $0xa0] sm:$0x7] }
 0x273   : > { %v3121_v15 = vpop.f32.mrf.mxu0  ;;  %v3194_v10 = vadd.f32 %v3119_v57, %v2934_v28  ;;  %v1974_v57 = vsel %vm1943_vm4, %v1971_v12, %v1973_v0  ;;  %v3012_v39 = vsel %vm2981_vm5, %v3009_v36, %v3011_v26  ;;  %v2749_v12 = vsel %vm2588_vm3, %v2739_v14, %v2748_v3 }
 0x275   : > { %v3518_v54 = vmul.f32 %v3381_v58, %v3194_v10 }
 0x276   : > { %v2468_v17 = vpop.f32.mrf.mxu2 }
 0x277   : > { %v3553_v8 = vadd.f32 %v3552_v55, %v3518_v54  ;;  %v3596_v49 = vmul.f32 %v3518_v54, %v3194_v10  ;;  %v2542_v24 = vadd.f32 %v2468_v17, %v2157_v27  ;;  %v2586_v55 = vunpack.c.l.b16 %v2567_v46 }
 0x278   : > { %v2086_v44 = vpop.f32.mrf.mxu1  ;;  %v5990_v11 = vpop.f32.mrf.mxu3 }
 0x279   : > { %v3631_v63 = vadd.f32 %v3630_v42, %v3596_v49  ;;  %v2935_v21 = vadd.f32 %v5926_v33, %v2542_v24  ;;  %v5993_v1 = vpack.c.b16 %v2586_v55, %v2586_v55  ;;  %v6112_v42 = vld [vmem:[#allocation11_spill] sm:$0xff]  ;;  %v3391_v49 = vpop.permute.xlu0 %3390  ;;  %v3013_v55 = vrot.slane %v5932_v52, 3 }
 0x27a   : > { %v2158_v28 = vadd.f32 %v2086_v44, %v6112_v42  ;;  %v4694_v44 = vld [vmem:[%s4761_s6 + $0x88] sm:$0xff] }
 0x27b   : > { %v3124_v35 = vpop.f32.mrf.mxu0  ;;  %2125 = vmatmul.bf16.gmra.mxu1 %v1974_v57  ;;  %2510 = vmatmul.bf16.gmra.mxu2 %v2359_v47  ;;  %v3195_v6 = vadd.f32 %v3121_v15, %v2935_v21  ;;  %v2751_v27 = vshrl.u32 %v5993_v1, 16  ;;  %v2754_v15 = vshll.u32 %v5993_v1, 16  ;;  %v1975_v57 = vrot.slane %v4694_v44, 2 }
 0x27d   : > { %v4553_v33 = vpack.c.bf16 %v3195_v6, %v3194_v10  ;;  %v3519_v58 = vmul.f32 %v3386_v30, %v3195_v6  ;;  %2913 = vmatmul.bf16.gmra.mxu3 %v2749_v12  ;;  %v2753_v47 = vrot.slane %v2751_v27, 2  ;;  %v2756_v21 = vrot.slane %v2754_v15, 3 }
 0x27e   : > { %3163 = vmatmul.bf16.gmra.mxu0 %v3012_v39  ;;  %v2471_v25 = vpop.f32.mrf.mxu2  ;;  %v6113_v39 = vld [vmem:[#allocation12_spill] sm:$0xff] }
 0x27f   : > { %4622 = vst [vmem:[%s5762_s8 + $0x28] sm:$0xff] %v4553_v33   ;;  %v3554_v36 = vadd.f32 %v3553_v8, %v3519_v58  ;;  %v3597_v56 = vmul.f32 %v3519_v58, %v3195_v6  ;;  %v2543_v60 = vadd.f32 %v2471_v25, %v2158_v28  ;;  %v2360_v8 = vrot.slane %v5932_v52, 2 }
 0x280   : > { %v2088_v34 = vpop.f32.mrf.mxu1  ;;  %v6000_v24 = vpop.f32.mrf.mxu3  ;;  %v1976_v28 = vsel %vm1943_vm4, %v1973_v0, %v1975_v57  ;;  %v2757_v33 = vor.u32 %v2756_v21, %v2753_v47 }
 0x281   : > { %v3632_v54 = vadd.f32 %v3631_v63, %v3597_v56  ;;  %v2936_v14 = vadd.f32 %v5942_v48, %v2543_v60  ;;  %v2159_v46 = vadd.f32 %v2088_v34, %v6113_v39  ;;  %v3014_v60 = vsel %vm2981_vm5, %v3011_v26, %v3013_v55  ;;  %v3396_v34 = vpop.permute.xlu1 %3395  ;;  %v3401_v21 = vpop.permute.xlu2 %3400 }
 0x283   : > { %v3126_v17 = vpop.f32.mrf.mxu0  ;;  %v3196_v10 = vadd.f32 %v3124_v35, %v2936_v14  ;;  %v2361_v35 = vsel %vm1943_vm4, %v2358_v37, %v2360_v8 }
 0x285   : > { %v3520_v30 = vmul.f32 %v3391_v49, %v3196_v10 }
 0x286   : > { %v2473_v6 = vpop.f32.mrf.mxu2 }
 0x287   : > { %v3555_v63 = vadd.f32 %v3554_v36, %v3520_v30  ;;  %v3598_v12 = vmul.f32 %v3520_v30, %v3196_v10  ;;  %v2544_v48 = vadd.f32 %v2473_v6, %v2159_v46  ;;  %v2758_v36 = vsel %vm2588_vm3, %v2748_v3, %v2757_v33 }
 0x288   : > { %v2091_v42 = vpop.f32.mrf.mxu1  ;;  %v6010_v27 = vpop.f32.mrf.mxu3 }
 0x289   : > { %v3633_v58 = vadd.f32 %v3632_v54, %v3598_v12  ;;  %v2937_v25 = vadd.f32 %v5964_v61, %v2544_v48  ;;  %v2160_v37 = vadd.f32 %v2091_v42, %v5411_v5  ;;  %v2362_v5 = vrot.slane %v5969_v4, 2 }
 0x28b   : > { %v3129_v56 = vpop.f32.mrf.mxu0  ;;  %v3197_v52 = vadd.f32 %v3126_v17, %v2937_v25  ;;  %2130 = vmatmul.bf16.gmra.mxu1 %v1976_v28  ;;  %2515 = vmatmul.bf16.gmra.mxu2 %v2361_v35  ;;  %v2363_v33 = vsel %vm1943_vm4, %v2360_v8, %v2362_v5 }
 0x28d   : > { %v4558_v0 = vpack.c.bf16 %v3197_v52, %v3196_v10  ;;  %v3521_v15 = vmul.f32 %v3396_v34, %v3197_v52  ;;  %2918 = vmatmul.bf16.gmra.mxu3 %v2758_v36  ;;  %v4695_v10 = vld [vmem:[%s4761_s6 + $0x90] sm:$0xff]  ;;  %v3406_v34 = vpop.permute.xlu0 %3405 }
 0x28e   : > { %3168 = vmatmul.bf16.gmra.mxu0 %v3014_v60  ;;  %v2476_v54 = vpop.f32.mrf.mxu2  ;;  %v1977_v46 = vrot.slane %v4695_v10, 2 }
 0x28f   : > { %4623 = vst [vmem:[%s5762_s8 + $0x30] sm:$0xff] %v4558_v0   ;;  %v3556_v61 = vadd.f32 %v3555_v63, %v3521_v15  ;;  %v3599_v14 = vmul.f32 %v3521_v15, %v3197_v52  ;;  %v2545_v49 = vadd.f32 %v2476_v54, %v2160_v37  ;;  %v3015_v63 = vrot.slane %v5969_v4, 3 }
 0x290   : > { %v2093_v26 = vpop.f32.mrf.mxu1  ;;  %v6016_v39 = vpop.f32.mrf.mxu3  ;;  %v1978_v35 = vsel %vm1943_vm4, %v1975_v57, %v1977_v46 }
 0x291   : > { %v3634_v44 = vadd.f32 %v3633_v58, %v3599_v14  ;;  %v2938_v17 = vadd.f32 %v5976_v45, %v2545_v49  ;;  %v2161_v30 = vadd.f32 %v2093_v26, %v5422_v23  ;;  %v3016_v60 = vsel %vm2981_vm5, %v3013_v55, %v3015_v63  ;;  %v2218_v23 = vld [vmem:[%s4761_s6 + $0xa0] sm:$0x3] }
 0x292   : > { %v2309_v36 = vunpack.c.l.b16 %v2218_v23 }
 0x293   : > { %v3131_v47 = vpop.f32.mrf.mxu0  ;;  %v3198_v3 = vadd.f32 %v3129_v56, %v2938_v17 }
 0x294   : > { %v2328_v55 = vpack.c.b16 %v2309_v36, %v2309_v36 }
 0x295   : > { %v3522_v6 = vmul.f32 %v3401_v21, %v3198_v3  ;;  %v1979_v21 = vrot.slane %v5417_v7, 2 }
 0x296   : > { %v2478_v12 = vpop.f32.mrf.mxu2 }
 0x297   : > { %v3557_v48 = vadd.f32 %v3556_v61, %v3522_v6  ;;  %v3600_v42 = vmul.f32 %v3522_v6, %v3198_v3  ;;  %v2546_v28 = vadd.f32 %v2478_v12, %v2161_v30  ;;  %v3017_v30 = vrot.slane %v5993_v1, 3 }
 0x298   : > { %v2096_v45 = vpop.f32.mrf.mxu1  ;;  %v6027_v52 = vpop.f32.mrf.mxu3 }
 0x299   : > { %v3635_v58 = vadd.f32 %v3634_v44, %v3600_v42  ;;  %v2939_v25 = vadd.f32 %v5990_v11, %v2546_v28  ;;  %v2162_v57 = vadd.f32 %v2096_v45, %v5436_v38  ;;  %v3411_v44 = vpop.permute.xlu1 %3410  ;;  %v1980_v45 = vsel %vm1943_vm4, %v1977_v46, %v1979_v21 }
 0x29b   : > { %v3134_v56 = vpop.f32.mrf.mxu0  ;;  %v3199_v4 = vadd.f32 %v3131_v47, %v2939_v25  ;;  %2135 = vmatmul.bf16.gmra.mxu1 %v1978_v35  ;;  %2520 = vmatmul.bf16.gmra.mxu2 %v2363_v33 }
 0x29d   : > { %v4563_v0 = vpack.c.bf16 %v3199_v4, %v3198_v3  ;;  %v3523_v8 = vmul.f32 %v3406_v34, %v3199_v4  ;;  %v2364_v3 = vrot.slane %v2328_v55, 2 }
 0x29e   : > { %3173 = vmatmul.bf16.gmra.mxu0 %v3016_v60  ;;  %v2481_v37 = vpop.f32.mrf.mxu2 }
 0x29f   : > { %4624 = vst [vmem:[%s5762_s8 + $0x38] sm:$0xff] %v4563_v0   ;;  %v3558_v15 = vadd.f32 %v3557_v48, %v3523_v8  ;;  %v3601_v11 = vmul.f32 %v3523_v8, %v3199_v4  ;;  %v2547_v54 = vadd.f32 %v2481_v37, %v2162_v57  ;;  %v3421_v57 = vpop.permute.xlu0 %3420 }
 0x2a0   : > { %v2098_v61 = vpop.f32.mrf.mxu1  ;;  %v2884_v17 = vpop.f32.mrf.mxu3 }
 0x2a1   : > { %v3636_v14 = vadd.f32 %v3635_v58, %v3601_v11  ;;  %v2940_v49 = vadd.f32 %v6000_v24, %v2547_v54  ;;  %v2163_v38 = vadd.f32 %v2098_v61, %v5447_v31  ;;  %v2365_v24 = vsel %vm1943_vm4, %v2362_v5, %v2364_v3  ;;  %v3416_v31 = vpop.permute.xlu2 %3415  ;;  %v3426_v21 = vpop.permute.xlu1 %3425 }
 0x2a2   : > { %v3018_v58 = vsel %vm2981_vm5, %v3015_v63, %v3017_v30 }
 0x2a3   : > { %v3136_v26 = vpop.f32.mrf.mxu0  ;;  %v3200_v47 = vadd.f32 %v3134_v56, %v2940_v49 }
 0x2a5   : > { %v3524_v10 = vmul.f32 %v3411_v44, %v3200_v47 }
 0x2a6   : > { %v2483_v6 = vpop.f32.mrf.mxu2 }
 0x2a7   : > { %v3559_v12 = vadd.f32 %v3558_v15, %v3524_v10  ;;  %v3602_v48 = vmul.f32 %v3524_v10, %v3200_v47  ;;  %v2548_v42 = vadd.f32 %v2483_v6, %v2163_v38 }
 0x2a8   : > { %v2101_v28 = vpop.f32.mrf.mxu1  ;;  %v2886_v1 = vpop.f32.mrf.mxu3 }
 0x2a9   : > { %v3637_v35 = vadd.f32 %v3636_v14, %v3602_v48  ;;  %v2941_v33 = vadd.f32 %v6010_v27, %v2548_v42  ;;  %v2164_v60 = vadd.f32 %v2101_v28, %v5467_v50 }
 0x2ab   : > { %v3139_v7 = vpop.f32.mrf.mxu0  ;;  %v3201_v25 = vadd.f32 %v3136_v26, %v2941_v33  ;;  %2140 = vmatmul.bf16.gmra.mxu1 %v1980_v45  ;;  %2525 = vmatmul.bf16.gmra.mxu2 %v2365_v24 }
 0x2ad   : > { %v4568_v56 = vpack.c.bf16 %v3201_v25, %v3200_v47  ;;  %v3525_v23 = vmul.f32 %v3416_v31, %v3201_v25 }
 0x2ae   : > { %3178 = vmatmul.bf16.gmra.mxu0 %v3018_v58  ;;  %v2486_v46 = vpop.f32.mrf.mxu2 }
 0x2af   : > { %4625 = vst [vmem:[%s5762_s8 + $0x40] sm:$0xff] %v4568_v56   ;;  %v3560_v34 = vadd.f32 %v3559_v12, %v3525_v23  ;;  %v3603_v5 = vmul.f32 %v3525_v23, %v3201_v25  ;;  %v2549_v4 = vadd.f32 %v2486_v46, %v2164_v60 }
 0x2b0   : > { %v2103_v36 = vpop.f32.mrf.mxu1  ;;  %v2889_v54 = vpop.f32.mrf.mxu3 }
 0x2b1   : > { %v3638_v27 = vadd.f32 %v3637_v35, %v3603_v5  ;;  %v2942_v0 = vadd.f32 %v6016_v39, %v2549_v4  ;;  %v2165_v37 = vadd.f32 %v2103_v36, %v5482_v59  ;;  %v3431_v35 = vpop.permute.xlu2 %3430  ;;  %v3436_v5 = vpop.permute.xlu0 %3435 }
 0x2b3   : > { %v3141_v63 = vpop.f32.mrf.mxu0  ;;  %v3202_v8 = vadd.f32 %v3139_v7, %v2942_v0 }
 0x2b5   : > { %v3526_v15 = vmul.f32 %v3421_v57, %v3202_v8 }
 0x2b6   : > { %v2488_v11 = vpop.f32.mrf.mxu2 }
 0x2b7   : > { %v3561_v50 = vadd.f32 %v3560_v34, %v3526_v15  ;;  %v3604_v61 = vmul.f32 %v3526_v15, %v3202_v8  ;;  %v2550_v55 = vadd.f32 %v2488_v11, %v2165_v37 }
 0x2b8   : > { %v2106_v14 = vpop.f32.mrf.mxu1  ;;  %v2891_v48 = vpop.f32.mrf.mxu3 }
 0x2b9   : > { %v3639_v49 = vadd.f32 %v3638_v27, %v3604_v61  ;;  %v2943_v26 = vadd.f32 %v6027_v52, %v2550_v55  ;;  %v2166_v3 = vadd.f32 %v2106_v14, %v5497_v13 }
 0x2bb   : > { %v3144_v44 = vpop.f32.mrf.mxu0  ;;  %v3203_v47 = vadd.f32 %v3141_v63, %v2943_v26 }
 0x2bd   : > { %v4573_v39 = vpack.c.bf16 %v3203_v47, %v3202_v8  ;;  %v3527_v38 = vmul.f32 %v3426_v21, %v3203_v47 }
 0x2be   : > { %v2491_v10 = vpop.f32.mrf.mxu2 }
 0x2bf   : > { %4626 = vst [vmem:[%s5762_s8 + $0x48] sm:$0xff] %v4573_v39   ;;  %v3562_v59 = vadd.f32 %v3561_v50, %v3527_v38  ;;  %v3605_v30 = vmul.f32 %v3527_v38, %v3203_v47  ;;  %v2551_v6 = vadd.f32 %v2491_v10, %v2166_v3  ;;  %v3441_v50 = vpop.permute.xlu1 %3440  ;;  %v3446_v38 = vpop.permute.xlu2 %3445 }
 0x2c0   : > { %v2108_v12 = vpop.f32.mrf.mxu1  ;;  %v2894_v46 = vpop.f32.mrf.mxu3 }
 0x2c1   : > { %v3640_v42 = vadd.f32 %v3639_v49, %v3605_v30  ;;  %v2944_v28 = vadd.f32 %v2884_v17, %v2551_v6  ;;  %v2167_v33 = vadd.f32 %v2108_v12, %v5512_v40 }
 0x2c3   : > { %v3146_v45 = vpop.f32.mrf.mxu0  ;;  %v3204_v24 = vadd.f32 %v3144_v44, %v2944_v28 }
 0x2c5   : > { %v3528_v52 = vmul.f32 %v3431_v35, %v3204_v24 }
 0x2c6   : > { %v2493_v7 = vpop.f32.mrf.mxu2 }
 0x2c7   : > { %v3563_v58 = vadd.f32 %v3562_v59, %v3528_v52  ;;  %v3606_v13 = vmul.f32 %v3528_v52, %v3204_v24  ;;  %v2552_v31 = vadd.f32 %v2493_v7, %v2167_v33  ;;  %v3451_v33 = vpop.permute.xlu0 %3450 }
 0x2c8   : > { %v2111_v25 = vpop.f32.mrf.mxu1 }
 0x2c9   : > { %v3641_v56 = vadd.f32 %v3640_v42, %v3606_v13  ;;  %v2945_v60 = vadd.f32 %v2886_v1, %v2552_v31  ;;  %v2168_v36 = vadd.f32 %v2111_v25, %v5524_v53  ;;  %v2896_v1 = vpop.f32.mrf.mxu3 }
 0x2cb   : > { %v3149_v23 = vpop.f32.mrf.mxu0  ;;  %v3205_v34 = vadd.f32 %v3146_v45, %v2945_v60 }
 0x2cd   : > { %v4578_v4 = vpack.c.bf16 %v3205_v34, %v3204_v24  ;;  %v3529_v17 = vmul.f32 %v3436_v5, %v3205_v34 }
 0x2ce   : > { %v2496_v27 = vpop.f32.mrf.mxu2 }
 0x2cf   : > { %4627 = vst [vmem:[%s5762_s8 + $0x50] sm:$0xff] %v4578_v4   ;;  %v3564_v0 = vadd.f32 %v3563_v58, %v3529_v17  ;;  %v3607_v40 = vmul.f32 %v3529_v17, %v3205_v34  ;;  %v2553_v63 = vadd.f32 %v2496_v27, %v2168_v36  ;;  %v3456_v4 = vpop.permute.xlu1 %3455 }
 0x2d0   : > { %v2113_v57 = vpop.f32.mrf.mxu1 }
 0x2d1   : > { %v3642_v8 = vadd.f32 %v3641_v56, %v3607_v40  ;;  %v2946_v37 = vadd.f32 %v2889_v54, %v2553_v63  ;;  %v2169_v55 = vadd.f32 %v2113_v57, %v5536_v2  ;;  %v2899_v6 = vpop.f32.mrf.mxu3 }
 0x2d3   : > { %v3151_v15 = vpop.f32.mrf.mxu0  ;;  %v3206_v11 = vadd.f32 %v3149_v23, %v2946_v37 }
 0x2d5   : > { %v3530_v61 = vmul.f32 %v3441_v50, %v3206_v11  ;;  %v3461_v50 = vpop.permute.xlu2 %3460 }
 0x2d6   : > { %v2498_v14 = vpop.f32.mrf.mxu2 }
 0x2d7   : > { %v3565_v49 = vadd.f32 %v3564_v0, %v3530_v61  ;;  %v3608_v26 = vmul.f32 %v3530_v61, %v3206_v11  ;;  %v2554_v53 = vadd.f32 %v2498_v14, %v2169_v55 }
 0x2d8   : > { %v2116_v44 = vpop.f32.mrf.mxu1 }
 0x2d9   : > { %v3643_v47 = vadd.f32 %v3642_v8, %v3608_v26  ;;  %v2947_v21 = vadd.f32 %v2891_v48, %v2554_v53  ;;  %v2170_v59 = vadd.f32 %v2116_v44, %v5551_v16  ;;  %v2901_v56 = vpop.f32.mrf.mxu3 }
 0x2db   : > { %v3154_v39 = vpop.f32.mrf.mxu0  ;;  %v3207_v3 = vadd.f32 %v3151_v15, %v2947_v21 }
 0x2dd   : > { %v4583_v10 = vpack.c.bf16 %v3207_v3, %v3206_v11  ;;  %v3531_v54 = vmul.f32 %v3446_v38, %v3207_v3 }
 0x2de   : > { %v2501_v30 = vpop.f32.mrf.mxu2 }
 0x2df   : > { %4628 = vst [vmem:[%s5762_s8 + $0x58] sm:$0xff] %v4583_v10   ;;  %v3566_v12 = vadd.f32 %v3565_v49, %v3531_v54  ;;  %v3609_v2 = vmul.f32 %v3531_v54, %v3207_v3  ;;  %v2555_v42 = vadd.f32 %v2501_v30, %v2170_v59 }
 0x2e0   : > { %v2118_v28 = vpop.f32.mrf.mxu1 }
 0x2e1   : > { %v3644_v45 = vadd.f32 %v3643_v47, %v3609_v2  ;;  %v2948_v24 = vadd.f32 %v2894_v46, %v2555_v42  ;;  %v2171_v7 = vadd.f32 %v2118_v28, %v5569_v62  ;;  %v2904_v15 = vpop.f32.mrf.mxu3 }
 0x2e3   : > { %v3156_v35 = vpop.f32.mrf.mxu0  ;;  %v3208_v52 = vadd.f32 %v3154_v39, %v2948_v24  ;;  %v3466_v39 = vpop.permute.xlu0 %3465 }
 0x2e4   : > { %v3471_v24 = vpop.permute.xlu1 %3470 }
 0x2e5   : > { %v3532_v48 = vmul.f32 %v3451_v33, %v3208_v52 }
 0x2e6   : > { %v2503_v58 = vpop.f32.mrf.mxu2 }
 0x2e7   : > { %v3567_v13 = vadd.f32 %v3566_v12, %v3532_v48  ;;  %v3610_v31 = vmul.f32 %v3532_v48, %v3208_v52  ;;  %v2556_v16 = vadd.f32 %v2503_v58, %v2171_v7 }
 0x2e8   : > { %v2121_v25 = vpop.f32.mrf.mxu1 }
 0x2e9   : > { %v3645_v60 = vadd.f32 %v3644_v45, %v3610_v31  ;;  %v2949_v23 = vadd.f32 %v2896_v1, %v2556_v16  ;;  %v2172_v36 = vadd.f32 %v2121_v25, %v5584_v9  ;;  %v2906_v3 = vpop.f32.mrf.mxu3 }
 0x2eb   : > { %v3159_v34 = vpop.f32.mrf.mxu0  ;;  %v3209_v5 = vadd.f32 %v3156_v35, %v2949_v23 }
 0x2ed   : > { %v4588_v17 = vpack.c.bf16 %v3209_v5, %v3208_v52  ;;  %v3533_v46 = vmul.f32 %v3456_v4, %v3209_v5 }
 0x2ee   : > { %v2506_v27 = vpop.f32.mrf.mxu2 }
 0x2ef   : > { %4629 = vst [vmem:[%s5762_s8 + $0x60] sm:$0xff] %v4588_v17   ;;  %v3568_v0 = vadd.f32 %v3567_v13, %v3533_v46  ;;  %v3611_v62 = vmul.f32 %v3533_v46, %v3209_v5  ;;  %v2557_v40 = vadd.f32 %v2506_v27, %v2172_v36 }
 0x2f0   : > { %v2123_v63 = vpop.f32.mrf.mxu1 }
 0x2f1   : > { %v3646_v57 = vadd.f32 %v3645_v60, %v3611_v62  ;;  %v2950_v8 = vadd.f32 %v2899_v6, %v2557_v40  ;;  %v2173_v61 = vadd.f32 %v2123_v63, %v5599_v22  ;;  %v2909_v48 = vpop.f32.mrf.mxu3  ;;  %v3476_v60 = vpop.permute.xlu2 %3475 }
 0x2f3   : > { %v3161_v37 = vpop.f32.mrf.mxu0  ;;  %v3210_v11 = vadd.f32 %v3159_v34, %v2950_v8 }
 0x2f5   : > { %v3534_v1 = vmul.f32 %v3461_v50, %v3210_v11 }
 0x2f6   : > { %v2508_v55 = vpop.f32.mrf.mxu2 }
 0x2f7   : > { %v3569_v14 = vadd.f32 %v3568_v0, %v3534_v1  ;;  %v3612_v49 = vmul.f32 %v3534_v1, %v3210_v11  ;;  %v2558_v9 = vadd.f32 %v2508_v55, %v2173_v61 }
 0x2f8   : > { %v2126_v26 = vpop.f32.mrf.mxu1 }
 0x2f9   : > { %v3647_v53 = vadd.f32 %v3646_v57, %v3612_v49  ;;  %v2951_v44 = vadd.f32 %v2901_v56, %v2558_v9  ;;  %v2174_v54 = vadd.f32 %v2126_v26, %v5614_v18  ;;  %v2911_v27 = vpop.f32.mrf.mxu3  ;;  %v3481_v57 = vpop.permute.xlu0 %3480 }
 0x2fa   : > { %v3486_v9 = vpop.permute.xlu1 %3485 }
 0x2fb   : > { %v3164_v47 = vpop.f32.mrf.mxu0  ;;  %v3211_v21 = vadd.f32 %v3161_v37, %v2951_v44 }
 0x2fd   : > { %v4593_v38 = vpack.c.bf16 %v3211_v21, %v3210_v11  ;;  %v3535_v10 = vmul.f32 %v3466_v39, %v3211_v21 }
 0x2fe   : > { %v2511_v59 = vpop.f32.mrf.mxu2 }
 0x2ff   : > { %4630 = vst [vmem:[%s5762_s8 + $0x68] sm:$0xff] %v4593_v38   ;;  %v3570_v30 = vadd.f32 %v3569_v14, %v3535_v10  ;;  %v3613_v22 = vmul.f32 %v3535_v10, %v3211_v21  ;;  %v2559_v6 = vadd.f32 %v2511_v59, %v2174_v54 }
 0x300   : > { %v2128_v12 = vpop.f32.mrf.mxu1 }
 0x301   : > { %v3648_v2 = vadd.f32 %v3647_v53, %v3613_v22  ;;  %v2952_v42 = vadd.f32 %v2904_v15, %v2559_v6  ;;  %v2175_v52 = vadd.f32 %v2128_v12, %v5629_v43  ;;  %v2914_v14 = vpop.f32.mrf.mxu3 }
 0x303   : > { %v3166_v28 = vpop.f32.mrf.mxu0  ;;  %v3212_v45 = vadd.f32 %v3164_v47, %v2952_v42 }
 0x305   : > { %v3536_v35 = vmul.f32 %v3471_v24, %v3212_v45 }
 0x306   : > { %v2513_v33 = vpop.f32.mrf.mxu2 }
 0x307   : > { %v3571_v7 = vadd.f32 %v3570_v30, %v3536_v35  ;;  %v3614_v58 = vmul.f32 %v3536_v35, %v3212_v45  ;;  %v2560_v18 = vadd.f32 %v2513_v33, %v2175_v52  ;;  %v3491_v30 = vpop.permute.xlu2 %3490 }
 0x308   : > { %v2131_v13 = vpop.f32.mrf.mxu1 }
 0x309   : > { %v3649_v31 = vadd.f32 %v3648_v2, %v3614_v58  ;;  %v2953_v16 = vadd.f32 %v2906_v3, %v2560_v18  ;;  %v2176_v5 = vadd.f32 %v2131_v13, %v5644_v41  ;;  %v2916_v22 = vpop.f32.mrf.mxu3 }
 0x30b   : > { %v3169_v25 = vpop.f32.mrf.mxu0  ;;  %v3213_v56 = vadd.f32 %v3166_v28, %v2953_v16 }
 0x30d   : > { %v4598_v23 = vpack.c.bf16 %v3213_v56, %v3212_v45  ;;  %v3537_v34 = vmul.f32 %v3476_v60, %v3213_v56 }
 0x30e   : > { %v2516_v4 = vpop.f32.mrf.mxu2 }
 0x30f   : > { %4631 = vst [vmem:[%s5762_s8 + $0x70] sm:$0xff] %v4598_v23   ;;  %v3572_v17 = vadd.f32 %v3571_v7, %v3537_v34  ;;  %v3615_v43 = vmul.f32 %v3537_v34, %v3213_v56  ;;  %v2561_v46 = vadd.f32 %v2516_v4, %v2176_v5  ;;  %v3501_v4 = vpop.permute.xlu1 %3500 }
 0x310   : > { %v2133_v36 = vpop.f32.mrf.mxu1 }
 0x311   : > { %v3650_v0 = vadd.f32 %v3649_v31, %v3615_v43  ;;  %v2954_v62 = vadd.f32 %v2909_v48, %v2561_v46  ;;  %v2177_v37 = vadd.f32 %v2133_v36, %v5659_v32  ;;  %v3496_v48 = vpop.permute.xlu0 %3495  ;;  %v2919_v13 = vpop.f32.mrf.mxu3 }
 0x313   : > { %v3171_v40 = vpop.f32.mrf.mxu0  ;;  %v3214_v63 = vadd.f32 %v3169_v25, %v2954_v62 }
 0x315   : > { %v3538_v8 = vmul.f32 %v3481_v57, %v3214_v63 }
 0x316   : > { %v2518_v15 = vpop.f32.mrf.mxu2 }
 0x317   : > { %v3573_v11 = vadd.f32 %v3572_v17, %v3538_v8  ;;  %v3616_v50 = vmul.f32 %v3538_v8, %v3214_v63  ;;  %v2562_v41 = vadd.f32 %v2518_v15, %v2177_v37  ;;  %v3506_v8 = vpop.permute.xlu2 %3505 }
 0x318   : > { %v2136_v1 = vpop.f32.mrf.mxu1 }
 0x319   : > { %v3651_v61 = vadd.f32 %v3650_v0, %v3616_v50  ;;  %v2955_v55 = vadd.f32 %v2911_v27, %v2562_v41  ;;  %v2178_v47 = vadd.f32 %v2136_v1, %v5674_v29  ;;  %v2921_v0 = vpop.f32.mrf.mxu3 }
 0x31b   : > { %v3215_v49 = vadd.f32 %v3171_v40, %v2955_v55  ;;  %v3174_v26 = vpop.f32.mrf.mxu0 }
 0x31d   : > { %v4603_v53 = vpack.c.bf16 %v3215_v49, %v3214_v63  ;;  %v3539_v44 = vmul.f32 %v3486_v9, %v3215_v49 }
 0x31e   : > { %v2521_v21 = vpop.f32.mrf.mxu2 }
 0x31f   : > { %4632 = vst [vmem:[%s5762_s8 + $0x78] sm:$0xff] %v4603_v53   ;;  %v3574_v39 = vadd.f32 %v3573_v11, %v3539_v44  ;;  %v3617_v32 = vmul.f32 %v3539_v44, %v3215_v49  ;;  %v2563_v3 = vadd.f32 %v2521_v21, %v2178_v47 }
 0x320   : > { %v2138_v38 = vpop.f32.mrf.mxu1 }
 0x321   : > { %v3652_v10 = vadd.f32 %v3651_v61, %v3617_v32  ;;  %v2956_v54 = vadd.f32 %v2914_v14, %v2563_v3  ;;  %v2179_v12 = vadd.f32 %v2138_v38, %v5689_v20 }
 0x323   : > { %v3216_v59 = vadd.f32 %v3174_v26, %v2956_v54  ;;  %v3176_v2 = vpop.f32.mrf.mxu0 }
 0x325   : > { %v3540_v6 = vmul.f32 %v3491_v30, %v3216_v59 }
 0x326   : > { %v2523_v42 = vpop.f32.mrf.mxu2 }
 0x327   : > { %v3575_v28 = vadd.f32 %v3574_v39, %v3540_v6  ;;  %v3618_v45 = vmul.f32 %v3540_v6, %v3216_v59  ;;  %v2564_v29 = vadd.f32 %v2523_v42, %v2179_v12 }
 0x328   : > { %v2141_v24 = vpop.f32.mrf.mxu1 }
 0x329   : > { %v3653_v35 = vadd.f32 %v3652_v10, %v3618_v45  ;;  %v2957_v52 = vadd.f32 %v2916_v22, %v2564_v29  ;;  %v2180_v18 = vadd.f32 %v2141_v24, %v5704_v51 }
 0x32b   : > { %v3217_v33 = vadd.f32 %v3176_v2, %v2957_v52  ;;  %v3179_v56 = vpop.f32.mrf.mxu0 }
 0x32d   : > { %v4608_v7 = vpack.c.bf16 %v3217_v33, %v3216_v59  ;;  %v3541_v58 = vmul.f32 %v3496_v48, %v3217_v33 }
 0x32e   : > { %v2526_v31 = vpop.f32.mrf.mxu2 }
 0x32f   : > { %4633 = vst [vmem:[%s5762_s8 + $0x80] sm:$0xff] %v4608_v7   ;;  %v3576_v16 = vadd.f32 %v3575_v28, %v3541_v58  ;;  %v3619_v20 = vmul.f32 %v3541_v58, %v3217_v33  ;;  %v2565_v25 = vadd.f32 %v2526_v31, %v2180_v18 }
 0x330   : > { %v2143_v34 = vpop.f32.mrf.mxu1 }
 0x331   : > { %v3654_v60 = vadd.f32 %v3653_v35, %v3619_v20  ;;  %v2958_v23 = vadd.f32 %v2919_v13, %v2565_v25  ;;  %v2181_v43 = vadd.f32 %v2143_v34, %v5719_v19 }
 0x333   : > { %v3218_v5 = vadd.f32 %v3179_v56, %v2958_v23  ;;  %v3181_v63 = vpop.f32.mrf.mxu0 }
 0x335   : > { %v3542_v17 = vmul.f32 %v3501_v4, %v3218_v5 }
 0x336   : > { %v2528_v46 = vpop.f32.mrf.mxu2 }
 0x337   : > { %v3577_v36 = vadd.f32 %v3576_v16, %v3542_v17  ;;  %v3620_v27 = vmul.f32 %v3542_v17, %v3218_v5  ;;  %v2566_v51 = vadd.f32 %v2528_v46, %v2181_v43 }
 0x339   : > { %v3655_v62 = vadd.f32 %v3654_v60, %v3620_v27  ;;  %v2959_v40 = vadd.f32 %v2921_v0, %v2566_v51 }
 0x33b   : > { %v3219_v57 = vadd.f32 %v3181_v63, %v2959_v40 }
 0x33d   : > { %v4613_v37 = vpack.c.bf16 %v3219_v57, %v3218_v5  ;;  %v3543_v15 = vmul.f32 %v3506_v8, %v3219_v57 }
 0x33f   : > { %4634 = vst [vmem:[%s5762_s8 + $0x88] sm:$0xff] %v4613_v37   ;;  %v3578_v11 = vadd.f32 %v3577_v36, %v3543_v15  ;;  %v3621_v50 = vmul.f32 %v3543_v15, %v3219_v57 }
 0x341   : > { %v3579_v41 = vrot.slane %v3578_v11, 4  ;;  %v3656_v1 = vadd.f32 %v3655_v62, %v3621_v50 }
 0x343   : > { %v3580_v19 = vadd.f32 %v3579_v41, %v3578_v11  ;;  %v3657_v61 = vrot.slane %v3656_v1, 4 }
 0x345   : > { %v3581_v55 = vrot.slane %v3580_v19, 2  ;;  %v3658_v14 = vadd.f32 %v3657_v61, %v3656_v1 }
 0x347   : > { %v3582_v49 = vadd.f32 %v3581_v55, %v3580_v19  ;;  %v3659_v9 = vrot.slane %v3658_v14, 2 }
 0x349   : > { %v3583_v26 = vrot.slane %v3582_v49, 1  ;;  %v3660_v53 = vadd.f32 %v3659_v9, %v3658_v14 }
 0x34b   : > { %v3584_v44 = vadd.f32 %v3583_v26, %v3582_v49  ;;  %v3661_v47 = vrot.slane %v3660_v53, 1 }
 0x34d   : > { %3585 = vst [vmem:[%s238_s25] sm:$0x1] %v3584_v44  ;;  %v3662_v21 = vadd.f32 %v3661_v47, %v3660_v53 }
 0x34f   : > { %3663 = vst [vmem:[%s241_s27] sm:$0x1] %v3662_v21 }
 0x350 PF: > { %s16_s18 = sadd.s32 1, %s4702_s18  }
 0x351   : > { %p13_p4 = scmp.ge.s32.totalorder %s16_s18, 4  }
 0x353   :  { %15 = sbr.rel (!%p13_p4) target bundleno = 1 (0x1), region = 94 }

// kernel: gan_generator_forward.28
= control target key start
LH: loop header
LB: loop body
LE: loop exit
PB: predicated region body
PF: predicated region fallthrough
CT: control target
= control target key end

     0   :  { %s425_s12 = smov 0   ;;  %s494_s0 = inlined_call_operand.vmem [shape: bf16[2,80,128], index: 0, kind: input, shape index: {}]   ;;  %s495_s1 = inlined_call_operand.vmem [shape: f32[1,1,128], index: 1, kind: input, shape index: {}]   ;;  %s496_s2 = inlined_call_operand.vmem [shape: f32[1,1,128], index: 2, kind: input, shape index: {}]   ;;  %s497_s3 = inlined_call_operand.vmem [shape: bf16[2,80,128], index: 3, kind: output, shape index: {}]  }
   0x1 LB: > { %s324_s13 = sadd.s32 4294967295, %s403_s12   ;;  %p328_p0 = scmp.ge.s32.totalorder %s403_s12, 1  ;;  %s403_s12 = sphi %s425_s12, %s13_s12  }
   0x2   : > { %p137_p1 = scmp.lt.s32.totalorder %s403_s12, 3 }
   0x4   : > { %p138_p2 = pnand %p328_p0, %p137_p1 }
   0x5   : > { %p161_p3 = scmp.lt.s32.totalorder (!%p138_p2), %s324_s13, 1 }
   0x6   : > { %141 = sbr.rel (%p138_p2) target bundleno = 40 (0x28), region = 32 }
   0xb   : > { %s499_s13 = smov (!%p161_p3, %s324_s13), 1  ;;  %v446_v0 = vld [vmem:[%s495_s1] ss:$0 sm:$0xff] }
   0xc   : > { %s386_s14 = smul.u32 40, %s499_s13  ;;  %v454_v6 = vld [vmem:[%s496_s2] ss:$0 sm:$0xff] }
   0xe   : > { %s441_s17 = scalar_lea.vmem %s494_s0, %s386_s14  ;;  %s478_s24 = scalar_lea.vmem %s497_s3, %s386_s14 }
   0xf   : > { %v334_v1 = vld [vmem:[%s441_s17] sm:$0xff]   ;;  %v378_v2 = vld [vmem:[%s441_s17 + $0x8] sm:$0xff]   ;;  %v379_v3 = vld [vmem:[%s441_s17 + $0x10] sm:$0xff]  }
  0x10   : > { %v335_v4 = vunpack.c.l.bf16 %v334_v1  ;;  %v336_v5 = vunpack.c.h.bf16 %v334_v1  ;;  %v339_v7 = vunpack.c.l.bf16 %v378_v2  ;;  %v340_v8 = vunpack.c.h.bf16 %v378_v2  ;;  %v380_v9 = vld [vmem:[%s441_s17 + $0x18] sm:$0xff]   ;;  %v381_v36 = vld [vmem:[%s441_s17 + $0x20] sm:$0xff]  }
  0x11   : > { %v343_v10 = vunpack.c.l.bf16 %v379_v3  ;;  %v344_v11 = vunpack.c.h.bf16 %v379_v3  ;;  %v347_v12 = vunpack.c.l.bf16 %v380_v9  ;;  %v348_v13 = vunpack.c.h.bf16 %v380_v9 }
  0x12   : > { %v195_v14 = vmul.f32 %v446_v0, %v335_v4  ;;  %v196_v15 = vmul.f32 %v446_v0, %v336_v5  ;;  %v197_v16 = vmul.f32 %v446_v0, %v339_v7  ;;  %v198_v17 = vmul.f32 %v446_v0, %v340_v8 }
  0x13   : > { %v199_v18 = vmul.f32 %v446_v0, %v343_v10  ;;  %v200_v19 = vmul.f32 %v446_v0, %v344_v11  ;;  %v201_v20 = vmul.f32 %v446_v0, %v347_v12  ;;  %v202_v21 = vmul.f32 %v446_v0, %v348_v13 }
  0x14   : > { %v209_v22 = vadd.f32 %v454_v6, %v195_v14  ;;  %v210_v23 = vadd.f32 %v454_v6, %v196_v15  ;;  %v211_v24 = vadd.f32 %v454_v6, %v197_v16  ;;  %v212_v25 = vadd.f32 %v454_v6, %v198_v17 }
  0x15   : > { %v213_v26 = vadd.f32 %v454_v6, %v199_v18  ;;  %v214_v27 = vadd.f32 %v454_v6, %v200_v19  ;;  %v215_v28 = vadd.f32 %v454_v6, %v201_v20  ;;  %v216_v29 = vadd.f32 %v454_v6, %v202_v21 }
  0x16   : > { %vm219_vm0 = vcmp.ge.f32.partialorder %v209_v22, 0.0  ;;  %vm220_vm1 = vcmp.ge.f32.partialorder %v210_v23, 0.0  ;;  %v229_v30 = vmul.f32 0.01, %v209_v22  ;;  %v230_v31 = vmul.f32 0.01, %v210_v23 }
  0x17   : > { %vm221_vm2 = vcmp.ge.f32.partialorder %v211_v24, 0.0  ;;  %vm222_vm3 = vcmp.ge.f32.partialorder %v212_v25, 0.0  ;;  %v231_v32 = vmul.f32 0.01, %v211_v24  ;;  %v232_v33 = vmul.f32 0.01, %v212_v25 }
  0x18   : > { %v239_v34 = vsel %vm219_vm0, %v209_v22, %v229_v30  ;;  %v240_v35 = vsel %vm220_vm1, %v210_v23, %v230_v31  ;;  %vm223_vm4 = vcmp.ge.f32.partialorder %v213_v26, 0.0  ;;  %vm224_vm5 = vcmp.ge.f32.partialorder %v214_v27, 0.0 }
  0x19   : > { %v356_v37 = vpack.c.bf16 %v240_v35, %v239_v34  ;;  %v241_v38 = vsel %vm221_vm2, %v211_v24, %v231_v32  ;;  %v242_v39 = vsel %vm222_vm3, %v212_v25, %v232_v33  ;;  %v233_v40 = vmul.f32 0.01, %v213_v26 }
  0x1a   : > { %v361_v41 = vpack.c.bf16 %v242_v39, %v241_v38  ;;  %v234_v42 = vmul.f32 0.01, %v214_v27  ;;  %vm225_vm6 = vcmp.ge.f32.partialorder %v215_v28, 0.0  ;;  %vm226_vm7 = vcmp.ge.f32.partialorder %v216_v29, 0.0 }
  0x1b   : > { %357 = vst [vmem:[%s478_s24] sm:$0xff] %v356_v37   ;;  %v243_v43 = vsel %vm223_vm4, %v213_v26, %v233_v40  ;;  %v235_v44 = vmul.f32 0.01, %v215_v28  ;;  %v236_v45 = vmul.f32 0.01, %v216_v29  ;;  %v351_v46 = vunpack.c.l.bf16 %v381_v36 }
  0x1c   : > { %382 = vst [vmem:[%s478_s24 + $0x8] sm:$0xff] %v361_v41   ;;  %v244_v47 = vsel %vm224_vm5, %v214_v27, %v234_v42  ;;  %v352_v48 = vunpack.c.h.bf16 %v381_v36 }
  0x1d   : > { %v366_v49 = vpack.c.bf16 %v244_v47, %v243_v43  ;;  %v245_v50 = vsel %vm225_vm6, %v215_v28, %v235_v44  ;;  %v246_v51 = vsel %vm226_vm7, %v216_v29, %v236_v45  ;;  %v203_v52 = vmul.f32 %v446_v0, %v351_v46 }
  0x1e   : > { %v371_v53 = vpack.c.bf16 %v246_v51, %v245_v50  ;;  %v204_v54 = vmul.f32 %v446_v0, %v352_v48 }
  0x1f   : > { %383 = vst [vmem:[%s478_s24 + $0x10] sm:$0xff] %v366_v49   ;;  %v217_v55 = vadd.f32 %v454_v6, %v203_v52 }
  0x20   : > { %384 = vst [vmem:[%s478_s24 + $0x18] sm:$0xff] %v371_v53   ;;  %v218_v56 = vadd.f32 %v454_v6, %v204_v54 }
  0x21   : > { %vm227_vm8 = vcmp.ge.f32.partialorder %v217_v55, 0.0  ;;  %v237_v57 = vmul.f32 0.01, %v217_v55 }
  0x22   : > { %vm228_vm9 = vcmp.ge.f32.partialorder %v218_v56, 0.0  ;;  %v238_v58 = vmul.f32 0.01, %v218_v56 }
  0x23   : > { %v247_v59 = vsel %vm227_vm8, %v217_v55, %v237_v57 }
  0x24   : > { %v248_v60 = vsel %vm228_vm9, %v218_v56, %v238_v58 }
  0x25   : > { %v376_v61 = vpack.c.bf16 %v248_v60, %v247_v59 }
  0x27   : > { %385 = vst [vmem:[%s478_s24 + $0x20] sm:$0xff] %v376_v61  }
  0x28 PF: > { %s13_s12 = sadd.s32 1, %s403_s12  }
  0x29   : > { %p10_p4 = scmp.ge.s32.totalorder %s13_s12, 4  }
  0x2b   :  { %12 = sbr.rel (!%p10_p4) target bundleno = 1 (0x1), region = 62 }

// kernel: gan_generator_forward.27
= control target key start
LH: loop header
LB: loop body
LE: loop exit
PB: predicated region body
PF: predicated region fallthrough
CT: control target
= control target key end

     0   :  { %s2494_s18 = smov 0   ;;  %s3016_s0 = inlined_call_operand.vmem [shape: bf16[2,108,128], index: 0, kind: input, shape index: {}]   ;;  %s3017_s1 = inlined_call_operand.vmem [shape: bf16[9,128,128], index: 1, kind: input, shape index: {}]   ;;  %s3018_s2 = inlined_call_operand.vmem [shape: f32[80,1], index: 2, kind: input, shape index: {}]   ;;  %s3019_s3 = inlined_call_operand.vmem [shape: bf16[2,80,128], index: 3, kind: output, shape index: {0}]   ;;  %s3020_s4 = inlined_call_operand.vmem [shape: f32[2,1,128], index: 4, kind: output, shape index: {1}]   ;;  %s3021_s5 = inlined_call_operand.vmem [shape: f32[2,1,128], index: 5, kind: output, shape index: {2}]  }
   0x1 LB: > { %s1832_s19 = sadd.s32 4294967295, %s2461_s18   ;;  %p1836_p0 = scmp.ge.s32.totalorder %s2461_s18, 1  ;;  %s2461_s18 = sphi %s2494_s18, %s16_s18  }
   0x2   : > { %p192_p1 = scmp.lt.s32.totalorder %s2461_s18, 3 }
   0x4   : > { %p193_p2 = pnand %p1836_p0, %p192_p1 }
   0x5   : > { %p226_p3 = scmp.lt.s32.totalorder (!%p193_p2), %s1832_s19, 1 }
   0x6   : > { %196 = sbr.rel (%p193_p2) target bundleno = 387 (0x183), region = 32 }
   0xb   : > { %v2324_v0 = vld [vmem:[%s3017_s1 + $0x78] sm:$0xff]  ;;  %v2323_v1 = vld [vmem:[%s3017_s1 + $0x70] sm:$0xff]  ;;  %s3023_s19 = smov (!%p226_p3, %s1832_s19), 1  ;;  %v2322_v4 = vld [vmem:[%s3017_s1 + $0x68] sm:$0xff]  ;;  %vm314_vm0 = vsmask.f32 7424 }
   0xc   : > { %412 = vmatpush.bf16.msra.mxu0 %v2324_v0  ;;  %2425 = vmatpush.bf16.msra.mxu1 %v2324_v0  ;;  %v2344_v2 = vld [vmem:[%s3017_s1 + $0xf8] sm:$0xff]  ;;  %v2343_v3 = vld [vmem:[%s3017_s1 + $0xf0] sm:$0xff]  ;;  %s2441_s30 = smul.u32 56, %s3023_s19  ;;  %v2342_v5 = vld [vmem:[%s3017_s1 + $0xe8] sm:$0xff]  ;;  %vm554_vm1 = vcmask 1046528   ;;  %vm1020_vm4 = vcmask 1045504   ;;  %s238_s14 = scalar_lea.vmem %s3020_s4, %s3023_s19 }
   0xd   : > { %2426 = vmatpush.bf16.msra.mxu2 %v2324_v0  ;;  %783 = vmatpush.bf16.msra.mxu3 %v2344_v2  ;;  %v2321_v6 = vld [vmem:[%s3017_s1 + $0x60] sm:$0xff]  ;;  %v2320_v9 = vld [vmem:[%s3017_s1 + $0x58] sm:$0xff]  ;;  %v2319_v17 = vld [vmem:[%s3017_s1 + $0x50] sm:$0xff]  ;;  %vm848_vm2 = vsmask.f32 6400  ;;  %vm1486_vm5 = vcmask 1044480   ;;  %s241_s17 = scalar_lea.vmem %s3021_s5, %s3023_s19 }
   0xe   : > { %s2529_s12 = scalar_lea.vmem %s3016_s0, %s2441_s30  ;;  %v2341_v7 = vld [vmem:[%s3017_s1 + $0xe0] sm:$0xff]  ;;  %v2340_v14 = vld [vmem:[%s3017_s1 + $0xd8] sm:$0xff]  ;;  %v2339_v24 = vld [vmem:[%s3017_s1 + $0xd0] sm:$0xff]  ;;  %vm1314_vm3 = vsmask.f32 5376  ;;  %s2442_s7 = smul.u32 40, %s3023_s19 }
   0xf   : > { %v268_v8 = vld [vmem:[%s2529_s12 + $0x28] sm:$0x1]  ;;  %v2539_v10 = vld [vmem:[%s2529_s12] sm:$0xff]   ;;  %v2542_v11 = vld [vmem:[%s2529_s12 + $0x10] sm:$0xff] }
  0x10   : > { %413 = vmatpush.bf16.msra.mxu0 %v2323_v1  ;;  %2427 = vmatpush.bf16.msra.mxu1 %v2323_v1  ;;  %v2545_v12 = vld [vmem:[%s2529_s12 + $0x20] sm:$0xff]  ;;  %v307_v13 = vunpack.c.l.b16 %v268_v8  ;;  %v2551_v15 = vld [vmem:[%s2529_s12 + $0x8] sm:$0xff]  ;;  %v318_v16 = vshll.u32 %v2539_v10, 16  ;;  %v2558_v18 = vld [vmem:[%s2529_s12 + $0x18] sm:$0xff]  ;;  %v331_v19 = vshll.u32 %v2542_v11, 16  ;;  %v316_v25 = vshrl.u32 %v2539_v10, 16  ;;  %s2991_s10 = scalar_lea.vmem %s3019_s3, %s2442_s7 }
  0x11   : > { %2428 = vmatpush.bf16.msra.mxu2 %v2323_v1  ;;  %784 = vmatpush.bf16.msra.mxu3 %v2343_v3  ;;  %v347_v21 = vshll.u32 %v2545_v12, 16  ;;  %v663_v22 = vld [vmem:[%s2529_s12 + $0x4] sm:$0xe]  ;;  %v2566_v23 = vld [vmem:[%s2529_s12 + $0x8] sm:$0xff]   ;;  %v323_v27 = vshll.u32 %v2551_v15, 16  ;;  %v335_v28 = vshrl.u32 %v2542_v11, 16 }
  0x12   : > { %v2561_v20 = vpack.c.b16 %v307_v13, %v307_v13  ;;  %v320_v26 = vrot.slane %v318_v16, 1  ;;  %v2318_v29 = vld [vmem:[%s3017_s1 + $0x48] sm:$0xff]  ;;  %v2577_v30 = vrot.slane %v331_v19, 1  ;;  %v339_v31 = vshll.u32 %v2558_v18, 16  ;;  %v2317_v39 = vld [vmem:[%s3017_s1 + $0x40] sm:$0xff]  ;;  %v2316_v45 = vld [vmem:[%s3017_s1 + $0x38] sm:$0xff] }
  0x13   : > { %v702_v32 = vunpack.c.l.b16 %v663_v22  ;;  %v703_v33 = vunpack.c.l.b16 %v2566_v23  ;;  %v2581_v34 = vrot.slane %v347_v21, 1  ;;  %v351_v35 = vshrl.u32 %v2545_v12, 16  ;;  %v2338_v37 = vld [vmem:[%s3017_s1 + $0xc8] sm:$0xff]  ;;  %v2332_v48 = vld [vmem:[%s3017_s1 + $0xb8] sm:$0xff]  ;;  %v2337_v52 = vld [vmem:[%s3017_s1 + $0xc0] sm:$0xff] }
  0x14   : > { %414 = vmatpush.bf16.msra.mxu0 %v2322_v4  ;;  %2429 = vmatpush.bf16.msra.mxu1 %v2322_v4  ;;  %v355_v36 = vshll.u32 %v2561_v20, 16  ;;  %v325_v38 = vrot.slane %v323_v27, 1  ;;  %v321_v40 = vor.u32 %v320_v26, %v316_v25  ;;  %v337_v41 = vor.u32 %v335_v28, %v2577_v30  ;;  %v2593_v43 = vld [vmem:[%s2529_s12 + $0xc] sm:$0xff]  ;;  %v2352_v49 = vld [vmem:[%s3017_s1 + $0x138] sm:$0xff]  ;;  %v2313_v3 = vld [vmem:[%s3017_s1 + $0x20] sm:$0xff] }
  0x15   : > { %2430 = vmatpush.bf16.msra.mxu2 %v2322_v4  ;;  %785 = vmatpush.bf16.msra.mxu3 %v2342_v5  ;;  %v341_v42 = vrot.slane %v339_v31, 1  ;;  %v2597_v44 = vpack.c.b16 %v703_v33, %v702_v32  ;;  %v353_v46 = vor.u32 %v351_v35, %v2581_v34  ;;  %v720_v54 = vrot.slane %v2593_v43, 1  ;;  %v2315_v56 = vld [vmem:[%s3017_s1 + $0x30] sm:$0xff]  ;;  %v2380_v57 = vld [vmem:[%s3017_s1 + $0x1f8] sm:$0xff]  ;;  %v2314_v61 = vld [vmem:[%s3017_s1 + $0x28] sm:$0xff] }
  0x16   : > { %v357_v47 = vrot.slane %v355_v36, 1  ;;  %v326_v50 = vsel %vm314_vm0, %v321_v40, %v325_v38  ;;  %v2331_v58 = vld [vmem:[%s3017_s1 + $0xb0] sm:$0xff]  ;;  %v2330_v63 = vld [vmem:[%s3017_s1 + $0xa8] sm:$0xff]  ;;  %v327_v1 = vshrl.u32 %v2551_v15, 16  ;;  %v343_v2 = vshrl.u32 %v2558_v18, 16  ;;  %v2329_v4 = vld [vmem:[%s3017_s1 + $0xa0] sm:$0xff] }
  0x17   : > { %v342_v51 = vsel %vm314_vm0, %v337_v41, %v341_v42  ;;  %v719_v53 = vrot.slane %v2597_v44, 1  ;;  %v2351_v59 = vld [vmem:[%s3017_s1 + $0x130] sm:$0xff]  ;;  %v2350_v0 = vld [vmem:[%s3017_s1 + $0x128] sm:$0xff]  ;;  %v2349_v5 = vld [vmem:[%s3017_s1 + $0x120] sm:$0xff]  ;;  %v850_v27 = vshrl.u32 %v2597_v44, 16  ;;  %v861_v31 = vshll.u32 %v2593_v43, 16 }
  0x18   : > { %415 = vmatpush.bf16.msra.mxu0 %v2321_v6  ;;  %2431 = vmatpush.bf16.msra.mxu1 %v2321_v6  ;;  %v358_v55 = vsel %vm314_vm0, %v353_v46, %v357_v47  ;;  %v2379_v62 = vld [vmem:[%s3017_s1 + $0x1f0] sm:$0xff]  ;;  %v2328_v13 = vld [vmem:[%s3017_s1 + $0x98] sm:$0xff]  ;;  %v2418_v25 = vld [vmem:[%s2529_s12] sm:$0xf0]  ;;  %v556_v46 = vrot.slane %v2551_v15, 1 }
  0x19   : > { %2432 = vmatpush.bf16.msra.mxu2 %v2321_v6  ;;  %786 = vmatpush.bf16.msra.mxu3 %v2341_v7  ;;  %v721_v60 = vsel %vm554_vm1, %v719_v53, %v720_v54  ;;  %v329_v6 = vor.u32 %v327_v1, %v325_v38  ;;  %v345_v7 = vor.u32 %v343_v2, %v341_v42  ;;  %v2654_v8 = vld [vmem:[%s2529_s12 + $0x14] sm:$0xff]  ;;  %v2419_v26 = vld [vmem:[%s2529_s12] sm:$0xe]  ;;  %v2378_v28 = vld [vmem:[%s3017_s1 + $0x1e8] sm:$0xff]  ;;  %v852_v38 = vrot.slane %v850_v27, 1 }
  0x1a   : > { %v722_v19 = vrot.slane %v2654_v8, 1  ;;  %v2311_v21 = vld [vmem:[%s3017_s1 + $0x10] sm:$0xff]  ;;  %v2326_v35 = vld [vmem:[%s3017_s1 + $0x88] sm:$0xff]  ;;  %v863_v41 = vrot.slane %v861_v31, 2  ;;  %v2309_v42 = vld [vmem:[%s3017_s1] sm:$0xff] }
  0x1b   : > { %v334_v16 = vsel %vm314_vm0, %v329_v6, %v2577_v30  ;;  %v2327_v22 = vld [vmem:[%s3017_s1 + $0x90] sm:$0xff]  ;;  %v858_v30 = vshrl.u32 %v2593_v43, 16  ;;  %v2346_v36 = vld [vmem:[%s3017_s1 + $0x108] sm:$0xff]  ;;  %v2345_v47 = vld [vmem:[%s3017_s1 + $0x100] sm:$0xff] }
  0x1c   : > { %416 = vmatpush.bf16.msra.mxu0 %v2320_v9  ;;  %2433 = vmatpush.bf16.msra.mxu1 %v2320_v9  ;;  %v723_v32 = vsel %vm554_vm1, %v720_v54, %v722_v19  ;;  %v2720_v53 = vld [vmem:[%s2529_s12 + $0x1c] sm:$0xff]  ;;  %v2355_v27 = vld [vmem:[%s3017_s1 + $0x150] sm:$0xff] }
  0x1d   : > { %2434 = vmatpush.bf16.msra.mxu2 %v2320_v9  ;;  %787 = vmatpush.bf16.msra.mxu3 %v2340_v14  ;;  %v2312_v9 = vld [vmem:[%s3017_s1 + $0x18] sm:$0xff]  ;;  %v860_v40 = vrot.slane %v858_v30, 1  ;;  %v2357_v6 = vld [vmem:[%s3017_s1 + $0x160] sm:$0xff]  ;;  %v2383_v31 = vld [vmem:[%s3017_s1 + $0x210] sm:$0xff] }
  0x1e   : > { %v2348_v14 = vld [vmem:[%s3017_s1 + $0x118] sm:$0xff] }
  0x1f   : > { %v2376_v2 = vld [vmem:[%s3017_s1 + $0x1d8] sm:$0xff] }
  0x20   : > { %417 = vmatpush.bf16.msra.mxu0 %v2319_v17  ;;  %2435 = vmatpush.bf16.msra.mxu1 %v2319_v17 }
  0x21   : > { %2436 = vmatpush.bf16.msra.mxu2 %v2319_v17  ;;  %788 = vmatpush.bf16.msra.mxu3 %v2339_v24  ;;  %v350_v17 = vsel %vm314_vm0, %v345_v7, %v2581_v34  ;;  %v2347_v24 = vld [vmem:[%s3017_s1 + $0x110] sm:$0xff]  ;;  %v2310_v34 = vld [vmem:[%s3017_s1 + $0x8] sm:$0xff]  ;;  %v2385_v7 = vld [vmem:[%s3017_s1 + $0x220] sm:$0xff] }
  0x24   : > { %418 = vmatpush.bf16.msra.mxu0 %v2318_v29  ;;  %2437 = vmatpush.bf16.msra.mxu1 %v2318_v29 }
  0x25   : > { %2438 = vmatpush.bf16.msra.mxu2 %v2318_v29  ;;  %789 = vmatpush.bf16.msra.mxu3 %v2338_v37  ;;  %v853_v29 = vshll.u32 %v2597_v44, 16  ;;  %v2420_v37 = vor.u32 %v2419_v26, %v2418_v25  ;;  %v2325_v44 = vld [vmem:[%s3017_s1 + $0x80] sm:$0xff]  ;;  %v2384_v25 = vld [vmem:[%s3017_s1 + $0x218] sm:$0xff]  ;;  %v2375_v26 = vld [vmem:[%s3017_s1 + $0x1d0] sm:$0xff] }
  0x28   : > { %419 = vmatpush.bf16.msra.mxu0 %v2317_v39  ;;  %2439 = vmatpush.bf16.msra.mxu1 %v2317_v39 }
  0x29   : > { %2440 = vmatpush.bf16.msra.mxu2 %v2317_v39  ;;  %790 = vmatpush.bf16.msra.mxu3 %v2337_v52  ;;  %v855_v39 = vrot.slane %v853_v29, 2  ;;  %v2388_v52 = vld [vmem:[%s3017_s1 + $0x238] sm:$0xff]  ;;  %v879_v29 = vshll.u32 %v2720_v53, 16 }
  0x2b   : > { %420 = vmatmul.bf16.vlgmr.msra.gmra.mxu0 %v326_v50  ;;  %430 = vmatmul.bf16.vlgmr.msra.gmra.mxu1 %v342_v51  ;;  %v856_v50 = vor.u32 %v855_v39, %v852_v38  ;;  %v864_v51 = vor.u32 %v863_v41, %v860_v40  ;;  %v560_v38 = vrot.slane %v2558_v18, 1 }
  0x2c   : > { %499 = vmatpush.bf16.msrb.mxu1 %v2316_v45  ;;  %955 = vmatpush.bf16.msrb.mxu0 %v2352_v49  ;;  %v555_v45 = vrot.slane %v2420_v37, 1  ;;  %v2360_v49 = vld [vmem:[%s3017_s1 + $0x178] sm:$0xff] }
  0x2d   : > { %619 = vmatpush.bf16.msrb.mxu2 %v2332_v48  ;;  %1421 = vmatpush.bf16.msrb.mxu3 %v2380_v57  ;;  %v2372_v48 = vld [vmem:[%s3017_s1 + $0x1b8] sm:$0xff]  ;;  %v2359_v57 = vld [vmem:[%s3017_s1 + $0x170] sm:$0xff] }
  0x2e   : > { %440 = vmatmul.bf16.vlgmr.msra.gmra.mxu2 %v358_v55  ;;  %791 = vmatmul.bf16.vlgmr.msra.gmra.mxu3 %v721_v60  ;;  %v557_v54 = vsel %vm554_vm1, %v555_v45, %v556_v46  ;;  %v865_v55 = vsel %vm848_vm2, %v856_v50, %v864_v51  ;;  %v2377_v60 = vld [vmem:[%s3017_s1 + $0x1e0] sm:$0xff] }
  0x30   : > { %500 = vmatpush.bf16.msrb.mxu1 %v2315_v56  ;;  %956 = vmatpush.bf16.msrb.mxu0 %v2351_v59  ;;  %v2371_v56 = vld [vmem:[%s3017_s1 + $0x1b0] sm:$0xff] }
  0x31   : > { %620 = vmatpush.bf16.msrb.mxu2 %v2331_v58  ;;  %1422 = vmatpush.bf16.msrb.mxu3 %v2379_v62  ;;  %v724_v58 = vrot.slane %v2720_v53, 1  ;;  %v2387_v59 = vld [vmem:[%s3017_s1 + $0x230] sm:$0xff]  ;;  %v870_v62 = vshll.u32 %v2654_v8, 16 }
  0x33   : > { %v725_v1 = vsel %vm554_vm1, %v722_v19, %v724_v58 }
  0x34   : > { %501 = vmatpush.bf16.msrb.mxu1 %v2314_v61  ;;  %957 = vmatpush.bf16.msrb.mxu0 %v2350_v0  ;;  %v867_v61 = vshrl.u32 %v2654_v8, 16  ;;  %v2358_v0 = vld [vmem:[%s3017_s1 + $0x168] sm:$0xff] }
  0x35   : > { %621 = vmatpush.bf16.msrb.mxu2 %v2330_v63  ;;  %1423 = vmatpush.bf16.msrb.mxu3 %v2378_v28  ;;  %v2370_v63 = vld [vmem:[%s3017_s1 + $0x1a8] sm:$0xff]  ;;  %v876_v28 = vshrl.u32 %v2720_v53, 16 }
  0x38   : > { %502 = vmatpush.bf16.msrb.mxu1 %v2313_v3  ;;  %958 = vmatpush.bf16.msrb.mxu0 %v2349_v5  ;;  %v869_v3 = vrot.slane %v867_v61, 1  ;;  %v2369_v5 = vld [vmem:[%s3017_s1 + $0x1a0] sm:$0xff] }
  0x39   : > { %622 = vmatpush.bf16.msrb.mxu2 %v2329_v4  ;;  %1424 = vmatpush.bf16.msrb.mxu3 %v2377_v60  ;;  %v872_v4 = vrot.slane %v870_v62, 2  ;;  %v827_v60 = vld [vmem:[%s2529_s12 + $0x2c] sm:$0x3] }
  0x3b   : > { %425 = vmatmul.bf16.gmra.mxu0 %v334_v16  ;;  %435 = vmatmul.bf16.gmra.mxu1 %v350_v17  ;;  %v2769_v16 = vld [vmem:[%s2529_s12 + $0x24] sm:$0xff]  ;;  %v2356_v17 = vld [vmem:[%s3017_s1 + $0x158] sm:$0xff] }
  0x3c   : > { %503 = vmatpush.bf16.msrb.mxu1 %v2312_v9  ;;  %959 = vmatpush.bf16.msrb.mxu0 %v2348_v14  ;;  %v558_v9 = vrot.slane %v2542_v11, 1  ;;  %v2368_v14 = vld [vmem:[%s3017_s1 + $0x198] sm:$0xff]  ;;  %v888_v50 = vshll.u32 %v2769_v16, 16 }
  0x3d   : > { %623 = vmatpush.bf16.msrb.mxu2 %v2328_v13  ;;  %1425 = vmatpush.bf16.msrb.mxu3 %v2376_v2  ;;  %v873_v13 = vor.u32 %v872_v4, %v869_v3  ;;  %v846_v2 = vunpack.c.l.b16 %v827_v60 }
  0x3e   : > { %796 = vmatmul.bf16.gmra.mxu3 %v723_v32  ;;  %v559_v19 = vsel %vm554_vm1, %v556_v46, %v558_v9  ;;  %v673_v32 = vld [vmem:[%s2529_s12 + $0x2c] sm:$0x1]  ;;  %v561_v41 = vsel %vm554_vm1, %v558_v9, %v560_v38  ;;  %v2381_v9 = vld [vmem:[%s3017_s1 + $0x200] sm:$0xff] }
  0x3f   : > { %v712_v37 = vunpack.c.l.b16 %v673_v32 }
  0x40   : > { %504 = vmatpush.bf16.msrb.mxu1 %v2311_v21  ;;  %960 = vmatpush.bf16.msrb.mxu0 %v2347_v24  ;;  %v874_v21 = vsel %vm848_vm2, %v864_v51, %v873_v13  ;;  %v2367_v24 = vld [vmem:[%s3017_s1 + $0x190] sm:$0xff]  ;;  %v2365_v51 = vld [vmem:[%s3017_s1 + $0x180] sm:$0xff] }
  0x41   : > { %624 = vmatpush.bf16.msrb.mxu2 %v2327_v22  ;;  %v726_v22 = vrot.slane %v2769_v16, 1  ;;  %1426 = vmatpush.bf16.msrb.mxu3 %v2375_v26  ;;  %v718_v40 = vpack.c.b16 %v712_v37, %v712_v37  ;;  %v1465_v37 = vld [vmem:[%s2529_s12 + $0x8] sm:$0x8] }
  0x43   : > { %v727_v30 = vsel %vm554_vm1, %v724_v58, %v726_v22  ;;  %v728_v45 = vrot.slane %v718_v40, 1 }
  0x44   : > { %505 = vmatpush.bf16.msrb.mxu1 %v2310_v34  ;;  %961 = vmatpush.bf16.msrb.mxu0 %v2346_v36  ;;  %v2374_v34 = vld [vmem:[%s3017_s1 + $0x1c8] sm:$0xff]  ;;  %v881_v36 = vrot.slane %v879_v29, 2 }
  0x45   : > { %625 = vmatpush.bf16.msrb.mxu2 %v2326_v35  ;;  %v878_v35 = vrot.slane %v876_v28, 1  ;;  %1427 = vmatpush.bf16.msrb.mxu3 %v2374_v34 }
  0x47   : > { %v882_v39 = vor.u32 %v881_v36, %v878_v35  ;;  %v999_v35 = vld [vmem:[%s2529_s12 + $0x4] sm:$0xc] }
  0x48   : > { %506 = vmatpush.bf16.msrb.mxu1 %v2309_v42  ;;  %962 = vmatpush.bf16.msrb.mxu0 %v2345_v47  ;;  %v1129_v42 = vld [vmem:[%s2529_s12 + $0x8] sm:$0xc]  ;;  %v1169_v47 = vunpack.c.h.b16 %v2566_v23 }
  0x49   : > { %626 = vmatpush.bf16.msrb.mxu2 %v2325_v44  ;;  %v883_v44 = vsel %vm848_vm2, %v873_v13, %v882_v39  ;;  %v1168_v46 = vunpack.c.l.b16 %v1129_v42  ;;  %v2867_v42 = vld [vmem:[%s2529_s12 + $0x20] sm:$0xff] }
  0x4b   : > { %507 = vmatmul.bf16.vlgmr.msrb.gmra.mxu1 %v2539_v10  ;;  %963 = vmatmul.bf16.vlgmr.msrb.gmra.mxu0 %v865_v55  ;;  %v2386_v10 = vld [vmem:[%s3017_s1 + $0x228] sm:$0xff]  ;;  %v2353_v55 = vld [vmem:[%s3017_s1 + $0x140] sm:$0xff] }
  0x4c   : > { %1085 = vmatpush.bf16.msra.mxu1 %v2360_v49  ;;  %1551 = vmatpush.bf16.msra.mxu0 %v2388_v52  ;;  %v885_v49 = vshrl.u32 %v2769_v16, 16  ;;  %v2382_v52 = vld [vmem:[%s3017_s1 + $0x208] sm:$0xff] }
  0x4d   : > { %1249 = vmatpush.bf16.msra.mxu2 %v2372_v48  ;;  %v2354_v48 = vld [vmem:[%s3017_s1 + $0x148] sm:$0xff] }
  0x4e   : > { %627 = vmatmul.bf16.vlgmr.msrb.gmra.mxu2 %v557_v54  ;;  %801 = vmatmul.bf16.gmra.mxu3 %v725_v1  ;;  %v2373_v54 = vld [vmem:[%s3017_s1 + $0x1c0] sm:$0xff]  ;;  %v887_v58 = vrot.slane %v885_v49, 1  ;;  %v562_v1 = vrot.slane %v2545_v12, 1 }
  0x4f   : > { %1428 = vmatpush.bf16.msrb.mxu3 %v2373_v54 }
  0x50   : > { %1086 = vmatpush.bf16.msra.mxu1 %v2359_v57  ;;  %1552 = vmatpush.bf16.msra.mxu0 %v2387_v59  ;;  %v2832_v57 = vpack.c.b16 %v1169_v47, %v1168_v46  ;;  %v890_v59 = vrot.slane %v888_v50, 2  ;;  %v1345_v46 = vshll.u32 %v2867_v42, 16  ;;  %v1616_v50 = vld [vmem:[%s3018_s2 + $0x8] sm:$0xff] }
  0x51   : > { %1250 = vmatpush.bf16.msra.mxu2 %v2371_v56  ;;  %v2828_v56 = vld [vmem:[%s2529_s12 + $0x10] sm:$0xff] }
  0x52   : > { %v1316_v61 = vshrl.u32 %v2832_v57, 16  ;;  %v1319_v62 = vshll.u32 %v2832_v57, 16  ;;  %v1186_v49 = vrot.slane %v2828_v56, 2  ;;  %v1488_v23 = vrot.slane %v2828_v56, 3 }
  0x53   : > { %v1347_v54 = vrot.slane %v1345_v46, 3  ;;  %v1028_v46 = vrot.slane %v2769_v16, 2 }
  0x54   : > { %1087 = vmatpush.bf16.msra.mxu1 %v2358_v0  ;;  %1553 = vmatpush.bf16.msra.mxu0 %v2386_v10  ;;  %v1327_v0 = vshll.u32 %v2828_v56, 16  ;;  %v891_v10 = vor.u32 %v890_v59, %v887_v58  ;;  %v1318_v3 = vrot.slane %v1316_v61, 2  ;;  %v1321_v4 = vrot.slane %v1319_v62, 3  ;;  %v2890_v59 = vld [vmem:[%s2529_s12 + $0x28] sm:$0xff]  ;;  %v1618_v62 = vld [vmem:[%s3018_s2 + $0x18] sm:$0xff] }
  0x55   : > { %1251 = vmatpush.bf16.msra.mxu2 %v2370_v63  ;;  %v1324_v63 = vshrl.u32 %v2828_v56, 16  ;;  %v1351_v60 = vshrl.u32 %v2890_v59, 16  ;;  %v1354_v61 = vshll.u32 %v2890_v59, 16 }
  0x56   : > { %v892_v13 = vsel %vm848_vm2, %v882_v39, %v891_v10  ;;  %v1484_v39 = vunpack.c.l.b16 %v1465_v37 }
  0x58   : > { %1088 = vmatpush.bf16.msra.mxu1 %v2357_v6  ;;  %1554 = vmatpush.bf16.msra.mxu0 %v2385_v7  ;;  %v1329_v6 = vrot.slane %v1327_v0, 3  ;;  %v563_v7 = vsel %vm554_vm1, %v560_v38, %v562_v1  ;;  %v1018_v38 = vunpack.c.l.b16 %v999_v35  ;;  %v1024_v0 = vrot.slane %v2654_v8, 2 }
  0x59   : > { %1252 = vmatpush.bf16.msra.mxu2 %v2369_v5  ;;  %v1326_v5 = vrot.slane %v1324_v63, 2 }
  0x5b   : > { %512 = vmatmul.bf16.gmra.mxu1 %v2551_v15  ;;  %968 = vmatmul.bf16.gmra.mxu0 %v874_v21  ;;  %v2366_v15 = vld [vmem:[%s3017_s1 + $0x188] sm:$0xff] }
  0x5c   : > { %1089 = vmatpush.bf16.msra.mxu1 %v2356_v17  ;;  %1555 = vmatpush.bf16.msra.mxu0 %v2384_v25  ;;  %v1322_v17 = vor.u32 %v1321_v4, %v1318_v3  ;;  %v2852_v25 = vld [vmem:[%s2529_s12 + $0x18] sm:$0xff]  ;;  %v1293_v4 = vld [vmem:[%s2529_s12 + $0x30] sm:$0x7] }
  0x5d   : > { %1253 = vmatpush.bf16.msra.mxu2 %v2368_v14  ;;  %v2845_v14 = vpack.c.b16 %v846_v2, %v846_v2  ;;  %v1333_v28 = vshrl.u32 %v2852_v25, 16  ;;  %v1336_v29 = vshll.u32 %v2852_v25, 16  ;;  %v1188_v63 = vrot.slane %v2852_v25, 2 }
  0x5e   : > { %632 = vmatmul.bf16.gmra.mxu2 %v559_v19  ;;  %806 = vmatmul.bf16.gmra.mxu3 %v727_v30  ;;  %v1330_v19 = vor.u32 %v1329_v6, %v1326_v5  ;;  %v1356_v2 = vrot.slane %v1354_v61, 3 }
  0x5f   : > { %v894_v21 = vshrl.u32 %v2845_v14, 16  ;;  %v1189_v3 = vsel %vm1020_vm4, %v1186_v49, %v1188_v63 }
  0x60   : > { %1090 = vmatpush.bf16.msra.mxu1 %v2355_v27  ;;  %1556 = vmatpush.bf16.msra.mxu0 %v2383_v31  ;;  %v1338_v31 = vrot.slane %v1336_v29, 3  ;;  %v1492_v29 = vrot.slane %v2867_v42, 3 }
  0x61   : > { %1254 = vmatpush.bf16.msra.mxu2 %v2367_v24  ;;  %v1331_v24 = vsel %vm1314_vm3, %v1322_v17, %v1330_v19  ;;  %v896_v26 = vrot.slane %v894_v21, 1  ;;  %v1312_v17 = vunpack.c.l.b16 %v1293_v4 }
  0x64   : > { %1091 = vmatpush.bf16.msra.mxu1 %v2354_v48  ;;  %1557 = vmatpush.bf16.msra.mxu0 %v2382_v52  ;;  %v1185_v48 = vrot.slane %v2832_v57, 2 }
  0x65   : > { %1255 = vmatpush.bf16.msra.mxu2 %v2366_v15  ;;  %v1335_v15 = vrot.slane %v1333_v28, 2  ;;  %v1026_v28 = vrot.slane %v2720_v53, 2 }
  0x67   : > { %v1339_v36 = vor.u32 %v1338_v31, %v1335_v15  ;;  %v1621_v31 = vld [vmem:[%s3018_s2 + $0x30] sm:$0xff]  ;;  %v1027_v35 = vsel %vm1020_vm4, %v1024_v0, %v1026_v28 }
  0x68   : > { %1092 = vmatpush.bf16.msra.mxu1 %v2353_v55  ;;  %1558 = vmatpush.bf16.msra.mxu0 %v2381_v9 }
  0x69   : > { %1256 = vmatpush.bf16.msra.mxu2 %v2365_v51  ;;  %v1340_v40 = vsel %vm1314_vm3, %v1330_v19, %v1339_v36  ;;  %v2907_v19 = vpack.c.b16 %v1312_v17, %v1312_v17 }
  0x6b   : > { %517 = vmatmul.bf16.gmra.mxu1 %v2542_v11  ;;  %973 = vmatmul.bf16.gmra.mxu0 %v883_v44  ;;  %v729_v11 = vsel %vm554_vm1, %v726_v22, %v728_v45  ;;  %v897_v22 = vshll.u32 %v2845_v14, 16  ;;  %v1019_v44 = vpack.c.b16 %v703_v33, %v1018_v38  ;;  %v1342_v45 = vshrl.u32 %v2867_v42, 16 }
  0x6c   : > { %v1022_v33 = vrot.slane %v2593_v43, 2  ;;  %v1617_v43 = vld [vmem:[%s3018_s2 + $0x10] sm:$0xff] }
  0x6d   : > { %v899_v27 = vrot.slane %v897_v22, 2  ;;  %v1021_v51 = vrot.slane %v1019_v44, 2  ;;  %v1192_v44 = vrot.slane %v2890_v59, 2 }
  0x6e   : > { %637 = vmatmul.bf16.gmra.mxu2 %v561_v41  ;;  %811 = vmatmul.bf16.gmra.mxu3 %v729_v11  ;;  %v2463_v41 = vmov 0   ;;  %v1187_v11 = vsel %vm1020_vm4, %v1185_v48, %v1186_v49  ;;  %v1494_v48 = vrot.slane %v2890_v59, 3 }
  0x6f   : > { %v900_v30 = vor.u32 %v899_v27, %v896_v26  ;;  %2452 = vset.pattern.permute.xlu0 %v2463_v41  ;;  %2453 = vset.pattern.permute.xlu1 %v2463_v41  ;;  %v1023_v55 = vsel %vm1020_vm4, %v1021_v51, %v1022_v33  ;;  %v1190_v26 = vrot.slane %v2867_v42, 2  ;;  %v1622_v42 = vld [vmem:[%s3018_s2 + $0x38] sm:$0xff]  ;;  %v1619_v51 = vld [vmem:[%s3018_s2 + $0x20] sm:$0xff] }
  0x70   : > { %2454 = vset.pattern.permute.xlu2 %v2463_v41  ;;  %1637 = vperm.xlu1 %2453, %v1617_v43  }
  0x71   : > { %v901_v34 = vsel %vm848_vm2, %v891_v10, %v900_v30  ;;  %v1353_v10 = vrot.slane %v1351_v60, 2  ;;  %v1191_v15 = vsel %vm1020_vm4, %v1188_v63, %v1190_v26  ;;  %v1193_v49 = vsel %vm1020_vm4, %v1190_v26, %v1192_v44  ;;  %1647 = vperm.xlu2 %2454, %v1619_v51  }
  0x78   : > { %1642 = vperm.xlu1 %2453, %v1618_v62  }
  0x7b   : > { %522 = vmatmul.bf16.gmra.mxu1 %v2558_v18  ;;  %978 = vmatmul.bf16.gmra.mxu0 %v892_v13  ;;  %v564_v18 = vrot.slane %v2561_v20, 1  ;;  %v1615_v20 = vld [vmem:[%s3018_s2] sm:$0xff]  ;;  %v1357_v13 = vor.u32 %v1356_v2, %v1353_v10  ;;  %v1030_v10 = vrot.slane %v2845_v14, 2  ;;  %v1496_v2 = vrot.slane %v2907_v19, 3 }
  0x7c   : > { %1627 = vperm.xlu0 %2452, %v1615_v20  }
  0x7d   : > { %v565_v32 = vsel %vm554_vm1, %v562_v1, %v564_v18  ;;  %v1490_v1 = vrot.slane %v2852_v25, 3  ;;  %v1363_v25 = vshll.u32 %v2907_v19, 16  ;;  %v1497_v17 = vsel %vm1486_vm5, %v1494_v48, %v1496_v2 }
  0x7e   : > { %642 = vmatmul.bf16.gmra.mxu2 %v563_v7  ;;  %1429 = vmatmul.bf16.vlgmr.msrb.gmra.mxu3 %v1331_v24  ;;  %v1025_v7 = vsel %vm1020_vm4, %v1022_v33, %v1024_v0  ;;  %v1360_v24 = vshrl.u32 %v2907_v19, 16  ;;  %v1623_v19 = vld [vmem:[%s3018_s2 + $0x40] sm:$0xff] }
  0x7f   : > { %v1491_v9 = vsel %vm1486_vm5, %v1488_v23, %v1490_v1  ;;  %v1365_v30 = vrot.slane %v1363_v25, 3 }
  0x80   : > { %v1362_v18 = vrot.slane %v1360_v24, 2  ;;  %1662 = vperm.xlu1 %2453, %v1622_v42  }
  0x82   : > { %v1366_v37 = vor.u32 %v1365_v30, %v1362_v18 }
  0x84   : > { %1632 = vperm.xlu0 %2452, %v1616_v50   ;;  %v1367_v20 = vsel %vm1314_vm3, %v1357_v13, %v1366_v37  ;;  %v1139_v50 = vld [vmem:[%s2529_s12 + $0x30] sm:$0x3] }
  0x8b   : > { %527 = vmatmul.bf16.gmra.mxu1 %v2545_v12  ;;  %983 = vmatmul.bf16.gmra.mxu0 %v901_v34  ;;  %v1485_v12 = vpack.c.b16 %v1169_v47, %v1484_v39  ;;  %v1344_v47 = vrot.slane %v1342_v45, 2  ;;  %v1624_v39 = vld [vmem:[%s3018_s2 + $0x48] sm:$0xff] }
  0x8c   : > { %1657 = vperm.xlu0 %2452, %v1621_v31  }
  0x8d   : > { %v1487_v52 = vrot.slane %v1485_v12, 3  ;;  %v1348_v58 = vor.u32 %v1347_v54, %v1344_v47  ;;  %v1495_v47 = vsel %vm1486_vm5, %v1492_v29, %v1494_v48 }
  0x8e   : > { %647 = vmatmul.bf16.gmra.mxu2 %v565_v32  ;;  %1434 = vmatmul.bf16.gmra.mxu3 %v1340_v40 }
  0x8f   : > { %v1489_v57 = vsel %vm1486_vm5, %v1487_v52, %v1488_v23  ;;  %v1349_v56 = vsel %vm1314_vm3, %v1339_v36, %v1348_v58  ;;  %v1358_v8 = vsel %vm1314_vm3, %v1348_v58, %v1357_v13  ;;  %v1493_v36 = vsel %vm1486_vm5, %v1490_v1, %v1492_v29 }
  0x90   : > { %v1029_v23 = vsel %vm1020_vm4, %v1026_v28, %v1028_v46  ;;  %v1031_v13 = vsel %vm1020_vm4, %v1028_v46, %v1030_v10 }
  0x94   : > { %1672 = vperm.xlu0 %2452, %v1624_v39  }
  0x9b   : > { %1093 = vmatmul.bf16.vlgmr.msra.gmra.mxu1 %v1023_v55  ;;  %1559 = vmatmul.bf16.vlgmr.msra.gmra.mxu0 %v1489_v57 }
  0x9e   : > { %1257 = vmatmul.bf16.vlgmr.msra.gmra.mxu2 %v1187_v11  ;;  %1439 = vmatmul.bf16.gmra.mxu3 %v1349_v56  ;;  %v1178_v11 = vunpack.c.l.b16 %v1139_v50  ;;  %v1620_v56 = vld [vmem:[%s3018_s2 + $0x28] sm:$0xff] }
  0x9f   : > { %1652 = vperm.xlu2 %2454, %v1620_v56  }
  0xa0   : > { %v1184_v58 = vpack.c.b16 %v1178_v11, %v1178_v11 }
  0xa2   : > { %v1194_v63 = vrot.slane %v1184_v58, 2 }
  0xa4   : > { %v1195_v4 = vsel %vm1020_vm4, %v1192_v44, %v1194_v63 }
  0xa7   : > { %1667 = vperm.xlu2 %2454, %v1623_v19  }
  0xa8   : > { %v421_v5 = vpop.f32.mrf.mxu0  ;;  %v2902_v6 = vpop.f32.mrf.mxu1 }
  0xab   : > { %1098 = vmatmul.bf16.gmra.mxu1 %v1025_v7  ;;  %1564 = vmatmul.bf16.gmra.mxu0 %v1491_v9 }
  0xae   : > { %1262 = vmatmul.bf16.gmra.mxu2 %v1189_v3  ;;  %1444 = vmatmul.bf16.gmra.mxu3 %v1358_v8 }
  0xb0   : > { %v423_v21 = vpop.f32.mrf.mxu0  ;;  %v2909_v22 = vpop.f32.mrf.mxu1 }
  0xb1   : > { %v792_v27 = vpop.f32.mrf.mxu3  ;;  %v2924_v53 = vpop.f32.mrf.mxu2 }
  0xb8   : > { %v426_v32 = vpop.f32.mrf.mxu0  ;;  %v2920_v34 = vpop.f32.mrf.mxu1 }
  0xb9   : > { %v794_v38 = vpop.f32.mrf.mxu3  ;;  %v2936_v45 = vpop.f32.mrf.mxu2 }
  0xbb   : > { %1103 = vmatmul.bf16.gmra.mxu1 %v1027_v35  ;;  %1569 = vmatmul.bf16.gmra.mxu0 %v1493_v36 }
  0xbe   : > { %1267 = vmatmul.bf16.gmra.mxu2 %v1191_v15  ;;  %1449 = vmatmul.bf16.gmra.mxu3 %v1367_v20 }
  0xc0   : > { %v428_v40 = vpop.f32.mrf.mxu0  ;;  %v2930_v41 = vpop.f32.mrf.mxu1 }
  0xc1   : > { %v797_v12 = vpop.f32.mrf.mxu3 }
  0xc8   : > { %v508_v33 = vpop.f32.mrf.mxu1  ;;  %v964_v52 = vpop.f32.mrf.mxu0 }
  0xc9   : > { %v509_v54 = vadd.f32 %v508_v33, %v421_v5  ;;  %v799_v16 = vpop.f32.mrf.mxu3 }
  0xcb   : > { %1108 = vmatmul.bf16.gmra.mxu1 %v1029_v23  ;;  %1574 = vmatmul.bf16.gmra.mxu0 %v1495_v47 }
  0xce   : > { %1272 = vmatmul.bf16.gmra.mxu2 %v1193_v49 }
  0xd0   : > { %v510_v59 = vpop.f32.mrf.mxu1  ;;  %v966_v60 = vpop.f32.mrf.mxu0 }
  0xd1   : > { %v628_v55 = vpop.f32.mrf.mxu2  ;;  %v511_v61 = vadd.f32 %v510_v59, %v423_v21  ;;  %v802_v0 = vpop.f32.mrf.mxu3 }
  0xd2   : > { %v653_v57 = vadd.f32 %v628_v55, %v509_v54 }
  0xd4   : > { %v817_v43 = vadd.f32 %v792_v27, %v653_v57 }
  0xd6   : > { %v2950_v62 = vadd.f32 %v964_v52, %v817_v43 }
  0xd8   : > { %v513_v7 = vpop.f32.mrf.mxu1  ;;  %v969_v9 = vpop.f32.mrf.mxu0 }
  0xd9   : > { %v630_v1 = vpop.f32.mrf.mxu2  ;;  %v514_v8 = vadd.f32 %v513_v7, %v426_v32  ;;  %v804_v24 = vpop.f32.mrf.mxu3 }
  0xda   : > { %v654_v3 = vadd.f32 %v630_v1, %v511_v61 }
  0xdb   : > { %1113 = vmatmul.bf16.gmra.mxu1 %v1031_v13  ;;  %1579 = vmatmul.bf16.gmra.mxu0 %v1497_v17 }
  0xdc   : > { %v818_v5 = vadd.f32 %v794_v38, %v654_v3 }
  0xde   : > { %1277 = vmatmul.bf16.gmra.mxu2 %v1195_v4  ;;  %v2957_v21 = vadd.f32 %v966_v60, %v818_v5 }
  0xe0   : > { %v515_v27 = vpop.f32.mrf.mxu1  ;;  %v971_v28 = vpop.f32.mrf.mxu0 }
  0xe1   : > { %v633_v14 = vpop.f32.mrf.mxu2  ;;  %v516_v29 = vadd.f32 %v515_v27, %v428_v40  ;;  %v807_v30 = vpop.f32.mrf.mxu3 }
  0xe2   : > { %v655_v25 = vadd.f32 %v633_v14, %v514_v8 }
  0xe4   : > { %v819_v26 = vadd.f32 %v797_v12, %v655_v25 }
  0xe6   : > { %v2962_v18 = vadd.f32 %v969_v9, %v819_v26 }
  0xe8   : > { %v518_v35 = vpop.f32.mrf.mxu1  ;;  %v974_v36 = vpop.f32.mrf.mxu0 }
  0xe9   : > { %v635_v15 = vpop.f32.mrf.mxu2  ;;  %v519_v37 = vadd.f32 %v518_v35, %v2902_v6  ;;  %v809_v42 = vpop.f32.mrf.mxu3 }
  0xea   : > { %v656_v31 = vadd.f32 %v635_v15, %v516_v29 }
  0xec   : > { %v820_v32 = vadd.f32 %v799_v16, %v656_v31 }
  0xee   : > { %v2965_v38 = vadd.f32 %v971_v28, %v820_v32  ;;  %v1628_v27 = vpop.permute.xlu0 %1627 }
  0xf0   : > { %v520_v12 = vpop.f32.mrf.mxu1  ;;  %v976_v46 = vpop.f32.mrf.mxu0 }
  0xf1   : > { %v638_v20 = vpop.f32.mrf.mxu2  ;;  %v521_v40 = vadd.f32 %v520_v12, %v2909_v22  ;;  %v812_v33 = vpop.f32.mrf.mxu3 }
  0xf2   : > { %v657_v39 = vadd.f32 %v638_v20, %v519_v37 }
  0xf4   : > { %v821_v44 = vadd.f32 %v802_v0, %v657_v39 }
  0xf6   : > { %v2968_v48 = vadd.f32 %v974_v36, %v821_v44  ;;  %v1633_v37 = vpop.permute.xlu0 %1632 }
  0xf8   : > { %v523_v52 = vpop.f32.mrf.mxu1  ;;  %v979_v23 = vpop.f32.mrf.mxu0 }
  0xf9   : > { %v640_v49 = vpop.f32.mrf.mxu2  ;;  %v524_v6 = vadd.f32 %v523_v52, %v2920_v34  ;;  %v814_v22 = vpop.f32.mrf.mxu3 }
  0xfa   : > { %v658_v50 = vadd.f32 %v640_v49, %v521_v40  ;;  %v1638_v52 = vpop.permute.xlu1 %1637 }
  0xfc   : > { %v822_v51 = vadd.f32 %v804_v24, %v658_v50 }
  0xfe   : > { %v2971_v47 = vadd.f32 %v976_v46, %v822_v51 }
 0x100   : > { %v525_v55 = vpop.f32.mrf.mxu1  ;;  %v981_v57 = vpop.f32.mrf.mxu0 }
 0x101   : > { %v643_v54 = vpop.f32.mrf.mxu2  ;;  %v526_v58 = vadd.f32 %v525_v55, %v2930_v41  ;;  %v1430_v1 = vpop.f32.mrf.mxu3 }
 0x102   : > { %v659_v11 = vadd.f32 %v643_v54, %v524_v6 }
 0x104   : > { %v823_v16 = vadd.f32 %v807_v30, %v659_v11 }
 0x106   : > { %v2974_v43 = vadd.f32 %v979_v23, %v823_v16 }
 0x108   : > { %v528_v61 = vpop.f32.mrf.mxu1  ;;  %v984_v63 = vpop.f32.mrf.mxu0 }
 0x109   : > { %v645_v56 = vpop.f32.mrf.mxu2  ;;  %v529_v0 = vadd.f32 %v528_v61, %v2924_v53  ;;  %v1432_v17 = vpop.f32.mrf.mxu3 }
 0x10a   : > { %v660_v59 = vadd.f32 %v645_v56, %v526_v58 }
 0x10c   : > { %v824_v60 = vadd.f32 %v809_v42, %v660_v59 }
 0x10e   : > { %v2977_v34 = vadd.f32 %v981_v57, %v824_v60 }
 0x110   : > { %v530_v4 = vpop.f32.mrf.mxu1  ;;  %v986_v5 = vpop.f32.mrf.mxu0 }
 0x111   : > { %v648_v10 = vpop.f32.mrf.mxu2  ;;  %v531_v41 = vadd.f32 %v530_v4, %v2936_v45  ;;  %v1435_v28 = vpop.f32.mrf.mxu3 }
 0x112   : > { %v661_v2 = vadd.f32 %v648_v10, %v529_v0 }
 0x114   : > { %v825_v3 = vadd.f32 %v812_v33, %v661_v2 }
 0x116   : > { %v2980_v7 = vadd.f32 %v984_v63, %v825_v3  ;;  %v1643_v63 = vpop.permute.xlu1 %1642 }
 0x118   : > { %v1094_v24 = vpop.f32.mrf.mxu1  ;;  %v1560_v14 = vpop.f32.mrf.mxu0 }
 0x119   : > { %v650_v9 = vpop.f32.mrf.mxu2  ;;  %v1119_v53 = vadd.f32 %v1094_v24, %v2950_v62  ;;  %v1437_v12 = vpop.f32.mrf.mxu3 }
 0x11a   : > { %v662_v13 = vadd.f32 %v650_v9, %v531_v41 }
 0x11c   : > { %v826_v8 = vadd.f32 %v814_v22, %v662_v13  ;;  %v1648_v13 = vpop.permute.xlu2 %1647 }
 0x11e   : > { %v2983_v25 = vadd.f32 %v986_v5, %v826_v8 }
 0x120   : > { %v1096_v29 = vpop.f32.mrf.mxu1  ;;  %v1562_v30 = vpop.f32.mrf.mxu0 }
 0x121   : > { %v1258_v19 = vpop.f32.mrf.mxu2  ;;  %v1120_v15 = vadd.f32 %v1096_v29, %v2957_v21  ;;  %v1440_v58 = vpop.f32.mrf.mxu3 }
 0x122   : > { %v1283_v26 = vadd.f32 %v1258_v19, %v1119_v53 }
 0x124   : > { %v1455_v45 = vadd.f32 %v1430_v1, %v1283_v26 }
 0x126   : > { %v1585_v32 = vadd.f32 %v1560_v14, %v1455_v45 }
 0x128   : > { %v1099_v20 = vpop.f32.mrf.mxu1  ;;  %v1565_v39 = vpop.f32.mrf.mxu0  ;;  %v1675_v62 = vmul.f32 %v1628_v27, %v1585_v32 }
 0x129   : > { %v1260_v31 = vpop.f32.mrf.mxu2  ;;  %v1121_v44 = vadd.f32 %v1099_v20, %v2962_v18 }
 0x12a   : > { %v1284_v35 = vadd.f32 %v1260_v31, %v1120_v15  ;;  %v1701_v49 = vmul.f32 %v1675_v62, %v1585_v32  ;;  %v1653_v31 = vpop.permute.xlu2 %1652 }
 0x12c   : > { %v1456_v36 = vadd.f32 %v1432_v17, %v1284_v35  ;;  %v1442_v17 = vpop.f32.mrf.mxu3 }
 0x12e   : > { %v1586_v42 = vadd.f32 %v1562_v30, %v1456_v36 }
 0x130   : > { %v2396_v21 = vpack.c.bf16 %v1586_v42, %v1585_v32  ;;  %v1676_v46 = vmul.f32 %v1633_v37, %v1586_v42  ;;  %v1101_v54 = vpop.f32.mrf.mxu1  ;;  %v1567_v18 = vpop.f32.mrf.mxu0 }
 0x131   : > { %v1263_v40 = vpop.f32.mrf.mxu2  ;;  %v1122_v16 = vadd.f32 %v1101_v54, %v2965_v38 }
 0x132   : > { %2397 = vst [vmem:[%s2991_s10] sm:$0xff] %v2396_v21   ;;  %v1685_v50 = vadd.f32 %v1676_v46, %v1675_v62  ;;  %v1702_v51 = vmul.f32 %v1676_v46, %v1586_v42  ;;  %v1285_v33 = vadd.f32 %v1263_v40, %v1121_v44 }
 0x134   : > { %v1711_v23 = vadd.f32 %v1702_v51, %v1701_v49  ;;  %v1457_v6 = vadd.f32 %v1435_v28, %v1285_v33  ;;  %v1445_v32 = vpop.f32.mrf.mxu3  ;;  %v1658_v51 = vpop.permute.xlu0 %1657 }
 0x136   : > { %v1587_v11 = vadd.f32 %v1565_v39, %v1457_v6 }
 0x138   : > { %v1677_v55 = vmul.f32 %v1638_v52, %v1587_v11  ;;  %v1104_v0 = vpop.f32.mrf.mxu1  ;;  %v1570_v1 = vpop.f32.mrf.mxu0 }
 0x139   : > { %v1265_v57 = vpop.f32.mrf.mxu2  ;;  %v1123_v2 = vadd.f32 %v1104_v0, %v2968_v48 }
 0x13a   : > { %v1686_v22 = vadd.f32 %v1685_v50, %v1677_v55  ;;  %v1703_v56 = vmul.f32 %v1677_v55, %v1587_v11  ;;  %v1286_v59 = vadd.f32 %v1265_v57, %v1122_v16 }
 0x13c   : > { %v1712_v60 = vadd.f32 %v1711_v23, %v1703_v56  ;;  %v1458_v61 = vadd.f32 %v1437_v12, %v1286_v59  ;;  %v1447_v33 = vpop.f32.mrf.mxu3 }
 0x13e   : > { %v1588_v10 = vadd.f32 %v1567_v18, %v1458_v61 }
 0x140   : > { %v2401_v3 = vpack.c.bf16 %v1588_v10, %v1587_v11  ;;  %v1678_v4 = vmul.f32 %v1643_v63, %v1588_v10  ;;  %v1106_v14 = vpop.f32.mrf.mxu1  ;;  %v1572_v53 = vpop.f32.mrf.mxu0 }
 0x141   : > { %v1268_v5 = vpop.f32.mrf.mxu2  ;;  %v1124_v26 = vadd.f32 %v1106_v14, %v2971_v47 }
 0x142   : > { %2421 = vst [vmem:[%s2991_s10 + $0x8] sm:$0xff] %v2401_v3   ;;  %v1687_v38 = vadd.f32 %v1686_v22, %v1678_v4  ;;  %v1704_v41 = vmul.f32 %v1678_v4, %v1588_v10  ;;  %v1287_v9 = vadd.f32 %v1268_v5, %v1123_v2  ;;  %v1663_v22 = vpop.permute.xlu1 %1662 }
 0x144   : > { %v1713_v8 = vadd.f32 %v1712_v60, %v1704_v41  ;;  %v1459_v24 = vadd.f32 %v1440_v58, %v1287_v9  ;;  %v1450_v60 = vpop.f32.mrf.mxu3 }
 0x146   : > { %v1589_v19 = vadd.f32 %v1570_v1, %v1459_v24 }
 0x148   : > { %v1679_v27 = vmul.f32 %v1648_v13, %v1589_v19  ;;  %v1109_v35 = vpop.f32.mrf.mxu1  ;;  %v1575_v20 = vpop.f32.mrf.mxu0 }
 0x149   : > { %v1270_v28 = vpop.f32.mrf.mxu2  ;;  %v1125_v37 = vadd.f32 %v1109_v35, %v2974_v43 }
 0x14a   : > { %v1688_v48 = vadd.f32 %v1687_v38, %v1679_v27  ;;  %v1705_v29 = vmul.f32 %v1679_v27, %v1589_v19  ;;  %v1288_v30 = vadd.f32 %v1270_v28, %v1124_v26  ;;  %v1668_v38 = vpop.permute.xlu2 %1667  ;;  %v1673_v26 = vpop.permute.xlu0 %1672 }
 0x14c   : > { %v1714_v45 = vadd.f32 %v1713_v8, %v1705_v29  ;;  %v1460_v15 = vadd.f32 %v1442_v17, %v1288_v30  ;;  %v1452_v8 = vpop.f32.mrf.mxu3 }
 0x14e   : > { %v1590_v36 = vadd.f32 %v1572_v53, %v1460_v15 }
 0x150   : > { %v2406_v39 = vpack.c.bf16 %v1590_v36, %v1589_v19  ;;  %v1680_v62 = vmul.f32 %v1653_v31, %v1590_v36  ;;  %v1111_v40 = vpop.f32.mrf.mxu1  ;;  %v1577_v23 = vpop.f32.mrf.mxu0 }
 0x151   : > { %v1273_v42 = vpop.f32.mrf.mxu2  ;;  %v1126_v50 = vadd.f32 %v1111_v40, %v2977_v34 }
 0x152   : > { %2422 = vst [vmem:[%s2991_s10 + $0x10] sm:$0xff] %v2406_v39   ;;  %v1689_v47 = vadd.f32 %v1688_v48, %v1680_v62  ;;  %v1706_v44 = vmul.f32 %v1680_v62, %v1590_v36  ;;  %v1289_v12 = vadd.f32 %v1273_v42, %v1125_v37 }
 0x154   : > { %v1715_v21 = vadd.f32 %v1714_v45, %v1706_v44  ;;  %v1461_v46 = vadd.f32 %v1445_v32, %v1289_v12 }
 0x156   : > { %v1591_v49 = vadd.f32 %v1575_v20, %v1461_v46 }
 0x158   : > { %v1681_v52 = vmul.f32 %v1658_v51, %v1591_v49  ;;  %v1114_v55 = vpop.f32.mrf.mxu1  ;;  %v1580_v1 = vpop.f32.mrf.mxu0 }
 0x159   : > { %v1275_v43 = vpop.f32.mrf.mxu2  ;;  %v1127_v58 = vadd.f32 %v1114_v55, %v2980_v7 }
 0x15a   : > { %v1290_v6 = vadd.f32 %v1275_v43, %v1126_v50  ;;  %v1690_v54 = vadd.f32 %v1689_v47, %v1681_v52  ;;  %v1707_v18 = vmul.f32 %v1681_v52, %v1591_v49 }
 0x15c   : > { %v1462_v11 = vadd.f32 %v1447_v33, %v1290_v6  ;;  %v1716_v16 = vadd.f32 %v1715_v21, %v1707_v18 }
 0x15e   : > { %v1592_v57 = vadd.f32 %v1577_v23, %v1462_v11 }
 0x160   : > { %v2411_v56 = vpack.c.bf16 %v1592_v57, %v1591_v49  ;;  %v1682_v59 = vmul.f32 %v1663_v22, %v1592_v57  ;;  %v1116_v3 = vpop.f32.mrf.mxu1  ;;  %v1582_v53 = vpop.f32.mrf.mxu0 }
 0x161   : > { %v1278_v34 = vpop.f32.mrf.mxu2  ;;  %v1128_v5 = vadd.f32 %v1116_v3, %v2983_v25 }
 0x162   : > { %2423 = vst [vmem:[%s2991_s10 + $0x18] sm:$0xff] %v2411_v56   ;;  %v1691_v61 = vadd.f32 %v1690_v54, %v1682_v59  ;;  %v1708_v63 = vmul.f32 %v1682_v59, %v1592_v57  ;;  %v1291_v0 = vadd.f32 %v1278_v34, %v1127_v58 }
 0x164   : > { %v1717_v10 = vadd.f32 %v1716_v16, %v1708_v63  ;;  %v1463_v2 = vadd.f32 %v1450_v60, %v1291_v0 }
 0x166   : > { %v1593_v4 = vadd.f32 %v1580_v1, %v1463_v2 }
 0x168   : > { %v1683_v41 = vmul.f32 %v1668_v38, %v1593_v4 }
 0x169   : > { %v1280_v7 = vpop.f32.mrf.mxu2 }
 0x16a   : > { %v1692_v9 = vadd.f32 %v1691_v61, %v1683_v41  ;;  %v1709_v13 = vmul.f32 %v1683_v41, %v1593_v4  ;;  %v1292_v17 = vadd.f32 %v1280_v7, %v1128_v5 }
 0x16c   : > { %v1718_v24 = vadd.f32 %v1717_v10, %v1709_v13  ;;  %v1464_v14 = vadd.f32 %v1452_v8, %v1292_v17 }
 0x16e   : > { %v1594_v19 = vadd.f32 %v1582_v53, %v1464_v14 }
 0x170   : > { %v2416_v27 = vpack.c.bf16 %v1594_v19, %v1593_v4  ;;  %v1684_v28 = vmul.f32 %v1673_v26, %v1594_v19 }
 0x172   : > { %2424 = vst [vmem:[%s2991_s10 + $0x20] sm:$0xff] %v2416_v27   ;;  %v1693_v48 = vadd.f32 %v1692_v9, %v1684_v28  ;;  %v1710_v29 = vmul.f32 %v1684_v28, %v1594_v19 }
 0x174   : > { %v1694_v25 = vrot.slane %v1693_v48, 4  ;;  %v1719_v30 = vadd.f32 %v1718_v24, %v1710_v29 }
 0x176   : > { %v1695_v45 = vadd.f32 %v1694_v25, %v1693_v48  ;;  %v1720_v15 = vrot.slane %v1719_v30, 4 }
 0x178   : > { %v1696_v31 = vrot.slane %v1695_v45, 2  ;;  %v1721_v32 = vadd.f32 %v1720_v15, %v1719_v30 }
 0x17a   : > { %v1697_v35 = vadd.f32 %v1696_v31, %v1695_v45  ;;  %v1722_v36 = vrot.slane %v1721_v32, 2 }
 0x17c   : > { %v1698_v37 = vrot.slane %v1697_v35, 1  ;;  %v1723_v20 = vadd.f32 %v1722_v36, %v1721_v32 }
 0x17e   : > { %v1699_v39 = vadd.f32 %v1698_v37, %v1697_v35  ;;  %v1724_v62 = vrot.slane %v1723_v20, 1 }
 0x180   : > { %1700 = vst [vmem:[%s238_s14] sm:$0x1] %v1699_v39  ;;  %v1725_v42 = vadd.f32 %v1724_v62, %v1723_v20 }
 0x182   : > { %1726 = vst [vmem:[%s241_s17] sm:$0x1] %v1725_v42 }
 0x183 PF: > { %s16_s18 = sadd.s32 1, %s2461_s18  }
 0x184   : > { %p13_p4 = scmp.ge.s32.totalorder %s16_s18, 4  }
 0x186   :  { %15 = sbr.rel (!%p13_p4) target bundleno = 1 (0x1), region = 94 }

// kernel: gan_generator_forward.32
= control target key start
LH: loop header
LB: loop body
LE: loop exit
PB: predicated region body
PF: predicated region fallthrough
CT: control target
= control target key end

     0   :  { %s318_s12 = smov 0   ;;  %s341_s0 = inlined_call_operand.vmem [shape: bf16[2,24,128], index: 0, kind: input, shape index: {}]   ;;  %s342_s1 = inlined_call_operand.vmem [shape: f32[1,1,128], index: 1, kind: input, shape index: {}]   ;;  %s343_s2 = inlined_call_operand.vmem [shape: f32[1,1,128], index: 2, kind: input, shape index: {}]   ;;  %s344_s3 = inlined_call_operand.vmem [shape: bf16[2,24,128], index: 3, kind: output, shape index: {}]  }
   0x1 LB: > { %s261_s13 = sadd.s32 4294967295, %s296_s12   ;;  %p265_p0 = scmp.ge.s32.totalorder %s296_s12, 1  ;;  %s296_s12 = sphi %s318_s12, %s13_s12  }
   0x2   : > { %p137_p1 = scmp.lt.s32.totalorder %s296_s12, 3 }
   0x4   : > { %p138_p2 = pnand %p265_p0, %p137_p1 }
   0x5   : > { %p161_p3 = scmp.lt.s32.totalorder (!%p138_p2), %s261_s13, 1 }
   0x6   : > { %141 = sbr.rel (%p138_p2) target bundleno = 29 (0x1d), region = 32 }
   0xb   : > { %s346_s13 = smov (!%p161_p3, %s261_s13), 1  ;;  %v288_v0 = vld [vmem:[%s342_s1] ss:$0 sm:$0xff] }
   0xc   : > { %s279_s14 = smul.u32 12, %s346_s13  ;;  %v289_v6 = vld [vmem:[%s343_s2] ss:$0 sm:$0xff] }
   0xe   : > { %s165_s17 = scalar_lea.vmem %s341_s0, %s279_s14  ;;  %s170_s24 = scalar_lea.vmem %s344_s3, %s279_s14 }
   0xf   : > { %v271_v1 = vld [vmem:[%s165_s17] sm:$0xff]   ;;  %v173_v2 = vld [vmem:[%s165_s17 + $0x8] sm:$0xf] }
  0x10   : > { %v272_v3 = vunpack.c.l.bf16 %v271_v1  ;;  %v273_v4 = vunpack.c.h.bf16 %v271_v1  ;;  %v176_v5 = vunpack.c.l.bf16 %v173_v2 }
  0x12   : > { %v181_v7 = vmul.f32 %v288_v0, %v272_v3  ;;  %v182_v8 = vmul.f32 %v288_v0, %v273_v4  ;;  %v183_v9 = vmul.f32 %v288_v0, %v176_v5 }
  0x14   : > { %v188_v10 = vadd.f32 %v289_v6, %v181_v7  ;;  %v189_v11 = vadd.f32 %v289_v6, %v182_v8  ;;  %v190_v12 = vadd.f32 %v289_v6, %v183_v9 }
  0x16   : > { %vm191_vm0 = vcmp.ge.f32.partialorder %v188_v10, 0.0  ;;  %vm192_vm1 = vcmp.ge.f32.partialorder %v189_v11, 0.0  ;;  %v194_v13 = vmul.f32 0.01, %v188_v10  ;;  %v195_v14 = vmul.f32 0.01, %v189_v11 }
  0x17   : > { %vm193_vm2 = vcmp.ge.f32.partialorder %v190_v12, 0.0  ;;  %v196_v15 = vmul.f32 0.01, %v190_v12 }
  0x18   : > { %v197_v16 = vsel %vm191_vm0, %v188_v10, %v194_v13  ;;  %v198_v17 = vsel %vm192_vm1, %v189_v11, %v195_v14 }
  0x19   : > { %v277_v18 = vpack.c.bf16 %v198_v17, %v197_v16  ;;  %v199_v19 = vsel %vm193_vm2, %v190_v12, %v196_v15 }
  0x1a   : > { %v202_v20 = vpack.c.bf16 %v199_v19, %v199_v19 }
  0x1b   : > { %278 = vst [vmem:[%s170_s24] sm:$0xff] %v277_v18  }
  0x1c   : > { %205 = vst [vmem:[%s170_s24 + $0x8] sm:$0xf] %v202_v20 }
  0x1d PF: > { %s13_s12 = sadd.s32 1, %s296_s12  }
  0x1e   : > { %p10_p4 = scmp.ge.s32.totalorder %s13_s12, 4  }
  0x20   :  { %12 = sbr.rel (!%p10_p4) target bundleno = 1 (0x1), region = 62 }

// kernel: gan_generator_forward.31
= control target key start
LH: loop header
LB: loop body
LE: loop exit
PB: predicated region body
PF: predicated region fallthrough
CT: control target
= control target key end

     0   :  { %s1873_s18 = smov 0   ;;  %s2217_s0 = inlined_call_operand.vmem [shape: bf16[2,44,128], index: 0, kind: input, shape index: {}]   ;;  %s2218_s1 = inlined_call_operand.vmem [shape: bf16[9,128,128], index: 1, kind: input, shape index: {}]   ;;  %s2219_s2 = inlined_call_operand.vmem [shape: f32[24,1], index: 2, kind: input, shape index: {}]   ;;  %s2220_s3 = inlined_call_operand.vmem [shape: bf16[2,24,128], index: 3, kind: output, shape index: {0}]   ;;  %s2221_s4 = inlined_call_operand.vmem [shape: f32[2,1,128], index: 4, kind: output, shape index: {1}]   ;;  %s2222_s5 = inlined_call_operand.vmem [shape: f32[2,1,128], index: 5, kind: output, shape index: {2}]  }
   0x1 LB: > { %s1302_s19 = sadd.s32 4294967295, %s1840_s18   ;;  %p1306_p0 = scmp.ge.s32.totalorder %s1840_s18, 1  ;;  %s1840_s18 = sphi %s1873_s18, %s16_s18  }
   0x2   : > { %p192_p1 = scmp.lt.s32.totalorder %s1840_s18, 3 }
   0x4   : > { %p193_p2 = pnand %p1306_p0, %p192_p1 }
   0x5   : > { %p226_p3 = scmp.lt.s32.totalorder (!%p193_p2), %s1302_s19, 1 }
   0x6   : > { %196 = sbr.rel (%p193_p2) target bundleno = 264 (0x108), region = 32 }
   0xb   : > { %v1742_v0 = vld [vmem:[%s2218_s1 + $0x78] sm:$0xff]  ;;  %v1741_v4 = vld [vmem:[%s2218_s1 + $0x70] sm:$0xff]  ;;  %s2224_s19 = smov (!%p226_p3, %s1302_s19), 1  ;;  %v1740_v8 = vld [vmem:[%s2218_s1 + $0x68] sm:$0xff]  ;;  %vm289_vm0 = vsmask.f32 7424 }
   0xc   : > { %v1734_v1 = vld [vmem:[%s2218_s1 + $0x38] sm:$0xff]  ;;  %355 = vmatpush.bf16.msra.mxu0 %v1742_v0  ;;  %v1733_v5 = vld [vmem:[%s2218_s1 + $0x30] sm:$0xff]  ;;  %s1821_s11 = smul.u32 24, %s2224_s19  ;;  %v1732_v9 = vld [vmem:[%s2218_s1 + $0x28] sm:$0xff]  ;;  %vm463_vm1 = vcmask 1046528   ;;  %vm563_vm2 = vcmask 1044480   ;;  %s238_s23 = scalar_lea.vmem %s2221_s4, %s2224_s19 }
   0xd   : > { %v1750_v2 = vld [vmem:[%s2218_s1 + $0xb8] sm:$0xff]  ;;  %424 = vmatpush.bf16.msra.mxu1 %v1734_v1  ;;  %v1749_v6 = vld [vmem:[%s2218_s1 + $0xb0] sm:$0xff]  ;;  %v1748_v10 = vld [vmem:[%s2218_s1 + $0xa8] sm:$0xff]  ;;  %vm659_vm3 = vsmask.f32 4352  ;;  %vm869_vm4 = vcmask 1045504   ;;  %s241_s27 = scalar_lea.vmem %s2222_s5, %s2224_s19 }
   0xe   : > { %v1758_v3 = vld [vmem:[%s2218_s1 + $0xf8] sm:$0xff]  ;;  %517 = vmatpush.bf16.msra.mxu2 %v1750_v2  ;;  %v1757_v7 = vld [vmem:[%s2218_s1 + $0xf0] sm:$0xff]  ;;  %v1756_v11 = vld [vmem:[%s2218_s1 + $0xe8] sm:$0xff]  ;;  %s1923_s24 = scalar_lea.vmem %s2217_s0, %s1821_s11  ;;  %vm965_vm5 = vsmask.f32 5376 }
   0xf   : > { %617 = vmatpush.bf16.msra.mxu3 %v1758_v3  ;;  %v1739_v12 = vld [vmem:[%s2218_s1 + $0x60] sm:$0xff]  ;;  %v1938_v16 = vld [vmem:[%s1923_s24 + $0x8] sm:$0xff]   ;;  %v1738_v18 = vld [vmem:[%s2218_s1 + $0x58] sm:$0xff] }
  0x10   : > { %356 = vmatpush.bf16.msra.mxu0 %v1741_v4  ;;  %v1731_v13 = vld [vmem:[%s2218_s1 + $0x20] sm:$0xff]  ;;  %v261_v17 = vld [vmem:[%s1923_s24 + $0xc] sm:$0x1]  ;;  %v1730_v19 = vld [vmem:[%s2218_s1 + $0x18] sm:$0xff]  ;;  %v1948_v20 = vunpack.c.l.b16 %v1938_v16 }
  0x11   : > { %425 = vmatpush.bf16.msra.mxu1 %v1733_v5  ;;  %v1747_v14 = vld [vmem:[%s2218_s1 + $0xa0] sm:$0xff]  ;;  %v286_v21 = vunpack.c.l.b16 %v261_v17  ;;  %v1746_v22 = vld [vmem:[%s2218_s1 + $0x98] sm:$0xff]  ;;  %v539_v27 = vld [vmem:[%s1923_s24 + $0xc] sm:$0x7] }
  0x12   : > { %518 = vmatpush.bf16.msra.mxu2 %v1749_v6  ;;  %v1755_v15 = vld [vmem:[%s2218_s1 + $0xe0] sm:$0xff]  ;;  %v1754_v23 = vld [vmem:[%s2218_s1 + $0xd8] sm:$0xff]  ;;  %v1737_v28 = vld [vmem:[%s2218_s1 + $0x50] sm:$0xff]  ;;  %v560_v37 = vunpack.c.l.b16 %v539_v27  ;;  %v373_v27 = vpack.c.b16 %v1948_v20, %v1948_v20 }
  0x13   : > { %618 = vmatpush.bf16.msra.mxu3 %v1757_v7  ;;  %v1957_v24 = vld [vmem:[%s1923_s24] sm:$0xff]   ;;  %v1729_v29 = vld [vmem:[%s2218_s1 + $0x10] sm:$0xff]  ;;  %v1969_v30 = vpack.c.b16 %v286_v21, %v1948_v20  ;;  %v1736_v38 = vld [vmem:[%s2218_s1 + $0x48] sm:$0xff] }
  0x14   : > { %357 = vmatpush.bf16.msra.mxu0 %v1740_v8  ;;  %v442_v25 = vld [vmem:[%s1923_s24] sm:$0xe]  ;;  %v293_v31 = vshll.u32 %v1957_v24, 16  ;;  %v1745_v32 = vld [vmem:[%s2218_s1 + $0x90] sm:$0xff]  ;;  %v1979_v34 = vunpack.c.h.b16 %v1957_v24  ;;  %v1728_v39 = vld [vmem:[%s2218_s1 + $0x8] sm:$0xff]  ;;  %v291_v40 = vshrl.u32 %v1957_v24, 16  ;;  %v2000_v47 = vpack.c.b16 %v560_v37, %v1948_v20 }
  0x15   : > { %426 = vmatpush.bf16.msra.mxu1 %v1732_v9  ;;  %v538_v26 = vld [vmem:[%s1923_s24] sm:$0x8]  ;;  %v1753_v33 = vld [vmem:[%s2218_s1 + $0xd0] sm:$0xff]  ;;  %v461_v35 = vunpack.c.l.b16 %v442_v25  ;;  %v298_v42 = vshll.u32 %v1969_v30, 16  ;;  %v1744_v43 = vld [vmem:[%s2218_s1 + $0x88] sm:$0xff]  ;;  %v465_v55 = vrot.slane %v1969_v30, 1 }
  0x16   : > { %519 = vmatpush.bf16.msra.mxu2 %v1748_v10  ;;  %v559_v36 = vunpack.c.l.b16 %v538_v26  ;;  %v295_v41 = vrot.slane %v293_v31, 1  ;;  %v1752_v44 = vld [vmem:[%s2218_s1 + $0xc8] sm:$0xff]  ;;  %v1735_v48 = vld [vmem:[%s2218_s1 + $0x40] sm:$0xff]  ;;  %v565_v57 = vrot.slane %v2000_v47, 3  ;;  %v1766_v58 = vld [vmem:[%s2218_s1 + $0x138] sm:$0xff] }
  0x17   : > { %619 = vmatpush.bf16.msra.mxu3 %v1756_v11  ;;  %v462_v45 = vpack.c.b16 %v1979_v34, %v461_v35  ;;  %v1727_v49 = vld [vmem:[%s2218_s1] sm:$0xff]  ;;  %v2008_v51 = vrot.slane %v298_v42, 1  ;;  %v1774_v59 = vld [vmem:[%s2218_s1 + $0x178] sm:$0xff]  ;;  %v1765_v1 = vld [vmem:[%s2218_s1 + $0x130] sm:$0xff] }
  0x18   : > { %358 = vmatpush.bf16.msra.mxu0 %v1739_v12  ;;  %v1997_v46 = vpack.c.b16 %v1979_v34, %v559_v36  ;;  %v296_v50 = vor.u32 %v295_v41, %v291_v40  ;;  %v1743_v52 = vld [vmem:[%s2218_s1 + $0x80] sm:$0xff]  ;;  %v1782_v62 = vld [vmem:[%s2218_s1 + $0x1b8] sm:$0xff]  ;;  %v1773_v2 = vld [vmem:[%s2218_s1 + $0x170] sm:$0xff]  ;;  %v672_v40 = vshll.u32 %v1938_v16, 16 }
  0x19   : > { %427 = vmatpush.bf16.msra.mxu1 %v1731_v13  ;;  %v1751_v53 = vld [vmem:[%s2218_s1 + $0xc0] sm:$0xff]  ;;  %v464_v54 = vrot.slane %v462_v45, 1  ;;  %v1790_v0 = vld [vmem:[%s2218_s1 + $0x1f8] sm:$0xff]  ;;  %v1781_v3 = vld [vmem:[%s2218_s1 + $0x1b0] sm:$0xff] }
  0x1a   : > { %520 = vmatpush.bf16.msra.mxu2 %v1747_v14  ;;  %v564_v56 = vrot.slane %v1997_v46, 3  ;;  %v301_v60 = vsel %vm289_vm0, %v296_v50, %v2008_v51  ;;  %v1789_v4 = vld [vmem:[%s2218_s1 + $0x1f0] sm:$0xff]  ;;  %v1764_v5 = vld [vmem:[%s2218_s1 + $0x128] sm:$0xff]  ;;  %v1763_v9 = vld [vmem:[%s2218_s1 + $0x120] sm:$0xff]  ;;  %v302_v14 = vshrl.u32 %v1969_v30, 16  ;;  %v661_v37 = vshrl.u32 %v1997_v46, 16 }
  0x1b   : > { %620 = vmatpush.bf16.msra.mxu3 %v1755_v15  ;;  %v466_v61 = vsel %vm463_vm1, %v464_v54, %v465_v55  ;;  %v1772_v6 = vld [vmem:[%s2218_s1 + $0x168] sm:$0xff]  ;;  %v1771_v10 = vld [vmem:[%s2218_s1 + $0x160] sm:$0xff]  ;;  %v944_v13 = vld [vmem:[%s1923_s24 + $0x10] sm:$0x7]  ;;  %v657_v15 = vunpack.c.h.b16 %v1938_v16 }
  0x1c   : > { %359 = vmatpush.bf16.msra.mxu0 %v1738_v18  ;;  %v566_v63 = vsel %vm563_vm2, %v564_v56, %v565_v57  ;;  %v1780_v7 = vld [vmem:[%s2218_s1 + $0x1a8] sm:$0xff]  ;;  %v838_v11 = vld [vmem:[%s1923_s24 + $0x4] sm:$0xc]  ;;  %v1770_v25 = vld [vmem:[%s2218_s1 + $0x158] sm:$0xff]  ;;  %v304_v26 = vor.u32 %v302_v14, %v2008_v51  ;;  %v1842_v14 = vmov 0  }
  0x1d   : > { %428 = vmatpush.bf16.msra.mxu1 %v1730_v19  ;;  %v1788_v8 = vld [vmem:[%s2218_s1 + $0x1e8] sm:$0xff]  ;;  %v1779_v17 = vld [vmem:[%s2218_s1 + $0x1a0] sm:$0xff]  ;;  %v841_v31 = vld [vmem:[%s1923_s24 + $0x10] sm:$0x3]  ;;  %1832 = vset.pattern.permute.xlu0 %v1842_v14 }
  0x1e   : > { %521 = vmatpush.bf16.msra.mxu2 %v1746_v22  ;;  %v2071_v12 = vld [vmem:[%s1923_s24 + $0x8] sm:$0xff]   ;;  %v1787_v18 = vld [vmem:[%s2218_s1 + $0x1e0] sm:$0xff]  ;;  %v863_v22 = vunpack.c.l.b16 %v838_v11  ;;  %v1761_v35 = vld [vmem:[%s2218_s1 + $0x110] sm:$0xff]  ;;  %v866_v41 = vunpack.c.l.b16 %v841_v31  ;;  %1833 = vset.pattern.permute.xlu1 %v1842_v14 }
  0x1f   : > { %621 = vmatpush.bf16.msra.mxu3 %v1754_v23  ;;  %v1805_v19 = vunpack.c.l.b16 %v2071_v12  ;;  %v1806_v21 = vunpack.c.h.b16 %v2071_v12  ;;  %v963_v23 = vunpack.c.l.b16 %v944_v13  ;;  %v1769_v36 = vld [vmem:[%s2218_s1 + $0x150] sm:$0xff]  ;;  %v1760_v47 = vld [vmem:[%s2218_s1 + $0x108] sm:$0xff] }
  0x20   : > { %360 = vmatpush.bf16.msra.mxu0 %v1737_v28  ;;  %v1778_v28 = vld [vmem:[%s2218_s1 + $0x198] sm:$0xff]  ;;  %v1777_v42 = vld [vmem:[%s2218_s1 + $0x190] sm:$0xff]  ;;  %v1776_v54 = vld [vmem:[%s2218_s1 + $0x188] sm:$0xff] }
  0x21   : > { %429 = vmatpush.bf16.msra.mxu1 %v1729_v29  ;;  %v1786_v29 = vld [vmem:[%s2218_s1 + $0x1d8] sm:$0xff]  ;;  %v1785_v30 = vld [vmem:[%s2218_s1 + $0x1d0] sm:$0xff]  ;;  %v1796_v13 = vld [vmem:[%s2218_s1 + $0x228] sm:$0xff] }
  0x22   : > { %522 = vmatpush.bf16.msra.mxu2 %v1745_v32  ;;  %v2102_v32 = vpack.c.b16 %v1805_v19, %v863_v22  ;;  %v1797_v11 = vld [vmem:[%s2218_s1 + $0x230] sm:$0xff]  ;;  %v766_v22 = vpack.c.b16 %v657_v15, %v657_v15 }
  0x23   : > { %622 = vmatpush.bf16.msra.mxu3 %v1753_v33  ;;  %v2104_v33 = vpack.c.b16 %v963_v23, %v1806_v21  ;;  %v1793_v23 = vld [vmem:[%s2218_s1 + $0x210] sm:$0xff] }
  0x24   : > { %361 = vmatpush.bf16.msra.mxu0 %v1736_v38  ;;  %v664_v38 = vshll.u32 %v1997_v46, 16 }
  0x25   : > { %430 = vmatpush.bf16.msra.mxu1 %v1728_v39  ;;  %v669_v39 = vshrl.u32 %v1938_v16, 16  ;;  %v975_v45 = vshrl.u32 %v2104_v33, 16  ;;  %v978_v46 = vshll.u32 %v2104_v33, 16  ;;  %v1792_v16 = vld [vmem:[%s2218_s1 + $0x208] sm:$0xff] }
  0x26   : > { %523 = vmatpush.bf16.msra.mxu2 %v1744_v43  ;;  %v967_v43 = vshrl.u32 %v2102_v32, 16  ;;  %v666_v50 = vrot.slane %v664_v38, 4 }
  0x27   : > { %623 = vmatpush.bf16.msra.mxu3 %v1752_v44  ;;  %v970_v44 = vshll.u32 %v2102_v32, 16  ;;  %v671_v51 = vrot.slane %v669_v39, 3 }
  0x28   : > { %362 = vmatpush.bf16.msra.mxu0 %v1735_v48  ;;  %v1768_v48 = vld [vmem:[%s2218_s1 + $0x148] sm:$0xff]  ;;  %v969_v56 = vrot.slane %v967_v43, 2 }
  0x29   : > { %431 = vmatpush.bf16.msra.mxu1 %v1727_v49  ;;  %v663_v49 = vrot.slane %v661_v37, 3 }
  0x2a   : > { %524 = vmatpush.bf16.msra.mxu2 %v1743_v52  ;;  %v674_v52 = vrot.slane %v672_v40, 4 }
  0x2b   : > { %624 = vmatpush.bf16.msra.mxu3 %v1751_v53  ;;  %363 = vmatmul.bf16.vlgmr.msra.gmra.mxu0 %v301_v60  ;;  %v2136_v53 = vpack.c.b16 %v866_v41, %v1806_v21  ;;  %v1759_v60 = vld [vmem:[%s2218_s1 + $0x100] sm:$0xff]  ;;  %v1794_v21 = vld [vmem:[%s2218_s1 + $0x218] sm:$0xff] }
  0x2c   : > { %727 = vmatpush.bf16.msrb.mxu0 %v1766_v58  ;;  %432 = vmatmul.bf16.vlgmr.msra.gmra.mxu1 %v1957_v24  ;;  %v1762_v24 = vld [vmem:[%s2218_s1 + $0x118] sm:$0xff]  ;;  %v977_v58 = vrot.slane %v975_v45, 2 }
  0x2d   : > { %817 = vmatpush.bf16.msrb.mxu1 %v1774_v59  ;;  %525 = vmatmul.bf16.vlgmr.msra.gmra.mxu2 %v466_v61  ;;  %v980_v59 = vrot.slane %v978_v46, 3  ;;  %v1767_v61 = vld [vmem:[%s2218_s1 + $0x140] sm:$0xff] }
  0x2e   : > { %625 = vmatmul.bf16.vlgmr.msra.gmra.mxu3 %v566_v63  ;;  %923 = vmatpush.bf16.msrb.mxu2 %v1782_v62  ;;  %v1798_v62 = vld [vmem:[%s2218_s1 + $0x238] sm:$0xff]  ;;  %v667_v63 = vor.u32 %v666_v50, %v663_v49 }
  0x2f   : > { %1033 = vmatpush.bf16.msrb.mxu3 %v1790_v0  ;;  %v675_v0 = vor.u32 %v674_v52, %v671_v51 }
  0x30   : > { %728 = vmatpush.bf16.msrb.mxu0 %v1765_v1  ;;  %v1775_v1 = vld [vmem:[%s2218_s1 + $0x180] sm:$0xff] }
  0x31   : > { %818 = vmatpush.bf16.msrb.mxu1 %v1773_v2  ;;  %v1783_v2 = vld [vmem:[%s2218_s1 + $0x1c0] sm:$0xff] }
  0x32   : > { %924 = vmatpush.bf16.msrb.mxu2 %v1781_v3  ;;  %v870_v3 = vrot.slane %v2102_v32, 2 }
  0x33   : > { %1034 = vmatpush.bf16.msrb.mxu3 %v1789_v4  ;;  %v871_v4 = vrot.slane %v2136_v53, 2 }
  0x34   : > { %729 = vmatpush.bf16.msrb.mxu0 %v1764_v5 }
  0x35   : > { %819 = vmatpush.bf16.msrb.mxu1 %v1772_v6  ;;  %v981_v6 = vor.u32 %v980_v59, %v977_v58 }
  0x36   : > { %925 = vmatpush.bf16.msrb.mxu2 %v1780_v7  ;;  %v765_v7 = vpack.c.b16 %v1948_v20, %v1979_v34  ;;  %v1155_v20 = vld [vmem:[%s2219_s2] sm:$0xff]  ;;  %v1157_v34 = vld [vmem:[%s2219_s2 + $0x10] sm:$0xff] }
  0x37   : > { %1035 = vmatpush.bf16.msrb.mxu3 %v1788_v8  ;;  %v676_v8 = vsel %vm659_vm3, %v667_v63, %v675_v0  ;;  %1160 = vperm.xlu0 %1832, %v1155_v20  }
  0x38   : > { %730 = vmatpush.bf16.msrb.mxu0 %v1763_v9  ;;  %v872_v9 = vsel %vm869_vm4, %v870_v3, %v871_v4  ;;  %1170 = vperm.xlu1 %1833, %v1157_v34  }
  0x39   : > { %820 = vmatpush.bf16.msrb.mxu1 %v1771_v10 }
  0x3a   : > { %926 = vmatpush.bf16.msrb.mxu2 %v1779_v17  ;;  %v1795_v17 = vld [vmem:[%s2218_s1 + $0x220] sm:$0xff] }
  0x3b   : > { %1036 = vmatpush.bf16.msrb.mxu3 %v1787_v18  ;;  %368 = vmatmul.bf16.gmra.mxu0 %v304_v26  ;;  %v1156_v18 = vld [vmem:[%s2219_s2 + $0x8] sm:$0xff]  ;;  %v1791_v26 = vld [vmem:[%s2218_s1 + $0x200] sm:$0xff] }
  0x3c   : > { %731 = vmatpush.bf16.msrb.mxu0 %v1762_v24  ;;  %437 = vmatmul.bf16.gmra.mxu1 %v373_v27  ;;  %v1054_v24 = vld [vmem:[%s1923_s24 + $0x4] sm:$0x8]  ;;  %s1822_s24 = smul.u32 12, %s2224_s19 }
  0x3d   : > { %821 = vmatpush.bf16.msrb.mxu1 %v1770_v25  ;;  %530 = vmatmul.bf16.gmra.mxu2 %v465_v55  ;;  %v1784_v55 = vld [vmem:[%s2218_s1 + $0x1c8] sm:$0xff]  ;;  %v1073_v25 = vunpack.c.l.b16 %v1054_v24 }
  0x3e   : > { %630 = vmatmul.bf16.gmra.mxu3 %v565_v57  ;;  %927 = vmatpush.bf16.msrb.mxu2 %v1778_v28  ;;  %v972_v57 = vrot.slane %v970_v44, 3  ;;  %v1076_v28 = vrot.slane %v2104_v33, 3  ;;  %s235_s20 = scalar_lea.vmem %s2220_s3, %s1822_s24 }
  0x3f   : > { %1037 = vmatpush.bf16.msrb.mxu3 %v1786_v29  ;;  %1165 = vperm.xlu0 %1832, %v1156_v18   ;;  %v1074_v15 = vpack.c.b16 %v1805_v19, %v1073_v25 }
  0x40   : > { %732 = vmatpush.bf16.msrb.mxu0 %v1761_v35  ;;  %v973_v5 = vor.u32 %v972_v57, %v969_v56 }
  0x41   : > { %822 = vmatpush.bf16.msrb.mxu1 %v1769_v36  ;;  %v1075_v27 = vrot.slane %v1074_v15, 3 }
  0x42   : > { %928 = vmatpush.bf16.msrb.mxu2 %v1777_v42  ;;  %v982_v10 = vsel %vm965_vm5, %v973_v5, %v981_v6 }
  0x43   : > { %1038 = vmatpush.bf16.msrb.mxu3 %v1785_v30  ;;  %v1077_v29 = vsel %vm563_vm2, %v1075_v27, %v1076_v28 }
  0x44   : > { %733 = vmatpush.bf16.msrb.mxu0 %v1760_v47 }
  0x45   : > { %823 = vmatpush.bf16.msrb.mxu1 %v1768_v48 }
  0x46   : > { %929 = vmatpush.bf16.msrb.mxu2 %v1776_v54 }
  0x47   : > { %1039 = vmatpush.bf16.msrb.mxu3 %v1784_v55 }
  0x48   : > { %734 = vmatpush.bf16.msrb.mxu0 %v1759_v60 }
  0x49   : > { %824 = vmatpush.bf16.msrb.mxu1 %v1767_v61 }
  0x4a   : > { %930 = vmatpush.bf16.msrb.mxu2 %v1775_v1 }
  0x4b   : > { %1040 = vmatpush.bf16.msrb.mxu3 %v1783_v2  ;;  %735 = vmatmul.bf16.vlgmr.msrb.gmra.mxu0 %v676_v8 }
  0x4c   : > { %1128 = vmatpush.bf16.msra.mxu0 %v1798_v62  ;;  %825 = vmatmul.bf16.vlgmr.msrb.gmra.mxu1 %v765_v7 }
  0x4d   : > { %1813 = vmatpush.bf16.msra.mxu1 %v1798_v62  ;;  %931 = vmatmul.bf16.vlgmr.msrb.gmra.mxu2 %v872_v9 }
  0x4e   : > { %1041 = vmatmul.bf16.vlgmr.msrb.gmra.mxu3 %v982_v10 }
  0x50   : > { %1129 = vmatpush.bf16.msra.mxu0 %v1797_v11 }
  0x51   : > { %1814 = vmatpush.bf16.msra.mxu1 %v1797_v11 }
  0x54   : > { %1130 = vmatpush.bf16.msra.mxu0 %v1796_v13 }
  0x55   : > { %1815 = vmatpush.bf16.msra.mxu1 %v1796_v13 }
  0x58   : > { %1131 = vmatpush.bf16.msra.mxu0 %v1795_v17 }
  0x59   : > { %1816 = vmatpush.bf16.msra.mxu1 %v1795_v17 }
  0x5b   : > { %740 = vmatmul.bf16.gmra.mxu0 %v675_v0 }
  0x5c   : > { %1132 = vmatpush.bf16.msra.mxu0 %v1794_v21  ;;  %830 = vmatmul.bf16.gmra.mxu1 %v766_v22 }
  0x5d   : > { %1817 = vmatpush.bf16.msra.mxu1 %v1794_v21  ;;  %936 = vmatmul.bf16.gmra.mxu2 %v871_v4 }
  0x5e   : > { %1046 = vmatmul.bf16.gmra.mxu3 %v981_v6 }
  0x60   : > { %1133 = vmatpush.bf16.msra.mxu0 %v1793_v23 }
  0x61   : > { %1818 = vmatpush.bf16.msra.mxu1 %v1793_v23 }
  0x64   : > { %1134 = vmatpush.bf16.msra.mxu0 %v1792_v16 }
  0x65   : > { %1819 = vmatpush.bf16.msra.mxu1 %v1792_v16 }
  0x68   : > { %1135 = vmatpush.bf16.msra.mxu0 %v1791_v26 }
  0x69   : > { %1820 = vmatpush.bf16.msra.mxu1 %v1791_v26 }
  0x6b   : > { %1136 = vmatmul.bf16.vlgmr.msra.gmra.mxu0 %v1077_v29 }
  0x6c   : > { %1141 = vmatmul.bf16.vlgmr.msra.gmra.mxu1 %v1076_v28 }
  0xa8   : > { %v364_v31 = vpop.f32.mrf.mxu0 }
  0xa9   : > { %v433_v32 = vpop.f32.mrf.mxu1  ;;  %v1161_v10 = vpop.permute.xlu0 %1160 }
  0xaa   : > { %v434_v57 = vadd.f32 %v433_v32, %v364_v31  ;;  %v1171_v15 = vpop.permute.xlu1 %1170 }
  0xb0   : > { %v526_v35 = vpop.f32.mrf.mxu2  ;;  %v366_v19 = vpop.f32.mrf.mxu0 }
  0xb1   : > { %v626_v12 = vpop.f32.mrf.mxu3  ;;  %v435_v36 = vpop.f32.mrf.mxu1  ;;  %v535_v58 = vadd.f32 %v526_v35, %v434_v57 }
  0xb2   : > { %v436_v60 = vadd.f32 %v435_v36, %v366_v19  ;;  %v1166_v31 = vpop.permute.xlu0 %1165 }
  0xb3   : > { %v635_v62 = vadd.f32 %v626_v12, %v535_v58 }
  0xb8   : > { %v528_v37 = vpop.f32.mrf.mxu2  ;;  %v369_v39 = vpop.f32.mrf.mxu0 }
  0xb9   : > { %v628_v38 = vpop.f32.mrf.mxu3  ;;  %v438_v40 = vpop.f32.mrf.mxu1  ;;  %v536_v63 = vadd.f32 %v528_v37, %v436_v60 }
  0xba   : > { %v439_v51 = vadd.f32 %v438_v40, %v369_v39 }
  0xbb   : > { %v636_v6 = vadd.f32 %v628_v38, %v536_v63 }
  0xc0   : > { %v531_v41 = vpop.f32.mrf.mxu2  ;;  %v371_v30 = vpop.f32.mrf.mxu0 }
  0xc1   : > { %v631_v42 = vpop.f32.mrf.mxu3  ;;  %v440_v33 = vpop.f32.mrf.mxu1  ;;  %v537_v52 = vadd.f32 %v531_v41, %v439_v51 }
  0xc3   : > { %v637_v59 = vadd.f32 %v631_v42, %v537_v52 }
  0xc8   : > { %v533_v43 = vpop.f32.mrf.mxu2  ;;  %v736_v45 = vpop.f32.mrf.mxu0 }
  0xc9   : > { %v633_v44 = vpop.f32.mrf.mxu3  ;;  %v826_v46 = vpop.f32.mrf.mxu1  ;;  %v745_v4 = vadd.f32 %v736_v45, %v635_v62 }
  0xcb   : > { %v835_v8 = vadd.f32 %v826_v46, %v745_v4 }
  0xd0   : > { %v932_v47 = vpop.f32.mrf.mxu2  ;;  %v738_v49 = vpop.f32.mrf.mxu0 }
  0xd1   : > { %v1042_v48 = vpop.f32.mrf.mxu3  ;;  %v828_v50 = vpop.f32.mrf.mxu1  ;;  %v746_v9 = vadd.f32 %v738_v49, %v636_v6  ;;  %v941_v11 = vadd.f32 %v932_v47, %v835_v8 }
  0xd3   : > { %v836_v18 = vadd.f32 %v828_v50, %v746_v9  ;;  %v1051_v22 = vadd.f32 %v1042_v48, %v941_v11 }
  0xd8   : > { %v934_v53 = vpop.f32.mrf.mxu2  ;;  %v741_v55 = vpop.f32.mrf.mxu0 }
  0xd9   : > { %v1044_v54 = vpop.f32.mrf.mxu3  ;;  %v831_v56 = vpop.f32.mrf.mxu1  ;;  %v747_v61 = vadd.f32 %v741_v55, %v637_v59  ;;  %v942_v23 = vadd.f32 %v934_v53, %v836_v18 }
  0xdb   : > { %v837_v5 = vadd.f32 %v831_v56, %v747_v61  ;;  %v1052_v16 = vadd.f32 %v1044_v54, %v942_v23 }
  0xe0   : > { %v937_v0 = vpop.f32.mrf.mxu2  ;;  %v743_v2 = vpop.f32.mrf.mxu0 }
  0xe1   : > { %v1047_v1 = vpop.f32.mrf.mxu3  ;;  %v833_v3 = vpop.f32.mrf.mxu1  ;;  %v943_v7 = vadd.f32 %v937_v0, %v837_v5 }
  0xe3   : > { %v1053_v20 = vadd.f32 %v1047_v1, %v943_v7 }
  0xe8   : > { %v939_v34 = vpop.f32.mrf.mxu2  ;;  %v1137_v14 = vpop.f32.mrf.mxu0 }
  0xe9   : > { %v1049_v13 = vpop.f32.mrf.mxu3  ;;  %v1142_v17 = vpop.f32.mrf.mxu1  ;;  %v1146_v25 = vadd.f32 %v1137_v14, %v1051_v22 }
  0xea   : > { %v1148_v21 = vadd.f32 %v1142_v17, %v1053_v20 }
  0xeb   : > { %v1173_v28 = vmul.f32 %v1161_v10, %v1146_v25 }
  0xec   : > { %v1151_v24 = vpack.c.bf16 %v1148_v21, %v1148_v21  ;;  %v1175_v32 = vmul.f32 %v1171_v15, %v1148_v21 }
  0xed   : > { %v1185_v19 = vmul.f32 %v1173_v28, %v1146_v25 }
  0xee   : > { %1154 = vst [vmem:[%s235_s20 + $0x8] sm:$0xf] %v1151_v24  ;;  %v1187_v38 = vmul.f32 %v1175_v32, %v1148_v21 }
  0xf0   : > { %v1139_v26 = vpop.f32.mrf.mxu0 }
  0xf1   : > { %v1144_v27 = vpop.f32.mrf.mxu1  ;;  %v1147_v29 = vadd.f32 %v1139_v26, %v1052_v16 }
  0xf3   : > { %v1810_v35 = vpack.c.bf16 %v1147_v29, %v1146_v25  ;;  %v1174_v12 = vmul.f32 %v1166_v31, %v1147_v29 }
  0xf5   : > { %1811 = vst [vmem:[%s235_s20] sm:$0xff] %v1810_v35   ;;  %v1176_v36 = vadd.f32 %v1174_v12, %v1173_v28  ;;  %v1186_v37 = vmul.f32 %v1174_v12, %v1147_v29 }
  0xf7   : > { %v1177_v39 = vadd.f32 %v1176_v36, %v1175_v32  ;;  %v1188_v40 = vadd.f32 %v1186_v37, %v1185_v19 }
  0xf9   : > { %v1178_v41 = vrot.slane %v1177_v39, 4  ;;  %v1189_v42 = vadd.f32 %v1188_v40, %v1187_v38 }
  0xfb   : > { %v1179_v30 = vadd.f32 %v1178_v41, %v1177_v39  ;;  %v1190_v33 = vrot.slane %v1189_v42, 4 }
  0xfd   : > { %v1180_v43 = vrot.slane %v1179_v30, 2  ;;  %v1191_v44 = vadd.f32 %v1190_v33, %v1189_v42 }
  0xff   : > { %v1181_v45 = vadd.f32 %v1180_v43, %v1179_v30  ;;  %v1192_v46 = vrot.slane %v1191_v44, 2 }
 0x101   : > { %v1182_v47 = vrot.slane %v1181_v45, 1  ;;  %v1193_v48 = vadd.f32 %v1192_v46, %v1191_v44 }
 0x103   : > { %v1183_v49 = vadd.f32 %v1182_v47, %v1181_v45  ;;  %v1194_v50 = vrot.slane %v1193_v48, 1 }
 0x105   : > { %1184 = vst [vmem:[%s238_s23] sm:$0x1] %v1183_v49  ;;  %v1195_v51 = vadd.f32 %v1194_v50, %v1193_v48 }
 0x107   : > { %1196 = vst [vmem:[%s241_s27] sm:$0x1] %v1195_v51 }
 0x108 PF: > { %s16_s18 = sadd.s32 1, %s1840_s18  }
 0x109   : > { %p13_p4 = scmp.ge.s32.totalorder %s16_s18, 4  }
 0x10b   :  { %15 = sbr.rel (!%p13_p4) target bundleno = 1 (0x1), region = 94 }

// kernel: gan_generator_forward.43
= control target key start
LH: loop header
LB: loop body
LE: loop exit
PB: predicated region body
PF: predicated region fallthrough
CT: control target
= control target key end

     0   :  { %s1068_s15 = smov 0   ;;  %s1277_s0 = inlined_call_operand.vmem [shape: bf16[512,128], index: 0, kind: input, shape index: {}]   ;;  %s1278_s1 = inlined_call_operand.vmem [shape: bf16[128,128], index: 1, kind: input, shape index: {}]   ;;  %s1279_s2 = inlined_call_operand.vmem [shape: bf16[512,128], index: 2, kind: output, shape index: {0}]   ;;  %s1280_s3 = inlined_call_operand.vmem [shape: f32[2,1,128], index: 3, kind: output, shape index: {1}]   ;;  %s1281_s4 = inlined_call_operand.vmem [shape: f32[2,1,128], index: 4, kind: output, shape index: {2}]  }
   0x1 LB: > { %s1074_s16 = sadd.s32 4294967295, %s1041_s15   ;;  %p781_p0 = scmp.ge.s32.totalorder %s1041_s15, 1  ;;  %s1041_s15 = sphi %s1068_s15, %s15_s15  }
   0x2   : > { %p168_p1 = scmp.lt.s32.totalorder %s1041_s15, 3 }
   0x4   : > { %p169_p2 = pnand %p781_p0, %p168_p1 }
   0x5   : > { %s782_s25 = sshll.u32 (!%p169_p2), %s1074_s16, 5  ;;  %p212_p4 = scmp.lt.s32.totalorder (!%p169_p2), %s1074_s16, 1 }
   0x6   : > { %172 = sbr.rel (%p169_p2) target bundleno = 290 (0x122), region = 28  ;;  %p201_p3 = scmp.lt.s32.totalorder (!%p169_p2), %s782_s25, 63 }
   0xb   : > { %v907_v0 = vld [vmem:[%s1278_s1 + $0x38] sm:$0xff]  ;;  %v906_v1 = vld [vmem:[%s1278_s1 + $0x30] sm:$0xff]  ;;  %v905_v2 = vld [vmem:[%s1278_s1 + $0x28] sm:$0xff]  ;;  %s1283_s25 = smov (!%p201_p3, %s782_s25), 63  ;;  %s1285_s16 = smov (!%p212_p4, %s1074_s16), 1 }
   0xc   : > { %410 = vmatpush.bf16.msra.mxu0 %v907_v0  ;;  %1003 = vmatpush.bf16.msra.mxu1 %v907_v0  ;;  %v904_v3 = vld [vmem:[%s1278_s1 + $0x20] sm:$0xff]  ;;  %v903_v4 = vld [vmem:[%s1278_s1 + $0x18] sm:$0xff]  ;;  %v902_v5 = vld [vmem:[%s1278_s1 + $0x10] sm:$0xff]  ;;  %s783_s6 = sshll.u32 %s1283_s25, 2  ;;  %s214_s19 = scalar_lea.vmem %s1280_s3, %s1285_s16 }
   0xd   : > { %1004 = vmatpush.bf16.msra.mxu2 %v907_v0  ;;  %1005 = vmatpush.bf16.msra.mxu3 %v907_v0  ;;  %v901_v6 = vld [vmem:[%s1278_s1 + $0x8] sm:$0xff]  ;;  %v900_v7 = vld [vmem:[%s1278_s1] sm:$0xff]  ;;  %s1111_s11 = scalar_lea.vmem %s1277_s0, %s783_s6  ;;  %s1138_s14 = scalar_lea.vmem %s1279_s2, %s783_s6 }
   0xe   : > { %v884_v8 = vld [vmem:[%s1111_s11] sm:$0xff]  ;;  %v885_v12 = vld [vmem:[%s1111_s11 + $0x8] sm:$0xff]  ;;  %v886_v16 = vld [vmem:[%s1111_s11 + $0x10] sm:$0xff]  ;;  %s217_s22 = scalar_lea.vmem %s1281_s4, %s1285_s16 }
   0xf   : > { %v888_v9 = vld [vmem:[%s1111_s11 + $0x20] sm:$0xff]  ;;  %v889_v13 = vld [vmem:[%s1111_s11 + $0x28] sm:$0xff]  ;;  %v890_v17 = vld [vmem:[%s1111_s11 + $0x30] sm:$0xff] }
  0x10   : > { %411 = vmatpush.bf16.msra.mxu0 %v906_v1  ;;  %1006 = vmatpush.bf16.msra.mxu1 %v906_v1  ;;  %v892_v10 = vld [vmem:[%s1111_s11 + $0x40] sm:$0xff]  ;;  %v893_v14 = vld [vmem:[%s1111_s11 + $0x48] sm:$0xff]  ;;  %v894_v18 = vld [vmem:[%s1111_s11 + $0x50] sm:$0xff] }
  0x11   : > { %1007 = vmatpush.bf16.msra.mxu2 %v906_v1  ;;  %1008 = vmatpush.bf16.msra.mxu3 %v906_v1  ;;  %v896_v11 = vld [vmem:[%s1111_s11 + $0x60] sm:$0xff]  ;;  %v897_v15 = vld [vmem:[%s1111_s11 + $0x68] sm:$0xff]  ;;  %v898_v19 = vld [vmem:[%s1111_s11 + $0x70] sm:$0xff] }
  0x12   : > { %v887_v20 = vld [vmem:[%s1111_s11 + $0x18] sm:$0xff] }
  0x13   : > { %v891_v21 = vld [vmem:[%s1111_s11 + $0x38] sm:$0xff] }
  0x14   : > { %412 = vmatpush.bf16.msra.mxu0 %v905_v2  ;;  %1009 = vmatpush.bf16.msra.mxu1 %v905_v2  ;;  %v895_v22 = vld [vmem:[%s1111_s11 + $0x58] sm:$0xff] }
  0x15   : > { %1010 = vmatpush.bf16.msra.mxu2 %v905_v2  ;;  %1011 = vmatpush.bf16.msra.mxu3 %v905_v2  ;;  %v899_v23 = vld [vmem:[%s1111_s11 + $0x78] sm:$0xff] }
  0x18   : > { %413 = vmatpush.bf16.msra.mxu0 %v904_v3  ;;  %1012 = vmatpush.bf16.msra.mxu1 %v904_v3 }
  0x19   : > { %1013 = vmatpush.bf16.msra.mxu2 %v904_v3  ;;  %1014 = vmatpush.bf16.msra.mxu3 %v904_v3 }
  0x1c   : > { %414 = vmatpush.bf16.msra.mxu0 %v903_v4  ;;  %1015 = vmatpush.bf16.msra.mxu1 %v903_v4 }
  0x1d   : > { %1016 = vmatpush.bf16.msra.mxu2 %v903_v4  ;;  %1017 = vmatpush.bf16.msra.mxu3 %v903_v4 }
  0x20   : > { %415 = vmatpush.bf16.msra.mxu0 %v902_v5  ;;  %1018 = vmatpush.bf16.msra.mxu1 %v902_v5 }
  0x21   : > { %1019 = vmatpush.bf16.msra.mxu2 %v902_v5  ;;  %1020 = vmatpush.bf16.msra.mxu3 %v902_v5 }
  0x24   : > { %416 = vmatpush.bf16.msra.mxu0 %v901_v6  ;;  %1021 = vmatpush.bf16.msra.mxu1 %v901_v6 }
  0x25   : > { %1022 = vmatpush.bf16.msra.mxu2 %v901_v6  ;;  %1023 = vmatpush.bf16.msra.mxu3 %v901_v6 }
  0x28   : > { %417 = vmatpush.bf16.msra.mxu0 %v900_v7  ;;  %1024 = vmatpush.bf16.msra.mxu1 %v900_v7 }
  0x29   : > { %1025 = vmatpush.bf16.msra.mxu2 %v900_v7  ;;  %1026 = vmatpush.bf16.msra.mxu3 %v900_v7 }
  0x2b   : > { %418 = vmatmul.bf16.vlgmr.msra.gmra.mxu0 %v884_v8  ;;  %438 = vmatmul.bf16.vlgmr.msra.gmra.mxu1 %v888_v9 }
  0x2c   : > { %458 = vmatmul.bf16.vlgmr.msra.gmra.mxu2 %v892_v10  ;;  %478 = vmatmul.bf16.vlgmr.msra.gmra.mxu3 %v896_v11 }
  0x3b   : > { %423 = vmatmul.bf16.gmra.mxu0 %v885_v12  ;;  %443 = vmatmul.bf16.gmra.mxu1 %v889_v13 }
  0x3c   : > { %463 = vmatmul.bf16.gmra.mxu2 %v893_v14  ;;  %483 = vmatmul.bf16.gmra.mxu3 %v897_v15 }
  0x4b   : > { %428 = vmatmul.bf16.gmra.mxu0 %v886_v16  ;;  %448 = vmatmul.bf16.gmra.mxu1 %v890_v17 }
  0x4c   : > { %468 = vmatmul.bf16.gmra.mxu2 %v894_v18  ;;  %488 = vmatmul.bf16.gmra.mxu3 %v898_v19 }
  0x5b   : > { %433 = vmatmul.bf16.gmra.mxu0 %v887_v20  ;;  %453 = vmatmul.bf16.gmra.mxu1 %v891_v21 }
  0x5c   : > { %473 = vmatmul.bf16.gmra.mxu2 %v895_v22  ;;  %493 = vmatmul.bf16.gmra.mxu3 %v899_v23 }
  0xa8   : > { %v419_v24 = vpop.f32.mrf.mxu0  ;;  %v1129_v25 = vpop.f32.mrf.mxu1 }
  0xa9   : > { %v601_v57 = vmul.f32 %v419_v24, %v419_v24 }
  0xaf   : > { %v1131_v26 = vpop.f32.mrf.mxu2  ;;  %v1144_v31 = vpop.f32.mrf.mxu3 }
  0xb0   : > { %v421_v27 = vpop.f32.mrf.mxu0  ;;  %v1140_v28 = vpop.f32.mrf.mxu1 }
  0xb1   : > { %v911_v29 = vpack.c.bf16 %v421_v27, %v419_v24  ;;  %v931_v30 = vpack.c.bf16 %v1140_v28, %v1129_v25  ;;  %v602_v56 = vmul.f32 %v421_v27, %v421_v27  ;;  %v563_v59 = vadd.f32 %v421_v27, %v419_v24 }
  0xb2   : > { %v609_v27 = vmul.f32 %v1129_v25, %v1129_v25 }
  0xb3   : > { %912 = vst [vmem:[%s1138_s14] sm:$0xff] %v911_v29   ;;  %v633_v60 = vadd.f32 %v602_v56, %v601_v57 }
  0xb4   : > { %991 = vst [vmem:[%s1138_s14 + $0x20] sm:$0xff] %v931_v30  }
  0xb7   : > { %v1148_v32 = vpop.f32.mrf.mxu2  ;;  %v1154_v36 = vpop.f32.mrf.mxu3 }
  0xb8   : > { %v424_v33 = vpop.f32.mrf.mxu0  ;;  %v1150_v34 = vpop.f32.mrf.mxu1  ;;  %v951_v35 = vpack.c.bf16 %v1148_v32, %v1131_v26  ;;  %v971_v37 = vpack.c.bf16 %v1154_v36, %v1144_v31 }
  0xb9   : > { %v603_v58 = vmul.f32 %v424_v33, %v424_v33  ;;  %v564_v62 = vadd.f32 %v563_v59, %v424_v33 }
  0xba   : > { %995 = vst [vmem:[%s1138_s14 + $0x40] sm:$0xff] %v951_v35  }
  0xbb   : > { %999 = vst [vmem:[%s1138_s14 + $0x60] sm:$0xff] %v971_v37   ;;  %v634_v0 = vadd.f32 %v633_v60, %v603_v58 }
  0xbf   : > { %v1160_v38 = vpop.f32.mrf.mxu2  ;;  %v1166_v43 = vpop.f32.mrf.mxu3 }
  0xc0   : > { %v426_v39 = vpop.f32.mrf.mxu0  ;;  %v1162_v40 = vpop.f32.mrf.mxu1 }
  0xc1   : > { %v916_v41 = vpack.c.bf16 %v426_v39, %v424_v33  ;;  %v936_v42 = vpack.c.bf16 %v1162_v40, %v1150_v34  ;;  %v604_v61 = vmul.f32 %v426_v39, %v426_v39  ;;  %v565_v5 = vadd.f32 %v564_v62, %v426_v39 }
  0xc2   : > { %v610_v33 = vmul.f32 %v1140_v28, %v1140_v28  ;;  %v611_v39 = vmul.f32 %v1150_v34, %v1150_v34 }
  0xc3   : > { %988 = vst [vmem:[%s1138_s14 + $0x8] sm:$0xff] %v916_v41   ;;  %v635_v7 = vadd.f32 %v634_v0, %v604_v61 }
  0xc4   : > { %992 = vst [vmem:[%s1138_s14 + $0x28] sm:$0xff] %v936_v42  }
  0xc7   : > { %v1170_v44 = vpop.f32.mrf.mxu2  ;;  %v1176_v48 = vpop.f32.mrf.mxu3 }
  0xc8   : > { %v429_v45 = vpop.f32.mrf.mxu0  ;;  %v1172_v46 = vpop.f32.mrf.mxu1  ;;  %v956_v47 = vpack.c.bf16 %v1170_v44, %v1160_v38  ;;  %v976_v49 = vpack.c.bf16 %v1176_v48, %v1166_v43 }
  0xc9   : > { %v605_v1 = vmul.f32 %v429_v45, %v429_v45  ;;  %v566_v10 = vadd.f32 %v565_v5, %v429_v45  ;;  %v618_v5 = vmul.f32 %v1148_v32, %v1148_v32 }
  0xca   : > { %996 = vst [vmem:[%s1138_s14 + $0x48] sm:$0xff] %v956_v47  }
  0xcb   : > { %1000 = vst [vmem:[%s1138_s14 + $0x68] sm:$0xff] %v976_v49   ;;  %v636_v11 = vadd.f32 %v635_v7, %v605_v1 }
  0xcf   : > { %v1182_v50 = vpop.f32.mrf.mxu2  ;;  %v1188_v55 = vpop.f32.mrf.mxu3 }
  0xd0   : > { %v431_v51 = vpop.f32.mrf.mxu0  ;;  %v1184_v52 = vpop.f32.mrf.mxu1 }
  0xd1   : > { %v921_v53 = vpack.c.bf16 %v431_v51, %v429_v45  ;;  %v941_v54 = vpack.c.bf16 %v1184_v52, %v1172_v46  ;;  %v606_v8 = vmul.f32 %v431_v51, %v431_v51  ;;  %v567_v13 = vadd.f32 %v566_v10, %v431_v51 }
  0xd2   : > { %v620_v10 = vmul.f32 %v1170_v44, %v1170_v44 }
  0xd3   : > { %989 = vst [vmem:[%s1138_s14 + $0x10] sm:$0xff] %v921_v53   ;;  %v637_v14 = vadd.f32 %v636_v11, %v606_v8 }
  0xd4   : > { %993 = vst [vmem:[%s1138_s14 + $0x30] sm:$0xff] %v941_v54   ;;  %v613_v54 = vmul.f32 %v1172_v46, %v1172_v46 }
  0xd7   : > { %v1192_v63 = vpop.f32.mrf.mxu2  ;;  %v1196_v6 = vpop.f32.mrf.mxu3 }
  0xd8   : > { %v434_v2 = vpop.f32.mrf.mxu0  ;;  %v454_v3 = vpop.f32.mrf.mxu1  ;;  %v961_v4 = vpack.c.bf16 %v1192_v63, %v1182_v50  ;;  %v981_v9 = vpack.c.bf16 %v1196_v6, %v1188_v55 }
  0xd9   : > { %v607_v12 = vmul.f32 %v434_v2, %v434_v2  ;;  %v568_v15 = vadd.f32 %v567_v13, %v434_v2  ;;  %v615_v61 = vmul.f32 %v454_v3, %v454_v3 }
  0xda   : > { %997 = vst [vmem:[%s1138_s14 + $0x50] sm:$0xff] %v961_v4  }
  0xdb   : > { %1001 = vst [vmem:[%s1138_s14 + $0x70] sm:$0xff] %v981_v9   ;;  %v638_v17 = vadd.f32 %v637_v14, %v607_v12 }
  0xdf   : > { %v474_v16 = vpop.f32.mrf.mxu2  ;;  %v1202_v24 = vpop.f32.mrf.mxu3 }
  0xe0   : > { %v436_v18 = vpop.f32.mrf.mxu0  ;;  %v456_v19 = vpop.f32.mrf.mxu1 }
  0xe1   : > { %v926_v20 = vpack.c.bf16 %v436_v18, %v434_v2  ;;  %v569_v21 = vadd.f32 %v568_v15, %v436_v18  ;;  %v608_v22 = vmul.f32 %v436_v18, %v436_v18  ;;  %v946_v23 = vpack.c.bf16 %v456_v19, %v454_v3 }
  0xe2   : > { %v616_v1 = vmul.f32 %v456_v19, %v456_v19  ;;  %v617_v2 = vmul.f32 %v1131_v26, %v1131_v26  ;;  %v622_v15 = vmul.f32 %v1192_v63, %v1192_v63 }
  0xe3   : > { %990 = vst [vmem:[%s1138_s14 + $0x18] sm:$0xff] %v926_v20   ;;  %v570_v29 = vadd.f32 %v569_v21, %v1129_v25  ;;  %v639_v30 = vadd.f32 %v638_v17, %v608_v22  ;;  %v612_v25 = vmul.f32 %v1162_v40, %v1162_v40 }
  0xe4   : > { %994 = vst [vmem:[%s1138_s14 + $0x38] sm:$0xff] %v946_v23  }
  0xe5   : > { %v571_v35 = vadd.f32 %v570_v29, %v1140_v28  ;;  %v640_v37 = vadd.f32 %v639_v30, %v609_v27 }
  0xe7   : > { %v572_v41 = vadd.f32 %v571_v35, %v1150_v34  ;;  %v641_v42 = vadd.f32 %v640_v37, %v610_v33  ;;  %v476_v45 = vpop.f32.mrf.mxu2  ;;  %v496_v53 = vpop.f32.mrf.mxu3  ;;  %v614_v34 = vmul.f32 %v1184_v52, %v1184_v52  ;;  %v628_v35 = vmul.f32 %v1176_v48, %v1176_v48 }
  0xe8   : > { %v966_v47 = vpack.c.bf16 %v476_v45, %v474_v16  ;;  %v986_v28 = vpack.c.bf16 %v496_v53, %v1202_v24  ;;  %v624_v22 = vmul.f32 %v476_v45, %v476_v45 }
  0xe9   : > { %v642_v49 = vadd.f32 %v641_v42, %v611_v39  ;;  %v573_v51 = vadd.f32 %v572_v41, %v1162_v40  ;;  %v629_v39 = vmul.f32 %v1188_v55, %v1188_v55 }
  0xea   : > { %998 = vst [vmem:[%s1138_s14 + $0x58] sm:$0xff] %v966_v47  }
  0xeb   : > { %v574_v56 = vadd.f32 %v573_v51, %v1172_v46  ;;  %v643_v57 = vadd.f32 %v642_v49, %v612_v25  ;;  %1002 = vst [vmem:[%s1138_s14 + $0x78] sm:$0xff] %v986_v28   ;;  %v631_v49 = vmul.f32 %v1202_v24, %v1202_v24  ;;  %v632_v28 = vmul.f32 %v496_v53, %v496_v53 }
  0xed   : > { %v575_v58 = vadd.f32 %v574_v56, %v1184_v52  ;;  %v644_v59 = vadd.f32 %v643_v57, %v613_v54  ;;  %v619_v52 = vmul.f32 %v1160_v38, %v1160_v38 }
  0xef   : > { %v576_v60 = vadd.f32 %v575_v58, %v454_v3  ;;  %v645_v40 = vadd.f32 %v644_v59, %v614_v34 }
  0xf1   : > { %v646_v62 = vadd.f32 %v645_v40, %v615_v61  ;;  %v577_v0 = vadd.f32 %v576_v60, %v456_v19  ;;  %v623_v19 = vmul.f32 %v474_v16, %v474_v16 }
  0xf3   : > { %v578_v4 = vadd.f32 %v577_v0, %v1131_v26  ;;  %v647_v46 = vadd.f32 %v646_v62, %v616_v1  ;;  %v621_v26 = vmul.f32 %v1182_v50, %v1182_v50 }
  0xf5   : > { %v579_v7 = vadd.f32 %v578_v4, %v1148_v32  ;;  %v648_v8 = vadd.f32 %v647_v46, %v617_v2 }
  0xf7   : > { %v580_v3 = vadd.f32 %v579_v7, %v1160_v38  ;;  %v649_v9 = vadd.f32 %v648_v8, %v618_v5 }
  0xf9   : > { %v650_v11 = vadd.f32 %v649_v9, %v619_v52  ;;  %v581_v12 = vadd.f32 %v580_v3, %v1170_v44  ;;  %v625_v44 = vmul.f32 %v1144_v31, %v1144_v31 }
  0xfb   : > { %v582_v13 = vadd.f32 %v581_v12, %v1182_v50  ;;  %v651_v14 = vadd.f32 %v650_v11, %v620_v10  ;;  %v626_v50 = vmul.f32 %v1154_v36, %v1154_v36 }
  0xfd   : > { %v583_v32 = vadd.f32 %v582_v13, %v1192_v63  ;;  %v652_v17 = vadd.f32 %v651_v14, %v621_v26  ;;  %v627_v63 = vmul.f32 %v1166_v43, %v1166_v43 }
  0xff   : > { %v653_v38 = vadd.f32 %v652_v17, %v622_v15  ;;  %v584_v18 = vadd.f32 %v583_v32, %v474_v16 }
 0x101   : > { %v654_v20 = vadd.f32 %v653_v38, %v623_v19  ;;  %v585_v21 = vadd.f32 %v584_v18, %v476_v45 }
 0x103   : > { %v586_v23 = vadd.f32 %v585_v21, %v1144_v31  ;;  %v655_v27 = vadd.f32 %v654_v20, %v624_v22 }
 0x105   : > { %v587_v29 = vadd.f32 %v586_v23, %v1154_v36  ;;  %v656_v30 = vadd.f32 %v655_v27, %v625_v44 }
 0x107   : > { %v588_v16 = vadd.f32 %v587_v29, %v1166_v43  ;;  %v657_v33 = vadd.f32 %v656_v30, %v626_v50  ;;  %v630_v43 = vmul.f32 %v1196_v6, %v1196_v6 }
 0x109   : > { %v658_v37 = vadd.f32 %v657_v33, %v627_v63  ;;  %v589_v31 = vadd.f32 %v588_v16, %v1176_v48 }
 0x10b   : > { %v590_v41 = vadd.f32 %v589_v31, %v1188_v55  ;;  %v659_v36 = vadd.f32 %v658_v37, %v628_v35 }
 0x10d   : > { %v591_v42 = vadd.f32 %v590_v41, %v1196_v6  ;;  %v660_v45 = vadd.f32 %v659_v36, %v629_v39 }
 0x10f   : > { %v661_v47 = vadd.f32 %v660_v45, %v630_v43  ;;  %v592_v25 = vadd.f32 %v591_v42, %v1202_v24 }
 0x111   : > { %v662_v48 = vadd.f32 %v661_v47, %v631_v49  ;;  %v593_v51 = vadd.f32 %v592_v25, %v496_v53 }
 0x113   : > { %v594_v54 = vrot.slane %v593_v51, 4  ;;  %v663_v56 = vadd.f32 %v662_v48, %v632_v28 }
 0x115   : > { %v595_v55 = vadd.f32 %v594_v54, %v593_v51  ;;  %v664_v57 = vrot.slane %v663_v56, 4 }
 0x117   : > { %v596_v34 = vrot.slane %v595_v55, 2  ;;  %v665_v58 = vadd.f32 %v664_v57, %v663_v56 }
 0x119   : > { %v597_v59 = vadd.f32 %v596_v34, %v595_v55  ;;  %v666_v6 = vrot.slane %v665_v58, 2 }
 0x11b   : > { %v598_v60 = vrot.slane %v597_v59, 1  ;;  %v667_v61 = vadd.f32 %v666_v6, %v665_v58 }
 0x11d   : > { %v599_v24 = vadd.f32 %v598_v60, %v597_v59  ;;  %v668_v40 = vrot.slane %v667_v61, 1 }
 0x11f   : > { %600 = vst [vmem:[%s214_s19] sm:$0x1] %v599_v24  ;;  %v669_v53 = vadd.f32 %v668_v40, %v667_v61 }
 0x121   : > { %670 = vst [vmem:[%s217_s22] sm:$0x1] %v669_v53 }
 0x122 PF: > { %s15_s15 = sadd.s32 1, %s1041_s15  }
 0x123   : > { %p12_p5 = scmp.ge.s32.totalorder %s15_s15, 4  }
 0x125   :  { %14 = sbr.rel (!%p12_p5) target bundleno = 1 (0x1), region = 82 }

// kernel: gan_generator_forward.44
= control target key start
LH: loop header
LB: loop body
LE: loop exit
PB: predicated region body
PF: predicated region fallthrough
CT: control target
= control target key end

     0   :  { %s1253_s21 = smov 0   ;;  %s1540_s0 = inlined_call_operand.vmem [shape: bf16[512,128], index: 0, kind: input, shape index: {}]   ;;  %s1541_s1 = inlined_call_operand.vmem [shape: f32[1,128], index: 1, kind: input, shape index: {}]   ;;  %s1542_s2 = inlined_call_operand.vmem [shape: f32[1,128], index: 2, kind: input, shape index: {}]   ;;  %s1543_s3 = inlined_call_operand.vmem [shape: bf16[128,128], index: 3, kind: input, shape index: {}]   ;;  %s1544_s4 = inlined_call_operand.vmem [shape: bf16[512,128], index: 4, kind: output, shape index: {0}]   ;;  %s1545_s5 = inlined_call_operand.vmem [shape: f32[2,1,128], index: 5, kind: output, shape index: {1}]   ;;  %s1546_s6 = inlined_call_operand.vmem [shape: f32[2,1,128], index: 6, kind: output, shape index: {2}]  }
   0x1 LB: > { %s1259_s22 = sadd.s32 4294967295, %s1216_s21   ;;  %p955_p0 = scmp.ge.s32.totalorder %s1216_s21, 1  ;;  %s1216_s21 = sphi %s1253_s21, %s17_s21  }
   0x2   : > { %p218_p1 = scmp.lt.s32.totalorder %s1216_s21, 3 }
   0x4   : > { %p219_p2 = pnand %p955_p0, %p218_p1 }
   0x5   : > { %s956_s25 = sshll.u32 (!%p219_p2), %s1259_s22, 5  ;;  %p266_p4 = scmp.lt.s32.totalorder (!%p219_p2), %s1259_s22, 1 }
   0x6   : > { %222 = sbr.rel (%p219_p2) target bundleno = 290 (0x122), region = 36  ;;  %p255_p3 = scmp.lt.s32.totalorder (!%p219_p2), %s956_s25, 63 }
   0xb   : > { %v1001_v0 = vld [vmem:[%s1543_s3 + $0x38] sm:$0xff]  ;;  %v1000_v1 = vld [vmem:[%s1543_s3 + $0x30] sm:$0xff]  ;;  %s1548_s25 = smov (!%p255_p3, %s956_s25), 63  ;;  %v999_v2 = vld [vmem:[%s1543_s3 + $0x28] sm:$0xff]  ;;  %s1550_s22 = smov (!%p266_p4, %s1259_s22), 1 }
   0xc   : > { %584 = vmatpush.bf16.msra.mxu0 %v1001_v0  ;;  %1176 = vmatpush.bf16.msra.mxu1 %v1001_v0  ;;  %s957_s28 = sshll.u32 %s1548_s25, 2  ;;  %v1287_v4 = vld [vmem:[%s1541_s1] ss:$0 sm:$0xff]  ;;  %v997_v19 = vld [vmem:[%s1543_s3 + $0x18] sm:$0xff]  ;;  %v996_v26 = vld [vmem:[%s1543_s3 + $0x10] sm:$0xff]  ;;  %s268_s7 = scalar_lea.vmem %s1545_s5, %s1550_s22 }
   0xd   : > { %1177 = vmatpush.bf16.msra.mxu2 %v1001_v0  ;;  %1178 = vmatpush.bf16.msra.mxu3 %v1001_v0  ;;  %s1281_s9 = scalar_lea.vmem %s1540_s0, %s957_s28  ;;  %v998_v11 = vld [vmem:[%s1543_s3 + $0x20] sm:$0xff]  ;;  %v995_v35 = vld [vmem:[%s1543_s3 + $0x8] sm:$0xff]  ;;  %s1401_s30 = scalar_lea.vmem %s1544_s4, %s957_s28 }
   0xe   : > { %v1003_v3 = vld [vmem:[%s1281_s9] sm:$0xff]   ;;  %v1146_v28 = vld [vmem:[%s1281_s9 + $0x8] sm:$0xff]   ;;  %s271_s10 = scalar_lea.vmem %s1546_s6, %s1550_s22 }
   0xf   : > { %v1149_v5 = vld [vmem:[%s1281_s9 + $0x20] sm:$0xff]   ;;  %v1004_v6 = vunpack.c.l.bf16 %v1003_v3  ;;  %v1005_v7 = vunpack.c.h.bf16 %v1003_v3  ;;  %v1150_v34 = vld [vmem:[%s1281_s9 + $0x28] sm:$0xff]   ;;  %v1008_v36 = vunpack.c.l.bf16 %v1146_v28  ;;  %v1009_v38 = vunpack.c.h.bf16 %v1146_v28 }
  0x10   : > { %585 = vmatpush.bf16.msra.mxu0 %v1000_v1  ;;  %1179 = vmatpush.bf16.msra.mxu1 %v1000_v1  ;;  %v1153_v8 = vld [vmem:[%s1281_s9 + $0x40] sm:$0xff]   ;;  %v1020_v9 = vunpack.c.l.bf16 %v1149_v5  ;;  %v1021_v10 = vunpack.c.h.bf16 %v1149_v5  ;;  %v1154_v41 = vld [vmem:[%s1281_s9 + $0x48] sm:$0xff]   ;;  %v1024_v43 = vunpack.c.l.bf16 %v1150_v34  ;;  %v1025_v47 = vunpack.c.h.bf16 %v1150_v34 }
  0x11   : > { %1180 = vmatpush.bf16.msra.mxu2 %v1000_v1  ;;  %1181 = vmatpush.bf16.msra.mxu3 %v1000_v1  ;;  %v340_v12 = vmul.f32 %v1287_v4, %v1004_v6  ;;  %v1298_v13 = vld [vmem:[%s1542_s2] ss:$0 sm:$0xff]  ;;  %v1036_v14 = vunpack.c.l.bf16 %v1153_v8  ;;  %v1037_v15 = vunpack.c.h.bf16 %v1153_v8  ;;  %v341_v16 = vmul.f32 %v1287_v4, %v1005_v7  ;;  %v1147_v8 = vld [vmem:[%s1281_s9 + $0x10] sm:$0xff]  }
  0x12   : > { %v348_v17 = vmul.f32 %v1287_v4, %v1020_v9  ;;  %v349_v18 = vmul.f32 %v1287_v4, %v1021_v10  ;;  %v1157_v44 = vld [vmem:[%s1281_s9 + $0x60] sm:$0xff]   ;;  %v1040_v48 = vunpack.c.l.bf16 %v1154_v41  ;;  %v342_v50 = vmul.f32 %v1287_v4, %v1008_v36 }
  0x13   : > { %v376_v20 = vadd.f32 %v1298_v13, %v340_v12  ;;  %v356_v21 = vmul.f32 %v1287_v4, %v1036_v14  ;;  %v357_v22 = vmul.f32 %v1287_v4, %v1037_v15  ;;  %v377_v23 = vadd.f32 %v1298_v13, %v341_v16  ;;  %v994_v49 = vld [vmem:[%s1543_s3] sm:$0xff] }
  0x14   : > { %586 = vmatpush.bf16.msra.mxu0 %v999_v2  ;;  %1182 = vmatpush.bf16.msra.mxu1 %v999_v2  ;;  %v384_v24 = vadd.f32 %v1298_v13, %v348_v17  ;;  %v385_v25 = vadd.f32 %v1298_v13, %v349_v18  ;;  %v1041_v51 = vunpack.c.h.bf16 %v1154_v41  ;;  %v343_v52 = vmul.f32 %v1287_v4, %v1009_v38 }
  0x15   : > { %1183 = vmatpush.bf16.msra.mxu2 %v999_v2  ;;  %1184 = vmatpush.bf16.msra.mxu3 %v999_v2  ;;  %v440_v27 = vmul.f32 0.01, %v376_v20  ;;  %v392_v29 = vadd.f32 %v1298_v13, %v356_v21  ;;  %v393_v30 = vadd.f32 %v1298_v13, %v357_v22  ;;  %vm408_vm0 = vcmp.ge.f32.partialorder %v376_v20, 0.0 }
  0x16   : > { %v441_v31 = vmul.f32 0.01, %v377_v23  ;;  %vm409_vm1 = vcmp.ge.f32.partialorder %v377_v23, 0.0  ;;  %v448_v32 = vmul.f32 0.01, %v384_v24  ;;  %vm416_vm2 = vcmp.ge.f32.partialorder %v384_v24, 0.0 }
  0x17   : > { %v449_v33 = vmul.f32 0.01, %v385_v25  ;;  %vm417_vm3 = vcmp.ge.f32.partialorder %v385_v25, 0.0  ;;  %v472_v37 = vsel %vm408_vm0, %v376_v20, %v440_v27  ;;  %v456_v39 = vmul.f32 0.01, %v392_v29 }
  0x18   : > { %587 = vmatpush.bf16.msra.mxu0 %v998_v11  ;;  %1185 = vmatpush.bf16.msra.mxu1 %v998_v11  ;;  %v457_v40 = vmul.f32 0.01, %v393_v30  ;;  %v473_v42 = vsel %vm409_vm1, %v377_v23, %v441_v31  ;;  %vm424_vm4 = vcmp.ge.f32.partialorder %v392_v29, 0.0  ;;  %vm425_vm5 = vcmp.ge.f32.partialorder %v393_v30, 0.0  ;;  %v1155_v31 = vld [vmem:[%s1281_s9 + $0x50] sm:$0xff]  }
  0x19   : > { %1186 = vmatpush.bf16.msra.mxu2 %v998_v11  ;;  %1187 = vmatpush.bf16.msra.mxu3 %v998_v11  ;;  %v480_v45 = vsel %vm416_vm2, %v384_v24, %v448_v32  ;;  %v481_v46 = vsel %vm417_vm3, %v385_v25, %v449_v33  ;;  %v488_v53 = vsel %vm424_vm4, %v392_v29, %v456_v39  ;;  %v1052_v55 = vunpack.c.l.bf16 %v1157_v44  ;;  %v1151_v25 = vld [vmem:[%s1281_s9 + $0x30] sm:$0xff]  }
  0x1a   : > { %v489_v54 = vsel %vm425_vm5, %v393_v30, %v457_v40  ;;  %v504_v56 = vpack.c.bf16 %v473_v42, %v472_v37  ;;  %v508_v57 = vpack.c.bf16 %v481_v46, %v480_v45  ;;  %v350_v58 = vmul.f32 %v1287_v4, %v1024_v43 }
  0x1b   : > { %v351_v59 = vmul.f32 %v1287_v4, %v1025_v47  ;;  %v358_v60 = vmul.f32 %v1287_v4, %v1040_v48  ;;  %v1053_v61 = vunpack.c.h.bf16 %v1157_v44  ;;  %v364_v62 = vmul.f32 %v1287_v4, %v1052_v55 }
  0x1c   : > { %588 = vmatpush.bf16.msra.mxu0 %v997_v19  ;;  %1188 = vmatpush.bf16.msra.mxu1 %v997_v19  ;;  %v512_v63 = vpack.c.bf16 %v489_v54, %v488_v53  ;;  %v359_v0 = vmul.f32 %v1287_v4, %v1041_v51  ;;  %v378_v1 = vadd.f32 %v1298_v13, %v342_v50  ;;  %v1012_v16 = vunpack.c.l.bf16 %v1147_v8 }
  0x1d   : > { %1189 = vmatpush.bf16.msra.mxu2 %v997_v19  ;;  %1190 = vmatpush.bf16.msra.mxu3 %v997_v19  ;;  %v379_v2 = vadd.f32 %v1298_v13, %v343_v52  ;;  %v365_v3 = vmul.f32 %v1287_v4, %v1053_v61  ;;  %v400_v5 = vadd.f32 %v1298_v13, %v364_v62  ;;  %v1013_v29 = vunpack.c.h.bf16 %v1147_v8  ;;  %v1159_v62 = vld [vmem:[%s1281_s9 + $0x70] sm:$0xff]  }
  0x1e   : > { %v386_v6 = vadd.f32 %v1298_v13, %v350_v58  ;;  %v387_v7 = vadd.f32 %v1298_v13, %v351_v59  ;;  %v394_v9 = vadd.f32 %v1298_v13, %v358_v60  ;;  %v395_v10 = vadd.f32 %v1298_v13, %v359_v0 }
  0x1f   : > { %v401_v11 = vadd.f32 %v1298_v13, %v365_v3  ;;  %vm432_vm6 = vcmp.ge.f32.partialorder %v400_v5, 0.0  ;;  %v464_v12 = vmul.f32 0.01, %v400_v5  ;;  %vm410_vm7 = vcmp.ge.f32.partialorder %v378_v1, 0.0 }
  0x20   : > { %589 = vmatpush.bf16.msra.mxu0 %v996_v26  ;;  %1191 = vmatpush.bf16.msra.mxu1 %v996_v26  ;;  %v442_v14 = vmul.f32 0.01, %v378_v1  ;;  %v443_v15 = vmul.f32 0.01, %v379_v2  ;;  %vm411_vm9 = vcmp.ge.f32.partialorder %v379_v2, 0.0  ;;  %vm418_vm10 = vcmp.ge.f32.partialorder %v386_v6, 0.0 }
  0x21   : > { %1192 = vmatpush.bf16.msra.mxu2 %v996_v26  ;;  %1193 = vmatpush.bf16.msra.mxu3 %v996_v26  ;;  %vm433_vm8 = vcmp.ge.f32.partialorder %v401_v11, 0.0  ;;  %v465_v17 = vmul.f32 0.01, %v401_v11  ;;  %v496_v18 = vsel %vm432_vm6, %v400_v5, %v464_v12  ;;  %v450_v19 = vmul.f32 0.01, %v386_v6  ;;  %v1158_v26 = vld [vmem:[%s1281_s9 + $0x68] sm:$0xff]  }
  0x22   : > { %v451_v20 = vmul.f32 0.01, %v387_v7  ;;  %vm419_vm11 = vcmp.ge.f32.partialorder %v387_v7, 0.0  ;;  %v458_v21 = vmul.f32 0.01, %v394_v9  ;;  %vm426_vm12 = vcmp.ge.f32.partialorder %v394_v9, 0.0 }
  0x23   : > { %v459_v22 = vmul.f32 0.01, %v395_v10  ;;  %v497_v23 = vsel %vm433_vm8, %v401_v11, %v465_v17  ;;  %vm427_vm13 = vcmp.ge.f32.partialorder %v395_v10, 0.0  ;;  %v474_v27 = vsel %vm410_vm7, %v378_v1, %v442_v14 }
  0x24   : > { %590 = vmatpush.bf16.msra.mxu0 %v995_v35  ;;  %1194 = vmatpush.bf16.msra.mxu1 %v995_v35  ;;  %v516_v24 = vpack.c.bf16 %v497_v23, %v496_v18  ;;  %v475_v28 = vsel %vm411_vm9, %v379_v2, %v443_v15  ;;  %v344_v30 = vmul.f32 %v1287_v4, %v1012_v16  ;;  %v1056_v34 = vunpack.c.l.bf16 %v1158_v26  ;;  %v1156_v18 = vld [vmem:[%s1281_s9 + $0x58] sm:$0xff]  }
  0x25   : > { %1195 = vmatpush.bf16.msra.mxu2 %v995_v35  ;;  %1196 = vmatpush.bf16.msra.mxu3 %v995_v35  ;;  %v482_v32 = vsel %vm418_vm10, %v386_v6, %v450_v19  ;;  %v483_v33 = vsel %vm419_vm11, %v387_v7, %v451_v20  ;;  %v1057_v35 = vunpack.c.h.bf16 %v1158_v26  ;;  %v490_v36 = vsel %vm426_vm12, %v394_v9, %v458_v21  ;;  %v1148_v6 = vld [vmem:[%s1281_s9 + $0x18] sm:$0xff]  }
  0x26   : > { %v491_v37 = vsel %vm427_vm13, %v395_v10, %v459_v22  ;;  %v1028_v38 = vunpack.c.l.bf16 %v1151_v25  ;;  %v1029_v39 = vunpack.c.h.bf16 %v1151_v25  ;;  %v1044_v40 = vunpack.c.l.bf16 %v1155_v31  ;;  %v1152_v10 = vld [vmem:[%s1281_s9 + $0x38] sm:$0xff]  }
  0x27   : > { %v1045_v41 = vunpack.c.h.bf16 %v1155_v31  ;;  %v366_v42 = vmul.f32 %v1287_v4, %v1056_v34  ;;  %v367_v43 = vmul.f32 %v1287_v4, %v1057_v35  ;;  %v505_v44 = vpack.c.bf16 %v475_v28, %v474_v27 }
  0x28   : > { %591 = vmatpush.bf16.msra.mxu0 %v994_v49  ;;  %1197 = vmatpush.bf16.msra.mxu1 %v994_v49  ;;  %v509_v45 = vpack.c.bf16 %v483_v33, %v482_v32  ;;  %v345_v46 = vmul.f32 %v1287_v4, %v1013_v29  ;;  %v513_v48 = vpack.c.bf16 %v491_v37, %v490_v36  ;;  %v1060_v2 = vunpack.c.l.bf16 %v1159_v62 }
  0x29   : > { %1198 = vmatpush.bf16.msra.mxu2 %v994_v49  ;;  %1199 = vmatpush.bf16.msra.mxu3 %v994_v49  ;;  %v402_v47 = vadd.f32 %v1298_v13, %v366_v42  ;;  %v352_v49 = vmul.f32 %v1287_v4, %v1028_v38  ;;  %v353_v50 = vmul.f32 %v1287_v4, %v1029_v39  ;;  %v1061_v3 = vunpack.c.h.bf16 %v1159_v62  ;;  %v1160_v42 = vld [vmem:[%s1281_s9 + $0x78] sm:$0xff]  }
  0x2a   : > { %v403_v51 = vadd.f32 %v1298_v13, %v367_v43  ;;  %v380_v52 = vadd.f32 %v1298_v13, %v344_v30  ;;  %v360_v53 = vmul.f32 %v1287_v4, %v1044_v40  ;;  %v361_v54 = vmul.f32 %v1287_v4, %v1045_v41 }
  0x2b   : > { %592 = vmatmul.bf16.vlgmr.msra.gmra.mxu0 %v504_v56  ;;  %612 = vmatmul.bf16.vlgmr.msra.gmra.mxu1 %v508_v57  ;;  %vm434_vm14 = vcmp.ge.f32.partialorder %v402_v47, 0.0  ;;  %v466_v55 = vmul.f32 0.01, %v402_v47  ;;  %v381_v57 = vadd.f32 %v1298_v13, %v345_v46  ;;  %v388_v58 = vadd.f32 %v1298_v13, %v352_v49 }
  0x2c   : > { %632 = vmatmul.bf16.vlgmr.msra.gmra.mxu2 %v512_v63  ;;  %652 = vmatmul.bf16.vlgmr.msra.gmra.mxu3 %v516_v24  ;;  %vm435_vm15 = vcmp.ge.f32.partialorder %v403_v51, 0.0  ;;  %v467_v56 = vmul.f32 0.01, %v403_v51  ;;  %v389_v59 = vadd.f32 %v1298_v13, %v353_v50  ;;  %v396_v63 = vadd.f32 %v1298_v13, %v360_v53 }
  0x2d   : > { %v498_v60 = vsel %vm434_vm14, %v402_v47, %v466_v55  ;;  %v397_v0 = vadd.f32 %v1298_v13, %v361_v54  ;;  %v444_v1 = vmul.f32 0.01, %v380_v52  ;;  %vm412_vm0 = vcmp.ge.f32.partialorder %v380_v52, 0.0 }
  0x2e   : > { %v499_v61 = vsel %vm435_vm15, %v403_v51, %v467_v56  ;;  %vm413_vm1 = vcmp.ge.f32.partialorder %v381_v57, 0.0  ;;  %v445_v5 = vmul.f32 0.01, %v381_v57  ;;  %v452_v8 = vmul.f32 0.01, %v388_v58 }
  0x2f   : > { %v517_v7 = vpack.c.bf16 %v499_v61, %v498_v60  ;;  %v453_v9 = vmul.f32 0.01, %v389_v59  ;;  %v368_v11 = vmul.f32 %v1287_v4, %v1060_v2  ;;  %v369_v12 = vmul.f32 %v1287_v4, %v1061_v3 }
  0x30   : > { %vm420_vm2 = vcmp.ge.f32.partialorder %v388_v58, 0.0  ;;  %vm421_vm3 = vcmp.ge.f32.partialorder %v389_v59, 0.0  ;;  %v460_v14 = vmul.f32 0.01, %v396_v63  ;;  %v461_v15 = vmul.f32 0.01, %v397_v0 }
  0x31   : > { %v476_v16 = vsel %vm412_vm0, %v380_v52, %v444_v1  ;;  %v1016_v17 = vunpack.c.l.bf16 %v1148_v6  ;;  %vm428_vm4 = vcmp.ge.f32.partialorder %v396_v63, 0.0  ;;  %vm429_vm5 = vcmp.ge.f32.partialorder %v397_v0, 0.0 }
  0x32   : > { %v477_v19 = vsel %vm413_vm1, %v381_v57, %v445_v5  ;;  %v1017_v20 = vunpack.c.h.bf16 %v1148_v6  ;;  %v1032_v21 = vunpack.c.l.bf16 %v1152_v10  ;;  %v1033_v22 = vunpack.c.h.bf16 %v1152_v10 }
  0x33   : > { %v484_v23 = vsel %vm420_vm2, %v388_v58, %v452_v8  ;;  %v485_v24 = vsel %vm421_vm3, %v389_v59, %v453_v9  ;;  %v404_v25 = vadd.f32 %v1298_v13, %v368_v11  ;;  %v405_v26 = vadd.f32 %v1298_v13, %v369_v12 }
  0x34   : > { %v492_v27 = vsel %vm428_vm4, %v396_v63, %v460_v14  ;;  %v493_v28 = vsel %vm429_vm5, %v397_v0, %v461_v15  ;;  %v1048_v29 = vunpack.c.l.bf16 %v1156_v18  ;;  %v1049_v30 = vunpack.c.h.bf16 %v1156_v18 }
  0x35   : > { %v506_v31 = vpack.c.bf16 %v477_v19, %v476_v16  ;;  %v346_v32 = vmul.f32 %v1287_v4, %v1016_v17  ;;  %v510_v33 = vpack.c.bf16 %v485_v24, %v484_v23  ;;  %v347_v34 = vmul.f32 %v1287_v4, %v1017_v20 }
  0x36   : > { %v354_v35 = vmul.f32 %v1287_v4, %v1032_v21  ;;  %v355_v36 = vmul.f32 %v1287_v4, %v1033_v22  ;;  %v514_v37 = vpack.c.bf16 %v493_v28, %v492_v27  ;;  %v468_v38 = vmul.f32 0.01, %v404_v25 }
  0x37   : > { %v469_v39 = vmul.f32 0.01, %v405_v26  ;;  %v362_v40 = vmul.f32 %v1287_v4, %v1048_v29  ;;  %v363_v41 = vmul.f32 %v1287_v4, %v1049_v30  ;;  %vm436_vm6 = vcmp.ge.f32.partialorder %v404_v25, 0.0 }
  0x38   : > { %vm437_vm7 = vcmp.ge.f32.partialorder %v405_v26, 0.0  ;;  %v382_v43 = vadd.f32 %v1298_v13, %v346_v32  ;;  %v391_v46 = vadd.f32 %v1298_v13, %v355_v36  ;;  %v500_v47 = vsel %vm436_vm6, %v404_v25, %v468_v38 }
  0x39   : > { %v1064_v49 = vunpack.c.l.bf16 %v1160_v42  ;;  %v1065_v50 = vunpack.c.h.bf16 %v1160_v42  ;;  %v398_v51 = vadd.f32 %v1298_v13, %v362_v40  ;;  %v399_v52 = vadd.f32 %v1298_v13, %v363_v41 }
  0x3a   : > { %vm414_vm8 = vcmp.ge.f32.partialorder %v382_v43, 0.0  ;;  %v446_v53 = vmul.f32 0.01, %v382_v43  ;;  %v455_v57 = vmul.f32 0.01, %v391_v46  ;;  %vm423_vm11 = vcmp.ge.f32.partialorder %v391_v46, 0.0 }
  0x3b   : > { %597 = vmatmul.bf16.gmra.mxu0 %v505_v44  ;;  %617 = vmatmul.bf16.gmra.mxu1 %v509_v45  ;;  %v383_v44 = vadd.f32 %v1298_v13, %v347_v34  ;;  %v390_v45 = vadd.f32 %v1298_v13, %v354_v35  ;;  %v370_v58 = vmul.f32 %v1287_v4, %v1064_v49  ;;  %v462_v60 = vmul.f32 0.01, %v398_v51 }
  0x3c   : > { %637 = vmatmul.bf16.gmra.mxu2 %v513_v48  ;;  %657 = vmatmul.bf16.gmra.mxu3 %v517_v7  ;;  %v501_v48 = vsel %vm437_vm7, %v405_v26, %v469_v39  ;;  %v371_v59 = vmul.f32 %v1287_v4, %v1065_v50  ;;  %v463_v61 = vmul.f32 0.01, %v399_v52  ;;  %vm430_vm12 = vcmp.ge.f32.partialorder %v398_v51, 0.0 }
  0x3d   : > { %vm415_vm9 = vcmp.ge.f32.partialorder %v383_v44, 0.0  ;;  %v447_v54 = vmul.f32 0.01, %v383_v44  ;;  %v518_v55 = vpack.c.bf16 %v501_v48, %v500_v47  ;;  %v454_v56 = vmul.f32 0.01, %v390_v45 }
  0x3e   : > { %vm422_vm10 = vcmp.ge.f32.partialorder %v390_v45, 0.0  ;;  %vm431_vm13 = vcmp.ge.f32.partialorder %v399_v52, 0.0  ;;  %v478_v62 = vsel %vm414_vm8, %v382_v43, %v446_v53  ;;  %v487_v1 = vsel %vm423_vm11, %v391_v46, %v455_v57 }
  0x3f   : > { %v479_v63 = vsel %vm415_vm9, %v383_v44, %v447_v54  ;;  %v486_v0 = vsel %vm422_vm10, %v390_v45, %v454_v56  ;;  %v406_v2 = vadd.f32 %v1298_v13, %v370_v58  ;;  %v407_v3 = vadd.f32 %v1298_v13, %v371_v59 }
  0x40   : > { %v494_v5 = vsel %vm430_vm12, %v398_v51, %v462_v60  ;;  %v495_v6 = vsel %vm431_vm13, %v399_v52, %v463_v61  ;;  %v507_v7 = vpack.c.bf16 %v479_v63, %v478_v62  ;;  %v511_v8 = vpack.c.bf16 %v487_v1, %v486_v0 }
  0x41   : > { %v515_v4 = vpack.c.bf16 %v495_v6, %v494_v5  ;;  %v470_v9 = vmul.f32 0.01, %v406_v2  ;;  %v471_v10 = vmul.f32 0.01, %v407_v3  ;;  %vm438_vm14 = vcmp.ge.f32.partialorder %v406_v2, 0.0 }
  0x42   : > { %vm439_vm15 = vcmp.ge.f32.partialorder %v407_v3, 0.0 }
  0x43   : > { %v502_v11 = vsel %vm438_vm14, %v406_v2, %v470_v9  ;;  %v503_v12 = vsel %vm439_vm15, %v407_v3, %v471_v10 }
  0x44   : > { %v519_v14 = vpack.c.bf16 %v503_v12, %v502_v11 }
  0x4b   : > { %602 = vmatmul.bf16.gmra.mxu0 %v506_v31  ;;  %622 = vmatmul.bf16.gmra.mxu1 %v510_v33 }
  0x4c   : > { %642 = vmatmul.bf16.gmra.mxu2 %v514_v37  ;;  %662 = vmatmul.bf16.gmra.mxu3 %v518_v55 }
  0x5b   : > { %607 = vmatmul.bf16.gmra.mxu0 %v507_v7  ;;  %627 = vmatmul.bf16.gmra.mxu1 %v511_v8 }
  0x5c   : > { %647 = vmatmul.bf16.gmra.mxu2 %v515_v4  ;;  %667 = vmatmul.bf16.gmra.mxu3 %v519_v14 }
  0xa8   : > { %v593_v15 = vpop.f32.mrf.mxu0  ;;  %v1392_v16 = vpop.f32.mrf.mxu1 }
  0xa9   : > { %v775_v46 = vmul.f32 %v593_v15, %v593_v15 }
  0xaf   : > { %v1394_v13 = vpop.f32.mrf.mxu2  ;;  %v1409_v21 = vpop.f32.mrf.mxu3 }
  0xb0   : > { %v595_v17 = vpop.f32.mrf.mxu0  ;;  %v1403_v18 = vpop.f32.mrf.mxu1 }
  0xb1   : > { %v1069_v19 = vpack.c.bf16 %v595_v17, %v593_v15  ;;  %v1089_v20 = vpack.c.bf16 %v1403_v18, %v1392_v16  ;;  %v776_v45 = vmul.f32 %v595_v17, %v595_v17  ;;  %v737_v48 = vadd.f32 %v595_v17, %v593_v15 }
  0xb2   : > { %v783_v15 = vmul.f32 %v1392_v16, %v1392_v16 }
  0xb3   : > { %1070 = vst [vmem:[%s1401_s30] sm:$0xff] %v1069_v19   ;;  %v807_v49 = vadd.f32 %v776_v45, %v775_v46 }
  0xb4   : > { %1164 = vst [vmem:[%s1401_s30 + $0x20] sm:$0xff] %v1089_v20   ;;  %v784_v20 = vmul.f32 %v1403_v18, %v1403_v18 }
  0xb7   : > { %v1411_v22 = vpop.f32.mrf.mxu2  ;;  %v1418_v26 = vpop.f32.mrf.mxu3 }
  0xb8   : > { %v598_v23 = vpop.f32.mrf.mxu0  ;;  %v1413_v24 = vpop.f32.mrf.mxu1  ;;  %v1109_v25 = vpack.c.bf16 %v1411_v22, %v1394_v13  ;;  %v1129_v28 = vpack.c.bf16 %v1418_v26, %v1409_v21 }
  0xb9   : > { %v777_v47 = vmul.f32 %v598_v23, %v598_v23  ;;  %v738_v52 = vadd.f32 %v737_v48, %v598_v23 }
  0xba   : > { %1168 = vst [vmem:[%s1401_s30 + $0x40] sm:$0xff] %v1109_v25  }
  0xbb   : > { %1172 = vst [vmem:[%s1401_s30 + $0x60] sm:$0xff] %v1129_v28   ;;  %v808_v54 = vadd.f32 %v807_v49, %v777_v47 }
  0xbf   : > { %v1420_v27 = vpop.f32.mrf.mxu2  ;;  %v1431_v33 = vpop.f32.mrf.mxu3 }
  0xc0   : > { %v600_v29 = vpop.f32.mrf.mxu0  ;;  %v1424_v30 = vpop.f32.mrf.mxu1 }
  0xc1   : > { %v1074_v31 = vpack.c.bf16 %v600_v29, %v598_v23  ;;  %v1094_v32 = vpack.c.bf16 %v1424_v30, %v1413_v24  ;;  %v778_v50 = vmul.f32 %v600_v29, %v600_v29  ;;  %v739_v59 = vadd.f32 %v738_v52, %v600_v29 }
  0xc2   : > { %v785_v29 = vmul.f32 %v1413_v24, %v1413_v24 }
  0xc3   : > { %1161 = vst [vmem:[%s1401_s30 + $0x8] sm:$0xff] %v1074_v31   ;;  %v809_v60 = vadd.f32 %v808_v54, %v778_v50 }
  0xc4   : > { %1165 = vst [vmem:[%s1401_s30 + $0x28] sm:$0xff] %v1094_v32  }
  0xc7   : > { %v1433_v34 = vpop.f32.mrf.mxu2  ;;  %v1440_v38 = vpop.f32.mrf.mxu3 }
  0xc8   : > { %v603_v35 = vpop.f32.mrf.mxu0  ;;  %v1435_v36 = vpop.f32.mrf.mxu1  ;;  %v1114_v37 = vpack.c.bf16 %v1433_v34, %v1420_v27  ;;  %v1134_v40 = vpack.c.bf16 %v1440_v38, %v1431_v33 }
  0xc9   : > { %v779_v55 = vmul.f32 %v603_v35, %v603_v35  ;;  %v740_v62 = vadd.f32 %v739_v59, %v603_v35 }
  0xca   : > { %1169 = vst [vmem:[%s1401_s30 + $0x48] sm:$0xff] %v1114_v37  }
  0xcb   : > { %1173 = vst [vmem:[%s1401_s30 + $0x68] sm:$0xff] %v1134_v40   ;;  %v810_v63 = vadd.f32 %v809_v60, %v779_v55 }
  0xcf   : > { %v1442_v39 = vpop.f32.mrf.mxu2  ;;  %v1453_v51 = vpop.f32.mrf.mxu3 }
  0xd0   : > { %v605_v41 = vpop.f32.mrf.mxu0  ;;  %v1446_v42 = vpop.f32.mrf.mxu1 }
  0xd1   : > { %v1079_v43 = vpack.c.bf16 %v605_v41, %v603_v35  ;;  %v1099_v44 = vpack.c.bf16 %v1446_v42, %v1435_v36  ;;  %v780_v61 = vmul.f32 %v605_v41, %v605_v41  ;;  %v741_v1 = vadd.f32 %v740_v62, %v605_v41 }
  0xd3   : > { %1162 = vst [vmem:[%s1401_s30 + $0x10] sm:$0xff] %v1079_v43   ;;  %v811_v2 = vadd.f32 %v810_v63, %v780_v61  ;;  %v794_v63 = vmul.f32 %v1433_v34, %v1433_v34 }
  0xd4   : > { %1166 = vst [vmem:[%s1401_s30 + $0x30] sm:$0xff] %v1099_v44  }
  0xd7   : > { %v1455_v53 = vpop.f32.mrf.mxu2  ;;  %v1460_v3 = vpop.f32.mrf.mxu3 }
  0xd8   : > { %v608_v56 = vpop.f32.mrf.mxu0  ;;  %v628_v57 = vpop.f32.mrf.mxu1  ;;  %v1119_v58 = vpack.c.bf16 %v1455_v53, %v1442_v39  ;;  %v1139_v7 = vpack.c.bf16 %v1460_v3, %v1453_v51 }
  0xd9   : > { %v781_v0 = vmul.f32 %v608_v56, %v608_v56  ;;  %v742_v5 = vadd.f32 %v741_v1, %v608_v56  ;;  %v789_v49 = vmul.f32 %v628_v57, %v628_v57 }
  0xda   : > { %1170 = vst [vmem:[%s1401_s30 + $0x50] sm:$0xff] %v1119_v58  }
  0xdb   : > { %v812_v8 = vadd.f32 %v811_v2, %v781_v0  ;;  %1174 = vst [vmem:[%s1401_s30 + $0x70] sm:$0xff] %v1139_v7   ;;  %v796_v7 = vmul.f32 %v1455_v53, %v1455_v53 }
  0xdf   : > { %v648_v6 = vpop.f32.mrf.mxu2  ;;  %v1473_v28 = vpop.f32.mrf.mxu3 }
  0xe0   : > { %v610_v4 = vpop.f32.mrf.mxu0  ;;  %v630_v9 = vpop.f32.mrf.mxu1 }
  0xe1   : > { %v1084_v10 = vpack.c.bf16 %v610_v4, %v608_v56  ;;  %v743_v11 = vadd.f32 %v742_v5, %v610_v4  ;;  %v782_v12 = vmul.f32 %v610_v4, %v610_v4  ;;  %v1104_v14 = vpack.c.bf16 %v630_v9, %v628_v57 }
  0xe2   : > { %v790_v55 = vmul.f32 %v630_v9, %v630_v9 }
  0xe3   : > { %1163 = vst [vmem:[%s1401_s30 + $0x18] sm:$0xff] %v1084_v10   ;;  %v744_v17 = vadd.f32 %v743_v11, %v1392_v16  ;;  %v813_v19 = vadd.f32 %v812_v8, %v782_v12  ;;  %v786_v16 = vmul.f32 %v1424_v30, %v1424_v30 }
  0xe4   : > { %1167 = vst [vmem:[%s1401_s30 + $0x38] sm:$0xff] %v1104_v14  }
  0xe5   : > { %v745_v23 = vadd.f32 %v744_v17, %v1403_v18  ;;  %v814_v25 = vadd.f32 %v813_v19, %v783_v15  ;;  %v787_v18 = vmul.f32 %v1435_v36, %v1435_v36 }
  0xe7   : > { %v746_v31 = vadd.f32 %v745_v23, %v1413_v24  ;;  %v815_v32 = vadd.f32 %v814_v25, %v784_v20  ;;  %v650_v35 = vpop.f32.mrf.mxu2  ;;  %v788_v24 = vmul.f32 %v1446_v42, %v1446_v42  ;;  %v670_v47 = vpop.f32.mrf.mxu3  ;;  %v802_v23 = vmul.f32 %v1440_v38, %v1440_v38 }
  0xe8   : > { %v1124_v37 = vpack.c.bf16 %v650_v35, %v648_v6  ;;  %v798_v12 = vmul.f32 %v650_v35, %v650_v35 }
  0xe9   : > { %v816_v40 = vadd.f32 %v815_v32, %v785_v29  ;;  %v747_v41 = vadd.f32 %v746_v31, %v1424_v30  ;;  %v1144_v30 = vpack.c.bf16 %v670_v47, %v1473_v28  ;;  %v803_v29 = vmul.f32 %v1453_v51, %v1453_v51 }
  0xea   : > { %1171 = vst [vmem:[%s1401_s30 + $0x58] sm:$0xff] %v1124_v37  }
  0xeb   : > { %v748_v43 = vadd.f32 %v747_v41, %v1435_v36  ;;  %v817_v44 = vadd.f32 %v816_v40, %v786_v16  ;;  %1175 = vst [vmem:[%s1401_s30 + $0x78] sm:$0xff] %v1144_v30   ;;  %v791_v36 = vmul.f32 %v1394_v13, %v1394_v13  ;;  %v805_v40 = vmul.f32 %v1473_v28, %v1473_v28 }
  0xed   : > { %v749_v45 = vadd.f32 %v748_v43, %v1446_v42  ;;  %v818_v46 = vadd.f32 %v817_v44, %v787_v18  ;;  %v792_v42 = vmul.f32 %v1411_v22, %v1411_v22  ;;  %v806_v18 = vmul.f32 %v670_v47, %v670_v47 }
  0xef   : > { %v750_v48 = vadd.f32 %v749_v45, %v628_v57  ;;  %v819_v50 = vadd.f32 %v818_v46, %v788_v24  ;;  %v793_v57 = vmul.f32 %v1420_v27, %v1420_v27 }
  0xf1   : > { %v820_v52 = vadd.f32 %v819_v50, %v789_v49  ;;  %v751_v54 = vadd.f32 %v750_v48, %v630_v9  ;;  %v797_v9 = vmul.f32 %v648_v6, %v648_v6 }
  0xf3   : > { %v752_v56 = vadd.f32 %v751_v54, %v1394_v13  ;;  %v821_v58 = vadd.f32 %v820_v52, %v790_v55  ;;  %v795_v13 = vmul.f32 %v1442_v39, %v1442_v39 }
  0xf5   : > { %v753_v59 = vadd.f32 %v752_v56, %v1411_v22  ;;  %v822_v60 = vadd.f32 %v821_v58, %v791_v36 }
  0xf7   : > { %v754_v61 = vadd.f32 %v753_v59, %v1420_v27  ;;  %v823_v62 = vadd.f32 %v822_v60, %v792_v42 }
  0xf9   : > { %v824_v0 = vadd.f32 %v823_v62, %v793_v57  ;;  %v755_v1 = vadd.f32 %v754_v61, %v1433_v34  ;;  %v799_v34 = vmul.f32 %v1409_v21, %v1409_v21 }
  0xfb   : > { %v756_v2 = vadd.f32 %v755_v1, %v1442_v39  ;;  %v825_v5 = vadd.f32 %v824_v0, %v794_v63  ;;  %v800_v39 = vmul.f32 %v1418_v26, %v1418_v26 }
  0xfd   : > { %v757_v22 = vadd.f32 %v756_v2, %v1455_v53  ;;  %v826_v8 = vadd.f32 %v825_v5, %v795_v13  ;;  %v801_v53 = vmul.f32 %v1431_v33, %v1431_v33 }
  0xff   : > { %v827_v27 = vadd.f32 %v826_v8, %v796_v7  ;;  %v758_v4 = vadd.f32 %v757_v22, %v648_v6 }
 0x101   : > { %v828_v10 = vadd.f32 %v827_v27, %v797_v9  ;;  %v759_v11 = vadd.f32 %v758_v4, %v650_v35 }
 0x103   : > { %v760_v14 = vadd.f32 %v759_v11, %v1409_v21  ;;  %v829_v15 = vadd.f32 %v828_v10, %v798_v12 }
 0x105   : > { %v761_v17 = vadd.f32 %v760_v14, %v1418_v26  ;;  %v830_v19 = vadd.f32 %v829_v15, %v799_v34 }
 0x107   : > { %v762_v6 = vadd.f32 %v761_v17, %v1431_v33  ;;  %v831_v20 = vadd.f32 %v830_v19, %v800_v39  ;;  %v804_v33 = vmul.f32 %v1460_v3, %v1460_v3 }
 0x109   : > { %v832_v25 = vadd.f32 %v831_v20, %v801_v53  ;;  %v763_v21 = vadd.f32 %v762_v6, %v1440_v38 }
 0x10b   : > { %v764_v31 = vadd.f32 %v763_v21, %v1453_v51  ;;  %v833_v26 = vadd.f32 %v832_v25, %v802_v23 }
 0x10d   : > { %v765_v32 = vadd.f32 %v764_v31, %v1460_v3  ;;  %v834_v35 = vadd.f32 %v833_v26, %v803_v29 }
 0x10f   : > { %v835_v37 = vadd.f32 %v834_v35, %v804_v33  ;;  %v766_v16 = vadd.f32 %v765_v32, %v1473_v28 }
 0x111   : > { %v836_v38 = vadd.f32 %v835_v37, %v805_v40  ;;  %v767_v41 = vadd.f32 %v766_v16, %v670_v47 }
 0x113   : > { %v768_v43 = vrot.slane %v767_v41, 4  ;;  %v837_v44 = vadd.f32 %v836_v38, %v806_v18 }
 0x115   : > { %v769_v51 = vadd.f32 %v768_v43, %v767_v41  ;;  %v838_v24 = vrot.slane %v837_v44, 4 }
 0x117   : > { %v770_v45 = vrot.slane %v769_v51, 2  ;;  %v839_v46 = vadd.f32 %v838_v24, %v837_v44 }
 0x119   : > { %v771_v48 = vadd.f32 %v770_v45, %v769_v51  ;;  %v840_v3 = vrot.slane %v839_v46, 2 }
 0x11b   : > { %v772_v49 = vrot.slane %v771_v48, 1  ;;  %v841_v50 = vadd.f32 %v840_v3, %v839_v46 }
 0x11d   : > { %v773_v28 = vadd.f32 %v772_v49, %v771_v48  ;;  %v842_v30 = vrot.slane %v841_v50, 1 }
 0x11f   : > { %774 = vst [vmem:[%s268_s7] sm:$0x1] %v773_v28  ;;  %v843_v47 = vadd.f32 %v842_v30, %v841_v50 }
 0x121   : > { %844 = vst [vmem:[%s271_s10] sm:$0x1] %v843_v47 }
 0x122 PF: > { %s17_s21 = sadd.s32 1, %s1216_s21  }
 0x123   : > { %p14_p5 = scmp.ge.s32.totalorder %s17_s21, 4  }
 0x125   :  { %16 = sbr.rel (!%p14_p5) target bundleno = 1 (0x1), region = 90 }

// kernel: gan_generator_forward.45
= control target key start
LH: loop header
LB: loop body
LE: loop exit
PB: predicated region body
PF: predicated region fallthrough
CT: control target
= control target key end

     0   :  { %s1088_s21 = smov 0   ;;  %s1349_s0 = inlined_call_operand.vmem [shape: bf16[512,128], index: 0, kind: input, shape index: {}]   ;;  %s1350_s1 = inlined_call_operand.vmem [shape: f32[1,128], index: 1, kind: input, shape index: {}]   ;;  %s1351_s2 = inlined_call_operand.vmem [shape: f32[1,128], index: 2, kind: input, shape index: {}]   ;;  %s1352_s3 = inlined_call_operand.vmem [shape: bf16[128,128], index: 3, kind: input, shape index: {}]   ;;  %s1353_s4 = inlined_call_operand.vmem [shape: f32[1,128], index: 4, kind: input, shape index: {}]   ;;  %s1354_s5 = inlined_call_operand.vmem [shape: f32[512,128], index: 5, kind: input, shape index: {}]   ;;  %s1355_s6 = inlined_call_operand.vmem [shape: f32[512,128], index: 6, kind: output, shape index: {}]  }
   0x1 LB: > { %s878_s22 = sadd.s32 4294967295, %s1051_s21   ;;  %p882_p0 = scmp.ge.s32.totalorder %s1051_s21, 1  ;;  %s1051_s21 = sphi %s1088_s21, %s16_s21  }
   0x2   : > { %p224_p1 = scmp.lt.s32.totalorder %s1051_s21, 3 }
   0x4   : > { %p225_p2 = pnand %p882_p0, %p224_p1 }
   0x5   : > { %s883_s25 = sshll.u32 (!%p225_p2), %s878_s22, 5 }
   0x6   : > { %228 = sbr.rel (%p225_p2) target bundleno = 236 (0xec), region = 44  ;;  %p260_p3 = scmp.lt.s32.totalorder (!%p225_p2), %s883_s25, 63 }
   0xb   : > { %v930_v0 = vld [vmem:[%s1352_s3 + $0x38] sm:$0xff]  ;;  %v929_v1 = vld [vmem:[%s1352_s3 + $0x30] sm:$0xff]  ;;  %s1357_s25 = smov (!%p260_p3, %s883_s25), 63  ;;  %v928_v2 = vld [vmem:[%s1352_s3 + $0x28] sm:$0xff] }
   0xc   : > { %657 = vmatpush.bf16.msra.mxu0 %v930_v0  ;;  %1010 = vmatpush.bf16.msra.mxu1 %v930_v0  ;;  %s884_s28 = sshll.u32 %s1357_s25, 2  ;;  %v1116_v3 = vld [vmem:[%s1350_s1] ss:$0 sm:$0xff]  ;;  %v926_v23 = vld [vmem:[%s1352_s3 + $0x18] sm:$0xff]  ;;  %v925_v32 = vld [vmem:[%s1352_s3 + $0x10] sm:$0xff]  ;;  %s886_s26 = sshll.u32 %s1357_s25, 3 }
   0xd   : > { %1011 = vmatpush.bf16.msra.mxu2 %v930_v0  ;;  %1012 = vmatpush.bf16.msra.mxu3 %v930_v0  ;;  %s1111_s9 = scalar_lea.vmem %s1349_s0, %s884_s28  ;;  %v927_v13 = vld [vmem:[%s1352_s3 + $0x20] sm:$0xff]  ;;  %v924_v38 = vld [vmem:[%s1352_s3 + $0x8] sm:$0xff]  ;;  %s1232_s29 = scalar_lea.vmem %s1354_s5, %s886_s26 }
   0xe   : > { %v932_v4 = vld [vmem:[%s1111_s9] sm:$0xff]   ;;  %v995_v31 = vld [vmem:[%s1111_s9 + $0x8] sm:$0xff]  }
   0xf   : > { %v998_v5 = vld [vmem:[%s1111_s9 + $0x20] sm:$0xff]   ;;  %v933_v7 = vunpack.c.l.bf16 %v932_v4  ;;  %v934_v8 = vunpack.c.h.bf16 %v932_v4  ;;  %v937_v41 = vunpack.c.l.bf16 %v995_v31  ;;  %v938_v42 = vunpack.c.h.bf16 %v995_v31  ;;  %v999_v44 = vld [vmem:[%s1111_s9 + $0x28] sm:$0xff]   ;;  %v1000_v31 = vld [vmem:[%s1111_s9 + $0x30] sm:$0xff]  }
  0x10   : > { %658 = vmatpush.bf16.msra.mxu0 %v929_v1  ;;  %1013 = vmatpush.bf16.msra.mxu1 %v929_v1  ;;  %v1002_v6 = vld [vmem:[%s1111_s9 + $0x40] sm:$0xff]   ;;  %v949_v9 = vunpack.c.l.bf16 %v998_v5  ;;  %v950_v11 = vunpack.c.h.bf16 %v998_v5  ;;  %v1003_v50 = vld [vmem:[%s1111_s9 + $0x48] sm:$0xff]   ;;  %v953_v57 = vunpack.c.l.bf16 %v999_v44  ;;  %v954_v58 = vunpack.c.h.bf16 %v999_v44 }
  0x11   : > { %1014 = vmatpush.bf16.msra.mxu2 %v929_v1  ;;  %1015 = vmatpush.bf16.msra.mxu3 %v929_v1  ;;  %v1006_v10 = vld [vmem:[%s1111_s9 + $0x60] sm:$0xff]   ;;  %v965_v12 = vunpack.c.l.bf16 %v1002_v6  ;;  %v345_v14 = vmul.f32 %v1116_v3, %v933_v7  ;;  %v966_v16 = vunpack.c.h.bf16 %v1002_v6  ;;  %v346_v19 = vmul.f32 %v1116_v3, %v934_v8  ;;  %v1007_v54 = vld [vmem:[%s1111_s9 + $0x68] sm:$0xff]  }
  0x12   : > { %v1129_v15 = vld [vmem:[%s1351_s2] ss:$0 sm:$0xff]  ;;  %v981_v17 = vunpack.c.l.bf16 %v1006_v10  ;;  %v982_v18 = vunpack.c.h.bf16 %v1006_v10  ;;  %v353_v20 = vmul.f32 %v1116_v3, %v949_v9  ;;  %v354_v21 = vmul.f32 %v1116_v3, %v950_v11 }
  0x13   : > { %v361_v22 = vmul.f32 %v1116_v3, %v965_v12  ;;  %v381_v24 = vadd.f32 %v1129_v15, %v345_v14  ;;  %v362_v25 = vmul.f32 %v1116_v3, %v966_v16  ;;  %v382_v28 = vadd.f32 %v1129_v15, %v346_v19  ;;  %v923_v59 = vld [vmem:[%s1352_s3] sm:$0xff] }
  0x14   : > { %659 = vmatpush.bf16.msra.mxu0 %v928_v2  ;;  %1016 = vmatpush.bf16.msra.mxu1 %v928_v2  ;;  %v369_v26 = vmul.f32 %v1116_v3, %v981_v17  ;;  %v370_v27 = vmul.f32 %v1116_v3, %v982_v18  ;;  %v389_v29 = vadd.f32 %v1129_v15, %v353_v20  ;;  %v969_v63 = vunpack.c.l.bf16 %v1003_v50 }
  0x15   : > { %1017 = vmatpush.bf16.msra.mxu2 %v928_v2  ;;  %1018 = vmatpush.bf16.msra.mxu3 %v928_v2  ;;  %v390_v30 = vadd.f32 %v1129_v15, %v354_v21  ;;  %v445_v33 = vmul.f32 0.01, %v381_v24  ;;  %v397_v34 = vadd.f32 %v1129_v15, %v361_v22  ;;  %v398_v35 = vadd.f32 %v1129_v15, %v362_v25 }
  0x16   : > { %v405_v36 = vadd.f32 %v1129_v15, %v369_v26  ;;  %vm413_vm0 = vcmp.ge.f32.partialorder %v381_v24, 0.0  ;;  %v406_v37 = vadd.f32 %v1129_v15, %v370_v27  ;;  %v446_v39 = vmul.f32 0.01, %v382_v28  ;;  %v996_v26 = vld [vmem:[%s1111_s9 + $0x10] sm:$0xff]  }
  0x17   : > { %v453_v40 = vmul.f32 0.01, %v389_v29  ;;  %vm414_vm1 = vcmp.ge.f32.partialorder %v382_v28, 0.0  ;;  %vm421_vm2 = vcmp.ge.f32.partialorder %v389_v29, 0.0  ;;  %vm422_vm3 = vcmp.ge.f32.partialorder %v390_v30, 0.0 }
  0x18   : > { %660 = vmatpush.bf16.msra.mxu0 %v927_v13  ;;  %1019 = vmatpush.bf16.msra.mxu1 %v927_v13  ;;  %v454_v43 = vmul.f32 0.01, %v390_v30  ;;  %v477_v45 = vsel %vm413_vm0, %v381_v24, %v445_v33  ;;  %v461_v46 = vmul.f32 0.01, %v397_v34  ;;  %v462_v47 = vmul.f32 0.01, %v398_v35 }
  0x19   : > { %1020 = vmatpush.bf16.msra.mxu2 %v927_v13  ;;  %1021 = vmatpush.bf16.msra.mxu3 %v927_v13  ;;  %v469_v48 = vmul.f32 0.01, %v405_v36  ;;  %vm429_vm4 = vcmp.ge.f32.partialorder %v397_v34, 0.0  ;;  %vm430_vm5 = vcmp.ge.f32.partialorder %v398_v35, 0.0  ;;  %vm437_vm6 = vcmp.ge.f32.partialorder %v405_v36, 0.0 }
  0x1a   : > { %v470_v49 = vmul.f32 0.01, %v406_v37  ;;  %v478_v51 = vsel %vm414_vm1, %v382_v28, %v446_v39  ;;  %v485_v52 = vsel %vm421_vm2, %v389_v29, %v453_v40  ;;  %vm438_vm7 = vcmp.ge.f32.partialorder %v406_v37, 0.0 }
  0x1b   : > { %v347_v53 = vmul.f32 %v1116_v3, %v937_v41  ;;  %v486_v55 = vsel %vm422_vm3, %v390_v30, %v454_v43  ;;  %v348_v56 = vmul.f32 %v1116_v3, %v938_v42  ;;  %v493_v60 = vsel %vm429_vm4, %v397_v34, %v461_v46  ;;  %v1004_v34 = vld [vmem:[%s1111_s9 + $0x50] sm:$0xff]  }
  0x1c   : > { %661 = vmatpush.bf16.msra.mxu0 %v926_v23  ;;  %1022 = vmatpush.bf16.msra.mxu1 %v926_v23  ;;  %v494_v61 = vsel %vm430_vm5, %v398_v35, %v462_v47  ;;  %v501_v62 = vsel %vm437_vm6, %v405_v36, %v469_v48  ;;  %v502_v0 = vsel %vm438_vm7, %v406_v37, %v470_v49  ;;  %v970_v1 = vunpack.c.h.bf16 %v1003_v50  ;;  %v1008_v35 = vld [vmem:[%s1111_s9 + $0x70] sm:$0xff]  }
  0x1d   : > { %1023 = vmatpush.bf16.msra.mxu2 %v926_v23  ;;  %1024 = vmatpush.bf16.msra.mxu3 %v926_v23  ;;  %v985_v2 = vunpack.c.l.bf16 %v1007_v54  ;;  %v986_v4 = vunpack.c.h.bf16 %v1007_v54  ;;  %v577_v5 = vpack.c.bf16 %v478_v51, %v477_v45  ;;  %v383_v6 = vadd.f32 %v1129_v15, %v347_v53 }
  0x1e   : > { %v581_v7 = vpack.c.bf16 %v486_v55, %v485_v52  ;;  %v384_v8 = vadd.f32 %v1129_v15, %v348_v56  ;;  %v355_v9 = vmul.f32 %v1116_v3, %v953_v57  ;;  %v356_v10 = vmul.f32 %v1116_v3, %v954_v58 }
  0x1f   : > { %v585_v11 = vpack.c.bf16 %v494_v61, %v493_v60  ;;  %v589_v12 = vpack.c.bf16 %v502_v0, %v501_v62  ;;  %v363_v13 = vmul.f32 %v1116_v3, %v969_v63  ;;  %v364_v14 = vmul.f32 %v1116_v3, %v970_v1 }
  0x20   : > { %662 = vmatpush.bf16.msra.mxu0 %v925_v32  ;;  %1025 = vmatpush.bf16.msra.mxu1 %v925_v32  ;;  %v371_v16 = vmul.f32 %v1116_v3, %v985_v2  ;;  %v372_v17 = vmul.f32 %v1116_v3, %v986_v4  ;;  %v447_v18 = vmul.f32 0.01, %v383_v6  ;;  %vm415_vm8 = vcmp.ge.f32.partialorder %v383_v6, 0.0 }
  0x21   : > { %1026 = vmatpush.bf16.msra.mxu2 %v925_v32  ;;  %1027 = vmatpush.bf16.msra.mxu3 %v925_v32  ;;  %v448_v19 = vmul.f32 0.01, %v384_v8  ;;  %v391_v20 = vadd.f32 %v1129_v15, %v355_v9  ;;  %v392_v21 = vadd.f32 %v1129_v15, %v356_v10  ;;  %vm416_vm9 = vcmp.ge.f32.partialorder %v384_v8, 0.0  ;;  %v997_v10 = vld [vmem:[%s1111_s9 + $0x18] sm:$0xff]  }
  0x22   : > { %v399_v22 = vadd.f32 %v1129_v15, %v363_v13  ;;  %v400_v23 = vadd.f32 %v1129_v15, %v364_v14  ;;  %v407_v24 = vadd.f32 %v1129_v15, %v371_v16  ;;  %v408_v25 = vadd.f32 %v1129_v15, %v372_v17  ;;  %v1001_v16 = vld [vmem:[%s1111_s9 + $0x38] sm:$0xff]  }
  0x23   : > { %v479_v27 = vsel %vm415_vm8, %v383_v6, %v447_v18  ;;  %v480_v28 = vsel %vm416_vm9, %v384_v8, %v448_v19  ;;  %vm423_vm10 = vcmp.ge.f32.partialorder %v391_v20, 0.0  ;;  %v455_v29 = vmul.f32 0.01, %v391_v20 }
  0x24   : > { %663 = vmatpush.bf16.msra.mxu0 %v924_v38  ;;  %1028 = vmatpush.bf16.msra.mxu1 %v924_v38  ;;  %v456_v30 = vmul.f32 0.01, %v392_v21  ;;  %vm424_vm11 = vcmp.ge.f32.partialorder %v392_v21, 0.0  ;;  %vm431_vm12 = vcmp.ge.f32.partialorder %v399_v22, 0.0  ;;  %v463_v32 = vmul.f32 0.01, %v399_v22 }
  0x25   : > { %1029 = vmatpush.bf16.msra.mxu2 %v924_v38  ;;  %1030 = vmatpush.bf16.msra.mxu3 %v924_v38  ;;  %v941_v33 = vunpack.c.l.bf16 %v996_v26  ;;  %v464_v36 = vmul.f32 0.01, %v400_v23  ;;  %v471_v37 = vmul.f32 0.01, %v407_v24  ;;  %v472_v38 = vmul.f32 0.01, %v408_v25 }
  0x26   : > { %v942_v39 = vunpack.c.h.bf16 %v996_v26  ;;  %vm432_vm13 = vcmp.ge.f32.partialorder %v400_v23, 0.0  ;;  %vm439_vm14 = vcmp.ge.f32.partialorder %v407_v24, 0.0  ;;  %vm440_vm15 = vcmp.ge.f32.partialorder %v408_v25, 0.0 }
  0x27   : > { %v957_v40 = vunpack.c.l.bf16 %v1000_v31  ;;  %v487_v41 = vsel %vm423_vm10, %v391_v20, %v455_v29  ;;  %v488_v42 = vsel %vm424_vm11, %v392_v21, %v456_v30  ;;  %v958_v43 = vunpack.c.h.bf16 %v1000_v31  ;;  %v1005_v21 = vld [vmem:[%s1111_s9 + $0x58] sm:$0xff]  }
  0x28   : > { %664 = vmatpush.bf16.msra.mxu0 %v923_v59  ;;  %1031 = vmatpush.bf16.msra.mxu1 %v923_v59  ;;  %v973_v44 = vunpack.c.l.bf16 %v1004_v34  ;;  %v495_v45 = vsel %vm431_vm12, %v399_v22, %v463_v32  ;;  %v349_v46 = vmul.f32 %v1116_v3, %v941_v33  ;;  %v974_v47 = vunpack.c.h.bf16 %v1004_v34 }
  0x29   : > { %1032 = vmatpush.bf16.msra.mxu2 %v923_v59  ;;  %1033 = vmatpush.bf16.msra.mxu3 %v923_v59  ;;  %v989_v48 = vunpack.c.l.bf16 %v1008_v35  ;;  %v496_v49 = vsel %vm432_vm13, %v400_v23, %v464_v36  ;;  %v503_v50 = vsel %vm439_vm14, %v407_v24, %v471_v37  ;;  %v504_v51 = vsel %vm440_vm15, %v408_v25, %v472_v38  ;;  %v1009_v25 = vld [vmem:[%s1111_s9 + $0x78] sm:$0xff]   ;;  %s1246_s9 = scalar_lea.vmem %s1355_s6, %s886_s26 }
  0x2a   : > { %v990_v52 = vunpack.c.h.bf16 %v1008_v35  ;;  %v350_v53 = vmul.f32 %v1116_v3, %v942_v39  ;;  %v357_v54 = vmul.f32 %v1116_v3, %v957_v40  ;;  %v578_v55 = vpack.c.bf16 %v480_v28, %v479_v27 }
  0x2b   : > { %665 = vmatmul.bf16.vlgmr.msra.gmra.mxu0 %v577_v5  ;;  %685 = vmatmul.bf16.vlgmr.msra.gmra.mxu1 %v581_v7  ;;  %v582_v56 = vpack.c.bf16 %v488_v42, %v487_v41  ;;  %v358_v57 = vmul.f32 %v1116_v3, %v958_v43  ;;  %v365_v58 = vmul.f32 %v1116_v3, %v973_v44  ;;  %v945_v24 = vunpack.c.l.bf16 %v997_v10 }
  0x2c   : > { %705 = vmatmul.bf16.vlgmr.msra.gmra.mxu2 %v585_v11  ;;  %725 = vmatmul.bf16.vlgmr.msra.gmra.mxu3 %v589_v12  ;;  %v586_v59 = vpack.c.bf16 %v496_v49, %v495_v45  ;;  %v590_v60 = vpack.c.bf16 %v504_v51, %v503_v50  ;;  %v366_v61 = vmul.f32 %v1116_v3, %v974_v47  ;;  %v946_v28 = vunpack.c.h.bf16 %v997_v10 }
  0x2d   : > { %v373_v62 = vmul.f32 %v1116_v3, %v989_v48  ;;  %v385_v63 = vadd.f32 %v1129_v15, %v349_v46  ;;  %v374_v0 = vmul.f32 %v1116_v3, %v990_v52  ;;  %v386_v1 = vadd.f32 %v1129_v15, %v350_v53 }
  0x2e   : > { %v393_v2 = vadd.f32 %v1129_v15, %v357_v54  ;;  %v394_v4 = vadd.f32 %v1129_v15, %v358_v57  ;;  %v401_v5 = vadd.f32 %v1129_v15, %v365_v58  ;;  %v402_v6 = vadd.f32 %v1129_v15, %v366_v61 }
  0x2f   : > { %v409_v7 = vadd.f32 %v1129_v15, %v373_v62  ;;  %v449_v8 = vmul.f32 0.01, %v385_v63  ;;  %v410_v9 = vadd.f32 %v1129_v15, %v374_v0  ;;  %vm417_vm0 = vcmp.ge.f32.partialorder %v385_v63, 0.0 }
  0x30   : > { %vm418_vm1 = vcmp.ge.f32.partialorder %v386_v1, 0.0  ;;  %v450_v11 = vmul.f32 0.01, %v386_v1  ;;  %v457_v12 = vmul.f32 0.01, %v393_v2  ;;  %vm425_vm2 = vcmp.ge.f32.partialorder %v393_v2, 0.0 }
  0x31   : > { %v458_v13 = vmul.f32 0.01, %v394_v4  ;;  %v465_v14 = vmul.f32 0.01, %v401_v5  ;;  %vm426_vm3 = vcmp.ge.f32.partialorder %v394_v4, 0.0  ;;  %vm433_vm4 = vcmp.ge.f32.partialorder %v401_v5, 0.0 }
  0x32   : > { %v466_v17 = vmul.f32 0.01, %v402_v6  ;;  %v473_v18 = vmul.f32 0.01, %v409_v7  ;;  %v481_v19 = vsel %vm417_vm0, %v385_v63, %v449_v8  ;;  %vm434_vm5 = vcmp.ge.f32.partialorder %v402_v6, 0.0 }
  0x33   : > { %vm441_vm6 = vcmp.ge.f32.partialorder %v409_v7, 0.0  ;;  %v474_v20 = vmul.f32 0.01, %v410_v9  ;;  %v482_v22 = vsel %vm418_vm1, %v386_v1, %v450_v11  ;;  %v489_v23 = vsel %vm425_vm2, %v393_v2, %v457_v12 }
  0x34   : > { %vm442_vm7 = vcmp.ge.f32.partialorder %v410_v9, 0.0  ;;  %v490_v26 = vsel %vm426_vm3, %v394_v4, %v458_v13  ;;  %v497_v27 = vsel %vm433_vm4, %v401_v5, %v465_v14  ;;  %v961_v29 = vunpack.c.l.bf16 %v1001_v16  ;;  %v1237_v13 = vld [vmem:[%s1353_s4] ss:$0 sm:$0xff] }
  0x35   : > { %v498_v30 = vsel %vm434_vm5, %v402_v6, %v466_v17  ;;  %v505_v31 = vsel %vm441_vm6, %v409_v7, %v473_v18  ;;  %v962_v32 = vunpack.c.h.bf16 %v1001_v16  ;;  %v977_v33 = vunpack.c.l.bf16 %v1005_v21  ;;  %v509_v14 = vld [vmem:[%s1232_s29] sm:$0xff] }
  0x36   : > { %v506_v34 = vsel %vm442_vm7, %v410_v9, %v474_v20  ;;  %v978_v35 = vunpack.c.h.bf16 %v1005_v21  ;;  %v993_v36 = vunpack.c.l.bf16 %v1009_v25  ;;  %v994_v37 = vunpack.c.h.bf16 %v1009_v25  ;;  %v517_v16 = vld [vmem:[%s1232_s29 + $0x40] sm:$0xff]  ;;  %v510_v25 = vld [vmem:[%s1232_s29 + $0x8] sm:$0xff] }
  0x37   : > { %v351_v38 = vmul.f32 %v1116_v3, %v945_v24  ;;  %v579_v39 = vpack.c.bf16 %v482_v22, %v481_v19  ;;  %v583_v40 = vpack.c.bf16 %v490_v26, %v489_v23  ;;  %v352_v41 = vmul.f32 %v1116_v3, %v946_v28  ;;  %v525_v23 = vld [vmem:[%s1232_s29 + $0x80] sm:$0xff]  ;;  %v518_v26 = vld [vmem:[%s1232_s29 + $0x48] sm:$0xff] }
  0x38   : > { %v359_v42 = vmul.f32 %v1116_v3, %v961_v29  ;;  %v587_v43 = vpack.c.bf16 %v498_v30, %v497_v27  ;;  %v591_v44 = vpack.c.bf16 %v506_v34, %v505_v31  ;;  %v360_v45 = vmul.f32 %v1116_v3, %v962_v32  ;;  %v533_v24 = vld [vmem:[%s1232_s29 + $0xc0] sm:$0xff] }
  0x39   : > { %v367_v46 = vmul.f32 %v1116_v3, %v977_v33  ;;  %v368_v47 = vmul.f32 %v1116_v3, %v978_v35  ;;  %v375_v48 = vmul.f32 %v1116_v3, %v993_v36  ;;  %v376_v49 = vmul.f32 %v1116_v3, %v994_v37 }
  0x3a   : > { %v387_v50 = vadd.f32 %v1129_v15, %v351_v38  ;;  %v388_v51 = vadd.f32 %v1129_v15, %v352_v41  ;;  %v395_v52 = vadd.f32 %v1129_v15, %v359_v42  ;;  %v396_v53 = vadd.f32 %v1129_v15, %v360_v45  ;;  %v511_v41 = vld [vmem:[%s1232_s29 + $0x10] sm:$0xff] }
  0x3b   : > { %670 = vmatmul.bf16.gmra.mxu0 %v578_v55  ;;  %690 = vmatmul.bf16.gmra.mxu1 %v582_v56  ;;  %v403_v54 = vadd.f32 %v1129_v15, %v367_v46  ;;  %v404_v55 = vadd.f32 %v1129_v15, %v368_v47  ;;  %v411_v56 = vadd.f32 %v1129_v15, %v375_v48  ;;  %v519_v42 = vld [vmem:[%s1232_s29 + $0x50] sm:$0xff] }
  0x3c   : > { %710 = vmatmul.bf16.gmra.mxu2 %v586_v59  ;;  %730 = vmatmul.bf16.gmra.mxu3 %v590_v60  ;;  %v412_v3 = vadd.f32 %v1129_v15, %v376_v49  ;;  %v451_v57 = vmul.f32 0.01, %v387_v50  ;;  %vm419_vm8 = vcmp.ge.f32.partialorder %v387_v50, 0.0  ;;  %vm420_vm9 = vcmp.ge.f32.partialorder %v388_v51, 0.0 }
  0x3d   : > { %v452_v58 = vmul.f32 0.01, %v388_v51  ;;  %v459_v59 = vmul.f32 0.01, %v395_v52  ;;  %vm427_vm10 = vcmp.ge.f32.partialorder %v395_v52, 0.0  ;;  %vm428_vm11 = vcmp.ge.f32.partialorder %v396_v53, 0.0 }
  0x3e   : > { %v460_v60 = vmul.f32 0.01, %v396_v53  ;;  %v467_v61 = vmul.f32 0.01, %v403_v54  ;;  %v468_v62 = vmul.f32 0.01, %v404_v55  ;;  %v483_v1 = vsel %vm419_vm8, %v387_v50, %v451_v57 }
  0x3f   : > { %v475_v63 = vmul.f32 0.01, %v411_v56  ;;  %v476_v0 = vmul.f32 0.01, %v412_v3  ;;  %vm435_vm12 = vcmp.ge.f32.partialorder %v403_v54, 0.0  ;;  %vm436_vm13 = vcmp.ge.f32.partialorder %v404_v55, 0.0 }
  0x40   : > { %vm443_vm14 = vcmp.ge.f32.partialorder %v411_v56, 0.0  ;;  %vm444_vm15 = vcmp.ge.f32.partialorder %v412_v3, 0.0  ;;  %v484_v2 = vsel %vm420_vm9, %v388_v51, %v452_v58  ;;  %v491_v15 = vsel %vm427_vm10, %v395_v52, %v459_v59  ;;  %v520_v57 = vld [vmem:[%s1232_s29 + $0x58] sm:$0xff] }
  0x41   : > { %v492_v4 = vsel %vm428_vm11, %v396_v53, %v460_v60  ;;  %v499_v5 = vsel %vm435_vm12, %v403_v54, %v467_v61  ;;  %v500_v6 = vsel %vm436_vm13, %v404_v55, %v468_v62  ;;  %v507_v7 = vsel %vm443_vm14, %v411_v56, %v475_v63  ;;  %v527_v55 = vld [vmem:[%s1232_s29 + $0x90] sm:$0xff] }
  0x42   : > { %v508_v8 = vsel %vm444_vm15, %v412_v3, %v476_v0  ;;  %v580_v9 = vpack.c.bf16 %v484_v2, %v483_v1  ;;  %v584_v10 = vpack.c.bf16 %v492_v4, %v491_v15  ;;  %v588_v11 = vpack.c.bf16 %v500_v6, %v499_v5  ;;  %v535_v56 = vld [vmem:[%s1232_s29 + $0xd0] sm:$0xff]  ;;  %v512_v3 = vld [vmem:[%s1232_s29 + $0x18] sm:$0xff] }
  0x43   : > { %v592_v12 = vpack.c.bf16 %v508_v8, %v507_v7  ;;  %v545_v17 = vadd.f32 %v1237_v13, %v509_v14  ;;  %v553_v18 = vadd.f32 %v1237_v13, %v517_v16  ;;  %v561_v27 = vadd.f32 %v1237_v13, %v525_v23  ;;  %v528_v6 = vld [vmem:[%s1232_s29 + $0x98] sm:$0xff]  ;;  %v513_v8 = vld [vmem:[%s1232_s29 + $0x20] sm:$0xff] }
  0x44   : > { %v569_v28 = vadd.f32 %v1237_v13, %v533_v24  ;;  %v546_v29 = vadd.f32 %v1237_v13, %v510_v25  ;;  %v554_v30 = vadd.f32 %v1237_v13, %v518_v26  ;;  %v547_v45 = vadd.f32 %v1237_v13, %v511_v41  ;;  %v536_v7 = vld [vmem:[%s1232_s29 + $0xd8] sm:$0xff] }
  0x45   : > { %v555_v46 = vadd.f32 %v1237_v13, %v519_v42  ;;  %v563_v58 = vadd.f32 %v1237_v13, %v527_v55  ;;  %v571_v59 = vadd.f32 %v1237_v13, %v535_v56  ;;  %v548_v60 = vadd.f32 %v1237_v13, %v512_v3  ;;  %v532_v16 = vld [vmem:[%s1232_s29 + $0xb8] sm:$0xff] }
  0x46   : > { %v556_v61 = vadd.f32 %v1237_v13, %v520_v57 }
  0x4b   : > { %675 = vmatmul.bf16.gmra.mxu0 %v579_v39  ;;  %695 = vmatmul.bf16.gmra.mxu1 %v583_v40  ;;  %v526_v39 = vld [vmem:[%s1232_s29 + $0x88] sm:$0xff] }
  0x4c   : > { %715 = vmatmul.bf16.gmra.mxu2 %v587_v43  ;;  %735 = vmatmul.bf16.gmra.mxu3 %v591_v44  ;;  %v534_v40 = vld [vmem:[%s1232_s29 + $0xc8] sm:$0xff]  ;;  %v562_v43 = vadd.f32 %v1237_v13, %v526_v39 }
  0x4d   : > { %v570_v44 = vadd.f32 %v1237_v13, %v534_v40 }
  0x5b   : > { %680 = vmatmul.bf16.gmra.mxu0 %v580_v9  ;;  %700 = vmatmul.bf16.gmra.mxu1 %v584_v10  ;;  %v521_v9 = vld [vmem:[%s1232_s29 + $0x60] sm:$0xff]  ;;  %v564_v10 = vadd.f32 %v1237_v13, %v528_v6 }
  0x5c   : > { %720 = vmatmul.bf16.gmra.mxu2 %v588_v11  ;;  %740 = vmatmul.bf16.gmra.mxu3 %v592_v12  ;;  %v572_v11 = vadd.f32 %v1237_v13, %v536_v7  ;;  %v549_v12 = vadd.f32 %v1237_v13, %v513_v8  ;;  %v557_v14 = vadd.f32 %v1237_v13, %v521_v9 }
  0xa8   : > { %v666_v19 = vpop.f32.mrf.mxu0  ;;  %v686_v20 = vpop.f32.mrf.mxu1 }
  0xa9   : > { %v746_v21 = vadd.f32 %v666_v19, %v545_v17  ;;  %v754_v22 = vadd.f32 %v686_v20, %v553_v18  ;;  %v1296_v17 = vadd.f32 %v1237_v13, %v532_v16  ;;  %v540_v18 = vld [vmem:[%s1232_s29 + $0xf8] sm:$0xff] }
  0xab   : > { %778 = vst [vmem:[%s1246_s9] sm:$0xff] %v746_v21  ;;  %v1300_v21 = vadd.f32 %v1237_v13, %v540_v18 }
  0xac   : > { %786 = vst [vmem:[%s1246_s9 + $0x40] sm:$0xff] %v754_v22 }
  0xaf   : > { %v706_v31 = vpop.f32.mrf.mxu2  ;;  %v726_v32 = vpop.f32.mrf.mxu3 }
  0xb0   : > { %v762_v33 = vadd.f32 %v706_v31, %v561_v27  ;;  %v770_v34 = vadd.f32 %v726_v32, %v569_v28  ;;  %v668_v35 = vpop.f32.mrf.mxu0  ;;  %v688_v36 = vpop.f32.mrf.mxu1  ;;  %v529_v28 = vld [vmem:[%s1232_s29 + $0xa0] sm:$0xff]  ;;  %v522_v31 = vld [vmem:[%s1232_s29 + $0x68] sm:$0xff] }
  0xb1   : > { %v747_v37 = vadd.f32 %v668_v35, %v546_v29  ;;  %v755_v38 = vadd.f32 %v688_v36, %v554_v30  ;;  %v537_v29 = vld [vmem:[%s1232_s29 + $0xe0] sm:$0xff]  ;;  %v514_v30 = vld [vmem:[%s1232_s29 + $0x28] sm:$0xff]  ;;  %v565_v32 = vadd.f32 %v1237_v13, %v529_v28  ;;  %v558_v35 = vadd.f32 %v1237_v13, %v522_v31 }
  0xb2   : > { %794 = vst [vmem:[%s1246_s9 + $0x80] sm:$0xff] %v762_v33  ;;  %v573_v33 = vadd.f32 %v1237_v13, %v537_v29 }
  0xb3   : > { %802 = vst [vmem:[%s1246_s9 + $0xc0] sm:$0xff] %v770_v34  ;;  %v550_v34 = vadd.f32 %v1237_v13, %v514_v30 }
  0xb4   : > { %779 = vst [vmem:[%s1246_s9 + $0x8] sm:$0xff] %v747_v37 }
  0xb5   : > { %787 = vst [vmem:[%s1246_s9 + $0x48] sm:$0xff] %v755_v38 }
  0xb7   : > { %v708_v47 = vpop.f32.mrf.mxu2  ;;  %v728_v48 = vpop.f32.mrf.mxu3 }
  0xb8   : > { %v763_v49 = vadd.f32 %v708_v47, %v562_v43  ;;  %v771_v50 = vadd.f32 %v728_v48, %v570_v44  ;;  %v671_v51 = vpop.f32.mrf.mxu0  ;;  %v691_v52 = vpop.f32.mrf.mxu1  ;;  %v530_v44 = vld [vmem:[%s1232_s29 + $0xa8] sm:$0xff]  ;;  %v523_v47 = vld [vmem:[%s1232_s29 + $0x70] sm:$0xff] }
  0xb9   : > { %v748_v53 = vadd.f32 %v671_v51, %v547_v45  ;;  %v756_v54 = vadd.f32 %v691_v52, %v555_v46  ;;  %v538_v45 = vld [vmem:[%s1232_s29 + $0xe8] sm:$0xff]  ;;  %v515_v46 = vld [vmem:[%s1232_s29 + $0x30] sm:$0xff]  ;;  %v566_v48 = vadd.f32 %v1237_v13, %v530_v44  ;;  %v559_v51 = vadd.f32 %v1237_v13, %v523_v47 }
  0xba   : > { %795 = vst [vmem:[%s1246_s9 + $0x88] sm:$0xff] %v763_v49  ;;  %v574_v49 = vadd.f32 %v1237_v13, %v538_v45 }
  0xbb   : > { %803 = vst [vmem:[%s1246_s9 + $0xc8] sm:$0xff] %v771_v50  ;;  %v551_v50 = vadd.f32 %v1237_v13, %v515_v46 }
  0xbc   : > { %780 = vst [vmem:[%s1246_s9 + $0x10] sm:$0xff] %v748_v53 }
  0xbd   : > { %788 = vst [vmem:[%s1246_s9 + $0x50] sm:$0xff] %v756_v54 }
  0xbf   : > { %v711_v62 = vpop.f32.mrf.mxu2  ;;  %v731_v63 = vpop.f32.mrf.mxu3 }
  0xc0   : > { %v764_v0 = vadd.f32 %v711_v62, %v563_v58  ;;  %v772_v1 = vadd.f32 %v731_v63, %v571_v59  ;;  %v673_v2 = vpop.f32.mrf.mxu0  ;;  %v693_v15 = vpop.f32.mrf.mxu1  ;;  %v531_v59 = vld [vmem:[%s1232_s29 + $0xb0] sm:$0xff]  ;;  %v524_v62 = vld [vmem:[%s1232_s29 + $0x78] sm:$0xff] }
  0xc1   : > { %v749_v4 = vadd.f32 %v673_v2, %v548_v60  ;;  %v757_v5 = vadd.f32 %v693_v15, %v556_v61  ;;  %v539_v60 = vld [vmem:[%s1232_s29 + $0xf0] sm:$0xff]  ;;  %v516_v61 = vld [vmem:[%s1232_s29 + $0x38] sm:$0xff]  ;;  %v567_v63 = vadd.f32 %v1237_v13, %v531_v59  ;;  %v560_v2 = vadd.f32 %v1237_v13, %v524_v62 }
  0xc2   : > { %796 = vst [vmem:[%s1246_s9 + $0x90] sm:$0xff] %v764_v0  ;;  %v575_v0 = vadd.f32 %v1237_v13, %v539_v60 }
  0xc3   : > { %804 = vst [vmem:[%s1246_s9 + $0xd0] sm:$0xff] %v772_v1  ;;  %v552_v1 = vadd.f32 %v1237_v13, %v516_v61 }
  0xc4   : > { %781 = vst [vmem:[%s1246_s9 + $0x18] sm:$0xff] %v749_v4 }
  0xc5   : > { %789 = vst [vmem:[%s1246_s9 + $0x58] sm:$0xff] %v757_v5 }
  0xc7   : > { %v713_v19 = vpop.f32.mrf.mxu2  ;;  %v733_v20 = vpop.f32.mrf.mxu3 }
  0xc8   : > { %v765_v22 = vadd.f32 %v713_v19, %v564_v10  ;;  %v773_v23 = vadd.f32 %v733_v20, %v572_v11  ;;  %v676_v24 = vpop.f32.mrf.mxu0  ;;  %v696_v25 = vpop.f32.mrf.mxu1 }
  0xc9   : > { %v750_v26 = vadd.f32 %v676_v24, %v549_v12  ;;  %v758_v27 = vadd.f32 %v696_v25, %v557_v14 }
  0xca   : > { %797 = vst [vmem:[%s1246_s9 + $0x98] sm:$0xff] %v765_v22 }
  0xcb   : > { %805 = vst [vmem:[%s1246_s9 + $0xd8] sm:$0xff] %v773_v23 }
  0xcc   : > { %782 = vst [vmem:[%s1246_s9 + $0x20] sm:$0xff] %v750_v26 }
  0xcd   : > { %790 = vst [vmem:[%s1246_s9 + $0x60] sm:$0xff] %v758_v27 }
  0xcf   : > { %v716_v36 = vpop.f32.mrf.mxu2  ;;  %v736_v37 = vpop.f32.mrf.mxu3 }
  0xd0   : > { %v766_v38 = vadd.f32 %v716_v36, %v565_v32  ;;  %v774_v39 = vadd.f32 %v736_v37, %v573_v33  ;;  %v678_v40 = vpop.f32.mrf.mxu0  ;;  %v698_v41 = vpop.f32.mrf.mxu1 }
  0xd1   : > { %v751_v42 = vadd.f32 %v678_v40, %v550_v34  ;;  %v759_v43 = vadd.f32 %v698_v41, %v558_v35 }
  0xd2   : > { %798 = vst [vmem:[%s1246_s9 + $0xa0] sm:$0xff] %v766_v38 }
  0xd3   : > { %806 = vst [vmem:[%s1246_s9 + $0xe0] sm:$0xff] %v774_v39 }
  0xd4   : > { %783 = vst [vmem:[%s1246_s9 + $0x28] sm:$0xff] %v751_v42 }
  0xd5   : > { %791 = vst [vmem:[%s1246_s9 + $0x68] sm:$0xff] %v759_v43 }
  0xd7   : > { %v718_v52 = vpop.f32.mrf.mxu2  ;;  %v738_v53 = vpop.f32.mrf.mxu3 }
  0xd8   : > { %v767_v54 = vadd.f32 %v718_v52, %v566_v48  ;;  %v775_v55 = vadd.f32 %v738_v53, %v574_v49  ;;  %v681_v56 = vpop.f32.mrf.mxu0  ;;  %v701_v3 = vpop.f32.mrf.mxu1 }
  0xd9   : > { %v752_v57 = vadd.f32 %v681_v56, %v551_v50  ;;  %v760_v58 = vadd.f32 %v701_v3, %v559_v51 }
  0xda   : > { %799 = vst [vmem:[%s1246_s9 + $0xa8] sm:$0xff] %v767_v54 }
  0xdb   : > { %807 = vst [vmem:[%s1246_s9 + $0xe8] sm:$0xff] %v775_v55 }
  0xdc   : > { %784 = vst [vmem:[%s1246_s9 + $0x30] sm:$0xff] %v752_v57 }
  0xdd   : > { %792 = vst [vmem:[%s1246_s9 + $0x70] sm:$0xff] %v760_v58 }
  0xdf   : > { %v721_v15 = vpop.f32.mrf.mxu2  ;;  %v741_v4 = vpop.f32.mrf.mxu3 }
  0xe0   : > { %v768_v5 = vadd.f32 %v721_v15, %v567_v63  ;;  %v776_v6 = vadd.f32 %v741_v4, %v575_v0  ;;  %v683_v7 = vpop.f32.mrf.mxu0  ;;  %v703_v8 = vpop.f32.mrf.mxu1 }
  0xe1   : > { %v753_v9 = vadd.f32 %v683_v7, %v552_v1  ;;  %v761_v10 = vadd.f32 %v703_v8, %v560_v2 }
  0xe2   : > { %800 = vst [vmem:[%s1246_s9 + $0xb0] sm:$0xff] %v768_v5 }
  0xe3   : > { %808 = vst [vmem:[%s1246_s9 + $0xf0] sm:$0xff] %v776_v6 }
  0xe4   : > { %785 = vst [vmem:[%s1246_s9 + $0x38] sm:$0xff] %v753_v9 }
  0xe5   : > { %793 = vst [vmem:[%s1246_s9 + $0x78] sm:$0xff] %v761_v10 }
  0xe7   : > { %v723_v11 = vpop.f32.mrf.mxu2  ;;  %v743_v12 = vpop.f32.mrf.mxu3 }
  0xe8   : > { %v769_v14 = vadd.f32 %v723_v11, %v1296_v17  ;;  %v777_v13 = vadd.f32 %v743_v12, %v1300_v21 }
  0xea   : > { %801 = vst [vmem:[%s1246_s9 + $0xb8] sm:$0xff] %v769_v14 }
  0xeb   : > { %809 = vst [vmem:[%s1246_s9 + $0xf8] sm:$0xff] %v777_v13 }
  0xec PF: > { %s16_s21 = sadd.s32 1, %s1051_s21  }
  0xed   : > { %p13_p4 = scmp.ge.s32.totalorder %s16_s21, 4  }
  0xef   :  { %15 = sbr.rel (!%p13_p4) target bundleno = 1 (0x1), region = 77 }

</bundles_post_ra>
